<compile_context>
chip_gen: v6e
topology: v6e:2x2x1
jax: 0.10.0
libtpu: 0.0.40
codegen_flags: <defaults>
</compile_context>

<pallas_src>
import functools

import jax
import jax.numpy as jnp
from jax.experimental import pallas as pl
from jax.experimental.pallas import tpu as pltpu

BEST_DEPTH = 5
BEST_HIDDEN = 256
BN_EPS = 1e-5

IN_K = 8        # input features padded 3 -> 8 (last block dim == full array dim)
OUT_PAD = 128   # output features padded 3 -> 128 (lane-dense, unmasked stores)


# ----------------------------------------------------------------------------
# Kernel
# ----------------------------------------------------------------------------
def _kinetic_kernel(depth,
                    x_ref,
                    w_in_ref, b_in_ref,
                    w1s_ref, b1s_ref,
                    w2s_ref, b2s_ref,
                    w_out_ref, b_out_ref,
                    o_ref):
    # ---- input stage: (folded Linear+BN) -> ReLU ----
    # x_ref is already bf16 (tile_b, IN_K); K=8 matmul is tiny vs the h x h ones.
    h = jnp.dot(x_ref[...], w_in_ref[...],
                preferred_element_type=jnp.float32) + b_in_ref[...]
    h = jnp.maximum(h, 0.0)                              # (tile_b, H) f32

    # ---- residual blocks (static unroll: depth=5 straight-line schedules
    #      best; switch to lax.fori_loop only if the bundle shows spills) ----
    for i in range(depth):
        z = jnp.dot(h.astype(jnp.bfloat16), w1s_ref[i],
                    preferred_element_type=jnp.float32) + b1s_ref[i]
        z = jnp.maximum(z, 0.0)
        # Dropout(p=0.1) is identity in eval mode.
        z = jnp.dot(z.astype(jnp.bfloat16), w2s_ref[i],
                    preferred_element_type=jnp.float32) + b2s_ref[i]
        h = jnp.maximum(z + h, 0.0)

    # ---- output stage: Linear(h, 3) zero-padded to 128 lanes, f32 weights ----
    o_ref[...] = jnp.dot(h, w_out_ref[...],
                         preferred_element_type=jnp.float32) + b_out_ref[...]


def _choose_tile_b(B):
    """Pick a batch tile that amortizes per-grid-step overhead (~0.35 us ~
    128 rows of MXU work) without wasting too much on zero-padded rows, and
    guarantees >= 2 grid steps (megacore on v7x) whenever B spans > 1 tile."""
    candidates = (1024, 512, 256, 128)

    def cost(t):
        nb = -(-B // t)
        return nb * t + 128 * nb   # padded rows + step-overhead equivalent

    best = min(candidates, key=cost)
    while best > 128 and -(-B // best) < 2:
        best //= 2
    return best


def kinetic_net_forward(x, params, depth=BEST_DEPTH, tile_b=None):
    """x: (B, 3) float32.  Returns (B, 3) float32."""
    B = x.shape[0]
    h = params["w_in"].shape[1]

    if tile_b is None:
        tile_b = _choose_tile_b(B)

    # Pad batch to a multiple of the tile; input features 3 -> 8, bf16.
    nb = pl.cdiv(B, tile_b)
    b_pad = nb * tile_b
    x_p = jnp.zeros((b_pad, IN_K), jnp.bfloat16).at[:B, :3].set(
        x.astype(jnp.bfloat16))

    flops = 2 * b_pad * (IN_K * h + 2 * depth * h * h + h * OUT_PAD)
    param_bytes = sum(int(a.size) * jnp.dtype(a.dtype).itemsize
                      for a in params.values())
    bytes_accessed = (int(x_p.size) * 2 + b_pad * OUT_PAD * 4 + param_bytes)

    kernel = functools.partial(_kinetic_kernel, depth)
    out = pl.pallas_call(
        kernel,
        out_shape=jax.ShapeDtypeStruct((b_pad, OUT_PAD), jnp.float32),
        grid=(nb,),
        in_specs=[
            # activations: tiled over the batch grid
            pl.BlockSpec((tile_b, IN_K), lambda i: (i, 0)),
            # weights / biases: full arrays, constant index_map -> VMEM-resident
            pl.BlockSpec((IN_K, h), lambda i: (0, 0)),
            pl.BlockSpec((1, h), lambda i: (0, 0)),
            pl.BlockSpec((depth, h, h), lambda i: (0, 0, 0)),
            pl.BlockSpec((depth, 1, h), lambda i: (0, 0, 0)),
            pl.BlockSpec((depth, h, h), lambda i: (0, 0, 0)),
            pl.BlockSpec((depth, 1, h), lambda i: (0, 0, 0)),
            pl.BlockSpec((h, OUT_PAD), lambda i: (0, 0)),
            pl.BlockSpec((1, OUT_PAD), lambda i: (0, 0)),
        ],
        out_specs=pl.BlockSpec((tile_b, OUT_PAD), lambda i: (i, 0)),
        compiler_params=pltpu.CompilerParams(
            dimension_semantics=("parallel",)),
        cost_estimate=pl.CostEstimate(flops=flops, transcendentals=0,
                                      bytes_accessed=bytes_accessed),
    )(
        x_p,
        params["w_in"], params["b_in"],
        params["w1s"], params["b1s"],
        params["w2s"], params["b2s"],
        params["w_out"], params["b_out"],
    )
    return out[:B, :3]


# ----------------------------------------------------------------------------
# Parameter construction (PyTorch-style Linear init; synthetic non-trivial BN
# running stats to exercise the eval-mode BN fold).
# ----------------------------------------------------------------------------
def _linear_init(key, d_in, d_out):
    kw, kb = jax.random.split(key)
    bound = 1.0 / jnp.sqrt(float(d_in))
    # weight stored already transposed: (d_in, d_out)
    w = jax.random.uniform(kw, (d_in, d_out), jnp.float32, -bound, bound)
    b = jax.random.uniform(kb, (d_out,), jnp.float32, -bound, bound)
    return w, b


def _bn_init(key, d):
    kg, kb, km, kv = jax.random.split(key, 4)
    gamma = jax.random.uniform(kg, (d,), jnp.float32, 0.5, 1.5)
    beta = jax.random.uniform(kb, (d,), jnp.float32, -0.1, 0.1)
    mean = 0.1 * jax.random.normal(km, (d,), jnp.float32)
    var = jax.random.uniform(kv, (d,), jnp.float32, 0.5, 1.5)
    return gamma, beta, mean, var


def make_raw_params(key, h=BEST_HIDDEN, depth=BEST_DEPTH):
    keys = jax.random.split(key, 3 + 4 * depth)
    w_in, b_in = _linear_init(keys[0], 3, h)
    bn_in = _bn_init(keys[1], h)
    w_out, b_out = _linear_init(keys[2], h, 3)

    w1, b1, bn1 = [], [], []
    w2, b2, bn2 = [], [], []
    for i in range(depth):
        k0, k1, k2, k3 = keys[3 + 4 * i: 7 + 4 * i]
        a, b = _linear_init(k0, h, h); w1.append(a); b1.append(b)
        bn1.append(_bn_init(k1, h))
        a, b = _linear_init(k2, h, h); w2.append(a); b2.append(b)
        bn2.append(_bn_init(k3, h))

    stack4 = lambda t: tuple(jnp.stack([x[j] for x in t]) for j in range(4))
    return {
        "w_in": w_in, "b_in": b_in, "bn_in": bn_in,
        "w1": jnp.stack(w1), "b1": jnp.stack(b1), "bn1": stack4(bn1),
        "w2": jnp.stack(w2), "b2": jnp.stack(b2), "bn2": stack4(bn2),
        "w_out": w_out, "b_out": b_out,
    }


def _fold_linear_bn(w, b, gamma, beta, mean, var, eps=BN_EPS):
    scale = gamma / jnp.sqrt(var + eps)
    return w * scale[None, :], b * scale + (beta - mean * scale)


def fold_params(raw, h=BEST_HIDDEN, depth=BEST_DEPTH):
    """Fold eval-mode BN into weights/biases, pad I/O layers, cast to kernel
    dtypes (bf16 for the big h x h weights, f32 for the tiny output layer)."""
    w_in, b_in = _fold_linear_bn(raw["w_in"], raw["b_in"], *raw["bn_in"])
    w_in_p = jnp.zeros((IN_K, h), jnp.float32).at[:3, :].set(w_in)

    w1s, b1s, w2s, b2s = [], [], [], []
    for i in range(depth):
        w1, b1 = _fold_linear_bn(raw["w1"][i], raw["b1"][i],
                                 *(a[i] for a in raw["bn1"]))
        w2, b2 = _fold_linear_bn(raw["w2"][i], raw["b2"][i],
                                 *(a[i] for a in raw["bn2"]))
        w1s.append(w1); b1s.append(b1); w2s.append(w2); b2s.append(b2)

    w_out_p = jnp.zeros((h, OUT_PAD), jnp.float32).at[:, :3].set(raw["w_out"])
    b_out_p = jnp.zeros((OUT_PAD,), jnp.float32).at[:3].set(raw["b_out"])

    return {
        "w_in": w_in_p.astype(jnp.bfloat16),
        "b_in": b_in.reshape(1, h),
        "w1s": jnp.stack(w1s).astype(jnp.bfloat16),
        "b1s": jnp.stack(b1s).reshape(depth, 1, h),
        "w2s": jnp.stack(w2s).astype(jnp.bfloat16),
        "b2s": jnp.stack(b2s).reshape(depth, 1, h),
        "w_out": w_out_p,                       # f32: tiny, better accuracy
        "b_out": b_out_p.reshape(1, OUT_PAD),
    }


# ----------------------------------------------------------------------------
# Pure-JAX references.
# ----------------------------------------------------------------------------
def _bn_eval(x, gamma, beta, mean, var, eps=BN_EPS):
    return (x - mean) * (gamma / jnp.sqrt(var + eps)) + beta


def kinetic_net_ref_f32(x, raw, depth=BEST_DEPTH):
    """Unfolded, full-f32 eval-mode forward (checks the BN/bias folding)."""
    h = jnp.maximum(_bn_eval(x @ raw["w_in"] + raw["b_in"], *raw["bn_in"]), 0.0)
    for i in range(depth):
        z = _bn_eval(h @ raw["w1"][i] + raw["b1"][i],
                     *(a[i] for a in raw["bn1"]))
        z = jnp.maximum(z, 0.0)
        z = _bn_eval(z @ raw["w2"][i] + raw["b2"][i],
                     *(a[i] for a in raw["bn2"]))
        h = jnp.maximum(z + h, 0.0)
    return h @ raw["w_out"] + raw["b_out"]


def kinetic_net_ref_folded(x, p, depth=BEST_DEPTH):
    """Mirrors the kernel math exactly (folded weights, f32 accumulate)."""
    xb = jnp.zeros((x.shape[0], IN_K), jnp.bfloat16).at[:, :3].set(
        x.astype(jnp.bfloat16))
    h = jnp.dot(xb, p["w_in"], preferred_element_type=jnp.float32) + p["b_in"]
    h = jnp.maximum(h, 0.0)
    for i in range(depth):
        z = jnp.dot(h.astype(jnp.bfloat16), p["w1s"][i],
                    preferred_element_type=jnp.float32) + p["b1s"][i]
        z = jnp.maximum(z, 0.0)
        z = jnp.dot(z.astype(jnp.bfloat16), p["w2s"][i],
                    preferred_element_type=jnp.float32) + p["b2s"][i]
        h = jnp.maximum(z + h, 0.0)
    out = jnp.dot(h, p["w_out"], preferred_element_type=jnp.float32) + p["b_out"]
    return out[:, :3]


if __name__ == "__main__":
    key = jax.random.PRNGKey(0)
    k_param, k_x = jax.random.split(key)

    B, H, DEPTH = 300, BEST_HIDDEN, BEST_DEPTH   # B non-multiple of any tile on purpose
    raw = make_raw_params(k_param, h=H, depth=DEPTH)
    params = fold_params(raw, h=H, depth=DEPTH)
    x = jax.random.normal(k_x, (B, 3), dtype=jnp.float32)

    out = jax.block_until_ready(kinetic_net_forward(x, params, depth=DEPTH))
    assert out.shape == (B, 3)

    # Tight check: kernel plumbing vs an exact folded-dtype JAX mirror.
    ref_tight = kinetic_net_ref_folded(x, params, depth=DEPTH)
    assert jnp.allclose(out, ref_tight, atol=2e-3, rtol=2e-3), \
        "mismatch vs folded reference"

    # Loose check: BN/bias folding + bf16 cast vs full-f32 unfolded reference.
    ref_f32 = kinetic_net_ref_f32(x, raw, depth=DEPTH)
    assert jnp.allclose(out, ref_f32, atol=1.5e-1, rtol=1.5e-1), \
        "mismatch vs f32 unfolded reference"

    print("KERNEL_OK")
</pallas_src>

<mosaic_0001>
module attributes {stable_mosaic.version = 11 : i64} {
  func.func @_kinetic_kernel(%arg0: i32, %arg1: memref<256x8xbf16, #tpu.memory_space<vmem>>, %arg2: memref<8x256xbf16, #tpu.memory_space<vmem>>, %arg3: memref<1x256xf32, #tpu.memory_space<vmem>>, %arg4: memref<5x256x256xbf16, #tpu.memory_space<vmem>>, %arg5: memref<5x1x256xf32, #tpu.memory_space<vmem>>, %arg6: memref<5x256x256xbf16, #tpu.memory_space<vmem>>, %arg7: memref<5x1x256xf32, #tpu.memory_space<vmem>>, %arg8: memref<256x128xf32, #tpu.memory_space<vmem>>, %arg9: memref<1x128xf32, #tpu.memory_space<vmem>>, %arg10: memref<256x128xf32, #tpu.memory_space<vmem>>) attributes {dimension_semantics = [#tpu.dimension_semantics<parallel>], iteration_bounds = array<i64: 2>, scalar_prefetch = 0 : i64, scratch_operands = 0 : i64, tpu.core_type = #tpu.core_type<tc>, window_params = [{transform_indices = @transform_0, window_bounds = array<i64: 256, 8>}, {pipeline_mode = #tpu.pipeline_mode<synchronous>, transform_indices = @transform_1, window_bounds = array<i64: 8, 256>}, {pipeline_mode = #tpu.pipeline_mode<synchronous>, transform_indices = @transform_2, window_bounds = array<i64: 1, 256>}, {pipeline_mode = #tpu.pipeline_mode<synchronous>, transform_indices = @transform_3, window_bounds = array<i64: 5, 256, 256>}, {pipeline_mode = #tpu.pipeline_mode<synchronous>, transform_indices = @transform_4, window_bounds = array<i64: 5, 1, 256>}, {pipeline_mode = #tpu.pipeline_mode<synchronous>, transform_indices = @transform_5, window_bounds = array<i64: 5, 256, 256>}, {pipeline_mode = #tpu.pipeline_mode<synchronous>, transform_indices = @transform_6, window_bounds = array<i64: 5, 1, 256>}, {pipeline_mode = #tpu.pipeline_mode<synchronous>, transform_indices = @transform_7, window_bounds = array<i64: 256, 128>}, {pipeline_mode = #tpu.pipeline_mode<synchronous>, transform_indices = @transform_8, window_bounds = array<i64: 1, 128>}, {transform_indices = @transform_9, window_bounds = array<i64: 256, 128>}]} {
    %c0 = arith.constant 0 : index
    %c0_0 = arith.constant 0 : index
    %0 = vector.load %arg1[%c0, %c0_0] : memref<256x8xbf16, #tpu.memory_space<vmem>>, vector<256x8xbf16>
    %c0_1 = arith.constant 0 : index
    %c0_2 = arith.constant 0 : index
    %1 = vector.load %arg2[%c0_1, %c0_2] : memref<8x256xbf16, #tpu.memory_space<vmem>>, vector<8x256xbf16>
    %cst = arith.constant dense<0.000000e+00> : vector<256x256xf32>
    %2 = tpu.matmul %0, %1, %cst {dimension_numbers = #tpu.dot_dimension_numbers<[1], [0], [0], [1], [0, 0, 1, 1], [], []>} : vector<256x8xbf16>, vector<8x256xbf16>, vector<256x256xf32> -> vector<256x256xf32>
    %c0_3 = arith.constant 0 : index
    %c0_4 = arith.constant 0 : index
    %3 = vector.load %arg3[%c0_3, %c0_4] : memref<1x256xf32, #tpu.memory_space<vmem>>, vector<1x256xf32>
    %4 = vector.broadcast %3 : vector<1x256xf32> to vector<256x256xf32>
    %5 = arith.addf %2, %4 : vector<256x256xf32>
    %cst_5 = arith.constant 0.000000e+00 : f32
    %6 = vector.broadcast %cst_5 : f32 to vector<256x256xf32>
    %7 = arith.maximumf %5, %6 : vector<256x256xf32>
    %8 = arith.truncf %7 : vector<256x256xf32> to vector<256x256xbf16>
    %c0_6 = arith.constant 0 : index
    %c0_7 = arith.constant 0 : index
    %c0_8 = arith.constant 0 : index
    %9 = vector.load %arg4[%c0_6, %c0_7, %c0_8] : memref<5x256x256xbf16, #tpu.memory_space<vmem>>, vector<1x256x256xbf16>
    %10 = vector.shape_cast %9 : vector<1x256x256xbf16> to vector<256x256xbf16>
    %cst_9 = arith.constant dense<0.000000e+00> : vector<256x256xf32>
    %11 = tpu.matmul %8, %10, %cst_9 {dimension_numbers = #tpu.dot_dimension_numbers<[1], [0], [0], [1], [0, 0, 1, 1], [], []>} : vector<256x256xbf16>, vector<256x256xbf16>, vector<256x256xf32> -> vector<256x256xf32>
    %c0_10 = arith.constant 0 : index
    %c0_11 = arith.constant 0 : index
    %c0_12 = arith.constant 0 : index
    %12 = vector.load %arg5[%c0_10, %c0_11, %c0_12] : memref<5x1x256xf32, #tpu.memory_space<vmem>>, vector<1x1x256xf32>
    %13 = vector.shape_cast %12 : vector<1x1x256xf32> to vector<1x256xf32>
    %14 = vector.broadcast %13 : vector<1x256xf32> to vector<256x256xf32>
    %15 = arith.addf %11, %14 : vector<256x256xf32>
    %cst_13 = arith.constant 0.000000e+00 : f32
    %16 = vector.broadcast %cst_13 : f32 to vector<256x256xf32>
    %17 = arith.maximumf %15, %16 : vector<256x256xf32>
    %18 = arith.truncf %17 : vector<256x256xf32> to vector<256x256xbf16>
    %c0_14 = arith.constant 0 : index
    %c0_15 = arith.constant 0 : index
    %c0_16 = arith.constant 0 : index
    %19 = vector.load %arg6[%c0_14, %c0_15, %c0_16] : memref<5x256x256xbf16, #tpu.memory_space<vmem>>, vector<1x256x256xbf16>
    %20 = vector.shape_cast %19 : vector<1x256x256xbf16> to vector<256x256xbf16>
    %cst_17 = arith.constant dense<0.000000e+00> : vector<256x256xf32>
    %21 = tpu.matmul %18, %20, %cst_17 {dimension_numbers = #tpu.dot_dimension_numbers<[1], [0], [0], [1], [0, 0, 1, 1], [], []>} : vector<256x256xbf16>, vector<256x256xbf16>, vector<256x256xf32> -> vector<256x256xf32>
    %c0_18 = arith.constant 0 : index
    %c0_19 = arith.constant 0 : index
    %c0_20 = arith.constant 0 : index
    %22 = vector.load %arg7[%c0_18, %c0_19, %c0_20] : memref<5x1x256xf32, #tpu.memory_space<vmem>>, vector<1x1x256xf32>
    %23 = vector.shape_cast %22 : vector<1x1x256xf32> to vector<1x256xf32>
    %24 = vector.broadcast %23 : vector<1x256xf32> to vector<256x256xf32>
    %25 = arith.addf %21, %24 : vector<256x256xf32>
    %26 = arith.addf %25, %7 : vector<256x256xf32>
    %cst_21 = arith.constant 0.000000e+00 : f32
    %27 = vector.broadcast %cst_21 : f32 to vector<256x256xf32>
    %28 = arith.maximumf %26, %27 : vector<256x256xf32>
    %29 = arith.truncf %28 : vector<256x256xf32> to vector<256x256xbf16>
    %c1 = arith.constant 1 : index
    %c0_22 = arith.constant 0 : index
    %c0_23 = arith.constant 0 : index
    %30 = vector.load %arg4[%c1, %c0_22, %c0_23] : memref<5x256x256xbf16, #tpu.memory_space<vmem>>, vector<1x256x256xbf16>
    %31 = vector.shape_cast %30 : vector<1x256x256xbf16> to vector<256x256xbf16>
    %cst_24 = arith.constant dense<0.000000e+00> : vector<256x256xf32>
    %32 = tpu.matmul %29, %31, %cst_24 {dimension_numbers = #tpu.dot_dimension_numbers<[1], [0], [0], [1], [0, 0, 1, 1], [], []>} : vector<256x256xbf16>, vector<256x256xbf16>, vector<256x256xf32> -> vector<256x256xf32>
    %c1_25 = arith.constant 1 : index
    %c0_26 = arith.constant 0 : index
    %c0_27 = arith.constant 0 : index
    %33 = vector.load %arg5[%c1_25, %c0_26, %c0_27] : memref<5x1x256xf32, #tpu.memory_space<vmem>>, vector<1x1x256xf32>
    %34 = vector.shape_cast %33 : vector<1x1x256xf32> to vector<1x256xf32>
    %35 = vector.broadcast %34 : vector<1x256xf32> to vector<256x256xf32>
    %36 = arith.addf %32, %35 : vector<256x256xf32>
    %cst_28 = arith.constant 0.000000e+00 : f32
    %37 = vector.broadcast %cst_28 : f32 to vector<256x256xf32>
    %38 = arith.maximumf %36, %37 : vector<256x256xf32>
    %39 = arith.truncf %38 : vector<256x256xf32> to vector<256x256xbf16>
    %c1_29 = arith.constant 1 : index
    %c0_30 = arith.constant 0 : index
    %c0_31 = arith.constant 0 : index
    %40 = vector.load %arg6[%c1_29, %c0_30, %c0_31] : memref<5x256x256xbf16, #tpu.memory_space<vmem>>, vector<1x256x256xbf16>
    %41 = vector.shape_cast %40 : vector<1x256x256xbf16> to vector<256x256xbf16>
    %cst_32 = arith.constant dense<0.000000e+00> : vector<256x256xf32>
    %42 = tpu.matmul %39, %41, %cst_32 {dimension_numbers = #tpu.dot_dimension_numbers<[1], [0], [0], [1], [0, 0, 1, 1], [], []>} : vector<256x256xbf16>, vector<256x256xbf16>, vector<256x256xf32> -> vector<256x256xf32>
    %c1_33 = arith.constant 1 : index
    %c0_34 = arith.constant 0 : index
    %c0_35 = arith.constant 0 : index
    %43 = vector.load %arg7[%c1_33, %c0_34, %c0_35] : memref<5x1x256xf32, #tpu.memory_space<vmem>>, vector<1x1x256xf32>
    %44 = vector.shape_cast %43 : vector<1x1x256xf32> to vector<1x256xf32>
    %45 = vector.broadcast %44 : vector<1x256xf32> to vector<256x256xf32>
    %46 = arith.addf %42, %45 : vector<256x256xf32>
    %47 = arith.addf %46, %28 : vector<256x256xf32>
    %cst_36 = arith.constant 0.000000e+00 : f32
    %48 = vector.broadcast %cst_36 : f32 to vector<256x256xf32>
    %49 = arith.maximumf %47, %48 : vector<256x256xf32>
    %50 = arith.truncf %49 : vector<256x256xf32> to vector<256x256xbf16>
    %c2 = arith.constant 2 : index
    %c0_37 = arith.constant 0 : index
    %c0_38 = arith.constant 0 : index
    %51 = vector.load %arg4[%c2, %c0_37, %c0_38] : memref<5x256x256xbf16, #tpu.memory_space<vmem>>, vector<1x256x256xbf16>
    %52 = vector.shape_cast %51 : vector<1x256x256xbf16> to vector<256x256xbf16>
    %cst_39 = arith.constant dense<0.000000e+00> : vector<256x256xf32>
    %53 = tpu.matmul %50, %52, %cst_39 {dimension_numbers = #tpu.dot_dimension_numbers<[1], [0], [0], [1], [0, 0, 1, 1], [], []>} : vector<256x256xbf16>, vector<256x256xbf16>, vector<256x256xf32> -> vector<256x256xf32>
    %c2_40 = arith.constant 2 : index
    %c0_41 = arith.constant 0 : index
    %c0_42 = arith.constant 0 : index
    %54 = vector.load %arg5[%c2_40, %c0_41, %c0_42] : memref<5x1x256xf32, #tpu.memory_space<vmem>>, vector<1x1x256xf32>
    %55 = vector.shape_cast %54 : vector<1x1x256xf32> to vector<1x256xf32>
    %56 = vector.broadcast %55 : vector<1x256xf32> to vector<256x256xf32>
    %57 = arith.addf %53, %56 : vector<256x256xf32>
    %cst_43 = arith.constant 0.000000e+00 : f32
    %58 = vector.broadcast %cst_43 : f32 to vector<256x256xf32>
    %59 = arith.maximumf %57, %58 : vector<256x256xf32>
    %60 = arith.truncf %59 : vector<256x256xf32> to vector<256x256xbf16>
    %c2_44 = arith.constant 2 : index
    %c0_45 = arith.constant 0 : index
    %c0_46 = arith.constant 0 : index
    %61 = vector.load %arg6[%c2_44, %c0_45, %c0_46] : memref<5x256x256xbf16, #tpu.memory_space<vmem>>, vector<1x256x256xbf16>
    %62 = vector.shape_cast %61 : vector<1x256x256xbf16> to vector<256x256xbf16>
    %cst_47 = arith.constant dense<0.000000e+00> : vector<256x256xf32>
    %63 = tpu.matmul %60, %62, %cst_47 {dimension_numbers = #tpu.dot_dimension_numbers<[1], [0], [0], [1], [0, 0, 1, 1], [], []>} : vector<256x256xbf16>, vector<256x256xbf16>, vector<256x256xf32> -> vector<256x256xf32>
    %c2_48 = arith.constant 2 : index
    %c0_49 = arith.constant 0 : index
    %c0_50 = arith.constant 0 : index
    %64 = vector.load %arg7[%c2_48, %c0_49, %c0_50] : memref<5x1x256xf32, #tpu.memory_space<vmem>>, vector<1x1x256xf32>
    %65 = vector.shape_cast %64 : vector<1x1x256xf32> to vector<1x256xf32>
    %66 = vector.broadcast %65 : vector<1x256xf32> to vector<256x256xf32>
    %67 = arith.addf %63, %66 : vector<256x256xf32>
    %68 = arith.addf %67, %49 : vector<256x256xf32>
    %cst_51 = arith.constant 0.000000e+00 : f32
    %69 = vector.broadcast %cst_51 : f32 to vector<256x256xf32>
    %70 = arith.maximumf %68, %69 : vector<256x256xf32>
    %71 = arith.truncf %70 : vector<256x256xf32> to vector<256x256xbf16>
    %c3 = arith.constant 3 : index
    %c0_52 = arith.constant 0 : index
    %c0_53 = arith.constant 0 : index
    %72 = vector.load %arg4[%c3, %c0_52, %c0_53] : memref<5x256x256xbf16, #tpu.memory_space<vmem>>, vector<1x256x256xbf16>
    %73 = vector.shape_cast %72 : vector<1x256x256xbf16> to vector<256x256xbf16>
    %cst_54 = arith.constant dense<0.000000e+00> : vector<256x256xf32>
    %74 = tpu.matmul %71, %73, %cst_54 {dimension_numbers = #tpu.dot_dimension_numbers<[1], [0], [0], [1], [0, 0, 1, 1], [], []>} : vector<256x256xbf16>, vector<256x256xbf16>, vector<256x256xf32> -> vector<256x256xf32>
    %c3_55 = arith.constant 3 : index
    %c0_56 = arith.constant 0 : index
    %c0_57 = arith.constant 0 : index
    %75 = vector.load %arg5[%c3_55, %c0_56, %c0_57] : memref<5x1x256xf32, #tpu.memory_space<vmem>>, vector<1x1x256xf32>
    %76 = vector.shape_cast %75 : vector<1x1x256xf32> to vector<1x256xf32>
    %77 = vector.broadcast %76 : vector<1x256xf32> to vector<256x256xf32>
    %78 = arith.addf %74, %77 : vector<256x256xf32>
    %cst_58 = arith.constant 0.000000e+00 : f32
    %79 = vector.broadcast %cst_58 : f32 to vector<256x256xf32>
    %80 = arith.maximumf %78, %79 : vector<256x256xf32>
    %81 = arith.truncf %80 : vector<256x256xf32> to vector<256x256xbf16>
    %c3_59 = arith.constant 3 : index
    %c0_60 = arith.constant 0 : index
    %c0_61 = arith.constant 0 : index
    %82 = vector.load %arg6[%c3_59, %c0_60, %c0_61] : memref<5x256x256xbf16, #tpu.memory_space<vmem>>, vector<1x256x256xbf16>
    %83 = vector.shape_cast %82 : vector<1x256x256xbf16> to vector<256x256xbf16>
    %cst_62 = arith.constant dense<0.000000e+00> : vector<256x256xf32>
    %84 = tpu.matmul %81, %83, %cst_62 {dimension_numbers = #tpu.dot_dimension_numbers<[1], [0], [0], [1], [0, 0, 1, 1], [], []>} : vector<256x256xbf16>, vector<256x256xbf16>, vector<256x256xf32> -> vector<256x256xf32>
    %c3_63 = arith.constant 3 : index
    %c0_64 = arith.constant 0 : index
    %c0_65 = arith.constant 0 : index
    %85 = vector.load %arg7[%c3_63, %c0_64, %c0_65] : memref<5x1x256xf32, #tpu.memory_space<vmem>>, vector<1x1x256xf32>
    %86 = vector.shape_cast %85 : vector<1x1x256xf32> to vector<1x256xf32>
    %87 = vector.broadcast %86 : vector<1x256xf32> to vector<256x256xf32>
    %88 = arith.addf %84, %87 : vector<256x256xf32>
    %89 = arith.addf %88, %70 : vector<256x256xf32>
    %cst_66 = arith.constant 0.000000e+00 : f32
    %90 = vector.broadcast %cst_66 : f32 to vector<256x256xf32>
    %91 = arith.maximumf %89, %90 : vector<256x256xf32>
    %92 = arith.truncf %91 : vector<256x256xf32> to vector<256x256xbf16>
    %c4 = arith.constant 4 : index
    %c0_67 = arith.constant 0 : index
    %c0_68 = arith.constant 0 : index
    %93 = vector.load %arg4[%c4, %c0_67, %c0_68] : memref<5x256x256xbf16, #tpu.memory_space<vmem>>, vector<1x256x256xbf16>
    %94 = vector.shape_cast %93 : vector<1x256x256xbf16> to vector<256x256xbf16>
    %cst_69 = arith.constant dense<0.000000e+00> : vector<256x256xf32>
    %95 = tpu.matmul %92, %94, %cst_69 {dimension_numbers = #tpu.dot_dimension_numbers<[1], [0], [0], [1], [0, 0, 1, 1], [], []>} : vector<256x256xbf16>, vector<256x256xbf16>, vector<256x256xf32> -> vector<256x256xf32>
    %c4_70 = arith.constant 4 : index
    %c0_71 = arith.constant 0 : index
    %c0_72 = arith.constant 0 : index
    %96 = vector.load %arg5[%c4_70, %c0_71, %c0_72] : memref<5x1x256xf32, #tpu.memory_space<vmem>>, vector<1x1x256xf32>
    %97 = vector.shape_cast %96 : vector<1x1x256xf32> to vector<1x256xf32>
    %98 = vector.broadcast %97 : vector<1x256xf32> to vector<256x256xf32>
    %99 = arith.addf %95, %98 : vector<256x256xf32>
    %cst_73 = arith.constant 0.000000e+00 : f32
    %100 = vector.broadcast %cst_73 : f32 to vector<256x256xf32>
    %101 = arith.maximumf %99, %100 : vector<256x256xf32>
    %102 = arith.truncf %101 : vector<256x256xf32> to vector<256x256xbf16>
    %c4_74 = arith.constant 4 : index
    %c0_75 = arith.constant 0 : index
    %c0_76 = arith.constant 0 : index
    %103 = vector.load %arg6[%c4_74, %c0_75, %c0_76] : memref<5x256x256xbf16, #tpu.memory_space<vmem>>, vector<1x256x256xbf16>
    %104 = vector.shape_cast %103 : vector<1x256x256xbf16> to vector<256x256xbf16>
    %cst_77 = arith.constant dense<0.000000e+00> : vector<256x256xf32>
    %105 = tpu.matmul %102, %104, %cst_77 {dimension_numbers = #tpu.dot_dimension_numbers<[1], [0], [0], [1], [0, 0, 1, 1], [], []>} : vector<256x256xbf16>, vector<256x256xbf16>, vector<256x256xf32> -> vector<256x256xf32>
    %c4_78 = arith.constant 4 : index
    %c0_79 = arith.constant 0 : index
    %c0_80 = arith.constant 0 : index
    %106 = vector.load %arg7[%c4_78, %c0_79, %c0_80] : memref<5x1x256xf32, #tpu.memory_space<vmem>>, vector<1x1x256xf32>
    %107 = vector.shape_cast %106 : vector<1x1x256xf32> to vector<1x256xf32>
    %108 = vector.broadcast %107 : vector<1x256xf32> to vector<256x256xf32>
    %109 = arith.addf %105, %108 : vector<256x256xf32>
    %110 = arith.addf %109, %91 : vector<256x256xf32>
    %cst_81 = arith.constant 0.000000e+00 : f32
    %111 = vector.broadcast %cst_81 : f32 to vector<256x256xf32>
    %112 = arith.maximumf %110, %111 : vector<256x256xf32>
    %c0_82 = arith.constant 0 : index
    %c0_83 = arith.constant 0 : index
    %113 = vector.load %arg8[%c0_82, %c0_83] : memref<256x128xf32, #tpu.memory_space<vmem>>, vector<256x128xf32>
    %cst_84 = arith.constant dense<0.000000e+00> : vector<256x128xf32>
    %114 = tpu.matmul %112, %113, %cst_84 {dimension_numbers = #tpu.dot_dimension_numbers<[1], [0], [0], [1], [0, 0, 1, 1], [], []>} : vector<256x256xf32>, vector<256x128xf32>, vector<256x128xf32> -> vector<256x128xf32>
    %c0_85 = arith.constant 0 : index
    %c0_86 = arith.constant 0 : index
    %115 = vector.load %arg9[%c0_85, %c0_86] : memref<1x128xf32, #tpu.memory_space<vmem>>, vector<1x128xf32>
    %116 = vector.broadcast %115 : vector<1x128xf32> to vector<256x128xf32>
    %117 = arith.addf %114, %116 : vector<256x128xf32>
    %c0_87 = arith.constant 0 : index
    %c0_88 = arith.constant 0 : index
    %118 = vector.load %arg10[%c0_87, %c0_88] : memref<256x128xf32, #tpu.memory_space<vmem>>, vector<256x128xf32>
    tpu.vector_store %arg10[%c0_87, %c0_88], %117 {strides = array<i32>} : memref<256x128xf32, #tpu.memory_space<vmem>>, vector<256x128xf32>,
    return
  }
  func.func @transform_0(%arg0: i32) -> (i32, i32) {
    %c0_i32 = arith.constant 0 : i32
    %c0_i32_0 = arith.constant 0 : i32
    return %arg0, %c0_i32 : i32, i32
  }
  func.func @transform_1(%arg0: i32) -> (i32, i32) {
    %c0_i32 = arith.constant 0 : i32
    %c0_i32_0 = arith.constant 0 : i32
    %c0_i32_1 = arith.constant 0 : i32
    return %c0_i32, %c0_i32_0 : i32, i32
  }
  func.func @transform_2(%arg0: i32) -> (i32, i32) {
    %c0_i32 = arith.constant 0 : i32
    %c0_i32_0 = arith.constant 0 : i32
    %c0_i32_1 = arith.constant 0 : i32
    return %c0_i32, %c0_i32_0 : i32, i32
  }
  func.func @transform_3(%arg0: i32) -> (i32, i32, i32) {
    %c0_i32 = arith.constant 0 : i32
    %c0_i32_0 = arith.constant 0 : i32
    %c0_i32_1 = arith.constant 0 : i32
    %c0_i32_2 = arith.constant 0 : i32
    return %c0_i32, %c0_i32_0, %c0_i32_1 : i32, i32, i32
  }
  func.func @transform_4(%arg0: i32) -> (i32, i32, i32) {
    %c0_i32 = arith.constant 0 : i32
    %c0_i32_0 = arith.constant 0 : i32
    %c0_i32_1 = arith.constant 0 : i32
    %c0_i32_2 = arith.constant 0 : i32
    return %c0_i32, %c0_i32_0, %c0_i32_1 : i32, i32, i32
  }
  func.func @transform_5(%arg0: i32) -> (i32, i32, i32) {
    %c0_i32 = arith.constant 0 : i32
    %c0_i32_0 = arith.constant 0 : i32
    %c0_i32_1 = arith.constant 0 : i32
    %c0_i32_2 = arith.constant 0 : i32
    return %c0_i32, %c0_i32_0, %c0_i32_1 : i32, i32, i32
  }
  func.func @transform_6(%arg0: i32) -> (i32, i32, i32) {
    %c0_i32 = arith.constant 0 : i32
    %c0_i32_0 = arith.constant 0 : i32
    %c0_i32_1 = arith.constant 0 : i32
    %c0_i32_2 = arith.constant 0 : i32
    return %c0_i32, %c0_i32_0, %c0_i32_1 : i32, i32, i32
  }
  func.func @transform_7(%arg0: i32) -> (i32, i32) {
    %c0_i32 = arith.constant 0 : i32
    %c0_i32_0 = arith.constant 0 : i32
    %c0_i32_1 = arith.constant 0 : i32
    return %c0_i32, %c0_i32_0 : i32, i32
  }
  func.func @transform_8(%arg0: i32) -> (i32, i32) {
    %c0_i32 = arith.constant 0 : i32
    %c0_i32_0 = arith.constant 0 : i32
    %c0_i32_1 = arith.constant 0 : i32
    return %c0_i32, %c0_i32_0 : i32, i32
  }
  func.func @transform_9(%arg0: i32) -> (i32, i32) {
    %c0_i32 = arith.constant 0 : i32
    %c0_i32_0 = arith.constant 0 : i32
    return %arg0, %c0_i32 : i32, i32
  }
}

</mosaic_0001>

<bundles_post_ra>
// kernel: tpu_custom_call.1
= control target key start
LH: loop header
LB: loop body
LE: loop exit
PB: predicated region body
PF: predicated region fallthrough
CT: control target
= control target key end

     0   :  { %14 = vsyncpa [#allocation3], 0  ;;  %s11249_s0 = inlined_call_operand.vmem [shape: bf16[512,8], index: 0, kind: input, shape index: {}]   ;;  %s11250_s1 = inlined_call_operand.vmem [shape: bf16[8,256], index: 1, kind: input, shape index: {}]   ;;  %s11251_s2 = inlined_call_operand.hbm [shape: f32[1,256], index: 2, kind: input, shape index: {}]   ;;  %s11252_s3 = inlined_call_operand.hbm [shape: bf16[5,256,256], index: 3, kind: input, shape index: {}]   ;;  %s11253_s4 = inlined_call_operand.vmem [shape: f32[5,1,256], index: 4, kind: input, shape index: {}]   ;;  %s11254_s5 = inlined_call_operand.hbm [shape: bf16[5,256,256], index: 5, kind: input, shape index: {}]   ;;  %s11255_s6 = inlined_call_operand.vmem [shape: f32[5,1,256], index: 6, kind: input, shape index: {}]   ;;  %s11256_s7 = inlined_call_operand.vmem [shape: f32[256,128], index: 7, kind: input, shape index: {}]   ;;  %s11257_s8 = inlined_call_operand.vmem [shape: f32[1,128], index: 8, kind: input, shape index: {}]   ;;  %s11258_s9 = inlined_call_operand.hbm [shape: f32[512,128], index: 9, kind: output, shape index: {}]  }
   0x1   :  { %15 = vsyncpa [#allocation6], 0 }
   0x2   :  { %16 = vsyncpa [#allocation4], 0 }
   0x3   :  { %18 = vsyncpa [#allocation4 + $0x1], 0  ;;  %s7718_s30 = smov 0   ;;  %s7720_s10 = smov 0  }
   0x4   :  { %s7722_s11 = smov 0   ;;  %s7724_s12 = smov 0  }
   0x5 LB: > { %s7739_s13 = sadd.s32 4294967295, %s7656_s12   ;;  %s6489_s14 = sadd.s32 4294967294, %s7656_s12   ;;  %s7656_s12 = sphi %s7724_s12, %s12292_s12   ;;  %s7652_s11 = sphi %s7722_s11, %s12291_s11   ;;  %s7648_s10 = sphi %s7720_s10, %s12290_s10   ;;  %s7644_s30 = sphi %s7718_s30, %s12289_s30  }
   0x6   : > { %s7743_s15 = sadd.s32 1, %s7656_s12   ;;  %s225_s16 = sadd.s32 1, %s7652_s11 }
   0x7   : > { %s222_s17 = ssub.s32 %s7656_s12, %s7743_s15  ;;  %p235_p0 = scmp.ne.s32.totalorder %s7652_s11, %s7648_s10 }
   0x8   : > { %p223_p1 = scmp.eq.s32.totalorder %s222_s17, 0  ;;  %p236_p2 = scmp.eq.s32.totalorder %s7739_s13, 1 }
   0x9   : > { %p241_p3 = scmp.ne.s32.totalorder %s7648_s10, %s7644_s30  ;;  %p242_p4 = scmp.eq.s32.totalorder %s6489_s14, 1 }
   0xa   : > { %s7754_s18 = scalar_select %p223_p1, %s7652_s11, %s225_s16  }
   0xb   : > { %p7756_p5 = por %p236_p2, %p235_p0  ;;  %p7760_p6 = por %p242_p4, %p241_p3 }
   0xc   : > { %p6490_p7 = scmp.ge.s32.totalorder %s7656_s12, 1  ;;  %p249_p8 = scmp.lt.s32.totalorder %s7656_s12, 3 }
   0xd   : > { %s11707_s19 = scalar_select %p7756_p5, 1, 0 }
   0xe   : > { %s11708_s20 = scalar_select %p7760_p6, 1, 0 }
   0xf   : > { %p11259_p9 = scmp.eq.s32.totalorder %s7739_s13, 0  ;;  %p7767_p10 = pnand %p6490_p7, %p249_p8 }
  0x10   : > { %s7658_s22 = smov [#allocation5]   ;;  %s7659_s25 = smov [#allocation2]  }
  0x11   : > { %s275_s23 = sshll.u32 %s7658_s22, 4  ;;  %p6950_p11 = pneg %p7767_p10  ;;  %s276_s23 = int_to_ptr.vmem [resolvable:$true] %s275_s23 }
  0x12   : > { %s265_s26 = sshll.u32 %s7659_s25, 4  ;;  %s7660_s27 = smov [#allocation7]   ;;  %s266_s26 = int_to_ptr.vmem [resolvable:$true] %s265_s26 }
  0x13   : > { %p7775_p12 = pnand %p11259_p9, %p6950_p11  ;;  %s291_s28 = sshll.u32 %s7660_s27, 4  ;;  %s292_s28 = int_to_ptr.vmem [resolvable:$true] %s291_s28 }
  0x14   : > { %s7521_s29 = scalar_lea.vmem %s276_s23, 20480  ;;  %p7529_p3 = scmp.lt.s32.totalorder %s276_s23, %s276_s23 }
  0x15   : > { %p7512_p13 = pneg %p7775_p12  ;;  %p7522_p0 = scmp.ne.s32.totalorder %s276_s23, %s7521_s29 }
  0x16   : > { %p7530_p4 = scmp.lt.s32.totalorder %s7521_s29, %s7521_s29 }
  0x17   : > { %p7524_p1 = pnand %p7522_p0, %p7512_p13 }
  0x18   : > { %p7531_p7 = por %p7530_p4, %p7529_p3 }
  0x19   : > { %p7525_p2 = pneg %p7524_p1 }
  0x1b   : > { %p7532_p8 = pnand %p7531_p7, %p7525_p2 }
  0x1d   : > { %7535 = shalt.err (!%p7532_p8)
}
  0x1e   : > { %s7661_s14 = smov 128   ;;  %s7662_s16 = smov 8  }
  0x1f   : > { %6956 = dma.hbm_to_vmem [thread:$0]  (!%p7775_p12), %s11252_s3, 20480, %s276_s23, [#allocation6], %s7661_s14, %s7661_s14, %s7662_s16  }
  0x20   : > { %s7547_s25 = scalar_lea.vmem %s266_s26, 32  ;;  %p7555_p9 = scmp.lt.s32.totalorder %s266_s26, %s266_s26 }
  0x21   : > { %p7548_p11 = scmp.ne.s32.totalorder %s266_s26, %s7547_s25  ;;  %p7556_p6 = scmp.lt.s32.totalorder %s7547_s25, %s7547_s25 }
  0x23   : > { %p7550_p0 = pnand %p7548_p11, %p7512_p13  ;;  %p7557_p3 = por %p7556_p6, %p7555_p9 }
  0x25   : > { %p7551_p1 = pneg %p7550_p0 }
  0x27   : > { %p7558_p2 = pnand %p7557_p3, %p7551_p1 }
  0x29   : > { %7561 = shalt.err (!%p7558_p2)
}
  0x2a   : > { %6953 = dma.hbm_to_vmem [thread:$0]  (!%p7775_p12), %s11251_s2, 32, %s266_s26, [#allocation3]  }
  0x2b   : > { %s7573_s23 = scalar_lea.vmem %s292_s28, 20480  ;;  %p7581_p11 = scmp.lt.s32.totalorder %s292_s28, %s292_s28 }
  0x2c   : > { %p7574_p4 = scmp.ne.s32.totalorder %s292_s28, %s7573_s23  ;;  %p7582_p0 = scmp.lt.s32.totalorder %s7573_s23, %s7573_s23 }
  0x2e   : > { %p7576_p7 = pnand %p7574_p4, %p7512_p13  ;;  %p7583_p5 = por %p7582_p0, %p7581_p11 }
  0x30   : > { %p7577_p8 = pneg %p7576_p7 }
  0x32   : > { %p7584_p6 = pnand %p7583_p5, %p7577_p8 }
  0x34   : > { %7587 = shalt.err (!%p7584_p6)
}
  0x35   : > { %6959 = dma.hbm_to_vmem [thread:$0]  (!%p7775_p12), %s11254_s5, 20480, %s292_s28, [#allocation6], %s7661_s14, %s7661_s14, %s7662_s16  }
  0x36   : > { %325 = sbr.rel (%p7767_p10) target bundleno = 2675 (0xa73), region = 56 }
  0x3b   : > { %p11711_p9 = scmp.eq.s32.totalorder %s7739_s13, 0 }
  0x3d   : > { %7631 = dma.done.wait (%p11711_p9), [#allocation3], 32   ;;  %p11712_p13 = pmov %p11711_p9 }
  0x3e   : > { %p11713_p1 = pmov %p11711_p9 }
  0x3f   : > { %7633 = vsyncadd (%p11712_p13), [#allocation3], 4294967264 }
  0x40   : > { %7635 = dma.done.wait (%p11713_p1), [#allocation6], 40960   ;;  %p11714_p5 = pmov %p11713_p1 }
  0x41   : > { %s6500_s24 = sshll.u32 %s7739_s13, 5  ;;  %v7663_v0 = vmov 0   ;;  %v409_v1 = vld [vmem:[%s11250_s1] sm:$0xff]  ;;  %vm556_vm0 = vcmask 1043456   ;;  %vm507_vm1 = vcmask 64512   ;;  %v412_v61 = vlaneseq  ;;  %s366_s27 = sand.u32 1, %s7648_s10  }
  0x42   : > { %7637 = vsyncadd (%p11714_p5), [#allocation6], 4294926336  ;;  %595 = vmatprep.mubr.bf16.mxu0 %v7663_v0  ;;  %p370_p12 = scmp.lt.s32.totalorder %s6500_s24, 63  ;;  %v6519_v2 = vcombine.high %v409_v1, %v409_v1  ;;  %v6518_v3 = vcombine.low %v409_v1, %v409_v1  ;;  %v7030_v7 = vld [vmem:[#allocation5 + $0x74] ss:$8 sps:$4 sm:$0xff]   ;;  %s6499_s29 = sshll.u32 %s366_s27, 8 }
  0x43   : > { %v7032_v8 = vld [vmem:[#allocation5 + $0x70] ss:$8 sps:$4 sm:$0xff]   ;;  %v7033_v9 = vld [vmem:[#allocation5 + $0x64] ss:$8 sps:$4 sm:$0xff]   ;;  %1056 = vmatprep.subr.bf16.mxu1 %v7030_v7  ;;  %v7035_v11 = vld [vmem:[#allocation5 + $0x60] ss:$8 sps:$4 sm:$0xff]  }
  0x44   : > { %s12294_s24 = smov (!%p370_p12, %s6500_s24), 63  ;;  %6520 = vmatprep.subr.msk.bf16.mxu0 %vm556_vm0, %v6519_v2  ;;  %v558_v4 = vsel %vm556_vm0, %v6518_v3, 0  ;;  %1057 = vmatpush1.bf16.msra.mxu1 %v7032_v8  ;;  %v7036_v12 = vld [vmem:[#allocation5 + $0x54] ss:$8 sps:$4 sm:$0xff]   ;;  %v7038_v13 = vld [vmem:[#allocation5 + $0x50] ss:$8 sps:$4 sm:$0xff]  }
  0x45   : > { %s6501_s21 = sshll.u32 %s12294_s24, 2  ;;  %578 = vmatpush1.bf16.msra.mxu0 %v558_v4  ;;  %1058 = vmatprep.subr.bf16.mxu1 %v7033_v9  ;;  %v7039_v14 = vld [vmem:[#allocation5 + $0x44] ss:$8 sps:$4 sm:$0xff]   ;;  %v7041_v16 = vld [vmem:[#allocation5 + $0x40] ss:$8 sps:$4 sm:$0xff]   ;;  %v413_v62 = vshrl.u32 %v412_v61, 7 }
  0x46   : > { %s7820_s14 = scalar_lea.vmem %s11249_s0, %s6501_s21  ;;  %v7042_v17 = vld [vmem:[#allocation5 + $0x34] ss:$8 sps:$4 sm:$0xff]   ;;  %v7044_v18 = vld [vmem:[#allocation5 + $0x30] ss:$8 sps:$4 sm:$0xff]   ;;  %v7045_v20 = vld [vmem:[#allocation5 + $0x24] ss:$8 sps:$4 sm:$0xff]  }
  0x47   : > { %v7014_v5 = vld [vmem:[%s7820_s14] sm:$0xff]   ;;  %v7015_v6 = vld [vmem:[%s7820_s14 + $0x8] sm:$0xff]   ;;  %v7016_v10 = vld [vmem:[%s7820_s14 + $0x10] sm:$0xff]   ;;  %v7872_v63 = vsub.s32 1, %v413_v62  ;;  %v7874_v2 = vsub.s32 0, %v413_v62  ;;  %s11133_s22 = scalar_lea.vmem [#allocation8], %s6499_s29 }
  0x48   : > { %6521 = vmatmul.mubr.msk.bf16.vlgmr.msra.gmra.mxu0 %vm507_vm1, %v7014_v5  ;;  %1059 = vmatpush1.bf16.msra.mxu1 %v7035_v11  ;;  %v7017_v15 = vld [vmem:[%s7820_s14 + $0x18] sm:$0xff]   ;;  %v7018_v19 = vld [vmem:[%s7820_s14 + $0x20] sm:$0xff]   ;;  %v7019_v25 = vld [vmem:[%s7820_s14 + $0x28] sm:$0xff]   ;;  %s6871_s24 = sshll.u32 %s7739_s13, 12  ;;  %s6396_s21 = sshll.u32 %s11133_s22, 4  ;;  %s11203_s21 = int_to_ptr.vmem [resolvable:$true] %s6396_s21 }
  0x49   : > { %605 = vmatprep.mubr.bf16.mxu0 %v7663_v0  ;;  %1060 = vmatprep.subr.bf16.mxu1 %v7036_v12  ;;  %v7047_v21 = vld [vmem:[#allocation5 + $0x20] ss:$8 sps:$4 sm:$0xff]   ;;  %v7048_v22 = vld [vmem:[#allocation5 + $0x14] ss:$8 sps:$4 sm:$0xff]   ;;  %v7050_v23 = vld [vmem:[#allocation5 + $0x10] ss:$8 sps:$4 sm:$0xff]  }
  0x4a   : > { %v7051_v24 = vld [vmem:[#allocation5 + $0x4] ss:$8 sps:$4 sm:$0xff]   ;;  %v7053_v26 = vld [vmem:[#allocation5] ss:$8 sps:$4 sm:$0xff]   ;;  %v7054_v27 = vld [vmem:[#allocation5 + $0xf4] ss:$8 sps:$4 sm:$0xff]  }
  0x4b   : > { %v7056_v28 = vld [vmem:[#allocation5 + $0xf0] ss:$8 sps:$4 sm:$0xff]   ;;  %v7057_v29 = vld [vmem:[#allocation5 + $0xe4] ss:$8 sps:$4 sm:$0xff]   ;;  %v7059_v31 = vld [vmem:[#allocation5 + $0xe0] ss:$8 sps:$4 sm:$0xff]  }
  0x4c   : > { %1061 = vmatpush1.bf16.msra.mxu1 %v7038_v13  ;;  %v7020_v30 = vld [vmem:[%s7820_s14 + $0x30] sm:$0xff]   ;;  %v7021_v35 = vld [vmem:[%s7820_s14 + $0x38] sm:$0xff]   ;;  %v7065_v36 = vld [vmem:[#allocation5 + $0xc0] ss:$8 sps:$4 sm:$0xff]   ;;  %s11209_s13 = scalar_lea.sflag [#allocation4], %s366_s27  ;;  %s7588_s16 = scalar_lea.vmem %s11203_s21, 4096 }
  0x4d   : > { %1062 = vmatprep.subr.bf16.mxu1 %v7039_v14  ;;  %v7060_v32 = vld [vmem:[#allocation5 + $0xd4] ss:$8 sps:$4 sm:$0xff]   ;;  %v7062_v33 = vld [vmem:[#allocation5 + $0xd0] ss:$8 sps:$4 sm:$0xff]   ;;  %v7063_v34 = vld [vmem:[#allocation5 + $0xc4] ss:$8 sps:$4 sm:$0xff]   ;;  %p7589_p10 = scmp.ne.s32.totalorder %s11203_s21, %s7588_s16 }
  0x4e   : > { %v7066_v37 = vld [vmem:[#allocation5 + $0xb4] ss:$8 sps:$4 sm:$0xff]   ;;  %v7068_v38 = vld [vmem:[#allocation5 + $0xb0] ss:$8 sps:$4 sm:$0xff]   ;;  %v7069_v40 = vld [vmem:[#allocation5 + $0xa4] ss:$8 sps:$4 sm:$0xff]  }
  0x4f   : > { %v7022_v39 = vld [vmem:[%s7820_s14 + $0x40] sm:$0xff]   ;;  %v7023_v42 = vld [vmem:[%s7820_s14 + $0x48] sm:$0xff]   ;;  %v7074_v44 = vld [vmem:[#allocation5 + $0x90] ss:$8 sps:$4 sm:$0xff]   ;;  %p12287_p3 = scmp.ne.s32.totalorder %s11707_s19, 0  ;;  %s7665_s25 = smov [#allocation8]  }
  0x50   : > { %6522 = vmatmul.mubr.msk.bf16.gmra.mxu0 %vm507_vm1, %v7015_v6  ;;  %1063 = vmatpush1.bf16.msra.mxu1 %v7041_v16  ;;  %v7071_v41 = vld [vmem:[#allocation5 + $0xa0] ss:$8 sps:$4 sm:$0xff]   ;;  %v7072_v43 = vld [vmem:[#allocation5 + $0x94] ss:$8 sps:$4 sm:$0xff]   ;;  %v7075_v45 = vld [vmem:[#allocation5 + $0x84] ss:$8 sps:$4 sm:$0xff]  }
  0x51   : > { %615 = vmatprep.mubr.bf16.mxu0 %v7663_v0  ;;  %1064 = vmatprep.subr.bf16.mxu1 %v7042_v17  ;;  %v7077_v46 = vld [vmem:[#allocation5 + $0x80] ss:$8 sps:$4 sm:$0xff]   ;;  %v7024_v47 = vld [vmem:[%s7820_s14 + $0x50] sm:$0xff]   ;;  %v7025_v48 = vld [vmem:[%s7820_s14 + $0x58] sm:$0xff]   ;;  %p7590_p2 = pnand %p7589_p10, %p12287_p3  ;;  %s7592_s29 = sshll.u32 %s7665_s25, 4  ;;  %s7593_s29 = int_to_ptr.vmem [resolvable:$false] %s7592_s29 }
  0x52   : > { %v7026_v49 = vld [vmem:[%s7820_s14 + $0x60] sm:$0xff]   ;;  %v7027_v50 = vld [vmem:[%s7820_s14 + $0x68] sm:$0xff]   ;;  %v7028_v51 = vld [vmem:[%s7820_s14 + $0x70] sm:$0xff]   ;;  %s7594_s23 = scalar_lea.vmem %s7593_s29, 8192  ;;  %p7595_p7 = scmp.lt.s32.totalorder %s11203_s21, %s7593_s29 }
  0x53   : > { %v7029_v52 = vld [vmem:[%s7820_s14 + $0x78] sm:$0xff]   ;;  %v7081_v55 = vld [vmem:[#allocation7 + $0x60] ss:$8 sps:$4 sm:$0xff]   ;;  %v7083_v56 = vld [vmem:[#allocation7 + $0x64] ss:$8 sps:$4 sm:$0xff]   ;;  %s11201_s14 = scalar_lea.hbm %s11258_s9, %s6871_s24  ;;  %p7591_p4 = pneg %p7590_p2 }
  0x54   : > { %1065 = vmatpush1.bf16.msra.mxu1 %v7044_v18  ;;  %v7078_v53 = vld [vmem:[#allocation7 + $0x70] ss:$8 sps:$4 sm:$0xff]   ;;  %v7080_v54 = vld [vmem:[#allocation7 + $0x74] ss:$8 sps:$4 sm:$0xff]   ;;  %v7087_v59 = vld [vmem:[#allocation7 + $0x40] ss:$8 sps:$4 sm:$0xff]   ;;  %p7596_p8 = scmp.lt.s32.totalorder %s7594_s23, %s7588_s16 }
  0x55   : > { %1066 = vmatprep.subr.bf16.mxu1 %v7045_v20  ;;  %1549 = vmatprep.subr.bf16.mxu0 %v7080_v54  ;;  %v7084_v57 = vld [vmem:[#allocation7 + $0x50] ss:$8 sps:$4 sm:$0xff]   ;;  %v7086_v58 = vld [vmem:[#allocation7 + $0x54] ss:$8 sps:$4 sm:$0xff]   ;;  %v7089_v60 = vld [vmem:[#allocation7 + $0x44] ss:$8 sps:$4 sm:$0xff]  }
  0x56   : > { %1550 = vmatpush1.bf16.msra.mxu0 %v7078_v53  ;;  %v7092_v1 = vld [vmem:[#allocation7 + $0x34] ss:$8 sps:$4 sm:$0xff]   ;;  %v7093_v6 = vld [vmem:[#allocation7 + $0x20] ss:$8 sps:$4 sm:$0xff]   ;;  %v7095_v7 = vld [vmem:[#allocation7 + $0x24] ss:$8 sps:$4 sm:$0xff]   ;;  %p7597_p11 = por %p7596_p8, %p7595_p7 }
  0x57   : > { %1551 = vmatprep.subr.bf16.mxu0 %v7083_v56  ;;  %v410_v3 = vld [vmem:[#allocation2] sm:$0x3]  ;;  %v7101_v18 = vld [vmem:[#allocation7 + $0x4] ss:$8 sps:$4 sm:$0xff]  }
  0x58   : > { %6523 = vmatmul.mubr.msk.bf16.gmra.mxu0 %vm507_vm1, %v7016_v10  ;;  %1067 = vmatpush1.bf16.msra.mxu1 %v7047_v21  ;;  %v7877_v5 = vrot.slane %v410_v3, %v7872_v63  ;;  %v7880_v8 = vrot.slane %v410_v3, %v7874_v2  ;;  %v7098_v16 = vld [vmem:[#allocation7 + $0x14] ss:$8 sps:$4 sm:$0xff]   ;;  %v7113_v53 = vld [vmem:[#allocation7 + $0xc4] ss:$8 sps:$4 sm:$0xff]   ;;  %p7598_p0 = pnand %p7597_p11, %p7591_p4 }
  0x59   : > { %625 = vmatprep.mubr.bf16.mxu0 %v7663_v0  ;;  %1068 = vmatprep.subr.bf16.mxu1 %v7048_v22  ;;  %v7116_v62 = vld [vmem:[#allocation7 + $0xb4] ss:$8 sps:$4 sm:$0xff]  }
  0x5a   : > { %1552 = vmatpush1.bf16.msra.mxu0 %v7081_v55 }
  0x5b   : > { %1553 = vmatprep.subr.bf16.mxu0 %v7086_v58 }
  0x5c   : > { %1069 = vmatpush1.bf16.msra.mxu1 %v7050_v23  ;;  %v7099_v23 = vld [vmem:[#allocation7] ss:$8 sps:$4 sm:$0xff]  }
  0x5d   : > { %1070 = vmatprep.subr.bf16.mxu1 %v7051_v24 }
  0x5e   : > { %1554 = vmatpush1.bf16.msra.mxu0 %v7084_v57 }
  0x5f   : > { %1555 = vmatprep.subr.bf16.mxu0 %v7089_v60 }
  0x60   : > { %6524 = vmatmul.mubr.msk.bf16.gmra.mxu0 %vm507_vm1, %v7017_v15  ;;  %1071 = vmatpush1.bf16.msra.mxu1 %v7053_v26  ;;  %v7096_v15 = vld [vmem:[#allocation7 + $0x10] ss:$8 sps:$4 sm:$0xff]   ;;  %v7104_v26 = vld [vmem:[#allocation7 + $0xf4] ss:$8 sps:$4 sm:$0xff]  }
  0x61   : > { %635 = vmatprep.mubr.bf16.mxu0 %v7663_v0  ;;  %1072 = vmatprep.subr.bf16.mxu1 %v7054_v27 }
  0x62   : > { %1556 = vmatpush1.bf16.msra.mxu0 %v7087_v59  ;;  %v7111_v59 = vld [vmem:[#allocation7 + $0xc0] ss:$8 sps:$4 sm:$0xff]  }
  0x63   : > { %1557 = vmatprep.subr.bf16.mxu0 %v7092_v1 }
  0x64   : > { %1073 = vmatpush2.bf16.msra.mxu1 %v7056_v28 }
  0x65   : > { %1074 = vmatprep.subr.bf16.mxu1 %v7057_v29 }
  0x68   : > { %6525 = vmatmul.mubr.msk.bf16.gmra.mxu0 %vm507_vm1, %v7018_v19  ;;  %1075 = vmatpush2.bf16.msra.mxu1 %v7059_v31 }
  0x69   : > { %645 = vmatprep.mubr.bf16.mxu0 %v7663_v0  ;;  %1076 = vmatprep.subr.bf16.mxu1 %v7060_v32  ;;  %v7102_v32 = vld [vmem:[#allocation7 + $0xf0] ss:$8 sps:$4 sm:$0xff]  }
  0x6c   : > { %1077 = vmatpush2.bf16.msra.mxu1 %v7062_v33 }
  0x6d   : > { %1078 = vmatprep.subr.bf16.mxu1 %v7063_v34 }
  0x70   : > { %6526 = vmatmul.mubr.msk.bf16.gmra.mxu0 %vm507_vm1, %v7019_v25  ;;  %1079 = vmatpush2.bf16.msra.mxu1 %v7065_v36 }
  0x71   : > { %655 = vmatprep.mubr.bf16.mxu0 %v7663_v0  ;;  %1080 = vmatprep.subr.bf16.mxu1 %v7066_v37 }
  0x74   : > { %1081 = vmatpush2.bf16.msra.mxu1 %v7068_v38 }
  0x75   : > { %1082 = vmatprep.subr.bf16.mxu1 %v7069_v40 }
  0x78   : > { %6527 = vmatmul.mubr.msk.bf16.gmra.mxu0 %vm507_vm1, %v7020_v30  ;;  %1083 = vmatpush2.bf16.msra.mxu1 %v7071_v41  ;;  %v7105_v41 = vld [vmem:[#allocation7 + $0xe0] ss:$8 sps:$4 sm:$0xff]  }
  0x79   : > { %665 = vmatprep.mubr.bf16.mxu0 %v7663_v0  ;;  %1084 = vmatprep.subr.bf16.mxu1 %v7072_v43 }
  0x7c   : > { %1085 = vmatpush2.bf16.msra.mxu1 %v7074_v44  ;;  %v7110_v44 = vld [vmem:[#allocation7 + $0xd4] ss:$8 sps:$4 sm:$0xff]  }
  0x7d   : > { %1086 = vmatprep.subr.bf16.mxu1 %v7075_v45 }
  0x80   : > { %6528 = vmatmul.mubr.msk.bf16.gmra.mxu0 %vm507_vm1, %v7021_v35  ;;  %1087 = vmatpush2.bf16.msra.mxu1 %v7077_v46  ;;  %v7107_v35 = vld [vmem:[#allocation7 + $0xe4] ss:$8 sps:$4 sm:$0xff]  }
  0x81   : > { %675 = vmatprep.mubr.bf16.mxu0 %v7663_v0 }
  0x88   : > { %6529 = vmatmul.mubr.msk.bf16.gmra.mxu0 %vm507_vm1, %v7022_v39 }
  0x89   : > { %685 = vmatprep.mubr.bf16.mxu0 %v7663_v0 }
  0x90   : > { %6530 = vmatmul.mubr.msk.bf16.gmra.mxu0 %vm507_vm1, %v7023_v42 }
  0x91   : > { %695 = vmatprep.mubr.bf16.mxu0 %v7663_v0 }
  0x98   : > { %6531 = vmatmul.mubr.msk.bf16.gmra.mxu0 %vm507_vm1, %v7024_v47 }
  0x99   : > { %705 = vmatprep.mubr.bf16.mxu0 %v7663_v0 }
  0xa0   : > { %6532 = vmatmul.mubr.msk.bf16.gmra.mxu0 %vm507_vm1, %v7025_v48 }
  0xa1   : > { %715 = vmatprep.mubr.bf16.mxu0 %v7663_v0 }
  0xa8   : > { %6533 = vmatmul.mubr.msk.bf16.gmra.mxu0 %vm507_vm1, %v7026_v49 }
  0xa9   : > { %725 = vmatprep.mubr.bf16.mxu0 %v7663_v0 }
  0xb0   : > { %6534 = vmatmul.mubr.msk.bf16.gmra.mxu0 %vm507_vm1, %v7027_v50  ;;  %v7108_v50 = vld [vmem:[#allocation7 + $0xd0] ss:$8 sps:$4 sm:$0xff]  }
  0xb1   : > { %735 = vmatprep.mubr.bf16.mxu0 %v7663_v0 }
  0xb8   : > { %6535 = vmatmul.mubr.msk.bf16.gmra.mxu0 %vm507_vm1, %v7028_v51 }
  0xb9   : > { %745 = vmatprep.mubr.bf16.mxu0 %v7663_v0  ;;  %v7090_v0 = vld [vmem:[#allocation7 + $0x30] ss:$8 sps:$4 sm:$0xff]  }
  0xba   : > { %1558 = vmatpush1.bf16.msra.mxu0 %v7090_v0 }
  0xbb   : > { %1559 = vmatprep.subr.bf16.mxu0 %v7095_v7  ;;  %v7114_v7 = vld [vmem:[#allocation7 + $0xb0] ss:$8 sps:$4 sm:$0xff]  }
  0xbe   : > { %1560 = vmatpush1.bf16.msra.mxu0 %v7093_v6 }
  0xbf   : > { %1561 = vmatprep.subr.bf16.mxu0 %v7098_v16 }
  0xc0   : > { %6536 = vmatmul.mubr.msk.bf16.gmra.mxu0 %vm507_vm1, %v7029_v52 }
  0xc2   : > { %1562 = vmatpush1.bf16.msra.mxu0 %v7096_v15 }
  0xc3   : > { %1563 = vmatprep.subr.bf16.mxu0 %v7101_v18 }
  0xc6   : > { %1564 = vmatpush1.bf16.msra.mxu0 %v7099_v23 }
  0xc7   : > { %1565 = vmatprep.subr.bf16.mxu0 %v7104_v26 }
  0xca   : > { %1566 = vmatpush2.bf16.msra.mxu0 %v7102_v32 }
  0xcb   : > { %1567 = vmatprep.subr.bf16.mxu0 %v7107_v35 }
  0xce   : > { %1568 = vmatpush2.bf16.msra.mxu0 %v7105_v41  ;;  %v7120_v41 = vld [vmem:[#allocation7 + $0x90] ss:$8 sps:$4 sm:$0xff]  }
  0xcf   : > { %1569 = vmatprep.subr.bf16.mxu0 %v7110_v44 }
  0xd2   : > { %1570 = vmatpush2.bf16.msra.mxu0 %v7108_v50 }
  0xd3   : > { %1571 = vmatprep.subr.bf16.mxu0 %v7113_v53 }
  0xd6   : > { %1572 = vmatpush2.bf16.msra.mxu0 %v7111_v59 }
  0xd7   : > { %1573 = vmatprep.subr.bf16.mxu0 %v7116_v62 }
  0xda   : > { %1574 = vmatpush2.bf16.msra.mxu0 %v7114_v7 }
 0x108   : > { %v597_v4 = vpop.f32.mrf.mxu0 }
 0x109   : > { %v7889_v13 = vadd.f32 %v597_v4, %v7880_v8 }
 0x10a   : > { %v599_v9 = vpop.f32.mrf.mxu0 }
 0x10b   : > { %v7883_v11 = vadd.f32 %v599_v9, %v7877_v5  ;;  %v11300_v24 = vmax.f32 %v7889_v13, 0.0 }
 0x10c   : > { %v601_v10 = vpop.f32.mrf.mxu0 }
 0x10d   : > { %v7886_v12 = vadd.f32 %v601_v10, %v7880_v8  ;;  %v11304_v21 = vmax.f32 %v7883_v11, 0.0 }
 0x10e   : > { %v603_v14 = vpop.f32.mrf.mxu0 }
 0x10f   : > { %v7892_v17 = vadd.f32 %v603_v14, %v7877_v5  ;;  %v11303_v19 = vmax.f32 %v7886_v12, 0.0  ;;  %v7119_v14 = vld [vmem:[#allocation7 + $0xa4] ss:$8 sps:$4 sm:$0xff]  }
 0x110   : > { %v607_v20 = vpop.f32.mrf.mxu0  ;;  %1575 = vmatprep.subr.bf16.mxu0 %v7119_v14 }
 0x111   : > { %v11297_v22 = vmax.f32 %v7892_v17, 0.0  ;;  %v820_v28 = vpack.c.bf16 %v11303_v19, %v11300_v24  ;;  %v7913_v33 = vadd.f32 %v607_v20, %v7880_v8 }
 0x112   : > { %v609_v25 = vpop.f32.mrf.mxu0 }
 0x113   : > { %v821_v27 = vpack.c.bf16 %v11297_v22, %v11304_v21  ;;  %v7907_v30 = vadd.f32 %v609_v25, %v7877_v5  ;;  %v11290_v42 = vmax.f32 %v7913_v33, 0.0  ;;  %v7117_v25 = vld [vmem:[#allocation7 + $0xa0] ss:$8 sps:$4 sm:$0xff]  }
 0x114   : > { %v611_v29 = vpop.f32.mrf.mxu0  ;;  %1576 = vmatpush2.bf16.msra.mxu0 %v7117_v25 }
 0x115   : > { %v7910_v31 = vadd.f32 %v611_v29, %v7880_v8  ;;  %1088 = vmatprep.mubr.bf16.mxu1 %v821_v27  ;;  %v11296_v39 = vmax.f32 %v7907_v30, 0.0 }
 0x116   : > { %v613_v34 = vpop.f32.mrf.mxu0  ;;  %1089 = vmatmul.mubr.bf16.vlgmr.msra.gmra.mxu1 %v820_v28  ;;  %v7122_v28 = vld [vmem:[#allocation7 + $0x94] ss:$8 sps:$4 sm:$0xff]  }
 0x117   : > { %v7916_v36 = vadd.f32 %v613_v34, %v7877_v5  ;;  %v11295_v37 = vmax.f32 %v7910_v31, 0.0  ;;  %1577 = vmatprep.subr.bf16.mxu0 %v7122_v28 }
 0x118   : > { %v617_v38 = vpop.f32.mrf.mxu0  ;;  %1578 = vmatpush2.bf16.msra.mxu0 %v7120_v41 }
 0x119   : > { %v11289_v40 = vmax.f32 %v7916_v36, 0.0  ;;  %v822_v46 = vpack.c.bf16 %v11295_v37, %v11290_v42  ;;  %v7937_v51 = vadd.f32 %v617_v38, %v7880_v8  ;;  %v7125_v42 = vld [vmem:[#allocation7 + $0x84] ss:$8 sps:$4 sm:$0xff]  }
 0x11a   : > { %v619_v43 = vpop.f32.mrf.mxu0  ;;  %1579 = vmatprep.subr.bf16.mxu0 %v7125_v42 }
 0x11b   : > { %v823_v45 = vpack.c.bf16 %v11289_v40, %v11296_v39  ;;  %v7931_v48 = vadd.f32 %v619_v43, %v7877_v5  ;;  %v11284_v60 = vmax.f32 %v7937_v51, 0.0 }
 0x11c   : > { %v621_v47 = vpop.f32.mrf.mxu0 }
 0x11d   : > { %v7934_v49 = vadd.f32 %v621_v47, %v7880_v8  ;;  %1098 = vmatprep.mubr.bf16.mxu1 %v823_v45  ;;  %v11288_v57 = vmax.f32 %v7931_v48, 0.0 }
 0x11e   : > { %v623_v52 = vpop.f32.mrf.mxu0  ;;  %1099 = vmatmul.mubr.bf16.gmra.mxu1 %v822_v46 }
 0x11f   : > { %v7940_v54 = vadd.f32 %v623_v52, %v7877_v5  ;;  %v11287_v55 = vmax.f32 %v7934_v49, 0.0 }
 0x120   : > { %v627_v56 = vpop.f32.mrf.mxu0 }
 0x121   : > { %v11281_v58 = vmax.f32 %v7940_v54, 0.0  ;;  %v824_v1 = vpack.c.bf16 %v11287_v55, %v11284_v60  ;;  %v7961_v9 = vadd.f32 %v627_v56, %v7880_v8 }
 0x122   : > { %v629_v61 = vpop.f32.mrf.mxu0 }
 0x123   : > { %v825_v0 = vpack.c.bf16 %v11281_v58, %v11288_v57  ;;  %v7955_v4 = vadd.f32 %v629_v61, %v7877_v5  ;;  %v11276_v26 = vmax.f32 %v7961_v9, 0.0 }
 0x124   : > { %v631_v3 = vpop.f32.mrf.mxu0 }
 0x125   : > { %v7958_v6 = vadd.f32 %v631_v3, %v7880_v8  ;;  %1108 = vmatprep.mubr.bf16.mxu1 %v825_v0  ;;  %v11280_v20 = vmax.f32 %v7955_v4, 0.0 }
 0x126   : > { %v633_v10 = vpop.f32.mrf.mxu0  ;;  %1109 = vmatmul.mubr.bf16.gmra.mxu1 %v824_v1 }
 0x127   : > { %v7964_v15 = vadd.f32 %v633_v10, %v7877_v5  ;;  %v11279_v16 = vmax.f32 %v7958_v6, 0.0 }
 0x128   : > { %v637_v18 = vpop.f32.mrf.mxu0 }
 0x129   : > { %v11273_v23 = vmax.f32 %v7964_v15, 0.0  ;;  %v826_v32 = vpack.c.bf16 %v11279_v16, %v11276_v26  ;;  %v7985_v43 = vadd.f32 %v637_v18, %v7880_v8 }
 0x12a   : > { %v639_v27 = vpop.f32.mrf.mxu0 }
 0x12b   : > { %v827_v29 = vpack.c.bf16 %v11273_v23, %v11280_v20  ;;  %v7979_v35 = vadd.f32 %v639_v27, %v7877_v5  ;;  %v11268_v53 = vmax.f32 %v7985_v43, 0.0 }
 0x12c   : > { %v641_v34 = vpop.f32.mrf.mxu0 }
 0x12d   : > { %v7982_v38 = vadd.f32 %v641_v34, %v7880_v8  ;;  %1118 = vmatprep.mubr.bf16.mxu1 %v827_v29  ;;  %v11272_v50 = vmax.f32 %v7979_v35, 0.0 }
 0x12e   : > { %v643_v44 = vpop.f32.mrf.mxu0  ;;  %1119 = vmatmul.mubr.bf16.gmra.mxu1 %v826_v32 }
 0x12f   : > { %v7988_v45 = vadd.f32 %v643_v44, %v7877_v5  ;;  %v11271_v46 = vmax.f32 %v7982_v38, 0.0 }
 0x130   : > { %v647_v47 = vpop.f32.mrf.mxu0 }
 0x131   : > { %v11265_v52 = vmax.f32 %v7988_v45, 0.0  ;;  %v828_v61 = vpack.c.bf16 %v11271_v46, %v11268_v53  ;;  %v8009_v3 = vadd.f32 %v647_v47, %v7880_v8 }
 0x132   : > { %v649_v56 = vpop.f32.mrf.mxu0 }
 0x133   : > { %v829_v59 = vpack.c.bf16 %v11265_v52, %v11272_v50  ;;  %v8003_v0 = vadd.f32 %v649_v56, %v7877_v5  ;;  %v11262_v28 = vmax.f32 %v8009_v3, 0.0 }
 0x134   : > { %v651_v62 = vpop.f32.mrf.mxu0 }
 0x135   : > { %v8006_v1 = vadd.f32 %v651_v62, %v7880_v8  ;;  %1128 = vmatprep.mubr.bf16.mxu1 %v829_v59  ;;  %v11264_v25 = vmax.f32 %v8003_v0, 0.0 }
 0x136   : > { %v653_v7 = vpop.f32.mrf.mxu0  ;;  %1129 = vmatmul.mubr.bf16.gmra.mxu1 %v828_v61 }
 0x137   : > { %v8012_v10 = vadd.f32 %v653_v7, %v7877_v5  ;;  %v11263_v14 = vmax.f32 %v8006_v1, 0.0 }
 0x138   : > { %v657_v18 = vpop.f32.mrf.mxu0 }
 0x139   : > { %v11261_v27 = vmax.f32 %v8012_v10, 0.0  ;;  %v830_v34 = vpack.c.bf16 %v11263_v14, %v11262_v28  ;;  %v8033_v56 = vadd.f32 %v657_v18, %v7880_v8 }
 0x13a   : > { %v659_v29 = vpop.f32.mrf.mxu0 }
 0x13b   : > { %v831_v32 = vpack.c.bf16 %v11261_v27, %v11264_v25  ;;  %v8027_v44 = vadd.f32 %v659_v29, %v7877_v5  ;;  %v11269_v28 = vmax.f32 %v8033_v56, 0.0 }
 0x13c   : > { %v661_v41 = vpop.f32.mrf.mxu0 }
 0x13d   : > { %v8030_v47 = vadd.f32 %v661_v41, %v7880_v8  ;;  %1138 = vmatprep.mubr.bf16.mxu1 %v831_v32  ;;  %v11267_v27 = vmax.f32 %v8027_v44, 0.0 }
 0x13e   : > { %v663_v59 = vpop.f32.mrf.mxu0  ;;  %1139 = vmatmul.mubr.bf16.gmra.mxu1 %v830_v34 }
 0x13f   : > { %v8036_v61 = vadd.f32 %v663_v59, %v7877_v5  ;;  %v11270_v62 = vmax.f32 %v8030_v47, 0.0 }
 0x140   : > { %v667_v7 = vpop.f32.mrf.mxu0 }
 0x141   : > { %v11266_v29 = vmax.f32 %v8036_v61, 0.0  ;;  %v832_v32 = vpack.c.bf16 %v11270_v62, %v11269_v28  ;;  %v8057_v25 = vadd.f32 %v667_v7, %v7880_v8 }
 0x142   : > { %v669_v41 = vpop.f32.mrf.mxu0 }
 0x143   : > { %v833_v18 = vpack.c.bf16 %v11266_v29, %v11267_v27  ;;  %v8051_v59 = vadd.f32 %v669_v41, %v7877_v5  ;;  %v11277_v62 = vmax.f32 %v8057_v25, 0.0 }
 0x144   : > { %v671_v34 = vpop.f32.mrf.mxu0 }
 0x145   : > { %v8054_v14 = vadd.f32 %v671_v34, %v7880_v8  ;;  %1148 = vmatprep.mubr.bf16.mxu1 %v833_v18  ;;  %v11275_v28 = vmax.f32 %v8051_v59, 0.0 }
 0x146   : > { %v673_v52 = vpop.f32.mrf.mxu0  ;;  %1149 = vmatmul.mubr.bf16.gmra.mxu1 %v832_v32 }
 0x147   : > { %v8060_v29 = vadd.f32 %v673_v52, %v7877_v5  ;;  %v11278_v27 = vmax.f32 %v8054_v14, 0.0 }
 0x148   : > { %v677_v53 = vpop.f32.mrf.mxu0 }
 0x149   : > { %v11274_v41 = vmax.f32 %v8060_v29, 0.0  ;;  %v834_v52 = vpack.c.bf16 %v11278_v27, %v11277_v62  ;;  %v8081_v50 = vadd.f32 %v677_v53, %v7880_v8 }
 0x14a   : > { %v679_v34 = vpop.f32.mrf.mxu0 }
 0x14b   : > { %v835_v7 = vpack.c.bf16 %v11274_v41, %v11275_v28  ;;  %v8075_v32 = vadd.f32 %v679_v34, %v7877_v5  ;;  %v11285_v27 = vmax.f32 %v8081_v50, 0.0 }
 0x14c   : > { %v681_v18 = vpop.f32.mrf.mxu0 }
 0x14d   : > { %v8078_v46 = vadd.f32 %v681_v18, %v7880_v8  ;;  %1158 = vmatprep.mubr.bf16.mxu1 %v835_v7  ;;  %v11283_v62 = vmax.f32 %v8075_v32, 0.0 }
 0x14e   : > { %v683_v23 = vpop.f32.mrf.mxu0  ;;  %1159 = vmatmul.mubr.bf16.gmra.mxu1 %v834_v52 }
 0x14f   : > { %v8084_v41 = vadd.f32 %v683_v23, %v7877_v5  ;;  %v11286_v28 = vmax.f32 %v8078_v46, 0.0 }
 0x150   : > { %v687_v26 = vpop.f32.mrf.mxu0 }
 0x151   : > { %v11282_v34 = vmax.f32 %v8084_v41, 0.0  ;;  %v836_v23 = vpack.c.bf16 %v11286_v28, %v11285_v27  ;;  %v8105_v20 = vadd.f32 %v687_v26, %v7880_v8 }
 0x152   : > { %v689_v18 = vpop.f32.mrf.mxu0 }
 0x153   : > { %v837_v53 = vpack.c.bf16 %v11282_v34, %v11283_v62  ;;  %v8099_v52 = vadd.f32 %v689_v18, %v7877_v5  ;;  %v11293_v28 = vmax.f32 %v8105_v20, 0.0 }
 0x154   : > { %v691_v7 = vpop.f32.mrf.mxu0 }
 0x155   : > { %v8102_v16 = vadd.f32 %v691_v7, %v7880_v8  ;;  %1168 = vmatprep.mubr.bf16.mxu1 %v837_v53  ;;  %v11292_v27 = vmax.f32 %v8099_v52, 0.0 }
 0x156   : > { %v693_v58 = vpop.f32.mrf.mxu0  ;;  %1169 = vmatmul.mubr.bf16.gmra.mxu1 %v836_v23 }
 0x157   : > { %v8108_v34 = vadd.f32 %v693_v58, %v7877_v5  ;;  %v11294_v62 = vmax.f32 %v8102_v16, 0.0 }
 0x158   : > { %v697_v60 = vpop.f32.mrf.mxu0 }
 0x159   : > { %11715 = vst [vmem:[#allocation12_spill] sm:$0xff] %v8108_v34  ;;  %v11291_v18 = vmax.f32 %v8108_v34, 0.0  ;;  %v838_v58 = vpack.c.bf16 %v11294_v62, %v11293_v28  ;;  %v8129_v57 = vadd.f32 %v697_v60, %v7880_v8 }
 0x15a   : > { %v699_v7 = vpop.f32.mrf.mxu0 }
 0x15b   : > { %v839_v26 = vpack.c.bf16 %v11291_v18, %v11292_v27  ;;  %v8123_v23 = vadd.f32 %v699_v7, %v7877_v5  ;;  %11718 = vst [vmem:[#allocation15_spill] sm:$0xff] %v8129_v57  ;;  %v7123_v27 = vld [vmem:[#allocation7 + $0x80] ss:$8 sps:$4 sm:$0xff]  }
 0x15c   : > { %v701_v53 = vpop.f32.mrf.mxu0  ;;  %1580 = vmatpush2.bf16.msra.mxu0 %v7123_v27 }
 0x15d   : > { %11716 = vst [vmem:[#allocation13_spill] sm:$0xff] %v8123_v23  ;;  %v8126_v55 = vadd.f32 %v701_v53, %v7880_v8  ;;  %1178 = vmatprep.mubr.bf16.mxu1 %v839_v26  ;;  %v11299_v7 = vmax.f32 %v8123_v23, 0.0  ;;  %v11301_v26 = vmax.f32 %v8129_v57, 0.0 }
 0x15e   : > { %v703_v40 = vpop.f32.mrf.mxu0  ;;  %1179 = vmatmul.mubr.bf16.gmra.mxu1 %v838_v58 }
 0x15f   : > { %11717 = vst [vmem:[#allocation14_spill] sm:$0xff] %v8126_v55  ;;  %v8132_v18 = vadd.f32 %v703_v40, %v7877_v5  ;;  %v11302_v28 = vmax.f32 %v8126_v55, 0.0 }
 0x160   : > { %v707_v62 = vpop.f32.mrf.mxu0 }
 0x161   : > { %11719 = vst [vmem:[#allocation16_spill] sm:$0xff] %v8132_v18  ;;  %v11298_v53 = vmax.f32 %v8132_v18, 0.0  ;;  %v840_v40 = vpack.c.bf16 %v11302_v28, %v11301_v26  ;;  %v8153_v27 = vadd.f32 %v707_v62, %v7880_v8 }
 0x162   : > { %v709_v60 = vpop.f32.mrf.mxu0 }
 0x163   : > { %v841_v58 = vpack.c.bf16 %v11298_v53, %v11299_v7  ;;  %v8147_v42 = vadd.f32 %v709_v60, %v7877_v5  ;;  %11722 = vst [vmem:[#allocation19_spill] sm:$0xff] %v8153_v27  ;;  %v11309_v28 = vmax.f32 %v8153_v27, 0.0 }
 0x164   : > { %v711_v37 = vpop.f32.mrf.mxu0 }
 0x165   : > { %11720 = vst [vmem:[#allocation17_spill] sm:$0xff] %v8147_v42  ;;  %v8150_v39 = vadd.f32 %v711_v37, %v7880_v8  ;;  %1188 = vmatprep.mubr.bf16.mxu1 %v841_v58  ;;  %v11307_v26 = vmax.f32 %v8147_v42, 0.0 }
 0x166   : > { %v713_v22 = vpop.f32.mrf.mxu0  ;;  %1189 = vmatmul.mubr.bf16.gmra.mxu1 %v840_v40 }
 0x167   : > { %11721 = vst [vmem:[#allocation18_spill] sm:$0xff] %v8150_v39  ;;  %v8156_v53 = vadd.f32 %v713_v22, %v7877_v5  ;;  %v11310_v7 = vmax.f32 %v8150_v39, 0.0 }
 0x168   : > { %v717_v24 = vpop.f32.mrf.mxu0 }
 0x169   : > { %11723 = vst [vmem:[#allocation20_spill] sm:$0xff] %v8156_v53  ;;  %v11306_v60 = vmax.f32 %v8156_v53, 0.0  ;;  %v842_v22 = vpack.c.bf16 %v11310_v7, %v11309_v28  ;;  %v8177_v21 = vadd.f32 %v717_v24, %v7880_v8 }
 0x16a   : > { %v719_v37 = vpop.f32.mrf.mxu0 }
 0x16b   : > { %v843_v62 = vpack.c.bf16 %v11306_v60, %v11307_v26  ;;  %v8171_v40 = vadd.f32 %v719_v37, %v7877_v5  ;;  %11726 = vst [vmem:[#allocation23_spill] sm:$0xff] %v8177_v21  ;;  %v11317_v7 = vmax.f32 %v8177_v21, 0.0 }
 0x16c   : > { %v721_v58 = vpop.f32.mrf.mxu0 }
 0x16d   : > { %11724 = vst [vmem:[#allocation21_spill] sm:$0xff] %v8171_v40  ;;  %v8174_v19 = vadd.f32 %v721_v58, %v7880_v8  ;;  %1198 = vmatprep.mubr.bf16.mxu1 %v843_v62  ;;  %v11315_v28 = vmax.f32 %v8171_v40, 0.0 }
 0x16e   : > { %v723_v42 = vpop.f32.mrf.mxu0  ;;  %1199 = vmatmul.mubr.bf16.gmra.mxu1 %v842_v22 }
 0x16f   : > { %11725 = vst [vmem:[#allocation22_spill] sm:$0xff] %v8174_v19  ;;  %v8180_v60 = vadd.f32 %v723_v42, %v7877_v5  ;;  %v11318_v26 = vmax.f32 %v8174_v19, 0.0 }
 0x170   : > { %v727_v53 = vpop.f32.mrf.mxu0 }
 0x171   : > { %11727 = vst [vmem:[#allocation24_spill] sm:$0xff] %v8180_v60  ;;  %v11314_v37 = vmax.f32 %v8180_v60, 0.0  ;;  %v844_v42 = vpack.c.bf16 %v11318_v26, %v11317_v7  ;;  %v8201_v39 = vadd.f32 %v727_v53, %v7880_v8 }
 0x172   : > { %v729_v58 = vpop.f32.mrf.mxu0 }
 0x173   : > { %v845_v24 = vpack.c.bf16 %v11314_v37, %v11315_v28  ;;  %v8195_v22 = vadd.f32 %v729_v58, %v7877_v5  ;;  %11730 = vst [vmem:[#allocation27_spill] sm:$0xff] %v8201_v39  ;;  %v11325_v26 = vmax.f32 %v8201_v39, 0.0 }
 0x174   : > { %v731_v62 = vpop.f32.mrf.mxu0 }
 0x175   : > { %11728 = vst [vmem:[#allocation25_spill] sm:$0xff] %v8195_v22  ;;  %v8198_v27 = vadd.f32 %v731_v62, %v7880_v8  ;;  %1208 = vmatprep.mubr.bf16.mxu1 %v845_v24  ;;  %v11323_v7 = vmax.f32 %v8195_v22, 0.0 }
 0x176   : > { %v733_v40 = vpop.f32.mrf.mxu0  ;;  %1209 = vmatmul.mubr.bf16.gmra.mxu1 %v844_v42 }
 0x177   : > { %11729 = vst [vmem:[#allocation26_spill] sm:$0xff] %v8198_v27  ;;  %v8204_v37 = vadd.f32 %v733_v40, %v7877_v5  ;;  %v11326_v28 = vmax.f32 %v8198_v27, 0.0 }
 0x178   : > { %v737_v60 = vpop.f32.mrf.mxu0 }
 0x179   : > { %11731 = vst [vmem:[#allocation28_spill] sm:$0xff] %v8204_v37  ;;  %v11322_v58 = vmax.f32 %v8204_v37, 0.0  ;;  %v846_v40 = vpack.c.bf16 %v11326_v28, %v11325_v26  ;;  %v8225_v19 = vadd.f32 %v737_v60, %v7880_v8 }
 0x17a   : > { %v739_v62 = vpop.f32.mrf.mxu0 }
 0x17b   : > { %v847_v53 = vpack.c.bf16 %v11322_v58, %v11323_v7  ;;  %v8219_v42 = vadd.f32 %v739_v62, %v7877_v5  ;;  %11734 = vst [vmem:[#allocation31_spill] sm:$0xff] %v8225_v19  ;;  %v11332_v28 = vmax.f32 %v8225_v19, 0.0 }
 0x17c   : > { %v741_v24 = vpop.f32.mrf.mxu0 }
 0x17d   : > { %11732 = vst [vmem:[#allocation29_spill] sm:$0xff] %v8219_v42  ;;  %v8222_v21 = vadd.f32 %v741_v24, %v7880_v8  ;;  %1218 = vmatprep.mubr.bf16.mxu1 %v847_v53  ;;  %v11331_v26 = vmax.f32 %v8219_v42, 0.0 }
 0x17e   : > { %v743_v22 = vpop.f32.mrf.mxu0  ;;  %1219 = vmatmul.mubr.bf16.gmra.mxu1 %v846_v40 }
 0x17f   : > { %11733 = vst [vmem:[#allocation30_spill] sm:$0xff] %v8222_v21  ;;  %v8228_v58 = vadd.f32 %v743_v22, %v7877_v5  ;;  %v11333_v7 = vmax.f32 %v8222_v21, 0.0  ;;  %v7144_v21 = vld [vmem:[#allocation5 + $0x110] ss:$8 sps:$4 sm:$0xff]  }
 0x180   : > { %v747_v37 = vpop.f32.mrf.mxu0 }
 0x181   : > { %11735 = vst [vmem:[#allocation32_spill] sm:$0xff] %v8228_v58  ;;  %v11330_v62 = vmax.f32 %v8228_v58, 0.0  ;;  %v848_v22 = vpack.c.bf16 %v11333_v7, %v11332_v28  ;;  %v8249_v27 = vadd.f32 %v747_v37, %v7880_v8  ;;  %v7128_v37 = vld [vmem:[#allocation5 + $0x174] ss:$8 sps:$4 sm:$0xff]  }
 0x182   : > { %v749_v24 = vpop.f32.mrf.mxu0  ;;  %2108 = vmatprep.subr.bf16.mxu1 %v7128_v37 }
 0x183   : > { %v849_v60 = vpack.c.bf16 %v11330_v62, %v11331_v26  ;;  %v8243_v40 = vadd.f32 %v749_v24, %v7877_v5  ;;  %11738 = vst [vmem:[#allocation35_spill] sm:$0xff] %v8249_v27  ;;  %v11337_v24 = vmax.f32 %v8249_v27, 0.0 }
 0x184   : > { %v751_v53 = vpop.f32.mrf.mxu0 }
 0x185   : > { %11736 = vst [vmem:[#allocation33_spill] sm:$0xff] %v8243_v40  ;;  %v8246_v39 = vadd.f32 %v751_v53, %v7880_v8  ;;  %1228 = vmatprep.mubr.bf16.mxu1 %v849_v60  ;;  %v11336_v28 = vmax.f32 %v8243_v40, 0.0  ;;  %v7132_v53 = vld [vmem:[#allocation5 + $0x150] ss:$8 sps:$4 sm:$0xff]   ;;  %v7134_v40 = vld [vmem:[#allocation5 + $0x154] ss:$8 sps:$4 sm:$0xff]  }
 0x186   : > { %v753_v42 = vpop.f32.mrf.mxu0  ;;  %1229 = vmatmul.mubr.bf16.gmra.mxu1 %v848_v22  ;;  %v7131_v22 = vld [vmem:[#allocation5 + $0x164] ss:$8 sps:$4 sm:$0xff]  }
 0x187   : > { %11737 = vst [vmem:[#allocation34_spill] sm:$0xff] %v8246_v39  ;;  %v8252_v62 = vadd.f32 %v753_v42, %v7877_v5  ;;  %v11338_v26 = vmax.f32 %v8246_v39, 0.0  ;;  %v7126_v5 = vld [vmem:[#allocation5 + $0x170] ss:$8 sps:$4 sm:$0xff]   ;;  %v7129_v42 = vld [vmem:[#allocation5 + $0x160] ss:$8 sps:$4 sm:$0xff]  }
 0x188   : > { %2109 = vmatpush1.bf16.msra.mxu1 %v7126_v5  ;;  %v7138_v5 = vld [vmem:[#allocation5 + $0x130] ss:$8 sps:$4 sm:$0xff]   ;;  %v7146_v39 = vld [vmem:[#allocation5 + $0x114] ss:$8 sps:$4 sm:$0xff]  }
 0x189   : > { %11739 = vst [vmem:[#allocation36_spill] sm:$0xff] %v8252_v62  ;;  %v11335_v7 = vmax.f32 %v8252_v62, 0.0  ;;  %v850_v8 = vpack.c.bf16 %v11338_v26, %v11337_v24  ;;  %2110 = vmatprep.subr.bf16.mxu1 %v7131_v22  ;;  %v7140_v24 = vld [vmem:[#allocation5 + $0x134] ss:$8 sps:$4 sm:$0xff]   ;;  %v7143_v26 = vld [vmem:[#allocation5 + $0x124] ss:$8 sps:$4 sm:$0xff]  }
 0x18b   : > { %v851_v60 = vpack.c.bf16 %v11335_v7, %v11336_v28  ;;  %v7135_v7 = vld [vmem:[#allocation5 + $0x140] ss:$8 sps:$4 sm:$0xff]   ;;  %v7137_v28 = vld [vmem:[#allocation5 + $0x144] ss:$8 sps:$4 sm:$0xff]  }
 0x18c   : > { %2111 = vmatpush1.bf16.msra.mxu1 %v7129_v42 }
 0x18d   : > { %1238 = vmatprep.mubr.bf16.mxu1 %v851_v60  ;;  %2112 = vmatprep.subr.bf16.mxu1 %v7134_v40  ;;  %v884_v60 = vld [vmem:[%s11253_s4] sm:$0x3] }
 0x18e   : > { %1239 = vmatmul.mubr.bf16.gmra.mxu1 %v850_v8  ;;  %v8270_v37 = vrot.slane %v884_v60, %v7872_v63  ;;  %v8273_v42 = vrot.slane %v884_v60, %v7874_v2 }
 0x190   : > { %2113 = vmatpush1.bf16.msra.mxu1 %v7132_v53  ;;  %v7141_v53 = vld [vmem:[#allocation5 + $0x120] ss:$8 sps:$4 sm:$0xff]  }
 0x191   : > { %2114 = vmatprep.subr.bf16.mxu1 %v7137_v28 }
 0x194   : > { %2115 = vmatpush1.bf16.msra.mxu1 %v7135_v7 }
 0x195   : > { %2116 = vmatprep.subr.bf16.mxu1 %v7140_v24 }
 0x198   : > { %2117 = vmatpush1.bf16.msra.mxu1 %v7138_v5  ;;  %v7149_v5 = vld [vmem:[#allocation5 + $0x104] ss:$8 sps:$4 sm:$0xff]  }
 0x199   : > { %2118 = vmatprep.subr.bf16.mxu1 %v7143_v26  ;;  %v7152_v26 = vld [vmem:[#allocation5 + $0x1f4] ss:$8 sps:$4 sm:$0xff]  }
 0x19c   : > { %2119 = vmatpush1.bf16.msra.mxu1 %v7141_v53  ;;  %v7155_v53 = vld [vmem:[#allocation5 + $0x1e4] ss:$8 sps:$4 sm:$0xff]  }
 0x19d   : > { %2120 = vmatprep.subr.bf16.mxu1 %v7146_v39 }
 0x1a0   : > { %2121 = vmatpush1.bf16.msra.mxu1 %v7144_v21 }
 0x1a1   : > { %2122 = vmatprep.subr.bf16.mxu1 %v7149_v5 }
 0x1d6   : > { %v1090_v8 = vpop.f32.mrf.mxu1 }
 0x1d7   : > { %v1091_v62 = vadd.f32 %v1090_v8, %v8273_v42  ;;  %v7147_v8 = vld [vmem:[#allocation5 + $0x100] ss:$8 sps:$4 sm:$0xff]  }
 0x1d8   : > { %v1092_v22 = vpop.f32.mrf.mxu1  ;;  %2123 = vmatpush1.bf16.msra.mxu1 %v7147_v8 }
 0x1d9   : > { %v1093_v28 = vadd.f32 %v1092_v22, %v8270_v37  ;;  %v1249_v22 = vmax.f32 %v1091_v62, 0.0  ;;  %2124 = vmatprep.subr.bf16.mxu1 %v7152_v26 }
 0x1da   : > { %v1094_v40 = vpop.f32.mrf.mxu1 }
 0x1db   : > { %v1095_v7 = vadd.f32 %v1094_v40, %v8273_v42  ;;  %v1250_v24 = vmax.f32 %v1093_v28, 0.0 }
 0x1dc   : > { %v1096_v27 = vpop.f32.mrf.mxu1 }
 0x1dd   : > { %v1097_v58 = vadd.f32 %v1096_v27, %v8270_v37  ;;  %v1251_v19 = vmax.f32 %v1095_v7, 0.0 }
 0x1de   : > { %v1100_v60 = vpop.f32.mrf.mxu1 }
 0x1df   : > { %v1252_v18 = vmax.f32 %v1097_v58, 0.0  ;;  %v1313_v55 = vpack.c.bf16 %v1251_v19, %v1249_v22  ;;  %v1101_v7 = vadd.f32 %v1100_v60, %v8273_v42  ;;  %v7150_v19 = vld [vmem:[#allocation5 + $0x1f0] ss:$8 sps:$4 sm:$0xff]  }
 0x1e0   : > { %v1102_v57 = vpop.f32.mrf.mxu1  ;;  %2125 = vmatpush2.bf16.msra.mxu1 %v7150_v19 }
 0x1e1   : > { %v1314_v40 = vpack.c.bf16 %v1252_v18, %v1250_v24  ;;  %v1103_v34 = vadd.f32 %v1102_v57, %v8270_v37  ;;  %v1253_v57 = vmax.f32 %v1101_v7, 0.0  ;;  %2126 = vmatprep.subr.bf16.mxu1 %v7155_v53 }
 0x1e2   : > { %v1104_v23 = vpop.f32.mrf.mxu1 }
 0x1e3   : > { %v1105_v27 = vadd.f32 %v1104_v23, %v8273_v42  ;;  %1581 = vmatprep.mubr.bf16.mxu0 %v1314_v40  ;;  %v1254_v18 = vmax.f32 %v1103_v34, 0.0  ;;  %v7153_v40 = vld [vmem:[#allocation5 + $0x1e0] ss:$8 sps:$4 sm:$0xff]  }
 0x1e4   : > { %v1106_v28 = vpop.f32.mrf.mxu1  ;;  %1582 = vmatmul.mubr.bf16.vlgmr.msra.gmra.mxu0 %v1313_v55  ;;  %2127 = vmatpush2.bf16.msra.mxu1 %v7153_v40 }
 0x1e5   : > { %v1107_v39 = vadd.f32 %v1106_v28, %v8270_v37  ;;  %v1255_v58 = vmax.f32 %v1105_v27, 0.0  ;;  %v7158_v27 = vld [vmem:[#allocation5 + $0x1d4] ss:$8 sps:$4 sm:$0xff]  }
 0x1e6   : > { %v1110_v62 = vpop.f32.mrf.mxu1  ;;  %2128 = vmatprep.subr.bf16.mxu1 %v7158_v27 }
 0x1e7   : > { %v1256_v21 = vmax.f32 %v1107_v39, 0.0  ;;  %v1315_v22 = vpack.c.bf16 %v1255_v58, %v1253_v57  ;;  %v1111_v8 = vadd.f32 %v1110_v62, %v8273_v42  ;;  %v7156_v39 = vld [vmem:[#allocation5 + $0x1d0] ss:$8 sps:$4 sm:$0xff]  }
 0x1e8   : > { %v1112_v24 = vpop.f32.mrf.mxu1  ;;  %2129 = vmatpush2.bf16.msra.mxu1 %v7156_v39 }
 0x1e9   : > { %v1316_v23 = vpack.c.bf16 %v1256_v21, %v1254_v18  ;;  %v1113_v60 = vadd.f32 %v1112_v24, %v8270_v37  ;;  %v7161_v18 = vld [vmem:[#allocation5 + $0x1c4] ss:$8 sps:$4 sm:$0xff]   ;;  %v1257_v21 = vmax.f32 %v1111_v8, 0.0 }
 0x1ea   : > { %v1114_v5 = vpop.f32.mrf.mxu1  ;;  %2130 = vmatprep.subr.bf16.mxu1 %v7161_v18 }
 0x1eb   : > { %v1115_v55 = vadd.f32 %v1114_v5, %v8273_v42  ;;  %1591 = vmatprep.mubr.bf16.mxu0 %v1316_v23  ;;  %v1258_v58 = vmax.f32 %v1113_v60, 0.0  ;;  %v7159_v5 = vld [vmem:[#allocation5 + $0x1c0] ss:$8 sps:$4 sm:$0xff]  }
 0x1ec   : > { %v1116_v34 = vpop.f32.mrf.mxu1  ;;  %1592 = vmatmul.mubr.bf16.gmra.mxu0 %v1315_v22  ;;  %2131 = vmatpush2.bf16.msra.mxu1 %v7159_v5 }
 0x1ed   : > { %v1117_v26 = vadd.f32 %v1116_v34, %v8270_v37  ;;  %v1259_v7 = vmax.f32 %v1115_v55, 0.0  ;;  %v7164_v55 = vld [vmem:[#allocation5 + $0x1b4] ss:$8 sps:$4 sm:$0xff]  }
 0x1ee   : > { %v1120_v28 = vpop.f32.mrf.mxu1  ;;  %2132 = vmatprep.subr.bf16.mxu1 %v7164_v55 }
 0x1ef   : > { %v1260_v19 = vmax.f32 %v1117_v26, 0.0  ;;  %v1317_v23 = vpack.c.bf16 %v1259_v7, %v1257_v21  ;;  %v1121_v40 = vadd.f32 %v1120_v28, %v8273_v42  ;;  %v7162_v26 = vld [vmem:[#allocation5 + $0x1b0] ss:$8 sps:$4 sm:$0xff]  }
 0x1f0   : > { %v1122_v57 = vpop.f32.mrf.mxu1  ;;  %2133 = vmatpush2.bf16.msra.mxu1 %v7162_v26 }
 0x1f1   : > { %v1318_v24 = vpack.c.bf16 %v1260_v19, %v1258_v58  ;;  %v1123_v62 = vadd.f32 %v1122_v57, %v8270_v37  ;;  %v7167_v58 = vld [vmem:[#allocation5 + $0x1a4] ss:$8 sps:$4 sm:$0xff]   ;;  %v1261_v19 = vmax.f32 %v1121_v40, 0.0 }
 0x1f2   : > { %v1124_v53 = vpop.f32.mrf.mxu1  ;;  %2134 = vmatprep.subr.bf16.mxu1 %v7167_v58 }
 0x1f3   : > { %v1125_v22 = vadd.f32 %v1124_v53, %v8273_v42  ;;  %1601 = vmatprep.mubr.bf16.mxu0 %v1318_v24  ;;  %v1262_v7 = vmax.f32 %v1123_v62, 0.0  ;;  %v7165_v53 = vld [vmem:[#allocation5 + $0x1a0] ss:$8 sps:$4 sm:$0xff]  }
 0x1f4   : > { %v1126_v60 = vpop.f32.mrf.mxu1  ;;  %1602 = vmatmul.mubr.bf16.gmra.mxu0 %v1317_v23  ;;  %2135 = vmatpush2.bf16.msra.mxu1 %v7165_v53 }
 0x1f5   : > { %v1127_v27 = vadd.f32 %v1126_v60, %v8270_v37  ;;  %v1263_v8 = vmax.f32 %v1125_v22, 0.0  ;;  %v7170_v22 = vld [vmem:[#allocation5 + $0x194] ss:$8 sps:$4 sm:$0xff]  }
 0x1f6   : > { %v1130_v34 = vpop.f32.mrf.mxu1  ;;  %2136 = vmatprep.subr.bf16.mxu1 %v7170_v22 }
 0x1f7   : > { %v1264_v39 = vmax.f32 %v1127_v27, 0.0  ;;  %v1319_v24 = vpack.c.bf16 %v1263_v8, %v1261_v19  ;;  %v1131_v5 = vadd.f32 %v1130_v34, %v8273_v42  ;;  %v7168_v27 = vld [vmem:[#allocation5 + $0x190] ss:$8 sps:$4 sm:$0xff]  }
 0x1f8   : > { %v1132_v21 = vpop.f32.mrf.mxu1  ;;  %2137 = vmatpush2.bf16.msra.mxu1 %v7168_v27 }
 0x1f9   : > { %v1320_v57 = vpack.c.bf16 %v1264_v39, %v1262_v7  ;;  %v1133_v28 = vadd.f32 %v1132_v21, %v8270_v37  ;;  %v1265_v7 = vmax.f32 %v1131_v5, 0.0 }
 0x1fa   : > { %v1134_v18 = vpop.f32.mrf.mxu1 }
 0x1fb   : > { %v1135_v23 = vadd.f32 %v1134_v18, %v8273_v42  ;;  %1611 = vmatprep.mubr.bf16.mxu0 %v1320_v57  ;;  %v1266_v8 = vmax.f32 %v1133_v28, 0.0 }
 0x1fc   : > { %v1136_v62 = vpop.f32.mrf.mxu1  ;;  %1612 = vmatmul.mubr.bf16.gmra.mxu0 %v1319_v24 }
 0x1fd   : > { %v1137_v55 = vadd.f32 %v1136_v62, %v8270_v37  ;;  %v1267_v40 = vmax.f32 %v1135_v23, 0.0 }
 0x1fe   : > { %v1140_v60 = vpop.f32.mrf.mxu1 }
 0x1ff   : > { %v1268_v26 = vmax.f32 %v1137_v55, 0.0  ;;  %v1321_v21 = vpack.c.bf16 %v1267_v40, %v1265_v7  ;;  %v1141_v24 = vadd.f32 %v1140_v60, %v8273_v42 }
 0x200   : > { %v1142_v39 = vpop.f32.mrf.mxu1 }
 0x201   : > { %v1322_v19 = vpack.c.bf16 %v1268_v26, %v1266_v8  ;;  %v1143_v58 = vadd.f32 %v1142_v39, %v8270_v37  ;;  %v1269_v62 = vmax.f32 %v1141_v24, 0.0 }
 0x202   : > { %v1144_v57 = vpop.f32.mrf.mxu1 }
 0x203   : > { %v1145_v34 = vadd.f32 %v1144_v57, %v8273_v42  ;;  %1621 = vmatprep.mubr.bf16.mxu0 %v1322_v19  ;;  %v1270_v22 = vmax.f32 %v1143_v58, 0.0 }
 0x204   : > { %v1146_v18 = vpop.f32.mrf.mxu1  ;;  %1622 = vmatmul.mubr.bf16.gmra.mxu0 %v1321_v21 }
 0x205   : > { %v1147_v53 = vadd.f32 %v1146_v18, %v8270_v37  ;;  %v1271_v28 = vmax.f32 %v1145_v34, 0.0 }
 0x206   : > { %v1150_v23 = vpop.f32.mrf.mxu1 }
 0x207   : > { %v1272_v5 = vmax.f32 %v1147_v53, 0.0  ;;  %v1323_v8 = vpack.c.bf16 %v1271_v28, %v1269_v62  ;;  %v1151_v60 = vadd.f32 %v1150_v23, %v8273_v42 }
 0x208   : > { %v1152_v55 = vpop.f32.mrf.mxu1 }
 0x209   : > { %v1324_v40 = vpack.c.bf16 %v1272_v5, %v1270_v22  ;;  %v1153_v26 = vadd.f32 %v1152_v55, %v8270_v37  ;;  %v1273_v24 = vmax.f32 %v1151_v60, 0.0 }
 0x20a   : > { %v1154_v27 = vpop.f32.mrf.mxu1 }
 0x20b   : > { %v1155_v7 = vadd.f32 %v1154_v27, %v8273_v42  ;;  %1631 = vmatprep.mubr.bf16.mxu0 %v1324_v40  ;;  %v1274_v58 = vmax.f32 %v1153_v26, 0.0 }
 0x20c   : > { %v1156_v39 = vpop.f32.mrf.mxu1  ;;  %1632 = vmatmul.mubr.bf16.gmra.mxu0 %v1323_v8 }
 0x20d   : > { %v1157_v19 = vadd.f32 %v1156_v39, %v8270_v37  ;;  %v1275_v21 = vmax.f32 %v1155_v7, 0.0 }
 0x20e   : > { %v1160_v57 = vpop.f32.mrf.mxu1 }
 0x20f   : > { %v1276_v34 = vmax.f32 %v1157_v19, 0.0  ;;  %v1325_v28 = vpack.c.bf16 %v1275_v21, %v1273_v24  ;;  %v1161_v23 = vadd.f32 %v1160_v57, %v8273_v42 }
 0x210   : > { %v1162_v18 = vpop.f32.mrf.mxu1 }
 0x211   : > { %v1326_v53 = vpack.c.bf16 %v1276_v34, %v1274_v58  ;;  %v1163_v5 = vadd.f32 %v1162_v18, %v8270_v37  ;;  %v1277_v60 = vmax.f32 %v1161_v23, 0.0 }
 0x212   : > { %v1164_v22 = vpop.f32.mrf.mxu1 }
 0x213   : > { %v1165_v62 = vadd.f32 %v1164_v22, %v8273_v42  ;;  %1641 = vmatprep.mubr.bf16.mxu0 %v1326_v53  ;;  %v1278_v26 = vmax.f32 %v1163_v5, 0.0 }
 0x214   : > { %v1166_v55 = vpop.f32.mrf.mxu1  ;;  %1642 = vmatmul.mubr.bf16.gmra.mxu0 %v1325_v28 }
 0x215   : > { %v1167_v40 = vadd.f32 %v1166_v55, %v8270_v37  ;;  %v1279_v8 = vmax.f32 %v1165_v62, 0.0 }
 0x216   : > { %v1170_v27 = vpop.f32.mrf.mxu1 }
 0x217   : > { %v1280_v7 = vmax.f32 %v1167_v40, 0.0  ;;  %v1327_v21 = vpack.c.bf16 %v1279_v8, %v1277_v60  ;;  %v1171_v57 = vadd.f32 %v1170_v27, %v8273_v42 }
 0x218   : > { %v1172_v39 = vpop.f32.mrf.mxu1 }
 0x219   : > { %v1328_v19 = vpack.c.bf16 %v1280_v7, %v1278_v26  ;;  %v1173_v34 = vadd.f32 %v1172_v39, %v8270_v37  ;;  %v1281_v23 = vmax.f32 %v1171_v57, 0.0 }
 0x21a   : > { %v1174_v58 = vpop.f32.mrf.mxu1 }
 0x21b   : > { %v1175_v24 = vadd.f32 %v1174_v58, %v8273_v42  ;;  %1651 = vmatprep.mubr.bf16.mxu0 %v1328_v19  ;;  %v1282_v5 = vmax.f32 %v1173_v34, 0.0 }
 0x21c   : > { %v1176_v18 = vpop.f32.mrf.mxu1  ;;  %1652 = vmatmul.mubr.bf16.gmra.mxu0 %v1327_v21 }
 0x21d   : > { %v1177_v53 = vadd.f32 %v1176_v18, %v8270_v37  ;;  %v1283_v28 = vmax.f32 %v1175_v24, 0.0 }
 0x21e   : > { %v1180_v22 = vpop.f32.mrf.mxu1 }
 0x21f   : > { %v1284_v62 = vmax.f32 %v1177_v53, 0.0  ;;  %v1329_v8 = vpack.c.bf16 %v1283_v28, %v1281_v23  ;;  %v1181_v27 = vadd.f32 %v1180_v22, %v8273_v42 }
 0x220   : > { %v1182_v55 = vpop.f32.mrf.mxu1 }
 0x221   : > { %v1330_v40 = vpack.c.bf16 %v1284_v62, %v1282_v5  ;;  %v1183_v7 = vadd.f32 %v1182_v55, %v8270_v37  ;;  %v1285_v57 = vmax.f32 %v1181_v27, 0.0 }
 0x222   : > { %v1184_v26 = vpop.f32.mrf.mxu1 }
 0x223   : > { %v1185_v60 = vadd.f32 %v1184_v26, %v8273_v42  ;;  %1661 = vmatprep.mubr.bf16.mxu0 %v1330_v40  ;;  %v1286_v34 = vmax.f32 %v1183_v7, 0.0  ;;  %v7173_v7 = vld [vmem:[#allocation5 + $0x184] ss:$8 sps:$4 sm:$0xff]  }
 0x224   : > { %v1186_v39 = vpop.f32.mrf.mxu1  ;;  %1662 = vmatmul.mubr.bf16.gmra.mxu0 %v1329_v8  ;;  %2138 = vmatprep.subr.bf16.mxu1 %v7173_v7 }
 0x225   : > { %v1187_v19 = vadd.f32 %v1186_v39, %v8270_v37  ;;  %v1287_v21 = vmax.f32 %v1185_v60, 0.0  ;;  %v7171_v39 = vld [vmem:[#allocation5 + $0x180] ss:$8 sps:$4 sm:$0xff]  }
 0x226   : > { %v1190_v58 = vpop.f32.mrf.mxu1  ;;  %2139 = vmatpush2.bf16.msra.mxu1 %v7171_v39 }
 0x227   : > { %v1288_v24 = vmax.f32 %v1187_v19, 0.0  ;;  %v1331_v28 = vpack.c.bf16 %v1287_v21, %v1285_v57  ;;  %v1191_v22 = vadd.f32 %v1190_v58, %v8273_v42 }
 0x228   : > { %v1192_v18 = vpop.f32.mrf.mxu1 }
 0x229   : > { %v1332_v53 = vpack.c.bf16 %v1288_v24, %v1286_v34  ;;  %v1193_v62 = vadd.f32 %v1192_v18, %v8270_v37  ;;  %v1289_v19 = vmax.f32 %v1191_v22, 0.0 }
 0x22a   : > { %v1194_v5 = vpop.f32.mrf.mxu1 }
 0x22b   : > { %v1195_v23 = vadd.f32 %v1194_v5, %v8273_v42  ;;  %1671 = vmatprep.mubr.bf16.mxu0 %v1332_v53  ;;  %v1290_v60 = vmax.f32 %v1193_v62, 0.0 }
 0x22c   : > { %v1196_v55 = vpop.f32.mrf.mxu1  ;;  %1672 = vmatmul.mubr.bf16.gmra.mxu0 %v1331_v28 }
 0x22d   : > { %v1197_v40 = vadd.f32 %v1196_v55, %v8270_v37  ;;  %v1291_v8 = vmax.f32 %v1195_v23, 0.0 }
 0x22e   : > { %v1200_v26 = vpop.f32.mrf.mxu1 }
 0x22f   : > { %v1292_v27 = vmax.f32 %v1197_v40, 0.0  ;;  %v1333_v24 = vpack.c.bf16 %v1291_v8, %v1289_v19  ;;  %v1201_v53 = vadd.f32 %v1200_v26, %v8273_v42 }
 0x230   : > { %v1202_v21 = vpop.f32.mrf.mxu1 }
 0x231   : > { %v1334_v34 = vpack.c.bf16 %v1292_v27, %v1290_v60  ;;  %v1203_v18 = vadd.f32 %v1202_v21, %v8270_v37  ;;  %v1293_v40 = vmax.f32 %v1201_v53, 0.0 }
 0x232   : > { %v1204_v57 = vpop.f32.mrf.mxu1 }
 0x233   : > { %v1205_v58 = vadd.f32 %v1204_v57, %v8273_v42  ;;  %1681 = vmatprep.mubr.bf16.mxu0 %v1334_v34  ;;  %v1294_v22 = vmax.f32 %v1203_v18, 0.0 }
 0x234   : > { %v1206_v28 = vpop.f32.mrf.mxu1  ;;  %1682 = vmatmul.mubr.bf16.gmra.mxu0 %v1333_v24 }
 0x235   : > { %v1207_v5 = vadd.f32 %v1206_v28, %v8270_v37  ;;  %v1295_v62 = vmax.f32 %v1205_v58, 0.0 }
 0x236   : > { %v1210_v23 = vpop.f32.mrf.mxu1 }
 0x237   : > { %v1296_v55 = vmax.f32 %v1207_v5, 0.0  ;;  %v1335_v8 = vpack.c.bf16 %v1295_v62, %v1293_v40  ;;  %v1211_v26 = vadd.f32 %v1210_v23, %v8273_v42 }
 0x238   : > { %v1212_v7 = vpop.f32.mrf.mxu1 }
 0x239   : > { %v1336_v60 = vpack.c.bf16 %v1296_v55, %v1294_v22  ;;  %v1213_v39 = vadd.f32 %v1212_v7, %v8270_v37  ;;  %v1297_v53 = vmax.f32 %v1211_v26, 0.0 }
 0x23a   : > { %v1214_v27 = vpop.f32.mrf.mxu1 }
 0x23b   : > { %v1215_v19 = vadd.f32 %v1214_v27, %v8273_v42  ;;  %1691 = vmatprep.mubr.bf16.mxu0 %v1336_v60  ;;  %v1298_v18 = vmax.f32 %v1213_v39, 0.0 }
 0x23c   : > { %v1216_v21 = vpop.f32.mrf.mxu1  ;;  %1692 = vmatmul.mubr.bf16.gmra.mxu0 %v1335_v8 }
 0x23d   : > { %v1217_v34 = vadd.f32 %v1216_v21, %v8270_v37  ;;  %v1299_v24 = vmax.f32 %v1215_v19, 0.0 }
 0x23e   : > { %v1220_v57 = vpop.f32.mrf.mxu1 }
 0x23f   : > { %v1300_v58 = vmax.f32 %v1217_v34, 0.0  ;;  %v1337_v62 = vpack.c.bf16 %v1299_v24, %v1297_v53  ;;  %v1221_v23 = vadd.f32 %v1220_v57, %v8273_v42 }
 0x240   : > { %v1222_v28 = vpop.f32.mrf.mxu1 }
 0x241   : > { %v1338_v5 = vpack.c.bf16 %v1300_v58, %v1298_v18  ;;  %v1223_v55 = vadd.f32 %v1222_v28, %v8270_v37  ;;  %v1301_v26 = vmax.f32 %v1221_v23, 0.0 }
 0x242   : > { %v1224_v22 = vpop.f32.mrf.mxu1 }
 0x243   : > { %v1225_v40 = vadd.f32 %v1224_v22, %v8273_v42  ;;  %1701 = vmatprep.mubr.bf16.mxu0 %v1338_v5  ;;  %v1302_v39 = vmax.f32 %v1223_v55, 0.0 }
 0x244   : > { %v1226_v7 = vpop.f32.mrf.mxu1  ;;  %1702 = vmatmul.mubr.bf16.gmra.mxu0 %v1337_v62 }
 0x245   : > { %v1227_v60 = vadd.f32 %v1226_v7, %v8270_v37  ;;  %v1303_v8 = vmax.f32 %v1225_v40, 0.0 }
 0x246   : > { %v1230_v27 = vpop.f32.mrf.mxu1 }
 0x247   : > { %v1304_v19 = vmax.f32 %v1227_v60, 0.0  ;;  %v1339_v24 = vpack.c.bf16 %v1303_v8, %v1301_v26  ;;  %v1231_v57 = vadd.f32 %v1230_v27, %v8273_v42 }
 0x248   : > { %v1232_v21 = vpop.f32.mrf.mxu1 }
 0x249   : > { %v1340_v34 = vpack.c.bf16 %v1304_v19, %v1302_v39  ;;  %v1233_v58 = vadd.f32 %v1232_v21, %v8270_v37  ;;  %v1305_v23 = vmax.f32 %v1231_v57, 0.0 }
 0x24a   : > { %v1234_v18 = vpop.f32.mrf.mxu1 }
 0x24b   : > { %v1235_v53 = vadd.f32 %v1234_v18, %v8273_v42  ;;  %1711 = vmatprep.mubr.bf16.mxu0 %v1340_v34  ;;  %v1306_v55 = vmax.f32 %v1233_v58, 0.0 }
 0x24c   : > { %v1236_v28 = vpop.f32.mrf.mxu1  ;;  %1712 = vmatmul.mubr.bf16.gmra.mxu0 %v1339_v24 }
 0x24d   : > { %v1237_v5 = vadd.f32 %v1236_v28, %v8270_v37  ;;  %v1307_v62 = vmax.f32 %v1235_v53, 0.0 }
 0x24e   : > { %v1240_v22 = vpop.f32.mrf.mxu1 }
 0x24f   : > { %v1308_v40 = vmax.f32 %v1237_v5, 0.0  ;;  %v1341_v8 = vpack.c.bf16 %v1307_v62, %v1305_v23  ;;  %v1241_v27 = vadd.f32 %v1240_v22, %v8273_v42  ;;  %v7174_v5 = vld [vmem:[#allocation7 + $0x170] ss:$8 sps:$4 sm:$0xff]   ;;  %v7176_v62 = vld [vmem:[#allocation7 + $0x174] ss:$8 sps:$4 sm:$0xff]  }
 0x250   : > { %v1242_v7 = vpop.f32.mrf.mxu1  ;;  %2603 = vmatprep.subr.bf16.mxu0 %v7176_v62  ;;  %v7182_v22 = vld [vmem:[#allocation7 + $0x154] ss:$8 sps:$4 sm:$0xff]   ;;  %v7185_v23 = vld [vmem:[#allocation7 + $0x144] ss:$8 sps:$4 sm:$0xff]   ;;  %v11741_v62 = vmax.f32 %v7886_v12, 0.0 }
 0x251   : > { %v1342_v60 = vpack.c.bf16 %v1308_v40, %v1306_v55  ;;  %v1243_v19 = vadd.f32 %v1242_v7, %v8270_v37  ;;  %v1309_v53 = vmax.f32 %v1241_v27, 0.0  ;;  %2604 = vmatpush1.bf16.msra.mxu0 %v7174_v5  ;;  %v7177_v55 = vld [vmem:[#allocation7 + $0x160] ss:$8 sps:$4 sm:$0xff]   ;;  %v7179_v40 = vld [vmem:[#allocation7 + $0x164] ss:$8 sps:$4 sm:$0xff]  }
 0x252   : > { %v1244_v39 = vpop.f32.mrf.mxu1  ;;  %2605 = vmatprep.subr.bf16.mxu0 %v7179_v40  ;;  %v1377_v7 = vld [vmem:[%s11255_s6] sm:$0x3]  ;;  %v7186_v27 = vld [vmem:[#allocation7 + $0x130] ss:$8 sps:$4 sm:$0xff]  }
 0x253   : > { %v1245_v26 = vadd.f32 %v1244_v39, %v8273_v42  ;;  %1721 = vmatprep.mubr.bf16.mxu0 %v1342_v60  ;;  %v1310_v18 = vmax.f32 %v1243_v19, 0.0  ;;  %v7180_v42 = vld [vmem:[#allocation7 + $0x150] ss:$8 sps:$4 sm:$0xff]   ;;  %v8343_v60 = vrot.slane %v1377_v7, %v7872_v63 }
 0x254   : > { %v1246_v21 = vpop.f32.mrf.mxu1  ;;  %1722 = vmatmul.mubr.bf16.gmra.mxu0 %v1341_v8  ;;  %v8346_v8 = vrot.slane %v1377_v7, %v7874_v2  ;;  %v11743_v7 = vmax.f32 %v7892_v17, 0.0  ;;  %v7192_v12 = vld [vmem:[#allocation7 + $0x110] ss:$8 sps:$4 sm:$0xff]  }
 0x255   : > { %v1247_v34 = vadd.f32 %v1246_v21, %v8270_v37  ;;  %v1311_v24 = vmax.f32 %v1245_v26, 0.0  ;;  %2606 = vmatpush1.bf16.msra.mxu0 %v7177_v55  ;;  %v7183_v37 = vld [vmem:[#allocation7 + $0x140] ss:$8 sps:$4 sm:$0xff]   ;;  %v7188_v21 = vld [vmem:[#allocation7 + $0x134] ss:$8 sps:$4 sm:$0xff]  }
 0x256   : > { %2607 = vmatprep.subr.bf16.mxu0 %v7182_v22 }
 0x257   : > { %v1312_v58 = vmax.f32 %v1247_v34, 0.0  ;;  %v1343_v28 = vpack.c.bf16 %v1311_v24, %v1309_v53 }
 0x259   : > { %v1344_v57 = vpack.c.bf16 %v1312_v58, %v1310_v18  ;;  %2608 = vmatpush1.bf16.msra.mxu0 %v7180_v42  ;;  %v7191_v18 = vld [vmem:[#allocation7 + $0x124] ss:$8 sps:$4 sm:$0xff]   ;;  %v11742_v42 = vmax.f32 %v7889_v13, 0.0 }
 0x25a   : > { %2609 = vmatprep.subr.bf16.mxu0 %v7185_v23  ;;  %v7194_v23 = vld [vmem:[#allocation7 + $0x114] ss:$8 sps:$4 sm:$0xff]   ;;  %v7197_v13 = vld [vmem:[#allocation7 + $0x104] ss:$8 sps:$4 sm:$0xff]  }
 0x25b   : > { %1731 = vmatprep.mubr.bf16.mxu0 %v1344_v57  ;;  %v7189_v57 = vld [vmem:[#allocation7 + $0x120] ss:$8 sps:$4 sm:$0xff]  }
 0x25c   : > { %1732 = vmatmul.mubr.bf16.gmra.mxu0 %v1343_v28  ;;  %v11740_v28 = vmax.f32 %v7883_v11, 0.0 }
 0x25d   : > { %2610 = vmatpush1.bf16.msra.mxu0 %v7183_v37 }
 0x25e   : > { %2611 = vmatprep.subr.bf16.mxu0 %v7188_v21 }
 0x261   : > { %2612 = vmatpush1.bf16.msra.mxu0 %v7186_v27 }
 0x262   : > { %2613 = vmatprep.subr.bf16.mxu0 %v7191_v18 }
 0x265   : > { %2614 = vmatpush1.bf16.msra.mxu0 %v7189_v57 }
 0x266   : > { %2615 = vmatprep.subr.bf16.mxu0 %v7194_v23 }
 0x269   : > { %2616 = vmatpush1.bf16.msra.mxu0 %v7192_v12  ;;  %v11747_v12 = vmax.f32 %v7916_v36, 0.0 }
 0x26a   : > { %2617 = vmatprep.subr.bf16.mxu0 %v7197_v13 }
 0x2a4   : > { %v1583_v39 = vpop.f32.mrf.mxu0 }
 0x2a5   : > { %v1584_v34 = vadd.f32 %v1583_v39, %v8346_v8 }
 0x2a6   : > { %v1585_v19 = vpop.f32.mrf.mxu0 }
 0x2a7   : > { %v1586_v26 = vadd.f32 %v1585_v19, %v8343_v60  ;;  %v8362_v22 = vadd.f32 %v1584_v34, %v11742_v42  ;;  %v11745_v42 = vmax.f32 %v7910_v31, 0.0 }
 0x2a8   : > { %v1587_v24 = vpop.f32.mrf.mxu0 }
 0x2a9   : > { %v1588_v58 = vadd.f32 %v1587_v24, %v8346_v8  ;;  %v8353_v5 = vadd.f32 %v1586_v26, %v11740_v28  ;;  %v11353_v34 = vmax.f32 %v8362_v22, 0.0  ;;  %v7195_v28 = vld [vmem:[#allocation7 + $0x100] ss:$8 sps:$4 sm:$0xff]  }
 0x2aa   : > { %v1589_v53 = vpop.f32.mrf.mxu0  ;;  %2618 = vmatpush1.bf16.msra.mxu0 %v7195_v28 }
 0x2ab   : > { %v8357_v55 = vadd.f32 %v1588_v58, %v11741_v62  ;;  %v1590_v40 = vadd.f32 %v1589_v53, %v8343_v60  ;;  %v11387_v26 = vmax.f32 %v8353_v5, 0.0  ;;  %v11744_v62 = vmax.f32 %v7907_v30, 0.0 }
 0x2ac   : > { %v1593_v37 = vpop.f32.mrf.mxu0 }
 0x2ad   : > { %v8366_v39 = vadd.f32 %v1590_v40, %v11743_v7  ;;  %v11384_v11 = vmax.f32 %v8357_v55, 0.0  ;;  %v1594_v24 = vadd.f32 %v1593_v37, %v8346_v8  ;;  %v7200_v7 = vld [vmem:[#allocation7 + $0x1f4] ss:$8 sps:$4 sm:$0xff]  }
 0x2ae   : > { %v1595_v19 = vpop.f32.mrf.mxu0  ;;  %2619 = vmatprep.subr.bf16.mxu0 %v7200_v7  ;;  %v7201_v7 = vld [vmem:[#allocation7 + $0x1e0] ss:$8 sps:$4 sm:$0xff]  }
 0x2af   : > { %v11350_v27 = vmax.f32 %v8366_v39, 0.0  ;;  %v1596_v21 = vadd.f32 %v1595_v19, %v8343_v60  ;;  %v1870_v53 = vpack.c.bf16 %v11384_v11, %v11353_v34  ;;  %v11746_v19 = vmax.f32 %v7913_v33, 0.0  ;;  %v7203_v33 = vld [vmem:[#allocation7 + $0x1e4] ss:$8 sps:$4 sm:$0xff]  }
 0x2b0   : > { %v1597_v17 = vpop.f32.mrf.mxu0 }
 0x2b1   : > { %v1598_v18 = vadd.f32 %v1597_v17, %v8346_v8  ;;  %v1871_v58 = vpack.c.bf16 %v11350_v27, %v11387_v26  ;;  %v8385_v40 = vadd.f32 %v1596_v21, %v11744_v62  ;;  %v8394_v17 = vadd.f32 %v1594_v24, %v11746_v19  ;;  %v7221_v26 = vld [vmem:[#allocation7 + $0x184] ss:$8 sps:$4 sm:$0xff]  }
 0x2b2   : > { %v1599_v57 = vpop.f32.mrf.mxu0  ;;  %v11748_v19 = vmax.f32 %v7931_v48, 0.0 }
 0x2b3   : > { %v8389_v37 = vadd.f32 %v1598_v18, %v11745_v42  ;;  %v1600_v23 = vadd.f32 %v1599_v57, %v8343_v60  ;;  %2140 = vmatprep.mubr.bf16.mxu1 %v1871_v58  ;;  %v7198_v18 = vld [vmem:[#allocation7 + $0x1f0] ss:$8 sps:$4 sm:$0xff]   ;;  %v11352_v57 = vmax.f32 %v8385_v40, 0.0  ;;  %v11354_v24 = vmax.f32 %v8394_v17, 0.0 }
 0x2b4   : > { %v1603_v27 = vpop.f32.mrf.mxu0  ;;  %2141 = vmatmul.mubr.bf16.vlgmr.msra.gmra.mxu1 %v1870_v53  ;;  %2620 = vmatpush2.bf16.msra.mxu0 %v7198_v18  ;;  %v11751_v18 = vmax.f32 %v7940_v54, 0.0 }
 0x2b5   : > { %v8398_v30 = vadd.f32 %v1600_v23, %v11747_v12  ;;  %v11357_v21 = vmax.f32 %v8389_v37, 0.0  ;;  %v1604_v53 = vadd.f32 %v1603_v27, %v8346_v8  ;;  %v11749_v27 = vmax.f32 %v7934_v49, 0.0  ;;  %2621 = vmatprep.subr.bf16.mxu0 %v7203_v33 }
 0x2b6   : > { %v1605_v31 = vpop.f32.mrf.mxu0 }
 0x2b7   : > { %v11351_v13 = vmax.f32 %v8398_v30, 0.0  ;;  %v1606_v58 = vadd.f32 %v1605_v31, %v8343_v60  ;;  %v1872_v23 = vpack.c.bf16 %v11357_v21, %v11354_v24 }
 0x2b8   : > { %v1607_v36 = vpop.f32.mrf.mxu0  ;;  %2622 = vmatpush2.bf16.msra.mxu0 %v7201_v7 }
 0x2b9   : > { %v1608_v62 = vadd.f32 %v1607_v36, %v8346_v8  ;;  %v1873_v28 = vpack.c.bf16 %v11351_v13, %v11352_v57  ;;  %v8417_v12 = vadd.f32 %v1606_v58, %v11748_v19  ;;  %v7206_v13 = vld [vmem:[#allocation7 + $0x1d4] ss:$8 sps:$4 sm:$0xff]   ;;  %v11750_v57 = vmax.f32 %v7937_v51, 0.0  ;;  %v7209_v51 = vld [vmem:[#allocation7 + $0x1c4] ss:$8 sps:$4 sm:$0xff]  }
 0x2ba   : > { %v1609_v42 = vpop.f32.mrf.mxu0  ;;  %2623 = vmatprep.subr.bf16.mxu0 %v7206_v13  ;;  %v7207_v13 = vld [vmem:[#allocation7 + $0x1c0] ss:$8 sps:$4 sm:$0xff]  }
 0x2bb   : > { %v8421_v31 = vadd.f32 %v1608_v62, %v11749_v27  ;;  %v1610_v36 = vadd.f32 %v1609_v42, %v8343_v60  ;;  %2150 = vmatprep.mubr.bf16.mxu1 %v1873_v28  ;;  %v8426_v34 = vadd.f32 %v1604_v53, %v11750_v57  ;;  %v7204_v62 = vld [vmem:[#allocation7 + $0x1d0] ss:$8 sps:$4 sm:$0xff]   ;;  %v11356_v42 = vmax.f32 %v8417_v12, 0.0 }
 0x2bc   : > { %v1613_v24 = vpop.f32.mrf.mxu0  ;;  %2151 = vmatmul.mubr.bf16.gmra.mxu1 %v1872_v23  ;;  %2624 = vmatpush2.bf16.msra.mxu0 %v7204_v62  ;;  %v11755_v62 = vmax.f32 %v7964_v15, 0.0 }
 0x2bd   : > { %v8430_v48 = vadd.f32 %v1610_v36, %v11751_v18  ;;  %v11361_v58 = vmax.f32 %v8421_v31, 0.0  ;;  %v11358_v57 = vmax.f32 %v8426_v34, 0.0  ;;  %v1614_v53 = vadd.f32 %v1613_v24, %v8346_v8  ;;  %2625 = vmatprep.subr.bf16.mxu0 %v7209_v51 }
 0x2be   : > { %v1615_v49 = vpop.f32.mrf.mxu0  ;;  %v11752_v36 = vmax.f32 %v7955_v4, 0.0  ;;  %v11753_v24 = vmax.f32 %v7958_v6, 0.0 }
 0x2bf   : > { %v11355_v33 = vmax.f32 %v8430_v48, 0.0  ;;  %v1616_v28 = vadd.f32 %v1615_v49, %v8343_v60  ;;  %v1874_v27 = vpack.c.bf16 %v11361_v58, %v11358_v57 }
 0x2c0   : > { %v1617_v54 = vpop.f32.mrf.mxu0  ;;  %2626 = vmatpush2.bf16.msra.mxu0 %v7207_v13 }
 0x2c1   : > { %v1618_v23 = vadd.f32 %v1617_v54, %v8346_v8  ;;  %v1875_v7 = vpack.c.bf16 %v11355_v33, %v11356_v42  ;;  %v8449_v18 = vadd.f32 %v1616_v28, %v11752_v36  ;;  %v7212_v33 = vld [vmem:[#allocation7 + $0x1b4] ss:$8 sps:$4 sm:$0xff]   ;;  %v11754_v42 = vmax.f32 %v7961_v9, 0.0  ;;  %v7215_v9 = vld [vmem:[#allocation7 + $0x1a4] ss:$8 sps:$4 sm:$0xff]  }
 0x2c2   : > { %v1619_v19 = vpop.f32.mrf.mxu0  ;;  %2627 = vmatprep.subr.bf16.mxu0 %v7212_v33  ;;  %v7213_v33 = vld [vmem:[#allocation7 + $0x1a0] ss:$8 sps:$4 sm:$0xff]  }
 0x2c3   : > { %v8453_v49 = vadd.f32 %v1618_v23, %v11753_v24  ;;  %v1620_v54 = vadd.f32 %v1619_v19, %v8343_v60  ;;  %2160 = vmatprep.mubr.bf16.mxu1 %v1875_v7  ;;  %v8458_v21 = vadd.f32 %v1614_v53, %v11754_v42  ;;  %v7210_v23 = vld [vmem:[#allocation7 + $0x1b0] ss:$8 sps:$4 sm:$0xff]   ;;  %v11360_v19 = vmax.f32 %v8449_v18, 0.0 }
 0x2c4   : > { %v1623_v57 = vpop.f32.mrf.mxu0  ;;  %2161 = vmatmul.mubr.bf16.gmra.mxu1 %v1874_v27  ;;  %2628 = vmatpush2.bf16.msra.mxu0 %v7210_v23  ;;  %v11759_v23 = vmax.f32 %v7988_v45, 0.0 }
 0x2c5   : > { %v8462_v4 = vadd.f32 %v1620_v54, %v11755_v62  ;;  %v11383_v28 = vmax.f32 %v8453_v49, 0.0  ;;  %v11362_v42 = vmax.f32 %v8458_v21, 0.0  ;;  %v1624_v53 = vadd.f32 %v1623_v57, %v8346_v8  ;;  %2629 = vmatprep.subr.bf16.mxu0 %v7215_v9 }
 0x2c6   : > { %v1625_v6 = vpop.f32.mrf.mxu0  ;;  %v11756_v54 = vmax.f32 %v7979_v35, 0.0  ;;  %v11757_v57 = vmax.f32 %v7982_v38, 0.0 }
 0x2c7   : > { %v11359_v51 = vmax.f32 %v8462_v4, 0.0  ;;  %v1626_v7 = vadd.f32 %v1625_v6, %v8343_v60  ;;  %v1876_v24 = vpack.c.bf16 %v11383_v28, %v11362_v42  ;;  %v11788_v28 = vld [vmem:[#allocation15_spill] sm:$0xff] }
 0x2c8   : > { %v1627_v15 = vpop.f32.mrf.mxu0  ;;  %2630 = vmatpush2.bf16.msra.mxu0 %v7213_v33  ;;  %v11789_v11 = vmax.f32 %v11788_v28, 0.0 }
 0x2c9   : > { %v1628_v27 = vadd.f32 %v1627_v15, %v8346_v8  ;;  %v1877_v13 = vpack.c.bf16 %v11359_v51, %v11360_v19  ;;  %v8481_v62 = vadd.f32 %v1626_v7, %v11756_v54  ;;  %v7218_v51 = vld [vmem:[#allocation7 + $0x194] ss:$8 sps:$4 sm:$0xff]   ;;  %v11758_v19 = vmax.f32 %v7985_v43, 0.0 }
 0x2ca   : > { %v1629_v36 = vpop.f32.mrf.mxu0  ;;  %2631 = vmatprep.subr.bf16.mxu0 %v7218_v51  ;;  %v11760_v51 = vmax.f32 %v8003_v0, 0.0 }
 0x2cb   : > { %v8485_v6 = vadd.f32 %v1628_v27, %v11757_v57  ;;  %v1630_v15 = vadd.f32 %v1629_v36, %v8343_v60  ;;  %2170 = vmatprep.mubr.bf16.mxu1 %v1877_v13  ;;  %v8490_v58 = vadd.f32 %v1624_v53, %v11758_v19  ;;  %v7216_v27 = vld [vmem:[#allocation7 + $0x190] ss:$8 sps:$4 sm:$0xff]   ;;  %v11380_v36 = vmax.f32 %v8481_v62, 0.0 }
 0x2cc   : > { %v1633_v42 = vpop.f32.mrf.mxu0  ;;  %2171 = vmatmul.mubr.bf16.gmra.mxu1 %v1876_v24  ;;  %2632 = vmatpush2.bf16.msra.mxu0 %v7216_v27 }
 0x2cd   : > { %v8494_v35 = vadd.f32 %v1630_v15, %v11759_v23  ;;  %v11367_v7 = vmax.f32 %v8485_v6, 0.0  ;;  %v11364_v43 = vmax.f32 %v8490_v58, 0.0  ;;  %v1634_v19 = vadd.f32 %v1633_v42, %v8346_v8  ;;  %2633 = vmatprep.subr.bf16.mxu0 %v7221_v26 }
 0x2ce   : > { %v1635_v38 = vpop.f32.mrf.mxu0  ;;  %v11761_v42 = vmax.f32 %v8006_v1, 0.0 }
 0x2cf   : > { %v11363_v9 = vmax.f32 %v8494_v35, 0.0  ;;  %v1636_v13 = vadd.f32 %v1635_v38, %v8343_v60  ;;  %v1878_v54 = vpack.c.bf16 %v11367_v7, %v11364_v43  ;;  %v11762_v38 = vmax.f32 %v8009_v3, 0.0 }
 0x2d0   : > { %v1637_v53 = vpop.f32.mrf.mxu0  ;;  %v11763_v43 = vmax.f32 %v8012_v10, 0.0  ;;  %v11767_v7 = vmax.f32 %v8036_v61, 0.0 }
 0x2d1   : > { %v1638_v45 = vadd.f32 %v1637_v53, %v8346_v8  ;;  %v1879_v24 = vpack.c.bf16 %v11363_v9, %v11380_v36  ;;  %v8513_v57 = vadd.f32 %v1636_v13, %v11760_v51  ;;  %v8522_v53 = vadd.f32 %v1634_v19, %v11762_v38 }
 0x2d2   : > { %v1639_v33 = vpop.f32.mrf.mxu0 }
 0x2d3   : > { %v8517_v15 = vadd.f32 %v1638_v45, %v11761_v42  ;;  %v1640_v23 = vadd.f32 %v1639_v33, %v8343_v60  ;;  %2180 = vmatprep.mubr.bf16.mxu1 %v1879_v24  ;;  %v11366_v1 = vmax.f32 %v8513_v57, 0.0  ;;  %v11368_v24 = vmax.f32 %v8522_v53, 0.0 }
 0x2d4   : > { %v1643_v9 = vpop.f32.mrf.mxu0  ;;  %2181 = vmatmul.mubr.bf16.gmra.mxu1 %v1878_v54  ;;  %v11764_v42 = vmax.f32 %v8027_v44, 0.0 }
 0x2d5   : > { %v8526_v27 = vadd.f32 %v1640_v23, %v11763_v43  ;;  %v11371_v0 = vmax.f32 %v8517_v15, 0.0  ;;  %v1644_v3 = vadd.f32 %v1643_v9, %v8346_v8  ;;  %v11765_v9 = vmax.f32 %v8030_v47, 0.0 }
 0x2d6   : > { %v1645_v13 = vpop.f32.mrf.mxu0 }
 0x2d7   : > { %v11365_v45 = vmax.f32 %v8526_v27, 0.0  ;;  %v1646_v33 = vadd.f32 %v1645_v13, %v8343_v60  ;;  %v1880_v51 = vpack.c.bf16 %v11371_v0, %v11368_v24  ;;  %v11771_v0 = vmax.f32 %v8060_v29, 0.0 }
 0x2d8   : > { %v1647_v19 = vpop.f32.mrf.mxu0 }
 0x2d9   : > { %v1648_v54 = vadd.f32 %v1647_v19, %v8346_v8  ;;  %v1881_v10 = vpack.c.bf16 %v11365_v45, %v11366_v1  ;;  %v8545_v23 = vadd.f32 %v1646_v33, %v11764_v42  ;;  %v11766_v19 = vmax.f32 %v8033_v56, 0.0 }
 0x2da   : > { %v1649_v43 = vpop.f32.mrf.mxu0 }
 0x2db   : > { %v8549_v38 = vadd.f32 %v1648_v54, %v11765_v9  ;;  %v1650_v13 = vadd.f32 %v1649_v43, %v8343_v60  ;;  %2190 = vmatprep.mubr.bf16.mxu1 %v1881_v10  ;;  %v8554_v45 = vadd.f32 %v1644_v3, %v11766_v19  ;;  %v11370_v47 = vmax.f32 %v8545_v23, 0.0 }
 0x2dc   : > { %v1653_v1 = vpop.f32.mrf.mxu0  ;;  %2191 = vmatmul.mubr.bf16.gmra.mxu1 %v1880_v51  ;;  %v11768_v9 = vmax.f32 %v8051_v59, 0.0 }
 0x2dd   : > { %v8558_v24 = vadd.f32 %v1650_v13, %v11767_v7  ;;  %v11375_v44 = vmax.f32 %v8549_v38, 0.0  ;;  %v11372_v10 = vmax.f32 %v8554_v45, 0.0  ;;  %v1654_v56 = vadd.f32 %v1653_v1, %v8346_v8 }
 0x2de   : > { %v1655_v33 = vpop.f32.mrf.mxu0  ;;  %v11769_v1 = vmax.f32 %v8054_v14, 0.0 }
 0x2df   : > { %v11369_v54 = vmax.f32 %v8558_v24, 0.0  ;;  %v1656_v43 = vadd.f32 %v1655_v33, %v8343_v60  ;;  %v1882_v42 = vpack.c.bf16 %v11375_v44, %v11372_v10  ;;  %v11775_v44 = vmax.f32 %v8084_v41, 0.0 }
 0x2e0   : > { %v1657_v3 = vpop.f32.mrf.mxu0 }
 0x2e1   : > { %v1658_v51 = vadd.f32 %v1657_v3, %v8346_v8  ;;  %v1883_v61 = vpack.c.bf16 %v11369_v54, %v11370_v47  ;;  %v8577_v13 = vadd.f32 %v1656_v43, %v11768_v9  ;;  %v11770_v3 = vmax.f32 %v8057_v25, 0.0 }
 0x2e2   : > { %v1659_v7 = vpop.f32.mrf.mxu0 }
 0x2e3   : > { %v8581_v19 = vadd.f32 %v1658_v51, %v11769_v1  ;;  %v1660_v33 = vadd.f32 %v1659_v7, %v8343_v60  ;;  %2200 = vmatprep.mubr.bf16.mxu1 %v1883_v61  ;;  %v8586_v54 = vadd.f32 %v1654_v56, %v11770_v3  ;;  %v11374_v14 = vmax.f32 %v8577_v13, 0.0 }
 0x2e4   : > { %v1663_v47 = vpop.f32.mrf.mxu0  ;;  %2201 = vmatmul.mubr.bf16.gmra.mxu1 %v1882_v42  ;;  %v11772_v1 = vmax.f32 %v8075_v32, 0.0 }
 0x2e5   : > { %v8590_v10 = vadd.f32 %v1660_v33, %v11771_v0  ;;  %v11379_v59 = vmax.f32 %v8581_v19, 0.0  ;;  %v11376_v61 = vmax.f32 %v8586_v54, 0.0  ;;  %v1664_v25 = vadd.f32 %v1663_v47, %v8346_v8 }
 0x2e6   : > { %v1665_v43 = vpop.f32.mrf.mxu0  ;;  %v11773_v47 = vmax.f32 %v8078_v46, 0.0 }
 0x2e7   : > { %v11373_v51 = vmax.f32 %v8590_v10, 0.0  ;;  %v1666_v7 = vadd.f32 %v1665_v43, %v8343_v60  ;;  %v1884_v9 = vpack.c.bf16 %v11379_v59, %v11376_v61  ;;  %v11779_v59 = vld [vmem:[#allocation12_spill] sm:$0xff] }
 0x2e8   : > { %v1667_v56 = vpop.f32.mrf.mxu0  ;;  %v11780_v36 = vmax.f32 %v11779_v59, 0.0 }
 0x2e9   : > { %v1668_v42 = vadd.f32 %v1667_v56, %v8346_v8  ;;  %v1885_v29 = vpack.c.bf16 %v11373_v51, %v11374_v14  ;;  %v8609_v33 = vadd.f32 %v1666_v7, %v11772_v1  ;;  %v11774_v56 = vmax.f32 %v8081_v50, 0.0 }
 0x2ea   : > { %v1669_v0 = vpop.f32.mrf.mxu0 }
 0x2eb   : > { %v8613_v3 = vadd.f32 %v1668_v42, %v11773_v47  ;;  %v1670_v43 = vadd.f32 %v1669_v0, %v8343_v60  ;;  %2210 = vmatprep.mubr.bf16.mxu1 %v1885_v29  ;;  %v8618_v51 = vadd.f32 %v1664_v25, %v11774_v56  ;;  %v11378_v46 = vmax.f32 %v8609_v33, 0.0 }
 0x2ec   : > { %v1673_v14 = vpop.f32.mrf.mxu0  ;;  %2211 = vmatmul.mubr.bf16.gmra.mxu1 %v1884_v9  ;;  %v11776_v47 = vmax.f32 %v8099_v52, 0.0 }
 0x2ed   : > { %v8622_v61 = vadd.f32 %v1670_v43, %v11775_v44  ;;  %v11382_v32 = vmax.f32 %v8613_v3, 0.0  ;;  %v11381_v29 = vmax.f32 %v8618_v51, 0.0  ;;  %v1674_v50 = vadd.f32 %v1673_v14, %v8346_v8 }
 0x2ee   : > { %v1675_v7 = vpop.f32.mrf.mxu0  ;;  %v11777_v14 = vmax.f32 %v8102_v16, 0.0 }
 0x2ef   : > { %v11377_v42 = vmax.f32 %v8622_v61, 0.0  ;;  %v1676_v0 = vadd.f32 %v1675_v7, %v8343_v60  ;;  %v1886_v1 = vpack.c.bf16 %v11382_v32, %v11381_v29 }
 0x2f0   : > { %v1677_v25 = vpop.f32.mrf.mxu0 }
 0x2f1   : > { %v1678_v9 = vadd.f32 %v1677_v25, %v8346_v8  ;;  %v1887_v41 = vpack.c.bf16 %v11377_v42, %v11378_v46  ;;  %v8641_v43 = vadd.f32 %v1676_v0, %v11776_v47  ;;  %v11778_v25 = vmax.f32 %v8105_v20, 0.0 }
 0x2f2   : > { %v1679_v44 = vpop.f32.mrf.mxu0 }
 0x2f3   : > { %v8645_v56 = vadd.f32 %v1678_v9, %v11777_v14  ;;  %v1680_v7 = vadd.f32 %v1679_v44, %v8343_v60  ;;  %2220 = vmatprep.mubr.bf16.mxu1 %v1887_v41  ;;  %v8650_v42 = vadd.f32 %v1674_v50, %v11778_v25  ;;  %v11386_v16 = vmax.f32 %v8641_v43, 0.0  ;;  %v11782_v14 = vld [vmem:[#allocation13_spill] sm:$0xff] }
 0x2f4   : > { %v1683_v46 = vpop.f32.mrf.mxu0  ;;  %2221 = vmatmul.mubr.bf16.gmra.mxu1 %v1886_v1 }
 0x2f5   : > { %v8654_v29 = vadd.f32 %v1680_v7, %v11780_v36  ;;  %v11390_v52 = vmax.f32 %v8645_v56, 0.0  ;;  %v11389_v41 = vmax.f32 %v8650_v42, 0.0  ;;  %v1684_v20 = vadd.f32 %v1683_v46, %v8346_v8 }
 0x2f6   : > { %v1685_v0 = vpop.f32.mrf.mxu0  ;;  %v11783_v7 = vmax.f32 %v11782_v14, 0.0 }
 0x2f7   : > { %11781 = vst [vmem:[#allocation12_spill] sm:$0xff] %v8654_v29  ;;  %v11385_v9 = vmax.f32 %v8654_v29, 0.0  ;;  %v1686_v44 = vadd.f32 %v1685_v0, %v8343_v60  ;;  %v1888_v47 = vpack.c.bf16 %v11390_v52, %v11389_v41  ;;  %v11785_v0 = vld [vmem:[#allocation14_spill] sm:$0xff]  ;;  %v11791_v29 = vld [vmem:[#allocation16_spill] sm:$0xff] }
 0x2f8   : > { %v1687_v50 = vpop.f32.mrf.mxu0  ;;  %v11786_v46 = vmax.f32 %v11785_v0, 0.0  ;;  %v11792_v41 = vmax.f32 %v11791_v29, 0.0  ;;  %v11794_v0 = vld [vmem:[#allocation17_spill] sm:$0xff] }
 0x2f9   : > { %v1688_v1 = vadd.f32 %v1687_v50, %v8346_v8  ;;  %v1889_v36 = vpack.c.bf16 %v11385_v9, %v11386_v16  ;;  %v8673_v25 = vadd.f32 %v1686_v44, %v11783_v7  ;;  %v8682_v9 = vadd.f32 %v1684_v20, %v11789_v11  ;;  %v7219_v44 = vld [vmem:[#allocation7 + $0x180] ss:$8 sps:$4 sm:$0xff]  }
 0x2fa   : > { %v1689_v59 = vpop.f32.mrf.mxu0  ;;  %2634 = vmatpush2.bf16.msra.mxu0 %v7219_v44  ;;  %v11797_v44 = vld [vmem:[#allocation18_spill] sm:$0xff] }
 0x2fb   : > { %11784 = vst [vmem:[#allocation13_spill] sm:$0xff] %v8673_v25  ;;  %v8677_v32 = vadd.f32 %v1688_v1, %v11786_v46  ;;  %v1690_v50 = vadd.f32 %v1689_v59, %v8343_v60  ;;  %2230 = vmatprep.mubr.bf16.mxu1 %v1889_v36  ;;  %11790 = vst [vmem:[#allocation15_spill] sm:$0xff] %v8682_v9  ;;  %v11394_v1 = vmax.f32 %v8673_v25, 0.0  ;;  %v11397_v11 = vmax.f32 %v8682_v9, 0.0  ;;  %v11800_v25 = vld [vmem:[#allocation19_spill] sm:$0xff]  ;;  %v11803_v9 = vld [vmem:[#allocation20_spill] sm:$0xff] }
 0x2fc   : > { %v1693_v16 = vpop.f32.mrf.mxu0  ;;  %2231 = vmatmul.mubr.bf16.gmra.mxu1 %v1888_v47  ;;  %v11795_v46 = vmax.f32 %v11794_v0, 0.0 }
 0x2fd   : > { %11787 = vst [vmem:[#allocation14_spill] sm:$0xff] %v8677_v32  ;;  %v8686_v52 = vadd.f32 %v1690_v50, %v11792_v41  ;;  %v11398_v14 = vmax.f32 %v8677_v32, 0.0  ;;  %v1694_v20 = vadd.f32 %v1693_v16, %v8346_v8  ;;  %v11798_v16 = vmax.f32 %v11797_v44, 0.0  ;;  %v11806_v44 = vld [vmem:[#allocation21_spill] sm:$0xff] }
 0x2fe   : > { %v1695_v7 = vpop.f32.mrf.mxu0  ;;  %v11804_v32 = vmax.f32 %v11803_v9, 0.0 }
 0x2ff   : > { %11793 = vst [vmem:[#allocation16_spill] sm:$0xff] %v8686_v52  ;;  %v11393_v36 = vmax.f32 %v8686_v52, 0.0  ;;  %v1696_v28 = vadd.f32 %v1695_v7, %v8343_v60  ;;  %v1890_v47 = vpack.c.bf16 %v11398_v14, %v11397_v11  ;;  %v11801_v52 = vmax.f32 %v11800_v25, 0.0 }
 0x300   : > { %v1697_v59 = vpop.f32.mrf.mxu0 }
 0x301   : > { %v1698_v29 = vadd.f32 %v1697_v59, %v8346_v8  ;;  %v1891_v41 = vpack.c.bf16 %v11393_v36, %v11394_v1  ;;  %v8705_v50 = vadd.f32 %v1696_v28, %v11795_v46  ;;  %v8714_v36 = vadd.f32 %v1694_v20, %v11801_v52 }
 0x302   : > { %v1699_v26 = vpop.f32.mrf.mxu0 }
 0x303   : > { %11796 = vst [vmem:[#allocation17_spill] sm:$0xff] %v8705_v50  ;;  %v8709_v7 = vadd.f32 %v1698_v29, %v11798_v16  ;;  %v1700_v59 = vadd.f32 %v1699_v26, %v8343_v60  ;;  %2240 = vmatprep.mubr.bf16.mxu1 %v1891_v41  ;;  %11802 = vst [vmem:[#allocation19_spill] sm:$0xff] %v8714_v36  ;;  %v11402_v46 = vmax.f32 %v8705_v50, 0.0  ;;  %v11405_v41 = vmax.f32 %v8714_v36, 0.0  ;;  %v11812_v50 = vld [vmem:[#allocation23_spill] sm:$0xff]  ;;  %v11815_v36 = vld [vmem:[#allocation24_spill] sm:$0xff] }
 0x304   : > { %v1703_v1 = vpop.f32.mrf.mxu0  ;;  %2241 = vmatmul.mubr.bf16.gmra.mxu1 %v1890_v47  ;;  %v11807_v16 = vmax.f32 %v11806_v44, 0.0 }
 0x305   : > { %11799 = vst [vmem:[#allocation18_spill] sm:$0xff] %v8709_v7  ;;  %v8718_v11 = vadd.f32 %v1700_v59, %v11804_v32  ;;  %v11406_v28 = vmax.f32 %v8709_v7, 0.0  ;;  %v1704_v52 = vadd.f32 %v1703_v1, %v8346_v8  ;;  %v11816_v7 = vmax.f32 %v11815_v36, 0.0 }
 0x306   : > { %v1705_v0 = vpop.f32.mrf.mxu0 }
 0x307   : > { %11805 = vst [vmem:[#allocation20_spill] sm:$0xff] %v8718_v11  ;;  %v11401_v29 = vmax.f32 %v8718_v11, 0.0  ;;  %v1706_v26 = vadd.f32 %v1705_v0, %v8343_v60  ;;  %v1892_v47 = vpack.c.bf16 %v11406_v28, %v11405_v41  ;;  %v11809_v0 = vld [vmem:[#allocation22_spill] sm:$0xff]  ;;  %v11813_v11 = vmax.f32 %v11812_v50, 0.0 }
 0x308   : > { %v1707_v25 = vpop.f32.mrf.mxu0  ;;  %v11810_v1 = vmax.f32 %v11809_v0, 0.0  ;;  %v11818_v0 = vld [vmem:[#allocation25_spill] sm:$0xff] }
 0x309   : > { %v1708_v20 = vadd.f32 %v1707_v25, %v8346_v8  ;;  %v1893_v32 = vpack.c.bf16 %v11401_v29, %v11402_v46  ;;  %v8737_v59 = vadd.f32 %v1706_v26, %v11807_v16  ;;  %v8746_v29 = vadd.f32 %v1704_v52, %v11813_v11 }
 0x30a   : > { %v1709_v9 = vpop.f32.mrf.mxu0 }
 0x30b   : > { %11808 = vst [vmem:[#allocation21_spill] sm:$0xff] %v8737_v59  ;;  %v8741_v14 = vadd.f32 %v1708_v20, %v11810_v1  ;;  %v1710_v25 = vadd.f32 %v1709_v9, %v8343_v60  ;;  %2250 = vmatprep.mubr.bf16.mxu1 %v1893_v32  ;;  %11814 = vst [vmem:[#allocation23_spill] sm:$0xff] %v8746_v29  ;;  %v11410_v16 = vmax.f32 %v8737_v59, 0.0  ;;  %v11412_v32 = vmax.f32 %v8746_v29, 0.0  ;;  %v11824_v59 = vld [vmem:[#allocation27_spill] sm:$0xff]  ;;  %v11827_v29 = vld [vmem:[#allocation28_spill] sm:$0xff] }
 0x30c   : > { %v1713_v46 = vpop.f32.mrf.mxu0  ;;  %2251 = vmatmul.mubr.bf16.gmra.mxu1 %v1892_v47  ;;  %v11819_v1 = vmax.f32 %v11818_v0, 0.0 }
 0x30d   : > { %11811 = vst [vmem:[#allocation22_spill] sm:$0xff] %v8741_v14  ;;  %v8750_v41 = vadd.f32 %v1710_v25, %v11816_v7  ;;  %v11413_v26 = vmax.f32 %v8741_v14, 0.0  ;;  %v1714_v11 = vadd.f32 %v1713_v46, %v8346_v8 }
 0x30e   : > { %v1715_v44 = vpop.f32.mrf.mxu0 }
 0x30f   : > { %11817 = vst [vmem:[#allocation24_spill] sm:$0xff] %v8750_v41  ;;  %v11409_v20 = vmax.f32 %v8750_v41, 0.0  ;;  %v1716_v9 = vadd.f32 %v1715_v44, %v8343_v60  ;;  %v1894_v7 = vpack.c.bf16 %v11413_v26, %v11412_v32  ;;  %v11821_v44 = vld [vmem:[#allocation26_spill] sm:$0xff]  ;;  %v11825_v41 = vmax.f32 %v11824_v59, 0.0 }
 0x310   : > { %v1717_v50 = vpop.f32.mrf.mxu0  ;;  %v11822_v46 = vmax.f32 %v11821_v44, 0.0  ;;  %v11828_v32 = vmax.f32 %v11827_v29, 0.0  ;;  %v11830_v44 = vld [vmem:[#allocation29_spill] sm:$0xff] }
 0x311   : > { %v1718_v52 = vadd.f32 %v1717_v50, %v8346_v8  ;;  %v1895_v36 = vpack.c.bf16 %v11409_v20, %v11410_v16  ;;  %v8769_v25 = vadd.f32 %v1716_v9, %v11819_v1  ;;  %v8778_v20 = vadd.f32 %v1714_v11, %v11825_v41 }
 0x312   : > { %v1719_v47 = vpop.f32.mrf.mxu0 }
 0x313   : > { %11820 = vst [vmem:[#allocation25_spill] sm:$0xff] %v8769_v25  ;;  %v8773_v28 = vadd.f32 %v1718_v52, %v11822_v46  ;;  %v1720_v50 = vadd.f32 %v1719_v47, %v8343_v60  ;;  %2260 = vmatprep.mubr.bf16.mxu1 %v1895_v36  ;;  %11826 = vst [vmem:[#allocation27_spill] sm:$0xff] %v8778_v20  ;;  %v11418_v1 = vmax.f32 %v8769_v25, 0.0  ;;  %v11420_v36 = vmax.f32 %v8778_v20, 0.0  ;;  %v11836_v25 = vld [vmem:[#allocation31_spill] sm:$0xff]  ;;  %v11839_v20 = vld [vmem:[#allocation32_spill] sm:$0xff] }
 0x314   : > { %v1723_v16 = vpop.f32.mrf.mxu0  ;;  %2261 = vmatmul.mubr.bf16.gmra.mxu1 %v1894_v7  ;;  %v11831_v46 = vmax.f32 %v11830_v44, 0.0 }
 0x315   : > { %11823 = vst [vmem:[#allocation26_spill] sm:$0xff] %v8773_v28  ;;  %v8782_v26 = vadd.f32 %v1720_v50, %v11828_v32  ;;  %v11421_v9 = vmax.f32 %v8773_v28, 0.0  ;;  %v1724_v41 = vadd.f32 %v1723_v16, %v8346_v8 }
 0x316   : > { %v1725_v0 = vpop.f32.mrf.mxu0 }
 0x317   : > { %11829 = vst [vmem:[#allocation28_spill] sm:$0xff] %v8782_v26  ;;  %v11417_v52 = vmax.f32 %v8782_v26, 0.0  ;;  %v1726_v47 = vadd.f32 %v1725_v0, %v8343_v60  ;;  %v1896_v32 = vpack.c.bf16 %v11421_v9, %v11420_v36  ;;  %v11833_v0 = vld [vmem:[#allocation30_spill] sm:$0xff]  ;;  %v11837_v26 = vmax.f32 %v11836_v25, 0.0 }
 0x318   : > { %v1727_v59 = vpop.f32.mrf.mxu0  ;;  %v11834_v16 = vmax.f32 %v11833_v0, 0.0  ;;  %v11840_v36 = vmax.f32 %v11839_v20, 0.0  ;;  %v11842_v0 = vld [vmem:[#allocation33_spill] sm:$0xff] }
 0x319   : > { %v1728_v11 = vadd.f32 %v1727_v59, %v8346_v8  ;;  %v1897_v29 = vpack.c.bf16 %v11417_v52, %v11418_v1  ;;  %v8801_v50 = vadd.f32 %v1726_v47, %v11831_v46  ;;  %v8810_v52 = vadd.f32 %v1724_v41, %v11837_v26 }
 0x31a   : > { %v1729_v7 = vpop.f32.mrf.mxu0 }
 0x31b   : > { %11832 = vst [vmem:[#allocation29_spill] sm:$0xff] %v8801_v50  ;;  %v8805_v14 = vadd.f32 %v1728_v11, %v11834_v16  ;;  %v1730_v59 = vadd.f32 %v1729_v7, %v8343_v60  ;;  %2270 = vmatprep.mubr.bf16.mxu1 %v1897_v29  ;;  %11838 = vst [vmem:[#allocation31_spill] sm:$0xff] %v8810_v52  ;;  %v11425_v46 = vmax.f32 %v8801_v50, 0.0  ;;  %v11427_v29 = vmax.f32 %v8810_v52, 0.0 }
 0x31c   : > { %v1733_v1 = vpop.f32.mrf.mxu0  ;;  %2271 = vmatmul.mubr.bf16.gmra.mxu1 %v1896_v32  ;;  %v11843_v16 = vmax.f32 %v11842_v0, 0.0 }
 0x31d   : > { %11835 = vst [vmem:[#allocation30_spill] sm:$0xff] %v8805_v14  ;;  %v8814_v9 = vadd.f32 %v1730_v59, %v11840_v36  ;;  %v11432_v47 = vmax.f32 %v8805_v14, 0.0  ;;  %v1734_v26 = vadd.f32 %v1733_v1, %v8346_v8 }
 0x31e   : > { %v1735_v44 = vpop.f32.mrf.mxu0 }
 0x31f   : > { %11841 = vst [vmem:[#allocation32_spill] sm:$0xff] %v8814_v9  ;;  %v11424_v11 = vmax.f32 %v8814_v9, 0.0  ;;  %v1736_v7 = vadd.f32 %v1735_v44, %v8343_v60  ;;  %v1898_v36 = vpack.c.bf16 %v11432_v47, %v11427_v29  ;;  %v11845_v44 = vld [vmem:[#allocation34_spill] sm:$0xff] }
 0x320   : > { %v1737_v25 = vpop.f32.mrf.mxu0  ;;  %v11846_v1 = vmax.f32 %v11845_v44, 0.0  ;;  %v7231_v44 = vld [vmem:[#allocation5 + $0x240] ss:$8 sps:$4 sm:$0xff]  }
 0x321   : > { %v1738_v41 = vadd.f32 %v1737_v25, %v8346_v8  ;;  %v1899_v20 = vpack.c.bf16 %v11424_v11, %v11425_v46  ;;  %v8833_v59 = vadd.f32 %v1736_v7, %v11843_v16  ;;  %v11848_v25 = vld [vmem:[#allocation35_spill] sm:$0xff]  ;;  %v11851_v46 = vld [vmem:[#allocation36_spill] sm:$0xff] }
 0x322   : > { %v1739_v32 = vpop.f32.mrf.mxu0  ;;  %v11849_v9 = vmax.f32 %v11848_v25, 0.0  ;;  %v11852_v52 = vmax.f32 %v11851_v46, 0.0  ;;  %v7224_v46 = vld [vmem:[#allocation5 + $0x274] ss:$8 sps:$4 sm:$0xff]  }
 0x323   : > { %11844 = vst [vmem:[#allocation33_spill] sm:$0xff] %v8833_v59  ;;  %v8837_v28 = vadd.f32 %v1738_v41, %v11846_v1  ;;  %v1740_v8 = vadd.f32 %v1739_v32, %v8343_v60  ;;  %2280 = vmatprep.mubr.bf16.mxu1 %v1899_v20  ;;  %v11431_v7 = vmax.f32 %v8833_v59, 0.0  ;;  %3162 = vmatprep.subr.bf16.mxu1 %v7224_v46  ;;  %v7227_v20 = vld [vmem:[#allocation5 + $0x264] ss:$8 sps:$4 sm:$0xff]   ;;  %v7230_v32 = vld [vmem:[#allocation5 + $0x254] ss:$8 sps:$4 sm:$0xff]  }
 0x324   : > { %v8842_v11 = vadd.f32 %v1734_v26, %v11849_v9  ;;  %2281 = vmatmul.mubr.bf16.gmra.mxu1 %v1898_v36  ;;  %v7225_v26 = vld [vmem:[#allocation5 + $0x260] ss:$8 sps:$4 sm:$0xff]   ;;  %v7228_v36 = vld [vmem:[#allocation5 + $0x250] ss:$8 sps:$4 sm:$0xff]   ;;  %v7233_v1 = vld [vmem:[#allocation5 + $0x244] ss:$8 sps:$4 sm:$0xff]  }
 0x325   : > { %11847 = vst [vmem:[#allocation34_spill] sm:$0xff] %v8837_v28  ;;  %v8846_v29 = vadd.f32 %v1740_v8, %v11852_v52  ;;  %v11430_v0 = vmax.f32 %v8837_v28, 0.0  ;;  %v7222_v52 = vld [vmem:[#allocation5 + $0x270] ss:$8 sps:$4 sm:$0xff]   ;;  %v6601_v8 = vld [vmem:[%s11253_s4 + $0x2] sm:$0x3] }
 0x326   : > { %11850 = vst [vmem:[#allocation35_spill] sm:$0xff] %v8842_v11  ;;  %v11429_v41 = vmax.f32 %v8842_v11, 0.0  ;;  %3163 = vmatpush1.bf16.msra.mxu1 %v7222_v52  ;;  %v7236_v52 = vld [vmem:[#allocation5 + $0x234] ss:$8 sps:$4 sm:$0xff]   ;;  %v8867_v46 = vrot.slane %v6601_v8, %v7874_v2 }
 0x327   : > { %11853 = vst [vmem:[#allocation36_spill] sm:$0xff] %v8846_v29  ;;  %v11428_v16 = vmax.f32 %v8846_v29, 0.0  ;;  %3164 = vmatprep.subr.bf16.mxu1 %v7227_v20  ;;  %v7240_v29 = vld [vmem:[#allocation5 + $0x210] ss:$8 sps:$4 sm:$0xff]  }
 0x328   : > { %v1900_v9 = vpack.c.bf16 %v11430_v0, %v11429_v41  ;;  %v7242_v0 = vld [vmem:[#allocation5 + $0x214] ss:$8 sps:$4 sm:$0xff]  }
 0x329   : > { %v1901_v60 = vpack.c.bf16 %v11428_v16, %v11431_v7 }
 0x32a   : > { %3165 = vmatpush1.bf16.msra.mxu1 %v7225_v26 }
 0x32b   : > { %2290 = vmatprep.mubr.bf16.mxu1 %v1901_v60  ;;  %3166 = vmatprep.subr.bf16.mxu1 %v7230_v32  ;;  %v8864_v60 = vrot.slane %v6601_v8, %v7872_v63 }
 0x32c   : > { %2291 = vmatmul.mubr.bf16.gmra.mxu1 %v1900_v9  ;;  %v7234_v9 = vld [vmem:[#allocation5 + $0x230] ss:$8 sps:$4 sm:$0xff]  }
 0x32e   : > { %3167 = vmatpush1.bf16.msra.mxu1 %v7228_v36 }
 0x32f   : > { %3168 = vmatprep.subr.bf16.mxu1 %v7233_v1  ;;  %v7239_v1 = vld [vmem:[#allocation5 + $0x224] ss:$8 sps:$4 sm:$0xff]  }
 0x332   : > { %3169 = vmatpush1.bf16.msra.mxu1 %v7231_v44  ;;  %v7237_v44 = vld [vmem:[#allocation5 + $0x220] ss:$8 sps:$4 sm:$0xff]  }
 0x333   : > { %3170 = vmatprep.subr.bf16.mxu1 %v7236_v52 }
 0x336   : > { %3171 = vmatpush1.bf16.msra.mxu1 %v7234_v9  ;;  %v7245_v9 = vld [vmem:[#allocation5 + $0x204] ss:$8 sps:$4 sm:$0xff]  }
 0x337   : > { %3172 = vmatprep.subr.bf16.mxu1 %v7239_v1  ;;  %v7251_v1 = vld [vmem:[#allocation5 + $0x2e4] ss:$8 sps:$4 sm:$0xff]  }
 0x33a   : > { %3173 = vmatpush1.bf16.msra.mxu1 %v7237_v44 }
 0x33b   : > { %3174 = vmatprep.subr.bf16.mxu1 %v7242_v0 }
 0x33e   : > { %3175 = vmatpush1.bf16.msra.mxu1 %v7240_v29 }
 0x33f   : > { %3176 = vmatprep.subr.bf16.mxu1 %v7245_v9 }
 0x374   : > { %v2142_v25 = vpop.f32.mrf.mxu1 }
 0x375   : > { %v2143_v16 = vadd.f32 %v2142_v25, %v8867_v46  ;;  %v7243_v25 = vld [vmem:[#allocation5 + $0x200] ss:$8 sps:$4 sm:$0xff]  }
 0x376   : > { %v2144_v26 = vpop.f32.mrf.mxu1  ;;  %3177 = vmatpush1.bf16.msra.mxu1 %v7243_v25 }
 0x377   : > { %v2145_v36 = vadd.f32 %v2144_v26, %v8864_v60  ;;  %v2301_v26 = vmax.f32 %v2143_v16, 0.0 }
 0x378   : > { %v2146_v20 = vpop.f32.mrf.mxu1 }
 0x379   : > { %v2147_v32 = vadd.f32 %v2146_v20, %v8867_v46  ;;  %v2302_v52 = vmax.f32 %v2145_v36, 0.0 }
 0x37a   : > { %v2148_v41 = vpop.f32.mrf.mxu1 }
 0x37b   : > { %v2149_v7 = vadd.f32 %v2148_v41, %v8864_v60  ;;  %v2303_v47 = vmax.f32 %v2147_v32, 0.0  ;;  %v7248_v32 = vld [vmem:[#allocation5 + $0x2f4] ss:$8 sps:$4 sm:$0xff]  }
 0x37c   : > { %v2152_v8 = vpop.f32.mrf.mxu1  ;;  %3178 = vmatprep.subr.bf16.mxu1 %v7248_v32 }
 0x37d   : > { %v2304_v11 = vmax.f32 %v2149_v7, 0.0  ;;  %v2365_v59 = vpack.c.bf16 %v2303_v47, %v2301_v26  ;;  %v2153_v44 = vadd.f32 %v2152_v8, %v8867_v46  ;;  %v7246_v47 = vld [vmem:[#allocation5 + $0x2f0] ss:$8 sps:$4 sm:$0xff]  }
 0x37e   : > { %v2154_v28 = vpop.f32.mrf.mxu1  ;;  %3179 = vmatpush2.bf16.msra.mxu1 %v7246_v47 }
 0x37f   : > { %v2366_v20 = vpack.c.bf16 %v2304_v11, %v2302_v52  ;;  %v2155_v50 = vadd.f32 %v2154_v28, %v8864_v60  ;;  %v2305_v28 = vmax.f32 %v2153_v44, 0.0  ;;  %3180 = vmatprep.subr.bf16.mxu1 %v7251_v1 }
 0x380   : > { %v2156_v14 = vpop.f32.mrf.mxu1 }
 0x381   : > { %v2157_v41 = vadd.f32 %v2156_v14, %v8867_v46  ;;  %2635 = vmatprep.mubr.bf16.mxu0 %v2366_v20  ;;  %v2306_v11 = vmax.f32 %v2155_v50, 0.0  ;;  %v7249_v20 = vld [vmem:[#allocation5 + $0x2e0] ss:$8 sps:$4 sm:$0xff]  }
 0x382   : > { %v2158_v36 = vpop.f32.mrf.mxu1  ;;  %2636 = vmatmul.mubr.bf16.vlgmr.msra.gmra.mxu0 %v2365_v59  ;;  %3181 = vmatpush2.bf16.msra.mxu1 %v7249_v20 }
 0x383   : > { %v2159_v0 = vadd.f32 %v2158_v36, %v8864_v60  ;;  %v2307_v7 = vmax.f32 %v2157_v41, 0.0  ;;  %v7254_v41 = vld [vmem:[#allocation5 + $0x2d4] ss:$8 sps:$4 sm:$0xff]  }
 0x384   : > { %v2162_v16 = vpop.f32.mrf.mxu1  ;;  %3182 = vmatprep.subr.bf16.mxu1 %v7254_v41 }
 0x385   : > { %v2308_v29 = vmax.f32 %v2159_v0, 0.0  ;;  %v2367_v26 = vpack.c.bf16 %v2307_v7, %v2305_v28  ;;  %v2163_v25 = vadd.f32 %v2162_v16, %v8867_v46  ;;  %v7252_v0 = vld [vmem:[#allocation5 + $0x2d0] ss:$8 sps:$4 sm:$0xff]  }
 0x386   : > { %v2164_v52 = vpop.f32.mrf.mxu1  ;;  %3183 = vmatpush2.bf16.msra.mxu1 %v7252_v0 }
 0x387   : > { %v2368_v14 = vpack.c.bf16 %v2308_v29, %v2306_v11  ;;  %v2165_v8 = vadd.f32 %v2164_v52, %v8864_v60  ;;  %v7257_v11 = vld [vmem:[#allocation5 + $0x2c4] ss:$8 sps:$4 sm:$0xff]   ;;  %v2309_v29 = vmax.f32 %v2163_v25, 0.0 }
 0x388   : > { %v2166_v9 = vpop.f32.mrf.mxu1  ;;  %3184 = vmatprep.subr.bf16.mxu1 %v7257_v11 }
 0x389   : > { %v2167_v59 = vadd.f32 %v2166_v9, %v8867_v46  ;;  %2645 = vmatprep.mubr.bf16.mxu0 %v2368_v14  ;;  %v2310_v7 = vmax.f32 %v2165_v8, 0.0  ;;  %v7255_v9 = vld [vmem:[#allocation5 + $0x2c0] ss:$8 sps:$4 sm:$0xff]  }
 0x38a   : > { %v2168_v50 = vpop.f32.mrf.mxu1  ;;  %2646 = vmatmul.mubr.bf16.gmra.mxu0 %v2367_v26  ;;  %3185 = vmatpush2.bf16.msra.mxu1 %v7255_v9 }
 0x38b   : > { %v2169_v32 = vadd.f32 %v2168_v50, %v8864_v60  ;;  %v2311_v44 = vmax.f32 %v2167_v59, 0.0  ;;  %v7260_v59 = vld [vmem:[#allocation5 + $0x2b4] ss:$8 sps:$4 sm:$0xff]  }
 0x38c   : > { %v2172_v36 = vpop.f32.mrf.mxu1  ;;  %3186 = vmatprep.subr.bf16.mxu1 %v7260_v59 }
 0x38d   : > { %v2312_v47 = vmax.f32 %v2169_v32, 0.0  ;;  %v2369_v14 = vpack.c.bf16 %v2311_v44, %v2309_v29  ;;  %v2173_v20 = vadd.f32 %v2172_v36, %v8867_v46  ;;  %v7258_v32 = vld [vmem:[#allocation5 + $0x2b0] ss:$8 sps:$4 sm:$0xff]  }
 0x38e   : > { %v2174_v28 = vpop.f32.mrf.mxu1  ;;  %3187 = vmatpush2.bf16.msra.mxu1 %v7258_v32 }
 0x38f   : > { %v2370_v52 = vpack.c.bf16 %v2312_v47, %v2310_v7  ;;  %v2175_v16 = vadd.f32 %v2174_v28, %v8864_v60  ;;  %v7263_v7 = vld [vmem:[#allocation5 + $0x2a4] ss:$8 sps:$4 sm:$0xff]   ;;  %v2313_v47 = vmax.f32 %v2173_v20, 0.0 }
 0x390   : > { %v2176_v1 = vpop.f32.mrf.mxu1  ;;  %3188 = vmatprep.subr.bf16.mxu1 %v7263_v7 }
 0x391   : > { %v2177_v26 = vadd.f32 %v2176_v1, %v8867_v46  ;;  %2655 = vmatprep.mubr.bf16.mxu0 %v2370_v52  ;;  %v2314_v44 = vmax.f32 %v2175_v16, 0.0  ;;  %v7261_v1 = vld [vmem:[#allocation5 + $0x2a0] ss:$8 sps:$4 sm:$0xff]  }
 0x392   : > { %v2178_v8 = vpop.f32.mrf.mxu1  ;;  %2656 = vmatmul.mubr.bf16.gmra.mxu0 %v2369_v14  ;;  %3189 = vmatpush2.bf16.msra.mxu1 %v7261_v1 }
 0x393   : > { %v2179_v41 = vadd.f32 %v2178_v8, %v8864_v60  ;;  %v2315_v25 = vmax.f32 %v2177_v26, 0.0  ;;  %v7266_v26 = vld [vmem:[#allocation5 + $0x294] ss:$8 sps:$4 sm:$0xff]  }
 0x394   : > { %v2182_v50 = vpop.f32.mrf.mxu1  ;;  %3190 = vmatprep.subr.bf16.mxu1 %v7266_v26 }
 0x395   : > { %v2316_v0 = vmax.f32 %v2179_v41, 0.0  ;;  %v2371_v52 = vpack.c.bf16 %v2315_v25, %v2313_v47  ;;  %v2183_v9 = vadd.f32 %v2182_v50, %v8867_v46  ;;  %v7264_v41 = vld [vmem:[#allocation5 + $0x290] ss:$8 sps:$4 sm:$0xff]  }
 0x396   : > { %v2184_v29 = vpop.f32.mrf.mxu1  ;;  %3191 = vmatpush2.bf16.msra.mxu1 %v7264_v41 }
 0x397   : > { %v2372_v28 = vpack.c.bf16 %v2316_v0, %v2314_v44  ;;  %v2185_v36 = vadd.f32 %v2184_v29, %v8864_v60  ;;  %v2317_v44 = vmax.f32 %v2183_v9, 0.0 }
 0x398   : > { %v2186_v11 = vpop.f32.mrf.mxu1 }
 0x399   : > { %v2187_v14 = vadd.f32 %v2186_v11, %v8867_v46  ;;  %2665 = vmatprep.mubr.bf16.mxu0 %v2372_v28  ;;  %v2318_v25 = vmax.f32 %v2185_v36, 0.0 }
 0x39a   : > { %v2188_v16 = vpop.f32.mrf.mxu1  ;;  %2666 = vmatmul.mubr.bf16.gmra.mxu0 %v2371_v52 }
 0x39b   : > { %v2189_v59 = vadd.f32 %v2188_v16, %v8864_v60  ;;  %v2319_v20 = vmax.f32 %v2187_v14, 0.0 }
 0x39c   : > { %v2192_v8 = vpop.f32.mrf.mxu1 }
 0x39d   : > { %v2320_v32 = vmax.f32 %v2189_v59, 0.0  ;;  %v2373_v29 = vpack.c.bf16 %v2319_v20, %v2317_v44  ;;  %v2193_v52 = vadd.f32 %v2192_v8, %v8867_v46 }
 0x39e   : > { %v2194_v0 = vpop.f32.mrf.mxu1 }
 0x39f   : > { %v2374_v47 = vpack.c.bf16 %v2320_v32, %v2318_v25  ;;  %v2195_v7 = vadd.f32 %v2194_v0, %v8864_v60  ;;  %v2321_v16 = vmax.f32 %v2193_v52, 0.0 }
 0x3a0   : > { %v2196_v28 = vpop.f32.mrf.mxu1 }
 0x3a1   : > { %v2197_v50 = vadd.f32 %v2196_v28, %v8867_v46  ;;  %2675 = vmatprep.mubr.bf16.mxu0 %v2374_v47  ;;  %v2322_v26 = vmax.f32 %v2195_v7, 0.0 }
 0x3a2   : > { %v2198_v11 = vpop.f32.mrf.mxu1  ;;  %2676 = vmatmul.mubr.bf16.gmra.mxu0 %v2373_v29 }
 0x3a3   : > { %v2199_v1 = vadd.f32 %v2198_v11, %v8864_v60  ;;  %v2323_v36 = vmax.f32 %v2197_v50, 0.0 }
 0x3a4   : > { %v2202_v14 = vpop.f32.mrf.mxu1 }
 0x3a5   : > { %v2324_v9 = vmax.f32 %v2199_v1, 0.0  ;;  %v2375_v25 = vpack.c.bf16 %v2323_v36, %v2321_v16  ;;  %v2203_v8 = vadd.f32 %v2202_v14, %v8867_v46 }
 0x3a6   : > { %v2204_v59 = vpop.f32.mrf.mxu1 }
 0x3a7   : > { %v2376_v20 = vpack.c.bf16 %v2324_v9, %v2322_v26  ;;  %v2205_v32 = vadd.f32 %v2204_v59, %v8864_v60  ;;  %v2325_v52 = vmax.f32 %v2203_v8, 0.0 }
 0x3a8   : > { %v2206_v41 = vpop.f32.mrf.mxu1 }
 0x3a9   : > { %v2207_v44 = vadd.f32 %v2206_v41, %v8867_v46  ;;  %2685 = vmatprep.mubr.bf16.mxu0 %v2376_v20  ;;  %v2326_v7 = vmax.f32 %v2205_v32, 0.0 }
 0x3aa   : > { %v2208_v0 = vpop.f32.mrf.mxu1  ;;  %2686 = vmatmul.mubr.bf16.gmra.mxu0 %v2375_v25 }
 0x3ab   : > { %v2209_v47 = vadd.f32 %v2208_v0, %v8864_v60  ;;  %v2327_v29 = vmax.f32 %v2207_v44, 0.0 }
 0x3ac   : > { %v2212_v28 = vpop.f32.mrf.mxu1 }
 0x3ad   : > { %v2328_v50 = vmax.f32 %v2209_v47, 0.0  ;;  %v2377_v36 = vpack.c.bf16 %v2327_v29, %v2325_v52  ;;  %v2213_v14 = vadd.f32 %v2212_v28, %v8867_v46 }
 0x3ae   : > { %v2214_v11 = vpop.f32.mrf.mxu1 }
 0x3af   : > { %v2378_v1 = vpack.c.bf16 %v2328_v50, %v2326_v7  ;;  %v2215_v9 = vadd.f32 %v2214_v11, %v8864_v60  ;;  %v2329_v8 = vmax.f32 %v2213_v14, 0.0 }
 0x3b0   : > { %v2216_v26 = vpop.f32.mrf.mxu1 }
 0x3b1   : > { %v2217_v16 = vadd.f32 %v2216_v26, %v8867_v46  ;;  %2695 = vmatprep.mubr.bf16.mxu0 %v2378_v1  ;;  %v2330_v32 = vmax.f32 %v2215_v9, 0.0 }
 0x3b2   : > { %v2218_v59 = vpop.f32.mrf.mxu1  ;;  %2696 = vmatmul.mubr.bf16.gmra.mxu0 %v2377_v36 }
 0x3b3   : > { %v2219_v20 = vadd.f32 %v2218_v59, %v8864_v60  ;;  %v2331_v25 = vmax.f32 %v2217_v16, 0.0 }
 0x3b4   : > { %v2222_v41 = vpop.f32.mrf.mxu1 }
 0x3b5   : > { %v2332_v44 = vmax.f32 %v2219_v20, 0.0  ;;  %v2379_v29 = vpack.c.bf16 %v2331_v25, %v2329_v8  ;;  %v2223_v28 = vadd.f32 %v2222_v41, %v8867_v46 }
 0x3b6   : > { %v2224_v0 = vpop.f32.mrf.mxu1 }
 0x3b7   : > { %v2380_v47 = vpack.c.bf16 %v2332_v44, %v2330_v32  ;;  %v2225_v50 = vadd.f32 %v2224_v0, %v8864_v60  ;;  %v2333_v14 = vmax.f32 %v2223_v28, 0.0 }
 0x3b8   : > { %v2226_v7 = vpop.f32.mrf.mxu1 }
 0x3b9   : > { %v2227_v52 = vadd.f32 %v2226_v7, %v8867_v46  ;;  %2705 = vmatprep.mubr.bf16.mxu0 %v2380_v47  ;;  %v2334_v9 = vmax.f32 %v2225_v50, 0.0 }
 0x3ba   : > { %v2228_v11 = vpop.f32.mrf.mxu1  ;;  %2706 = vmatmul.mubr.bf16.gmra.mxu0 %v2379_v29 }
 0x3bb   : > { %v2229_v1 = vadd.f32 %v2228_v11, %v8864_v60  ;;  %v2335_v36 = vmax.f32 %v2227_v52, 0.0 }
 0x3bc   : > { %v2232_v26 = vpop.f32.mrf.mxu1 }
 0x3bd   : > { %v2336_v16 = vmax.f32 %v2229_v1, 0.0  ;;  %v2381_v25 = vpack.c.bf16 %v2335_v36, %v2333_v14  ;;  %v2233_v41 = vadd.f32 %v2232_v26, %v8867_v46 }
 0x3be   : > { %v2234_v59 = vpop.f32.mrf.mxu1 }
 0x3bf   : > { %v2382_v20 = vpack.c.bf16 %v2336_v16, %v2334_v9  ;;  %v2235_v44 = vadd.f32 %v2234_v59, %v8864_v60  ;;  %v2337_v28 = vmax.f32 %v2233_v41, 0.0 }
 0x3c0   : > { %v2236_v32 = vpop.f32.mrf.mxu1 }
 0x3c1   : > { %v2237_v8 = vadd.f32 %v2236_v32, %v8867_v46  ;;  %2715 = vmatprep.mubr.bf16.mxu0 %v2382_v20  ;;  %v2338_v50 = vmax.f32 %v2235_v44, 0.0  ;;  %v7269_v44 = vld [vmem:[#allocation5 + $0x284] ss:$8 sps:$4 sm:$0xff]  }
 0x3c2   : > { %v2238_v0 = vpop.f32.mrf.mxu1  ;;  %2716 = vmatmul.mubr.bf16.gmra.mxu0 %v2381_v25  ;;  %3192 = vmatprep.subr.bf16.mxu1 %v7269_v44 }
 0x3c3   : > { %v2239_v47 = vadd.f32 %v2238_v0, %v8864_v60  ;;  %v2339_v29 = vmax.f32 %v2237_v8, 0.0  ;;  %v7267_v0 = vld [vmem:[#allocation5 + $0x280] ss:$8 sps:$4 sm:$0xff]  }
 0x3c4   : > { %v2242_v7 = vpop.f32.mrf.mxu1  ;;  %3193 = vmatpush2.bf16.msra.mxu1 %v7267_v0 }
 0x3c5   : > { %v2340_v52 = vmax.f32 %v2239_v47, 0.0  ;;  %v2383_v36 = vpack.c.bf16 %v2339_v29, %v2337_v28  ;;  %v2243_v26 = vadd.f32 %v2242_v7, %v8867_v46 }
 0x3c6   : > { %v2244_v11 = vpop.f32.mrf.mxu1 }
 0x3c7   : > { %v2384_v1 = vpack.c.bf16 %v2340_v52, %v2338_v50  ;;  %v2245_v16 = vadd.f32 %v2244_v11, %v8864_v60  ;;  %v2341_v47 = vmax.f32 %v2243_v26, 0.0 }
 0x3c8   : > { %v2246_v9 = vpop.f32.mrf.mxu1 }
 0x3c9   : > { %v2247_v14 = vadd.f32 %v2246_v9, %v8867_v46  ;;  %2725 = vmatprep.mubr.bf16.mxu0 %v2384_v1  ;;  %v2342_v8 = vmax.f32 %v2245_v16, 0.0 }
 0x3ca   : > { %v2248_v59 = vpop.f32.mrf.mxu1  ;;  %2726 = vmatmul.mubr.bf16.gmra.mxu0 %v2383_v36 }
 0x3cb   : > { %v2249_v20 = vadd.f32 %v2248_v59, %v8864_v60  ;;  %v2343_v25 = vmax.f32 %v2247_v14, 0.0 }
 0x3cc   : > { %v2252_v32 = vpop.f32.mrf.mxu1 }
 0x3cd   : > { %v2344_v41 = vmax.f32 %v2249_v20, 0.0  ;;  %v2385_v52 = vpack.c.bf16 %v2343_v25, %v2341_v47  ;;  %v2253_v1 = vadd.f32 %v2252_v32, %v8867_v46 }
 0x3ce   : > { %v2254_v29 = vpop.f32.mrf.mxu1 }
 0x3cf   : > { %v2386_v50 = vpack.c.bf16 %v2344_v41, %v2342_v8  ;;  %v2255_v11 = vadd.f32 %v2254_v29, %v8864_v60  ;;  %v2345_v20 = vmax.f32 %v2253_v1, 0.0 }
 0x3d0   : > { %v2256_v28 = vpop.f32.mrf.mxu1 }
 0x3d1   : > { %v2257_v7 = vadd.f32 %v2256_v28, %v8867_v46  ;;  %2735 = vmatprep.mubr.bf16.mxu0 %v2386_v50  ;;  %v2346_v26 = vmax.f32 %v2255_v11, 0.0 }
 0x3d2   : > { %v2258_v36 = vpop.f32.mrf.mxu1  ;;  %2736 = vmatmul.mubr.bf16.gmra.mxu0 %v2385_v52 }
 0x3d3   : > { %v2259_v9 = vadd.f32 %v2258_v36, %v8864_v60  ;;  %v2347_v16 = vmax.f32 %v2257_v7, 0.0 }
 0x3d4   : > { %v2262_v14 = vpop.f32.mrf.mxu1 }
 0x3d5   : > { %v2348_v59 = vmax.f32 %v2259_v9, 0.0  ;;  %v2387_v25 = vpack.c.bf16 %v2347_v16, %v2345_v20  ;;  %v2263_v32 = vadd.f32 %v2262_v14, %v8867_v46 }
 0x3d6   : > { %v2264_v44 = vpop.f32.mrf.mxu1 }
 0x3d7   : > { %v2388_v8 = vpack.c.bf16 %v2348_v59, %v2346_v26  ;;  %v2265_v0 = vadd.f32 %v2264_v44, %v8864_v60  ;;  %v2349_v1 = vmax.f32 %v2263_v32, 0.0 }
 0x3d8   : > { %v2266_v41 = vpop.f32.mrf.mxu1 }
 0x3d9   : > { %v2267_v47 = vadd.f32 %v2266_v41, %v8867_v46  ;;  %2745 = vmatprep.mubr.bf16.mxu0 %v2388_v8  ;;  %v2350_v11 = vmax.f32 %v2265_v0, 0.0 }
 0x3da   : > { %v2268_v29 = vpop.f32.mrf.mxu1  ;;  %2746 = vmatmul.mubr.bf16.gmra.mxu0 %v2387_v25 }
 0x3db   : > { %v2269_v50 = vadd.f32 %v2268_v29, %v8864_v60  ;;  %v2351_v52 = vmax.f32 %v2267_v47, 0.0 }
 0x3dc   : > { %v2272_v28 = vpop.f32.mrf.mxu1 }
 0x3dd   : > { %v2352_v7 = vmax.f32 %v2269_v50, 0.0  ;;  %v2389_v16 = vpack.c.bf16 %v2351_v52, %v2349_v1  ;;  %v2273_v14 = vadd.f32 %v2272_v28, %v8867_v46 }
 0x3de   : > { %v2274_v36 = vpop.f32.mrf.mxu1 }
 0x3df   : > { %v2390_v9 = vpack.c.bf16 %v2352_v7, %v2350_v11  ;;  %v2275_v59 = vadd.f32 %v2274_v36, %v8864_v60  ;;  %v2353_v32 = vmax.f32 %v2273_v14, 0.0 }
 0x3e0   : > { %v2276_v26 = vpop.f32.mrf.mxu1 }
 0x3e1   : > { %v2277_v20 = vadd.f32 %v2276_v26, %v8867_v46  ;;  %2755 = vmatprep.mubr.bf16.mxu0 %v2390_v9  ;;  %v2354_v0 = vmax.f32 %v2275_v59, 0.0 }
 0x3e2   : > { %v2278_v44 = vpop.f32.mrf.mxu1  ;;  %2756 = vmatmul.mubr.bf16.gmra.mxu0 %v2389_v16 }
 0x3e3   : > { %v2279_v8 = vadd.f32 %v2278_v44, %v8864_v60  ;;  %v2355_v25 = vmax.f32 %v2277_v20, 0.0 }
 0x3e4   : > { %v2282_v41 = vpop.f32.mrf.mxu1 }
 0x3e5   : > { %v2356_v47 = vmax.f32 %v2279_v8, 0.0  ;;  %v2391_v52 = vpack.c.bf16 %v2355_v25, %v2353_v32  ;;  %v2283_v28 = vadd.f32 %v2282_v41, %v8867_v46 }
 0x3e6   : > { %v2284_v29 = vpop.f32.mrf.mxu1 }
 0x3e7   : > { %v2392_v50 = vpack.c.bf16 %v2356_v47, %v2354_v0  ;;  %v2285_v7 = vadd.f32 %v2284_v29, %v8864_v60  ;;  %v2357_v14 = vmax.f32 %v2283_v28, 0.0 }
 0x3e8   : > { %v2286_v11 = vpop.f32.mrf.mxu1 }
 0x3e9   : > { %v2287_v1 = vadd.f32 %v2286_v11, %v8867_v46  ;;  %2765 = vmatprep.mubr.bf16.mxu0 %v2392_v50  ;;  %v2358_v59 = vmax.f32 %v2285_v7, 0.0 }
 0x3ea   : > { %v2288_v36 = vpop.f32.mrf.mxu1  ;;  %2766 = vmatmul.mubr.bf16.gmra.mxu0 %v2391_v52 }
 0x3eb   : > { %v2289_v9 = vadd.f32 %v2288_v36, %v8864_v60  ;;  %v2359_v16 = vmax.f32 %v2287_v1, 0.0 }
 0x3ec   : > { %v2292_v26 = vpop.f32.mrf.mxu1 }
 0x3ed   : > { %v2360_v20 = vmax.f32 %v2289_v9, 0.0  ;;  %v2393_v25 = vpack.c.bf16 %v2359_v16, %v2357_v14  ;;  %v2293_v41 = vadd.f32 %v2292_v26, %v8867_v46  ;;  %v7270_v9 = vld [vmem:[#allocation7 + $0x270] ss:$8 sps:$4 sm:$0xff]   ;;  %v7272_v16 = vld [vmem:[#allocation7 + $0x274] ss:$8 sps:$4 sm:$0xff]  }
 0x3ee   : > { %v2294_v44 = vpop.f32.mrf.mxu1  ;;  %3657 = vmatprep.subr.bf16.mxu0 %v7272_v16  ;;  %v7278_v26 = vld [vmem:[#allocation7 + $0x254] ss:$8 sps:$4 sm:$0xff]   ;;  %v7281_v14 = vld [vmem:[#allocation7 + $0x244] ss:$8 sps:$4 sm:$0xff]   ;;  %v11855_v16 = vmax.f32 %v8357_v55, 0.0 }
 0x3ef   : > { %v2394_v8 = vpack.c.bf16 %v2360_v20, %v2358_v59  ;;  %v2295_v47 = vadd.f32 %v2294_v44, %v8864_v60  ;;  %v2361_v1 = vmax.f32 %v2293_v41, 0.0  ;;  %3658 = vmatpush1.bf16.msra.mxu0 %v7270_v9  ;;  %v7273_v59 = vld [vmem:[#allocation7 + $0x260] ss:$8 sps:$4 sm:$0xff]   ;;  %v7275_v20 = vld [vmem:[#allocation7 + $0x264] ss:$8 sps:$4 sm:$0xff]  }
 0x3f0   : > { %v2296_v0 = vpop.f32.mrf.mxu1  ;;  %3659 = vmatprep.subr.bf16.mxu0 %v7275_v20  ;;  %v6634_v44 = vld [vmem:[%s11255_s6 + $0x2] sm:$0x3]  ;;  %v7282_v41 = vld [vmem:[#allocation7 + $0x230] ss:$8 sps:$4 sm:$0xff]  }
 0x3f1   : > { %v2297_v32 = vadd.f32 %v2296_v0, %v8867_v46  ;;  %2775 = vmatprep.mubr.bf16.mxu0 %v2394_v8  ;;  %v2362_v11 = vmax.f32 %v2295_v47, 0.0  ;;  %v7276_v46 = vld [vmem:[#allocation7 + $0x250] ss:$8 sps:$4 sm:$0xff]   ;;  %v8937_v8 = vrot.slane %v6634_v44, %v7872_v63 }
 0x3f2   : > { %v2298_v29 = vpop.f32.mrf.mxu1  ;;  %2776 = vmatmul.mubr.bf16.gmra.mxu0 %v2393_v25  ;;  %v8940_v25 = vrot.slane %v6634_v44, %v7874_v2  ;;  %v11857_v44 = vmax.f32 %v8366_v39, 0.0  ;;  %v7288_v55 = vld [vmem:[#allocation7 + $0x210] ss:$8 sps:$4 sm:$0xff]  }
 0x3f3   : > { %v2299_v50 = vadd.f32 %v2298_v29, %v8864_v60  ;;  %v2363_v52 = vmax.f32 %v2297_v32, 0.0  ;;  %3660 = vmatpush1.bf16.msra.mxu0 %v7273_v59  ;;  %v7279_v60 = vld [vmem:[#allocation7 + $0x240] ss:$8 sps:$4 sm:$0xff]   ;;  %v7284_v29 = vld [vmem:[#allocation7 + $0x234] ss:$8 sps:$4 sm:$0xff]  }
 0x3f4   : > { %3661 = vmatprep.subr.bf16.mxu0 %v7278_v26 }
 0x3f5   : > { %v2364_v7 = vmax.f32 %v2299_v50, 0.0  ;;  %v2395_v36 = vpack.c.bf16 %v2363_v52, %v2361_v1 }
 0x3f7   : > { %v2396_v28 = vpack.c.bf16 %v2364_v7, %v2362_v11  ;;  %3662 = vmatpush1.bf16.msra.mxu0 %v7276_v46  ;;  %v7287_v11 = vld [vmem:[#allocation7 + $0x224] ss:$8 sps:$4 sm:$0xff]   ;;  %v11856_v46 = vmax.f32 %v8362_v22, 0.0 }
 0x3f8   : > { %3663 = vmatprep.subr.bf16.mxu0 %v7281_v14  ;;  %v7290_v14 = vld [vmem:[#allocation7 + $0x214] ss:$8 sps:$4 sm:$0xff]   ;;  %v7293_v22 = vld [vmem:[#allocation7 + $0x204] ss:$8 sps:$4 sm:$0xff]  }
 0x3f9   : > { %2785 = vmatprep.mubr.bf16.mxu0 %v2396_v28  ;;  %v7285_v28 = vld [vmem:[#allocation7 + $0x220] ss:$8 sps:$4 sm:$0xff]  }
 0x3fa   : > { %2786 = vmatmul.mubr.bf16.gmra.mxu0 %v2395_v36  ;;  %v11854_v36 = vmax.f32 %v8353_v5, 0.0 }
 0x3fb   : > { %3664 = vmatpush1.bf16.msra.mxu0 %v7279_v60 }
 0x3fc   : > { %3665 = vmatprep.subr.bf16.mxu0 %v7284_v29 }
 0x3ff   : > { %3666 = vmatpush1.bf16.msra.mxu0 %v7282_v41 }
 0x400   : > { %3667 = vmatprep.subr.bf16.mxu0 %v7287_v11 }
 0x403   : > { %3668 = vmatpush1.bf16.msra.mxu0 %v7285_v28 }
 0x404   : > { %3669 = vmatprep.subr.bf16.mxu0 %v7290_v14 }
 0x407   : > { %3670 = vmatpush1.bf16.msra.mxu0 %v7288_v55  ;;  %v11861_v55 = vmax.f32 %v8398_v30, 0.0 }
 0x408   : > { %3671 = vmatprep.subr.bf16.mxu0 %v7293_v22 }
 0x442   : > { %v2637_v0 = vpop.f32.mrf.mxu0 }
 0x443   : > { %v2638_v50 = vadd.f32 %v2637_v0, %v8940_v25 }
 0x444   : > { %v2639_v47 = vpop.f32.mrf.mxu0 }
 0x445   : > { %v2640_v32 = vadd.f32 %v2639_v47, %v8937_v8  ;;  %v8956_v26 = vadd.f32 %v2638_v50, %v11856_v46  ;;  %v11859_v46 = vmax.f32 %v8389_v37, 0.0 }
 0x446   : > { %v2641_v52 = vpop.f32.mrf.mxu0 }
 0x447   : > { %v2642_v7 = vadd.f32 %v2641_v52, %v8940_v25  ;;  %v8947_v9 = vadd.f32 %v2640_v32, %v11854_v36  ;;  %v11442_v50 = vmax.f32 %v8956_v26, 0.0  ;;  %v7291_v36 = vld [vmem:[#allocation7 + $0x200] ss:$8 sps:$4 sm:$0xff]  }
 0x448   : > { %v2643_v1 = vpop.f32.mrf.mxu0  ;;  %3672 = vmatpush1.bf16.msra.mxu0 %v7291_v36 }
 0x449   : > { %v8951_v59 = vadd.f32 %v2642_v7, %v11855_v16  ;;  %v2644_v20 = vadd.f32 %v2643_v1, %v8937_v8  ;;  %v11476_v32 = vmax.f32 %v8947_v9, 0.0  ;;  %v11858_v16 = vmax.f32 %v8385_v40, 0.0 }
 0x44a   : > { %v2647_v60 = vpop.f32.mrf.mxu0 }
 0x44b   : > { %v8960_v0 = vadd.f32 %v2644_v20, %v11857_v44  ;;  %v11473_v5 = vmax.f32 %v8951_v59, 0.0  ;;  %v2648_v52 = vadd.f32 %v2647_v60, %v8940_v25  ;;  %v7296_v44 = vld [vmem:[#allocation7 + $0x2f4] ss:$8 sps:$4 sm:$0xff]  }
 0x44c   : > { %v2649_v47 = vpop.f32.mrf.mxu0  ;;  %3673 = vmatprep.subr.bf16.mxu0 %v7296_v44  ;;  %v7297_v44 = vld [vmem:[#allocation7 + $0x2e0] ss:$8 sps:$4 sm:$0xff]  }
 0x44d   : > { %v11439_v41 = vmax.f32 %v8960_v0, 0.0  ;;  %v2650_v29 = vadd.f32 %v2649_v47, %v8937_v8  ;;  %v2924_v1 = vpack.c.bf16 %v11473_v5, %v11442_v50  ;;  %v11860_v47 = vmax.f32 %v8394_v17, 0.0  ;;  %v7299_v17 = vld [vmem:[#allocation7 + $0x2e4] ss:$8 sps:$4 sm:$0xff]  }
 0x44e   : > { %v2651_v39 = vpop.f32.mrf.mxu0 }
 0x44f   : > { %v2652_v11 = vadd.f32 %v2651_v39, %v8940_v25  ;;  %v2925_v7 = vpack.c.bf16 %v11439_v41, %v11476_v32  ;;  %v8979_v20 = vadd.f32 %v2650_v29, %v11858_v16  ;;  %v8988_v39 = vadd.f32 %v2648_v52, %v11860_v47  ;;  %v7317_v32 = vld [vmem:[#allocation7 + $0x284] ss:$8 sps:$4 sm:$0xff]  }
 0x450   : > { %v2653_v28 = vpop.f32.mrf.mxu0  ;;  %v11862_v47 = vmax.f32 %v8417_v12, 0.0 }
 0x451   : > { %v8983_v60 = vadd.f32 %v2652_v11, %v11859_v46  ;;  %v2654_v14 = vadd.f32 %v2653_v28, %v8937_v8  ;;  %3194 = vmatprep.mubr.bf16.mxu1 %v2925_v7  ;;  %v7294_v11 = vld [vmem:[#allocation7 + $0x2f0] ss:$8 sps:$4 sm:$0xff]   ;;  %v11441_v28 = vmax.f32 %v8979_v20, 0.0  ;;  %v11443_v52 = vmax.f32 %v8988_v39, 0.0 }
 0x452   : > { %v2657_v41 = vpop.f32.mrf.mxu0  ;;  %3195 = vmatmul.mubr.bf16.vlgmr.msra.gmra.mxu1 %v2924_v1  ;;  %3674 = vmatpush2.bf16.msra.mxu0 %v7294_v11  ;;  %v11865_v11 = vmax.f32 %v8430_v48, 0.0 }
 0x453   : > { %v8992_v40 = vadd.f32 %v2654_v14, %v11861_v55  ;;  %v11446_v29 = vmax.f32 %v8983_v60, 0.0  ;;  %v2658_v1 = vadd.f32 %v2657_v41, %v8940_v25  ;;  %v11863_v41 = vmax.f32 %v8421_v31, 0.0  ;;  %3675 = vmatprep.subr.bf16.mxu0 %v7299_v17 }
 0x454   : > { %v2659_v37 = vpop.f32.mrf.mxu0 }
 0x455   : > { %v11440_v22 = vmax.f32 %v8992_v40, 0.0  ;;  %v2660_v7 = vadd.f32 %v2659_v37, %v8937_v8  ;;  %v2926_v46 = vpack.c.bf16 %v11446_v29, %v11443_v52 }
 0x456   : > { %v2661_v30 = vpop.f32.mrf.mxu0  ;;  %3676 = vmatpush2.bf16.msra.mxu0 %v7297_v44 }
 0x457   : > { %v2662_v16 = vadd.f32 %v2661_v30, %v8940_v25  ;;  %v2927_v36 = vpack.c.bf16 %v11440_v22, %v11441_v28  ;;  %v9011_v55 = vadd.f32 %v2660_v7, %v11862_v47  ;;  %v7302_v22 = vld [vmem:[#allocation7 + $0x2d4] ss:$8 sps:$4 sm:$0xff]   ;;  %v11864_v28 = vmax.f32 %v8426_v34, 0.0  ;;  %v7305_v34 = vld [vmem:[#allocation7 + $0x2c4] ss:$8 sps:$4 sm:$0xff]  }
 0x458   : > { %v2663_v14 = vpop.f32.mrf.mxu0  ;;  %3677 = vmatprep.subr.bf16.mxu0 %v7302_v22  ;;  %v7303_v22 = vld [vmem:[#allocation7 + $0x2c0] ss:$8 sps:$4 sm:$0xff]  }
 0x459   : > { %v9015_v37 = vadd.f32 %v2662_v16, %v11863_v41  ;;  %v2664_v30 = vadd.f32 %v2663_v14, %v8937_v8  ;;  %3204 = vmatprep.mubr.bf16.mxu1 %v2927_v36  ;;  %v9020_v50 = vadd.f32 %v2658_v1, %v11864_v28  ;;  %v7300_v16 = vld [vmem:[#allocation7 + $0x2d0] ss:$8 sps:$4 sm:$0xff]   ;;  %v11445_v14 = vmax.f32 %v9011_v55, 0.0 }
 0x45a   : > { %v2667_v52 = vpop.f32.mrf.mxu0  ;;  %3205 = vmatmul.mubr.bf16.gmra.mxu1 %v2926_v46  ;;  %3678 = vmatpush2.bf16.msra.mxu0 %v7300_v16  ;;  %v11869_v16 = vmax.f32 %v8462_v4, 0.0 }
 0x45b   : > { %v9024_v12 = vadd.f32 %v2664_v30, %v11865_v11  ;;  %v11450_v7 = vmax.f32 %v9015_v37, 0.0  ;;  %v11447_v28 = vmax.f32 %v9020_v50, 0.0  ;;  %v2668_v1 = vadd.f32 %v2667_v52, %v8940_v25  ;;  %3679 = vmatprep.subr.bf16.mxu0 %v7305_v34 }
 0x45c   : > { %v2669_v31 = vpop.f32.mrf.mxu0  ;;  %v11866_v30 = vmax.f32 %v8449_v18, 0.0  ;;  %v11867_v52 = vmax.f32 %v8453_v49, 0.0 }
 0x45d   : > { %v11444_v17 = vmax.f32 %v9024_v12, 0.0  ;;  %v2670_v36 = vadd.f32 %v2669_v31, %v8937_v8  ;;  %v2928_v47 = vpack.c.bf16 %v11450_v7, %v11447_v28 }
 0x45e   : > { %v2671_v48 = vpop.f32.mrf.mxu0  ;;  %3680 = vmatpush2.bf16.msra.mxu0 %v7303_v22 }
 0x45f   : > { %v2672_v46 = vadd.f32 %v2671_v48, %v8940_v25  ;;  %v2929_v44 = vpack.c.bf16 %v11444_v17, %v11445_v14  ;;  %v9043_v11 = vadd.f32 %v2670_v36, %v11866_v30  ;;  %v7308_v17 = vld [vmem:[#allocation7 + $0x2b4] ss:$8 sps:$4 sm:$0xff]   ;;  %v11868_v14 = vmax.f32 %v8458_v21, 0.0  ;;  %v7311_v21 = vld [vmem:[#allocation7 + $0x2a4] ss:$8 sps:$4 sm:$0xff]  }
 0x460   : > { %v2673_v41 = vpop.f32.mrf.mxu0  ;;  %3681 = vmatprep.subr.bf16.mxu0 %v7308_v17  ;;  %v7309_v17 = vld [vmem:[#allocation7 + $0x2a0] ss:$8 sps:$4 sm:$0xff]  }
 0x461   : > { %v9047_v31 = vadd.f32 %v2672_v46, %v11867_v52  ;;  %v2674_v48 = vadd.f32 %v2673_v41, %v8937_v8  ;;  %3214 = vmatprep.mubr.bf16.mxu1 %v2929_v44  ;;  %v9052_v29 = vadd.f32 %v2668_v1, %v11868_v14  ;;  %v7306_v46 = vld [vmem:[#allocation7 + $0x2b0] ss:$8 sps:$4 sm:$0xff]   ;;  %v11449_v41 = vmax.f32 %v9043_v11, 0.0 }
 0x462   : > { %v2677_v28 = vpop.f32.mrf.mxu0  ;;  %3215 = vmatmul.mubr.bf16.gmra.mxu1 %v2928_v47  ;;  %3682 = vmatpush2.bf16.msra.mxu0 %v7306_v46  ;;  %v11873_v46 = vmax.f32 %v8494_v35, 0.0 }
 0x463   : > { %v9056_v18 = vadd.f32 %v2674_v48, %v11869_v16  ;;  %v11472_v36 = vmax.f32 %v9047_v31, 0.0  ;;  %v11451_v14 = vmax.f32 %v9052_v29, 0.0  ;;  %v2678_v1 = vadd.f32 %v2677_v28, %v8940_v25  ;;  %3683 = vmatprep.subr.bf16.mxu0 %v7311_v21 }
 0x464   : > { %v2679_v49 = vpop.f32.mrf.mxu0  ;;  %v11870_v48 = vmax.f32 %v8481_v62, 0.0  ;;  %v11871_v28 = vmax.f32 %v8485_v6, 0.0 }
 0x465   : > { %v11448_v34 = vmax.f32 %v9056_v18, 0.0  ;;  %v2680_v44 = vadd.f32 %v2679_v49, %v8937_v8  ;;  %v2930_v30 = vpack.c.bf16 %v11472_v36, %v11451_v14  ;;  %v11902_v36 = vld [vmem:[#allocation15_spill] sm:$0xff] }
 0x466   : > { %v2681_v4 = vpop.f32.mrf.mxu0  ;;  %3684 = vmatpush2.bf16.msra.mxu0 %v7309_v17  ;;  %v11903_v5 = vmax.f32 %v11902_v36, 0.0 }
 0x467   : > { %v2682_v47 = vadd.f32 %v2681_v4, %v8940_v25  ;;  %v2931_v22 = vpack.c.bf16 %v11448_v34, %v11449_v41  ;;  %v9075_v16 = vadd.f32 %v2680_v44, %v11870_v48  ;;  %v7314_v34 = vld [vmem:[#allocation7 + $0x294] ss:$8 sps:$4 sm:$0xff]   ;;  %v11872_v41 = vmax.f32 %v8490_v58, 0.0 }
 0x468   : > { %v2683_v52 = vpop.f32.mrf.mxu0  ;;  %3685 = vmatprep.subr.bf16.mxu0 %v7314_v34  ;;  %v11874_v34 = vmax.f32 %v8513_v57, 0.0 }
 0x469   : > { %v9079_v49 = vadd.f32 %v2682_v47, %v11871_v28  ;;  %v2684_v4 = vadd.f32 %v2683_v52, %v8937_v8  ;;  %3224 = vmatprep.mubr.bf16.mxu1 %v2931_v22  ;;  %v9084_v7 = vadd.f32 %v2678_v1, %v11872_v41  ;;  %v7312_v47 = vld [vmem:[#allocation7 + $0x290] ss:$8 sps:$4 sm:$0xff]   ;;  %v11471_v52 = vmax.f32 %v9075_v16, 0.0 }
 0x46a   : > { %v2687_v14 = vpop.f32.mrf.mxu0  ;;  %3225 = vmatmul.mubr.bf16.gmra.mxu1 %v2930_v30  ;;  %3686 = vmatpush2.bf16.msra.mxu0 %v7312_v47 }
 0x46b   : > { %v9088_v62 = vadd.f32 %v2684_v4, %v11873_v46  ;;  %v11468_v44 = vmax.f32 %v9079_v49, 0.0  ;;  %v11453_v58 = vmax.f32 %v9084_v7, 0.0  ;;  %v2688_v41 = vadd.f32 %v2687_v14, %v8940_v25  ;;  %3687 = vmatprep.subr.bf16.mxu0 %v7317_v32 }
 0x46c   : > { %v2689_v6 = vpop.f32.mrf.mxu0  ;;  %v11875_v14 = vmax.f32 %v8517_v15, 0.0 }
 0x46d   : > { %v11452_v21 = vmax.f32 %v9088_v62, 0.0  ;;  %v2690_v22 = vadd.f32 %v2689_v6, %v8937_v8  ;;  %v2932_v17 = vpack.c.bf16 %v11468_v44, %v11453_v58  ;;  %v11876_v6 = vmax.f32 %v8522_v53, 0.0  ;;  %v11893_v44 = vld [vmem:[#allocation12_spill] sm:$0xff] }
 0x46e   : > { %v2691_v1 = vpop.f32.mrf.mxu0  ;;  %v11877_v58 = vmax.f32 %v8526_v27, 0.0 }
 0x46f   : > { %v2692_v35 = vadd.f32 %v2691_v1, %v8940_v25  ;;  %v2933_v30 = vpack.c.bf16 %v11452_v21, %v11471_v52  ;;  %v9107_v28 = vadd.f32 %v2690_v22, %v11874_v34  ;;  %v9116_v1 = vadd.f32 %v2688_v41, %v11876_v6 }
 0x470   : > { %v2693_v48 = vpop.f32.mrf.mxu0 }
 0x471   : > { %v9111_v4 = vadd.f32 %v2692_v35, %v11875_v14  ;;  %v2694_v46 = vadd.f32 %v2693_v48, %v8937_v8  ;;  %3234 = vmatprep.mubr.bf16.mxu1 %v2933_v30  ;;  %v11455_v15 = vmax.f32 %v9107_v28, 0.0  ;;  %v11456_v30 = vmax.f32 %v9116_v1, 0.0 }
 0x472   : > { %v2697_v21 = vpop.f32.mrf.mxu0  ;;  %3235 = vmatmul.mubr.bf16.gmra.mxu1 %v2932_v17  ;;  %v11878_v14 = vmax.f32 %v8545_v23, 0.0 }
 0x473   : > { %v9120_v47 = vadd.f32 %v2694_v46, %v11877_v58  ;;  %v11457_v57 = vmax.f32 %v9111_v4, 0.0  ;;  %v2698_v53 = vadd.f32 %v2697_v21, %v8940_v25  ;;  %v11879_v21 = vmax.f32 %v8549_v38, 0.0 }
 0x474   : > { %v2699_v22 = vpop.f32.mrf.mxu0 }
 0x475   : > { %v11454_v35 = vmax.f32 %v9120_v47, 0.0  ;;  %v2700_v48 = vadd.f32 %v2699_v22, %v8937_v8  ;;  %v2934_v58 = vpack.c.bf16 %v11457_v57, %v11456_v30  ;;  %v11881_v30 = vmax.f32 %v8558_v24, 0.0 }
 0x476   : > { %v2701_v41 = vpop.f32.mrf.mxu0 }
 0x477   : > { %v2702_v17 = vadd.f32 %v2701_v41, %v8940_v25  ;;  %v2935_v27 = vpack.c.bf16 %v11454_v35, %v11455_v15  ;;  %v9139_v46 = vadd.f32 %v2700_v48, %v11878_v14  ;;  %v11880_v41 = vmax.f32 %v8554_v45, 0.0 }
 0x478   : > { %v2703_v34 = vpop.f32.mrf.mxu0 }
 0x479   : > { %v9143_v6 = vadd.f32 %v2702_v17, %v11879_v21  ;;  %v2704_v22 = vadd.f32 %v2703_v34, %v8937_v8  ;;  %3244 = vmatprep.mubr.bf16.mxu1 %v2935_v27  ;;  %v9148_v35 = vadd.f32 %v2698_v53, %v11880_v41  ;;  %v11459_v38 = vmax.f32 %v9139_v46, 0.0 }
 0x47a   : > { %v2707_v15 = vpop.f32.mrf.mxu0  ;;  %3245 = vmatmul.mubr.bf16.gmra.mxu1 %v2934_v58  ;;  %v11882_v21 = vmax.f32 %v8577_v13, 0.0 }
 0x47b   : > { %v9152_v57 = vadd.f32 %v2704_v22, %v11881_v30  ;;  %v11461_v23 = vmax.f32 %v9143_v6, 0.0  ;;  %v11460_v27 = vmax.f32 %v9148_v35, 0.0  ;;  %v2708_v45 = vadd.f32 %v2707_v15, %v8940_v25 }
 0x47c   : > { %v2709_v48 = vpop.f32.mrf.mxu0  ;;  %v11883_v15 = vmax.f32 %v8581_v19, 0.0 }
 0x47d   : > { %v11458_v17 = vmax.f32 %v9152_v57, 0.0  ;;  %v2710_v34 = vadd.f32 %v2709_v48, %v8937_v8  ;;  %v2936_v30 = vpack.c.bf16 %v11461_v23, %v11460_v27  ;;  %v11885_v27 = vmax.f32 %v8590_v10, 0.0 }
 0x47e   : > { %v2711_v53 = vpop.f32.mrf.mxu0 }
 0x47f   : > { %v2712_v58 = vadd.f32 %v2711_v53, %v8940_v25  ;;  %v2937_v24 = vpack.c.bf16 %v11458_v17, %v11459_v38  ;;  %v9171_v22 = vadd.f32 %v2710_v34, %v11882_v21  ;;  %v11884_v53 = vmax.f32 %v8586_v54, 0.0 }
 0x480   : > { %v2713_v14 = vpop.f32.mrf.mxu0 }
 0x481   : > { %v9175_v41 = vadd.f32 %v2712_v58, %v11883_v15  ;;  %v2714_v48 = vadd.f32 %v2713_v14, %v8937_v8  ;;  %3254 = vmatprep.mubr.bf16.mxu1 %v2937_v24  ;;  %v9180_v17 = vadd.f32 %v2708_v45, %v11884_v53  ;;  %v11463_v19 = vmax.f32 %v9171_v22, 0.0 }
 0x482   : > { %v2717_v38 = vpop.f32.mrf.mxu0  ;;  %3255 = vmatmul.mubr.bf16.gmra.mxu1 %v2936_v30  ;;  %v11886_v15 = vmax.f32 %v8609_v33, 0.0 }
 0x483   : > { %v9184_v23 = vadd.f32 %v2714_v48, %v11885_v27  ;;  %v11465_v13 = vmax.f32 %v9175_v41, 0.0  ;;  %v11464_v24 = vmax.f32 %v9180_v17, 0.0  ;;  %v2718_v54 = vadd.f32 %v2717_v38, %v8940_v25 }
 0x484   : > { %v2719_v34 = vpop.f32.mrf.mxu0  ;;  %v11887_v38 = vmax.f32 %v8613_v3, 0.0 }
 0x485   : > { %v11462_v58 = vmax.f32 %v9184_v23, 0.0  ;;  %v2720_v14 = vadd.f32 %v2719_v34, %v8937_v8  ;;  %v2938_v27 = vpack.c.bf16 %v11465_v13, %v11464_v24  ;;  %v11889_v24 = vmax.f32 %v8622_v61, 0.0 }
 0x486   : > { %v2721_v45 = vpop.f32.mrf.mxu0 }
 0x487   : > { %v2722_v30 = vadd.f32 %v2721_v45, %v8940_v25  ;;  %v2939_v10 = vpack.c.bf16 %v11462_v58, %v11463_v19  ;;  %v9203_v48 = vadd.f32 %v2720_v14, %v11886_v15  ;;  %v11888_v45 = vmax.f32 %v8618_v51, 0.0 }
 0x488   : > { %v2723_v21 = vpop.f32.mrf.mxu0 }
 0x489   : > { %v9207_v53 = vadd.f32 %v2722_v30, %v11887_v38  ;;  %v2724_v34 = vadd.f32 %v2723_v21, %v8937_v8  ;;  %3264 = vmatprep.mubr.bf16.mxu1 %v2939_v10  ;;  %v9212_v58 = vadd.f32 %v2718_v54, %v11888_v45  ;;  %v11467_v3 = vmax.f32 %v9203_v48, 0.0 }
 0x48a   : > { %v2727_v19 = vpop.f32.mrf.mxu0  ;;  %3265 = vmatmul.mubr.bf16.gmra.mxu1 %v2938_v27  ;;  %v11890_v38 = vmax.f32 %v8641_v43, 0.0 }
 0x48b   : > { %v9216_v13 = vadd.f32 %v2724_v34, %v11889_v24  ;;  %v11470_v33 = vmax.f32 %v9207_v53, 0.0  ;;  %v11469_v10 = vmax.f32 %v9212_v58, 0.0  ;;  %v2728_v51 = vadd.f32 %v2727_v19, %v8940_v25 }
 0x48c   : > { %v2729_v14 = vpop.f32.mrf.mxu0  ;;  %v11891_v19 = vmax.f32 %v8645_v56, 0.0 }
 0x48d   : > { %v11466_v30 = vmax.f32 %v9216_v13, 0.0  ;;  %v2730_v21 = vadd.f32 %v2729_v14, %v8937_v8  ;;  %v2940_v24 = vpack.c.bf16 %v11470_v33, %v11469_v10  ;;  %v11894_v10 = vmax.f32 %v11893_v44, 0.0 }
 0x48e   : > { %v2731_v54 = vpop.f32.mrf.mxu0 }
 0x48f   : > { %v2732_v27 = vadd.f32 %v2731_v54, %v8940_v25  ;;  %v2941_v61 = vpack.c.bf16 %v11466_v30, %v11467_v3  ;;  %v9235_v34 = vadd.f32 %v2730_v21, %v11890_v38  ;;  %v11892_v54 = vmax.f32 %v8650_v42, 0.0 }
 0x490   : > { %v2733_v15 = vpop.f32.mrf.mxu0 }
 0x491   : > { %v9239_v45 = vadd.f32 %v2732_v27, %v11891_v19  ;;  %v2734_v14 = vadd.f32 %v2733_v15, %v8937_v8  ;;  %3274 = vmatprep.mubr.bf16.mxu1 %v2941_v61  ;;  %v9244_v30 = vadd.f32 %v2728_v51, %v11892_v54  ;;  %v11475_v56 = vmax.f32 %v9235_v34, 0.0  ;;  %v11896_v19 = vld [vmem:[#allocation13_spill] sm:$0xff] }
 0x492   : > { %v2737_v3 = vpop.f32.mrf.mxu0  ;;  %3275 = vmatmul.mubr.bf16.gmra.mxu1 %v2940_v24 }
 0x493   : > { %v9248_v33 = vadd.f32 %v2734_v14, %v11894_v10  ;;  %v11478_v43 = vmax.f32 %v9239_v45, 0.0  ;;  %v11477_v61 = vmax.f32 %v9244_v30, 0.0  ;;  %v2738_v42 = vadd.f32 %v2737_v3, %v8940_v25 }
 0x494   : > { %v2739_v21 = vpop.f32.mrf.mxu0  ;;  %v11897_v14 = vmax.f32 %v11896_v19, 0.0 }
 0x495   : > { %11895 = vst [vmem:[#allocation12_spill] sm:$0xff] %v9248_v33  ;;  %v11474_v27 = vmax.f32 %v9248_v33, 0.0  ;;  %v2740_v15 = vadd.f32 %v2739_v21, %v8937_v8  ;;  %v2942_v10 = vpack.c.bf16 %v11478_v43, %v11477_v61  ;;  %v11899_v21 = vld [vmem:[#allocation14_spill] sm:$0xff]  ;;  %v11905_v61 = vld [vmem:[#allocation16_spill] sm:$0xff] }
 0x496   : > { %v2741_v51 = vpop.f32.mrf.mxu0  ;;  %v11900_v3 = vmax.f32 %v11899_v21, 0.0  ;;  %v11906_v43 = vmax.f32 %v11905_v61, 0.0  ;;  %v11908_v21 = vld [vmem:[#allocation17_spill] sm:$0xff] }
 0x497   : > { %v2742_v24 = vadd.f32 %v2741_v51, %v8940_v25  ;;  %v2943_v44 = vpack.c.bf16 %v11474_v27, %v11475_v56  ;;  %v9267_v54 = vadd.f32 %v2740_v15, %v11897_v14  ;;  %v9276_v27 = vadd.f32 %v2738_v42, %v11903_v5  ;;  %v7315_v15 = vld [vmem:[#allocation7 + $0x280] ss:$8 sps:$4 sm:$0xff]  }
 0x498   : > { %v2743_v38 = vpop.f32.mrf.mxu0  ;;  %3688 = vmatpush2.bf16.msra.mxu0 %v7315_v15  ;;  %v11911_v15 = vld [vmem:[#allocation18_spill] sm:$0xff] }
 0x499   : > { %11898 = vst [vmem:[#allocation13_spill] sm:$0xff] %v9267_v54  ;;  %v9271_v52 = vadd.f32 %v2742_v24, %v11900_v3  ;;  %v2744_v51 = vadd.f32 %v2743_v38, %v8937_v8  ;;  %3284 = vmatprep.mubr.bf16.mxu1 %v2943_v44  ;;  %11904 = vst [vmem:[#allocation15_spill] sm:$0xff] %v9276_v27  ;;  %v11483_v24 = vmax.f32 %v9267_v54, 0.0  ;;  %v11485_v5 = vmax.f32 %v9276_v27, 0.0  ;;  %v11914_v54 = vld [vmem:[#allocation19_spill] sm:$0xff]  ;;  %v11917_v27 = vld [vmem:[#allocation20_spill] sm:$0xff] }
 0x49a   : > { %v2747_v56 = vpop.f32.mrf.mxu0  ;;  %3285 = vmatmul.mubr.bf16.gmra.mxu1 %v2942_v10  ;;  %v11909_v3 = vmax.f32 %v11908_v21, 0.0 }
 0x49b   : > { %11901 = vst [vmem:[#allocation14_spill] sm:$0xff] %v9271_v52  ;;  %v9280_v33 = vadd.f32 %v2744_v51, %v11906_v43  ;;  %v11486_v19 = vmax.f32 %v9271_v52, 0.0  ;;  %v2748_v42 = vadd.f32 %v2747_v56, %v8940_v25  ;;  %v11912_v56 = vmax.f32 %v11911_v15, 0.0  ;;  %v11920_v15 = vld [vmem:[#allocation21_spill] sm:$0xff] }
 0x49c   : > { %v2749_v14 = vpop.f32.mrf.mxu0 }
 0x49d   : > { %11907 = vst [vmem:[#allocation16_spill] sm:$0xff] %v9280_v33  ;;  %v11482_v44 = vmax.f32 %v9280_v33, 0.0  ;;  %v2750_v36 = vadd.f32 %v2749_v14, %v8937_v8  ;;  %v2944_v32 = vpack.c.bf16 %v11486_v19, %v11485_v5  ;;  %v11915_v33 = vmax.f32 %v11914_v54, 0.0 }
 0x49e   : > { %v2751_v10 = vpop.f32.mrf.mxu0  ;;  %v11918_v5 = vmax.f32 %v11917_v27, 0.0 }
 0x49f   : > { %v2752_v43 = vadd.f32 %v2751_v10, %v8940_v25  ;;  %v2945_v61 = vpack.c.bf16 %v11482_v44, %v11483_v24  ;;  %v9299_v51 = vadd.f32 %v2750_v36, %v11909_v3  ;;  %v9308_v44 = vadd.f32 %v2748_v42, %v11915_v33 }
 0x4a0   : > { %v2753_v38 = vpop.f32.mrf.mxu0 }
 0x4a1   : > { %11910 = vst [vmem:[#allocation17_spill] sm:$0xff] %v9299_v51  ;;  %v9303_v14 = vadd.f32 %v2752_v43, %v11912_v56  ;;  %v2754_v10 = vadd.f32 %v2753_v38, %v8937_v8  ;;  %3294 = vmatprep.mubr.bf16.mxu1 %v2945_v61  ;;  %11916 = vst [vmem:[#allocation19_spill] sm:$0xff] %v9308_v44  ;;  %v11491_v3 = vmax.f32 %v9299_v51, 0.0  ;;  %v11493_v61 = vmax.f32 %v9308_v44, 0.0  ;;  %v11926_v51 = vld [vmem:[#allocation23_spill] sm:$0xff]  ;;  %v11929_v44 = vld [vmem:[#allocation24_spill] sm:$0xff] }
 0x4a2   : > { %v2757_v24 = vpop.f32.mrf.mxu0  ;;  %3295 = vmatmul.mubr.bf16.gmra.mxu1 %v2944_v32  ;;  %v11921_v56 = vmax.f32 %v11920_v15, 0.0 }
 0x4a3   : > { %11913 = vst [vmem:[#allocation18_spill] sm:$0xff] %v9303_v14  ;;  %v9312_v19 = vadd.f32 %v2754_v10, %v11918_v5  ;;  %v11494_v36 = vmax.f32 %v9303_v14, 0.0  ;;  %v2758_v33 = vadd.f32 %v2757_v24, %v8940_v25 }
 0x4a4   : > { %v2759_v21 = vpop.f32.mrf.mxu0 }
 0x4a5   : > { %11919 = vst [vmem:[#allocation20_spill] sm:$0xff] %v9312_v19  ;;  %v11490_v43 = vmax.f32 %v9312_v19, 0.0  ;;  %v2760_v38 = vadd.f32 %v2759_v21, %v8937_v8  ;;  %v2946_v5 = vpack.c.bf16 %v11494_v36, %v11493_v61  ;;  %v11923_v21 = vld [vmem:[#allocation22_spill] sm:$0xff]  ;;  %v11927_v19 = vmax.f32 %v11926_v51, 0.0 }
 0x4a6   : > { %v2761_v54 = vpop.f32.mrf.mxu0  ;;  %v11924_v24 = vmax.f32 %v11923_v21, 0.0  ;;  %v11930_v61 = vmax.f32 %v11929_v44, 0.0  ;;  %v11932_v21 = vld [vmem:[#allocation25_spill] sm:$0xff] }
 0x4a7   : > { %v2762_v42 = vadd.f32 %v2761_v54, %v8940_v25  ;;  %v2947_v27 = vpack.c.bf16 %v11490_v43, %v11491_v3  ;;  %v9331_v10 = vadd.f32 %v2760_v38, %v11921_v56  ;;  %v9340_v43 = vadd.f32 %v2758_v33, %v11927_v19 }
 0x4a8   : > { %v2763_v32 = vpop.f32.mrf.mxu0 }
 0x4a9   : > { %11922 = vst [vmem:[#allocation21_spill] sm:$0xff] %v9331_v10  ;;  %v9335_v52 = vadd.f32 %v2762_v42, %v11924_v24  ;;  %v2764_v54 = vadd.f32 %v2763_v32, %v8937_v8  ;;  %3304 = vmatprep.mubr.bf16.mxu1 %v2947_v27  ;;  %11928 = vst [vmem:[#allocation23_spill] sm:$0xff] %v9340_v43  ;;  %v11499_v56 = vmax.f32 %v9331_v10, 0.0  ;;  %v11501_v27 = vmax.f32 %v9340_v43, 0.0  ;;  %v11938_v10 = vld [vmem:[#allocation27_spill] sm:$0xff]  ;;  %v11941_v43 = vld [vmem:[#allocation28_spill] sm:$0xff] }
 0x4aa   : > { %v2767_v3 = vpop.f32.mrf.mxu0  ;;  %3305 = vmatmul.mubr.bf16.gmra.mxu1 %v2946_v5  ;;  %v11933_v24 = vmax.f32 %v11932_v21, 0.0 }
 0x4ab   : > { %11925 = vst [vmem:[#allocation22_spill] sm:$0xff] %v9335_v52  ;;  %v9344_v36 = vadd.f32 %v2764_v54, %v11930_v61  ;;  %v11502_v38 = vmax.f32 %v9335_v52, 0.0  ;;  %v2768_v19 = vadd.f32 %v2767_v3, %v8940_v25 }
 0x4ac   : > { %v2769_v15 = vpop.f32.mrf.mxu0 }
 0x4ad   : > { %11931 = vst [vmem:[#allocation24_spill] sm:$0xff] %v9344_v36  ;;  %v11498_v42 = vmax.f32 %v9344_v36, 0.0  ;;  %v2770_v32 = vadd.f32 %v2769_v15, %v8937_v8  ;;  %v2948_v61 = vpack.c.bf16 %v11502_v38, %v11501_v27  ;;  %v11935_v15 = vld [vmem:[#allocation26_spill] sm:$0xff]  ;;  %v11939_v36 = vmax.f32 %v11938_v10, 0.0 }
 0x4ae   : > { %v2771_v51 = vpop.f32.mrf.mxu0  ;;  %v11936_v3 = vmax.f32 %v11935_v15, 0.0  ;;  %v11942_v27 = vmax.f32 %v11941_v43, 0.0  ;;  %v11944_v15 = vld [vmem:[#allocation29_spill] sm:$0xff] }
 0x4af   : > { %v2772_v33 = vadd.f32 %v2771_v51, %v8940_v25  ;;  %v2949_v44 = vpack.c.bf16 %v11498_v42, %v11499_v56  ;;  %v9363_v54 = vadd.f32 %v2770_v32, %v11933_v24  ;;  %v9372_v42 = vadd.f32 %v2768_v19, %v11939_v36 }
 0x4b0   : > { %v2773_v5 = vpop.f32.mrf.mxu0 }
 0x4b1   : > { %11934 = vst [vmem:[#allocation25_spill] sm:$0xff] %v9363_v54  ;;  %v9367_v14 = vadd.f32 %v2772_v33, %v11936_v3  ;;  %v2774_v51 = vadd.f32 %v2773_v5, %v8937_v8  ;;  %3314 = vmatprep.mubr.bf16.mxu1 %v2949_v44  ;;  %11940 = vst [vmem:[#allocation27_spill] sm:$0xff] %v9372_v42  ;;  %v11507_v24 = vmax.f32 %v9363_v54, 0.0  ;;  %v11509_v44 = vmax.f32 %v9372_v42, 0.0  ;;  %v11950_v54 = vld [vmem:[#allocation31_spill] sm:$0xff]  ;;  %v11953_v42 = vld [vmem:[#allocation32_spill] sm:$0xff] }
 0x4b2   : > { %v2777_v56 = vpop.f32.mrf.mxu0  ;;  %3315 = vmatmul.mubr.bf16.gmra.mxu1 %v2948_v61  ;;  %v11945_v3 = vmax.f32 %v11944_v15, 0.0 }
 0x4b3   : > { %11937 = vst [vmem:[#allocation26_spill] sm:$0xff] %v9367_v14  ;;  %v9376_v38 = vadd.f32 %v2774_v51, %v11942_v27  ;;  %v11510_v32 = vmax.f32 %v9367_v14, 0.0  ;;  %v2778_v36 = vadd.f32 %v2777_v56, %v8940_v25 }
 0x4b4   : > { %v2779_v21 = vpop.f32.mrf.mxu0 }
 0x4b5   : > { %11943 = vst [vmem:[#allocation28_spill] sm:$0xff] %v9376_v38  ;;  %v11506_v33 = vmax.f32 %v9376_v38, 0.0  ;;  %v2780_v5 = vadd.f32 %v2779_v21, %v8937_v8  ;;  %v2950_v27 = vpack.c.bf16 %v11510_v32, %v11509_v44  ;;  %v11947_v21 = vld [vmem:[#allocation30_spill] sm:$0xff]  ;;  %v11951_v38 = vmax.f32 %v11950_v54, 0.0 }
 0x4b6   : > { %v2781_v10 = vpop.f32.mrf.mxu0  ;;  %v11948_v56 = vmax.f32 %v11947_v21, 0.0  ;;  %v11954_v44 = vmax.f32 %v11953_v42, 0.0  ;;  %v11956_v21 = vld [vmem:[#allocation33_spill] sm:$0xff] }
 0x4b7   : > { %v2782_v19 = vadd.f32 %v2781_v10, %v8940_v25  ;;  %v2951_v43 = vpack.c.bf16 %v11506_v33, %v11507_v24  ;;  %v9395_v51 = vadd.f32 %v2780_v5, %v11945_v3  ;;  %v9404_v33 = vadd.f32 %v2778_v36, %v11951_v38 }
 0x4b8   : > { %v2783_v61 = vpop.f32.mrf.mxu0 }
 0x4b9   : > { %11946 = vst [vmem:[#allocation29_spill] sm:$0xff] %v9395_v51  ;;  %v9399_v52 = vadd.f32 %v2782_v19, %v11948_v56  ;;  %v2784_v10 = vadd.f32 %v2783_v61, %v8937_v8  ;;  %3324 = vmatprep.mubr.bf16.mxu1 %v2951_v43  ;;  %11952 = vst [vmem:[#allocation31_spill] sm:$0xff] %v9404_v33  ;;  %v11514_v3 = vmax.f32 %v9395_v51, 0.0  ;;  %v11516_v43 = vmax.f32 %v9404_v33, 0.0 }
 0x4ba   : > { %v2787_v24 = vpop.f32.mrf.mxu0  ;;  %3325 = vmatmul.mubr.bf16.gmra.mxu1 %v2950_v27  ;;  %v11957_v56 = vmax.f32 %v11956_v21, 0.0 }
 0x4bb   : > { %11949 = vst [vmem:[#allocation30_spill] sm:$0xff] %v9399_v52  ;;  %v9408_v32 = vadd.f32 %v2784_v10, %v11954_v44  ;;  %v11521_v5 = vmax.f32 %v9399_v52, 0.0  ;;  %v2788_v38 = vadd.f32 %v2787_v24, %v8940_v25 }
 0x4bc   : > { %v2789_v15 = vpop.f32.mrf.mxu0 }
 0x4bd   : > { %11955 = vst [vmem:[#allocation32_spill] sm:$0xff] %v9408_v32  ;;  %v11513_v19 = vmax.f32 %v9408_v32, 0.0  ;;  %v2790_v61 = vadd.f32 %v2789_v15, %v8937_v8  ;;  %v2952_v44 = vpack.c.bf16 %v11521_v5, %v11516_v43  ;;  %v11959_v15 = vld [vmem:[#allocation34_spill] sm:$0xff] }
 0x4be   : > { %v2791_v54 = vpop.f32.mrf.mxu0  ;;  %v11960_v24 = vmax.f32 %v11959_v15, 0.0  ;;  %v7327_v15 = vld [vmem:[#allocation5 + $0x340] ss:$8 sps:$4 sm:$0xff]  }
 0x4bf   : > { %v2792_v36 = vadd.f32 %v2791_v54, %v8940_v25  ;;  %v2953_v42 = vpack.c.bf16 %v11513_v19, %v11514_v3  ;;  %v9427_v10 = vadd.f32 %v2790_v61, %v11957_v56  ;;  %v11962_v54 = vld [vmem:[#allocation35_spill] sm:$0xff]  ;;  %v11965_v3 = vld [vmem:[#allocation36_spill] sm:$0xff] }
 0x4c0   : > { %v2793_v27 = vpop.f32.mrf.mxu0  ;;  %v11963_v32 = vmax.f32 %v11962_v54, 0.0  ;;  %v11966_v33 = vmax.f32 %v11965_v3, 0.0  ;;  %v7320_v3 = vld [vmem:[#allocation5 + $0x374] ss:$8 sps:$4 sm:$0xff]  }
 0x4c1   : > { %11958 = vst [vmem:[#allocation33_spill] sm:$0xff] %v9427_v10  ;;  %v9431_v14 = vadd.f32 %v2792_v36, %v11960_v24  ;;  %v2794_v25 = vadd.f32 %v2793_v27, %v8937_v8  ;;  %3334 = vmatprep.mubr.bf16.mxu1 %v2953_v42  ;;  %v11520_v61 = vmax.f32 %v9427_v10, 0.0  ;;  %4216 = vmatprep.subr.bf16.mxu1 %v7320_v3  ;;  %v7323_v42 = vld [vmem:[#allocation5 + $0x364] ss:$8 sps:$4 sm:$0xff]   ;;  %v7326_v27 = vld [vmem:[#allocation5 + $0x354] ss:$8 sps:$4 sm:$0xff]  }
 0x4c2   : > { %v9436_v19 = vadd.f32 %v2788_v38, %v11963_v32  ;;  %3335 = vmatmul.mubr.bf16.gmra.mxu1 %v2952_v44  ;;  %v7321_v38 = vld [vmem:[#allocation5 + $0x360] ss:$8 sps:$4 sm:$0xff]   ;;  %v7324_v44 = vld [vmem:[#allocation5 + $0x350] ss:$8 sps:$4 sm:$0xff]   ;;  %v7329_v24 = vld [vmem:[#allocation5 + $0x344] ss:$8 sps:$4 sm:$0xff]  }
 0x4c3   : > { %11961 = vst [vmem:[#allocation34_spill] sm:$0xff] %v9431_v14  ;;  %v9440_v43 = vadd.f32 %v2794_v25, %v11966_v33  ;;  %v11519_v21 = vmax.f32 %v9431_v14, 0.0  ;;  %v7318_v33 = vld [vmem:[#allocation5 + $0x370] ss:$8 sps:$4 sm:$0xff]   ;;  %v6667_v25 = vld [vmem:[%s11253_s4 + $0x4] sm:$0x3] }
 0x4c4   : > { %11964 = vst [vmem:[#allocation35_spill] sm:$0xff] %v9436_v19  ;;  %v11518_v36 = vmax.f32 %v9436_v19, 0.0  ;;  %4217 = vmatpush1.bf16.msra.mxu1 %v7318_v33  ;;  %v7332_v33 = vld [vmem:[#allocation5 + $0x334] ss:$8 sps:$4 sm:$0xff]   ;;  %v9461_v3 = vrot.slane %v6667_v25, %v7874_v2 }
 0x4c5   : > { %11967 = vst [vmem:[#allocation36_spill] sm:$0xff] %v9440_v43  ;;  %v11517_v56 = vmax.f32 %v9440_v43, 0.0  ;;  %4218 = vmatprep.subr.bf16.mxu1 %v7323_v42  ;;  %v7336_v43 = vld [vmem:[#allocation5 + $0x310] ss:$8 sps:$4 sm:$0xff]  }
 0x4c6   : > { %v2954_v32 = vpack.c.bf16 %v11519_v21, %v11518_v36  ;;  %v7338_v21 = vld [vmem:[#allocation5 + $0x314] ss:$8 sps:$4 sm:$0xff]  }
 0x4c7   : > { %v2955_v8 = vpack.c.bf16 %v11517_v56, %v11520_v61 }
 0x4c8   : > { %4219 = vmatpush1.bf16.msra.mxu1 %v7321_v38 }
 0x4c9   : > { %3344 = vmatprep.mubr.bf16.mxu1 %v2955_v8  ;;  %4220 = vmatprep.subr.bf16.mxu1 %v7326_v27  ;;  %v9458_v8 = vrot.slane %v6667_v25, %v7872_v63 }
 0x4ca   : > { %3345 = vmatmul.mubr.bf16.gmra.mxu1 %v2954_v32  ;;  %v7330_v32 = vld [vmem:[#allocation5 + $0x330] ss:$8 sps:$4 sm:$0xff]  }
 0x4cc   : > { %4221 = vmatpush1.bf16.msra.mxu1 %v7324_v44 }
 0x4cd   : > { %4222 = vmatprep.subr.bf16.mxu1 %v7329_v24  ;;  %v7335_v24 = vld [vmem:[#allocation5 + $0x324] ss:$8 sps:$4 sm:$0xff]  }
 0x4d0   : > { %4223 = vmatpush1.bf16.msra.mxu1 %v7327_v15  ;;  %v7333_v15 = vld [vmem:[#allocation5 + $0x320] ss:$8 sps:$4 sm:$0xff]  }
 0x4d1   : > { %4224 = vmatprep.subr.bf16.mxu1 %v7332_v33 }
 0x4d4   : > { %4225 = vmatpush1.bf16.msra.mxu1 %v7330_v32  ;;  %v7341_v32 = vld [vmem:[#allocation5 + $0x304] ss:$8 sps:$4 sm:$0xff]  }
 0x4d5   : > { %4226 = vmatprep.subr.bf16.mxu1 %v7335_v24  ;;  %v7347_v24 = vld [vmem:[#allocation5 + $0x3e4] ss:$8 sps:$4 sm:$0xff]  }
 0x4d8   : > { %4227 = vmatpush1.bf16.msra.mxu1 %v7333_v15 }
 0x4d9   : > { %4228 = vmatprep.subr.bf16.mxu1 %v7338_v21 }
 0x4dc   : > { %4229 = vmatpush1.bf16.msra.mxu1 %v7336_v43 }
 0x4dd   : > { %4230 = vmatprep.subr.bf16.mxu1 %v7341_v32 }
 0x512   : > { %v3196_v54 = vpop.f32.mrf.mxu1 }
 0x513   : > { %v3197_v56 = vadd.f32 %v3196_v54, %v9461_v3  ;;  %v7339_v54 = vld [vmem:[#allocation5 + $0x300] ss:$8 sps:$4 sm:$0xff]  }
 0x514   : > { %v3198_v38 = vpop.f32.mrf.mxu1  ;;  %4231 = vmatpush1.bf16.msra.mxu1 %v7339_v54 }
 0x515   : > { %v3199_v44 = vadd.f32 %v3198_v38, %v9458_v8  ;;  %v3355_v38 = vmax.f32 %v3197_v56, 0.0 }
 0x516   : > { %v3200_v42 = vpop.f32.mrf.mxu1 }
 0x517   : > { %v3201_v27 = vadd.f32 %v3200_v42, %v9461_v3  ;;  %v3356_v33 = vmax.f32 %v3199_v44, 0.0 }
 0x518   : > { %v3202_v36 = vpop.f32.mrf.mxu1 }
 0x519   : > { %v3203_v61 = vadd.f32 %v3202_v36, %v9458_v8  ;;  %v3357_v5 = vmax.f32 %v3201_v27, 0.0  ;;  %v7344_v27 = vld [vmem:[#allocation5 + $0x3f4] ss:$8 sps:$4 sm:$0xff]  }
 0x51a   : > { %v3206_v25 = vpop.f32.mrf.mxu1  ;;  %4232 = vmatprep.subr.bf16.mxu1 %v7344_v27 }
 0x51b   : > { %v3358_v19 = vmax.f32 %v3203_v61, 0.0  ;;  %v3419_v10 = vpack.c.bf16 %v3357_v5, %v3355_v38  ;;  %v3207_v15 = vadd.f32 %v3206_v25, %v9461_v3  ;;  %v7342_v5 = vld [vmem:[#allocation5 + $0x3f0] ss:$8 sps:$4 sm:$0xff]  }
 0x51c   : > { %v3208_v14 = vpop.f32.mrf.mxu1  ;;  %4233 = vmatpush2.bf16.msra.mxu1 %v7342_v5 }
 0x51d   : > { %v3420_v42 = vpack.c.bf16 %v3358_v19, %v3356_v33  ;;  %v3209_v51 = vadd.f32 %v3208_v14, %v9458_v8  ;;  %v3359_v14 = vmax.f32 %v3207_v15, 0.0  ;;  %4234 = vmatprep.subr.bf16.mxu1 %v7347_v24 }
 0x51e   : > { %v3210_v52 = vpop.f32.mrf.mxu1 }
 0x51f   : > { %v3211_v36 = vadd.f32 %v3210_v52, %v9461_v3  ;;  %3689 = vmatprep.mubr.bf16.mxu0 %v3420_v42  ;;  %v3360_v19 = vmax.f32 %v3209_v51, 0.0  ;;  %v7345_v42 = vld [vmem:[#allocation5 + $0x3e0] ss:$8 sps:$4 sm:$0xff]  }
 0x520   : > { %v3212_v44 = vpop.f32.mrf.mxu1  ;;  %3690 = vmatmul.mubr.bf16.vlgmr.msra.gmra.mxu0 %v3419_v10  ;;  %4235 = vmatpush2.bf16.msra.mxu1 %v7345_v42 }
 0x521   : > { %v3213_v21 = vadd.f32 %v3212_v44, %v9458_v8  ;;  %v3361_v61 = vmax.f32 %v3211_v36, 0.0  ;;  %v7350_v36 = vld [vmem:[#allocation5 + $0x3d4] ss:$8 sps:$4 sm:$0xff]  }
 0x522   : > { %v3216_v56 = vpop.f32.mrf.mxu1  ;;  %4236 = vmatprep.subr.bf16.mxu1 %v7350_v36 }
 0x523   : > { %v3362_v43 = vmax.f32 %v3213_v21, 0.0  ;;  %v3421_v38 = vpack.c.bf16 %v3361_v61, %v3359_v14  ;;  %v3217_v54 = vadd.f32 %v3216_v56, %v9461_v3  ;;  %v7348_v21 = vld [vmem:[#allocation5 + $0x3d0] ss:$8 sps:$4 sm:$0xff]  }
 0x524   : > { %v3218_v33 = vpop.f32.mrf.mxu1  ;;  %4237 = vmatpush2.bf16.msra.mxu1 %v7348_v21 }
 0x525   : > { %v3422_v52 = vpack.c.bf16 %v3362_v43, %v3360_v19  ;;  %v3219_v25 = vadd.f32 %v3218_v33, %v9458_v8  ;;  %v7353_v19 = vld [vmem:[#allocation5 + $0x3c4] ss:$8 sps:$4 sm:$0xff]   ;;  %v3363_v43 = vmax.f32 %v3217_v54, 0.0 }
 0x526   : > { %v3220_v32 = vpop.f32.mrf.mxu1  ;;  %4238 = vmatprep.subr.bf16.mxu1 %v7353_v19 }
 0x527   : > { %v3221_v10 = vadd.f32 %v3220_v32, %v9461_v3  ;;  %3699 = vmatprep.mubr.bf16.mxu0 %v3422_v52  ;;  %v3364_v61 = vmax.f32 %v3219_v25, 0.0  ;;  %v7351_v32 = vld [vmem:[#allocation5 + $0x3c0] ss:$8 sps:$4 sm:$0xff]  }
 0x528   : > { %v3222_v51 = vpop.f32.mrf.mxu1  ;;  %3700 = vmatmul.mubr.bf16.gmra.mxu0 %v3421_v38  ;;  %4239 = vmatpush2.bf16.msra.mxu1 %v7351_v32 }
 0x529   : > { %v3223_v27 = vadd.f32 %v3222_v51, %v9458_v8  ;;  %v3365_v15 = vmax.f32 %v3221_v10, 0.0  ;;  %v7356_v10 = vld [vmem:[#allocation5 + $0x3b4] ss:$8 sps:$4 sm:$0xff]  }
 0x52a   : > { %v3226_v44 = vpop.f32.mrf.mxu1  ;;  %4240 = vmatprep.subr.bf16.mxu1 %v7356_v10 }
 0x52b   : > { %v3366_v5 = vmax.f32 %v3223_v27, 0.0  ;;  %v3423_v52 = vpack.c.bf16 %v3365_v15, %v3363_v43  ;;  %v3227_v42 = vadd.f32 %v3226_v44, %v9461_v3  ;;  %v7354_v27 = vld [vmem:[#allocation5 + $0x3b0] ss:$8 sps:$4 sm:$0xff]  }
 0x52c   : > { %v3228_v14 = vpop.f32.mrf.mxu1  ;;  %4241 = vmatpush2.bf16.msra.mxu1 %v7354_v27 }
 0x52d   : > { %v3424_v33 = vpack.c.bf16 %v3366_v5, %v3364_v61  ;;  %v3229_v56 = vadd.f32 %v3228_v14, %v9458_v8  ;;  %v7359_v61 = vld [vmem:[#allocation5 + $0x3a4] ss:$8 sps:$4 sm:$0xff]   ;;  %v3367_v5 = vmax.f32 %v3227_v42, 0.0 }
 0x52e   : > { %v3230_v24 = vpop.f32.mrf.mxu1  ;;  %4242 = vmatprep.subr.bf16.mxu1 %v7359_v61 }
 0x52f   : > { %v3231_v38 = vadd.f32 %v3230_v24, %v9461_v3  ;;  %3709 = vmatprep.mubr.bf16.mxu0 %v3424_v33  ;;  %v3368_v15 = vmax.f32 %v3229_v56, 0.0  ;;  %v7357_v24 = vld [vmem:[#allocation5 + $0x3a0] ss:$8 sps:$4 sm:$0xff]  }
 0x530   : > { %v3232_v25 = vpop.f32.mrf.mxu1  ;;  %3710 = vmatmul.mubr.bf16.gmra.mxu0 %v3423_v52  ;;  %4243 = vmatpush2.bf16.msra.mxu1 %v7357_v24 }
 0x531   : > { %v3233_v36 = vadd.f32 %v3232_v25, %v9458_v8  ;;  %v3369_v54 = vmax.f32 %v3231_v38, 0.0  ;;  %v7362_v38 = vld [vmem:[#allocation5 + $0x394] ss:$8 sps:$4 sm:$0xff]  }
 0x532   : > { %v3236_v51 = vpop.f32.mrf.mxu1  ;;  %4244 = vmatprep.subr.bf16.mxu1 %v7362_v38 }
 0x533   : > { %v3370_v21 = vmax.f32 %v3233_v36, 0.0  ;;  %v3425_v33 = vpack.c.bf16 %v3369_v54, %v3367_v5  ;;  %v3237_v32 = vadd.f32 %v3236_v51, %v9461_v3  ;;  %v7360_v36 = vld [vmem:[#allocation5 + $0x390] ss:$8 sps:$4 sm:$0xff]  }
 0x534   : > { %v3238_v43 = vpop.f32.mrf.mxu1  ;;  %4245 = vmatpush2.bf16.msra.mxu1 %v7360_v36 }
 0x535   : > { %v3426_v14 = vpack.c.bf16 %v3370_v21, %v3368_v15  ;;  %v3239_v44 = vadd.f32 %v3238_v43, %v9458_v8  ;;  %v3371_v15 = vmax.f32 %v3237_v32, 0.0 }
 0x536   : > { %v3240_v19 = vpop.f32.mrf.mxu1 }
 0x537   : > { %v3241_v52 = vadd.f32 %v3240_v19, %v9461_v3  ;;  %3719 = vmatprep.mubr.bf16.mxu0 %v3426_v14  ;;  %v3372_v54 = vmax.f32 %v3239_v44, 0.0 }
 0x538   : > { %v3242_v56 = vpop.f32.mrf.mxu1  ;;  %3720 = vmatmul.mubr.bf16.gmra.mxu0 %v3425_v33 }
 0x539   : > { %v3243_v10 = vadd.f32 %v3242_v56, %v9458_v8  ;;  %v3373_v42 = vmax.f32 %v3241_v52, 0.0 }
 0x53a   : > { %v3246_v25 = vpop.f32.mrf.mxu1 }
 0x53b   : > { %v3374_v27 = vmax.f32 %v3243_v10, 0.0  ;;  %v3427_v43 = vpack.c.bf16 %v3373_v42, %v3371_v15  ;;  %v3247_v33 = vadd.f32 %v3246_v25, %v9461_v3 }
 0x53c   : > { %v3248_v21 = vpop.f32.mrf.mxu1 }
 0x53d   : > { %v3428_v5 = vpack.c.bf16 %v3374_v27, %v3372_v54  ;;  %v3249_v61 = vadd.f32 %v3248_v21, %v9458_v8  ;;  %v3375_v56 = vmax.f32 %v3247_v33, 0.0 }
 0x53e   : > { %v3250_v14 = vpop.f32.mrf.mxu1 }
 0x53f   : > { %v3251_v51 = vadd.f32 %v3250_v14, %v9461_v3  ;;  %3729 = vmatprep.mubr.bf16.mxu0 %v3428_v5  ;;  %v3376_v38 = vmax.f32 %v3249_v61, 0.0 }
 0x540   : > { %v3252_v19 = vpop.f32.mrf.mxu1  ;;  %3730 = vmatmul.mubr.bf16.gmra.mxu0 %v3427_v43 }
 0x541   : > { %v3253_v24 = vadd.f32 %v3252_v19, %v9458_v8  ;;  %v3377_v44 = vmax.f32 %v3251_v51, 0.0 }
 0x542   : > { %v3256_v52 = vpop.f32.mrf.mxu1 }
 0x543   : > { %v3378_v32 = vmax.f32 %v3253_v24, 0.0  ;;  %v3429_v54 = vpack.c.bf16 %v3377_v44, %v3375_v56  ;;  %v3257_v25 = vadd.f32 %v3256_v52, %v9461_v3 }
 0x544   : > { %v3258_v10 = vpop.f32.mrf.mxu1 }
 0x545   : > { %v3430_v42 = vpack.c.bf16 %v3378_v32, %v3376_v38  ;;  %v3259_v27 = vadd.f32 %v3258_v10, %v9458_v8  ;;  %v3379_v33 = vmax.f32 %v3257_v25, 0.0 }
 0x546   : > { %v3260_v36 = vpop.f32.mrf.mxu1 }
 0x547   : > { %v3261_v15 = vadd.f32 %v3260_v36, %v9461_v3  ;;  %3739 = vmatprep.mubr.bf16.mxu0 %v3430_v42  ;;  %v3380_v61 = vmax.f32 %v3259_v27, 0.0 }
 0x548   : > { %v3262_v21 = vpop.f32.mrf.mxu1  ;;  %3740 = vmatmul.mubr.bf16.gmra.mxu0 %v3429_v54 }
 0x549   : > { %v3263_v5 = vadd.f32 %v3262_v21, %v9458_v8  ;;  %v3381_v43 = vmax.f32 %v3261_v15, 0.0 }
 0x54a   : > { %v3266_v14 = vpop.f32.mrf.mxu1 }
 0x54b   : > { %v3382_v51 = vmax.f32 %v3263_v5, 0.0  ;;  %v3431_v44 = vpack.c.bf16 %v3381_v43, %v3379_v33  ;;  %v3267_v52 = vadd.f32 %v3266_v14, %v9461_v3 }
 0x54c   : > { %v3268_v19 = vpop.f32.mrf.mxu1 }
 0x54d   : > { %v3432_v24 = vpack.c.bf16 %v3382_v51, %v3380_v61  ;;  %v3269_v32 = vadd.f32 %v3268_v19, %v9458_v8  ;;  %v3383_v25 = vmax.f32 %v3267_v52, 0.0 }
 0x54e   : > { %v3270_v38 = vpop.f32.mrf.mxu1 }
 0x54f   : > { %v3271_v56 = vadd.f32 %v3270_v38, %v9461_v3  ;;  %3749 = vmatprep.mubr.bf16.mxu0 %v3432_v24  ;;  %v3384_v27 = vmax.f32 %v3269_v32, 0.0 }
 0x550   : > { %v3272_v10 = vpop.f32.mrf.mxu1  ;;  %3750 = vmatmul.mubr.bf16.gmra.mxu0 %v3431_v44 }
 0x551   : > { %v3273_v42 = vadd.f32 %v3272_v10, %v9458_v8  ;;  %v3385_v54 = vmax.f32 %v3271_v56, 0.0 }
 0x552   : > { %v3276_v36 = vpop.f32.mrf.mxu1 }
 0x553   : > { %v3386_v15 = vmax.f32 %v3273_v42, 0.0  ;;  %v3433_v43 = vpack.c.bf16 %v3385_v54, %v3383_v25  ;;  %v3277_v14 = vadd.f32 %v3276_v36, %v9461_v3 }
 0x554   : > { %v3278_v21 = vpop.f32.mrf.mxu1 }
 0x555   : > { %v3434_v5 = vpack.c.bf16 %v3386_v15, %v3384_v27  ;;  %v3279_v51 = vadd.f32 %v3278_v21, %v9458_v8  ;;  %v3387_v52 = vmax.f32 %v3277_v14, 0.0 }
 0x556   : > { %v3280_v61 = vpop.f32.mrf.mxu1 }
 0x557   : > { %v3281_v33 = vadd.f32 %v3280_v61, %v9461_v3  ;;  %3759 = vmatprep.mubr.bf16.mxu0 %v3434_v5  ;;  %v3388_v32 = vmax.f32 %v3279_v51, 0.0 }
 0x558   : > { %v3282_v19 = vpop.f32.mrf.mxu1  ;;  %3760 = vmatmul.mubr.bf16.gmra.mxu0 %v3433_v43 }
 0x559   : > { %v3283_v24 = vadd.f32 %v3282_v19, %v9458_v8  ;;  %v3389_v44 = vmax.f32 %v3281_v33, 0.0 }
 0x55a   : > { %v3286_v38 = vpop.f32.mrf.mxu1 }
 0x55b   : > { %v3390_v56 = vmax.f32 %v3283_v24, 0.0  ;;  %v3435_v54 = vpack.c.bf16 %v3389_v44, %v3387_v52  ;;  %v3287_v36 = vadd.f32 %v3286_v38, %v9461_v3 }
 0x55c   : > { %v3288_v10 = vpop.f32.mrf.mxu1 }
 0x55d   : > { %v3436_v42 = vpack.c.bf16 %v3390_v56, %v3388_v32  ;;  %v3289_v15 = vadd.f32 %v3288_v10, %v9458_v8  ;;  %v3391_v14 = vmax.f32 %v3287_v36, 0.0 }
 0x55e   : > { %v3290_v27 = vpop.f32.mrf.mxu1 }
 0x55f   : > { %v3291_v25 = vadd.f32 %v3290_v27, %v9461_v3  ;;  %3769 = vmatprep.mubr.bf16.mxu0 %v3436_v42  ;;  %v3392_v51 = vmax.f32 %v3289_v15, 0.0  ;;  %v7365_v15 = vld [vmem:[#allocation5 + $0x384] ss:$8 sps:$4 sm:$0xff]  }
 0x560   : > { %v3292_v21 = vpop.f32.mrf.mxu1  ;;  %3770 = vmatmul.mubr.bf16.gmra.mxu0 %v3435_v54  ;;  %4246 = vmatprep.subr.bf16.mxu1 %v7365_v15 }
 0x561   : > { %v3293_v5 = vadd.f32 %v3292_v21, %v9458_v8  ;;  %v3393_v43 = vmax.f32 %v3291_v25, 0.0  ;;  %v7363_v21 = vld [vmem:[#allocation5 + $0x380] ss:$8 sps:$4 sm:$0xff]  }
 0x562   : > { %v3296_v61 = vpop.f32.mrf.mxu1  ;;  %4247 = vmatpush2.bf16.msra.mxu1 %v7363_v21 }
 0x563   : > { %v3394_v33 = vmax.f32 %v3293_v5, 0.0  ;;  %v3437_v44 = vpack.c.bf16 %v3393_v43, %v3391_v14  ;;  %v3297_v38 = vadd.f32 %v3296_v61, %v9461_v3 }
 0x564   : > { %v3298_v19 = vpop.f32.mrf.mxu1 }
 0x565   : > { %v3438_v24 = vpack.c.bf16 %v3394_v33, %v3392_v51  ;;  %v3299_v56 = vadd.f32 %v3298_v19, %v9458_v8  ;;  %v3395_v5 = vmax.f32 %v3297_v38, 0.0 }
 0x566   : > { %v3300_v32 = vpop.f32.mrf.mxu1 }
 0x567   : > { %v3301_v52 = vadd.f32 %v3300_v32, %v9461_v3  ;;  %3779 = vmatprep.mubr.bf16.mxu0 %v3438_v24  ;;  %v3396_v25 = vmax.f32 %v3299_v56, 0.0 }
 0x568   : > { %v3302_v10 = vpop.f32.mrf.mxu1  ;;  %3780 = vmatmul.mubr.bf16.gmra.mxu0 %v3437_v44 }
 0x569   : > { %v3303_v42 = vadd.f32 %v3302_v10, %v9458_v8  ;;  %v3397_v54 = vmax.f32 %v3301_v52, 0.0 }
 0x56a   : > { %v3306_v27 = vpop.f32.mrf.mxu1 }
 0x56b   : > { %v3398_v36 = vmax.f32 %v3303_v42, 0.0  ;;  %v3439_v33 = vpack.c.bf16 %v3397_v54, %v3395_v5  ;;  %v3307_v24 = vadd.f32 %v3306_v27, %v9461_v3 }
 0x56c   : > { %v3308_v43 = vpop.f32.mrf.mxu1 }
 0x56d   : > { %v3440_v51 = vpack.c.bf16 %v3398_v36, %v3396_v25  ;;  %v3309_v19 = vadd.f32 %v3308_v43, %v9458_v8  ;;  %v3399_v42 = vmax.f32 %v3307_v24, 0.0 }
 0x56e   : > { %v3310_v14 = vpop.f32.mrf.mxu1 }
 0x56f   : > { %v3311_v61 = vadd.f32 %v3310_v14, %v9461_v3  ;;  %3789 = vmatprep.mubr.bf16.mxu0 %v3440_v51  ;;  %v3400_v38 = vmax.f32 %v3309_v19, 0.0 }
 0x570   : > { %v3312_v44 = vpop.f32.mrf.mxu1  ;;  %3790 = vmatmul.mubr.bf16.gmra.mxu0 %v3439_v33 }
 0x571   : > { %v3313_v32 = vadd.f32 %v3312_v44, %v9458_v8  ;;  %v3401_v56 = vmax.f32 %v3311_v61, 0.0 }
 0x572   : > { %v3316_v52 = vpop.f32.mrf.mxu1 }
 0x573   : > { %v3402_v10 = vmax.f32 %v3313_v32, 0.0  ;;  %v3441_v54 = vpack.c.bf16 %v3401_v56, %v3399_v42  ;;  %v3317_v27 = vadd.f32 %v3316_v52, %v9461_v3 }
 0x574   : > { %v3318_v15 = vpop.f32.mrf.mxu1 }
 0x575   : > { %v3442_v25 = vpack.c.bf16 %v3402_v10, %v3400_v38  ;;  %v3319_v21 = vadd.f32 %v3318_v15, %v9458_v8  ;;  %v3403_v24 = vmax.f32 %v3317_v27, 0.0 }
 0x576   : > { %v3320_v36 = vpop.f32.mrf.mxu1 }
 0x577   : > { %v3321_v5 = vadd.f32 %v3320_v36, %v9461_v3  ;;  %3799 = vmatprep.mubr.bf16.mxu0 %v3442_v25  ;;  %v3404_v19 = vmax.f32 %v3319_v21, 0.0 }
 0x578   : > { %v3322_v43 = vpop.f32.mrf.mxu1  ;;  %3800 = vmatmul.mubr.bf16.gmra.mxu0 %v3441_v54 }
 0x579   : > { %v3323_v51 = vadd.f32 %v3322_v43, %v9458_v8  ;;  %v3405_v33 = vmax.f32 %v3321_v5, 0.0 }
 0x57a   : > { %v3326_v14 = vpop.f32.mrf.mxu1 }
 0x57b   : > { %v3406_v61 = vmax.f32 %v3323_v51, 0.0  ;;  %v3443_v56 = vpack.c.bf16 %v3405_v33, %v3403_v24  ;;  %v3327_v52 = vadd.f32 %v3326_v14, %v9461_v3 }
 0x57c   : > { %v3328_v44 = vpop.f32.mrf.mxu1 }
 0x57d   : > { %v3444_v32 = vpack.c.bf16 %v3406_v61, %v3404_v19  ;;  %v3329_v10 = vadd.f32 %v3328_v44, %v9458_v8  ;;  %v3407_v27 = vmax.f32 %v3327_v52, 0.0 }
 0x57e   : > { %v3330_v38 = vpop.f32.mrf.mxu1 }
 0x57f   : > { %v3331_v42 = vadd.f32 %v3330_v38, %v9461_v3  ;;  %3809 = vmatprep.mubr.bf16.mxu0 %v3444_v32  ;;  %v3408_v21 = vmax.f32 %v3329_v10, 0.0 }
 0x580   : > { %v3332_v15 = vpop.f32.mrf.mxu1  ;;  %3810 = vmatmul.mubr.bf16.gmra.mxu0 %v3443_v56 }
 0x581   : > { %v3333_v25 = vadd.f32 %v3332_v15, %v9458_v8  ;;  %v3409_v54 = vmax.f32 %v3331_v42, 0.0 }
 0x582   : > { %v3336_v36 = vpop.f32.mrf.mxu1 }
 0x583   : > { %v3410_v5 = vmax.f32 %v3333_v25, 0.0  ;;  %v3445_v33 = vpack.c.bf16 %v3409_v54, %v3407_v27  ;;  %v3337_v14 = vadd.f32 %v3336_v36, %v9461_v3 }
 0x584   : > { %v3338_v43 = vpop.f32.mrf.mxu1 }
 0x585   : > { %v3446_v51 = vpack.c.bf16 %v3410_v5, %v3408_v21  ;;  %v3339_v61 = vadd.f32 %v3338_v43, %v9458_v8  ;;  %v3411_v52 = vmax.f32 %v3337_v14, 0.0 }
 0x586   : > { %v3340_v19 = vpop.f32.mrf.mxu1 }
 0x587   : > { %v3341_v24 = vadd.f32 %v3340_v19, %v9461_v3  ;;  %3819 = vmatprep.mubr.bf16.mxu0 %v3446_v51  ;;  %v3412_v10 = vmax.f32 %v3339_v61, 0.0 }
 0x588   : > { %v3342_v44 = vpop.f32.mrf.mxu1  ;;  %3820 = vmatmul.mubr.bf16.gmra.mxu0 %v3445_v33 }
 0x589   : > { %v3343_v32 = vadd.f32 %v3342_v44, %v9458_v8  ;;  %v3413_v56 = vmax.f32 %v3341_v24, 0.0 }
 0x58a   : > { %v3346_v38 = vpop.f32.mrf.mxu1 }
 0x58b   : > { %v3414_v42 = vmax.f32 %v3343_v32, 0.0  ;;  %v3447_v54 = vpack.c.bf16 %v3413_v56, %v3411_v52  ;;  %v3347_v36 = vadd.f32 %v3346_v38, %v9461_v3  ;;  %v7366_v32 = vld [vmem:[#allocation7 + $0x370] ss:$8 sps:$4 sm:$0xff]   ;;  %v7368_v56 = vld [vmem:[#allocation7 + $0x374] ss:$8 sps:$4 sm:$0xff]  }
 0x58c   : > { %v3348_v15 = vpop.f32.mrf.mxu1  ;;  %4711 = vmatprep.subr.bf16.mxu0 %v7368_v56  ;;  %v7374_v38 = vld [vmem:[#allocation7 + $0x354] ss:$8 sps:$4 sm:$0xff]   ;;  %v7377_v52 = vld [vmem:[#allocation7 + $0x344] ss:$8 sps:$4 sm:$0xff]   ;;  %v11969_v56 = vmax.f32 %v8951_v59, 0.0 }
 0x58d   : > { %v3448_v25 = vpack.c.bf16 %v3414_v42, %v3412_v10  ;;  %v3349_v5 = vadd.f32 %v3348_v15, %v9458_v8  ;;  %v3415_v24 = vmax.f32 %v3347_v36, 0.0  ;;  %4712 = vmatpush1.bf16.msra.mxu0 %v7366_v32  ;;  %v7369_v10 = vld [vmem:[#allocation7 + $0x360] ss:$8 sps:$4 sm:$0xff]   ;;  %v7371_v42 = vld [vmem:[#allocation7 + $0x364] ss:$8 sps:$4 sm:$0xff]  }
 0x58e   : > { %v3350_v21 = vpop.f32.mrf.mxu1  ;;  %4713 = vmatprep.subr.bf16.mxu0 %v7371_v42  ;;  %v6700_v15 = vld [vmem:[%s11255_s6 + $0x4] sm:$0x3]  ;;  %v7378_v36 = vld [vmem:[#allocation7 + $0x330] ss:$8 sps:$4 sm:$0xff]  }
 0x58f   : > { %v3351_v27 = vadd.f32 %v3350_v21, %v9461_v3  ;;  %3829 = vmatprep.mubr.bf16.mxu0 %v3448_v25  ;;  %v3416_v19 = vmax.f32 %v3349_v5, 0.0  ;;  %v7372_v3 = vld [vmem:[#allocation7 + $0x350] ss:$8 sps:$4 sm:$0xff]   ;;  %v9531_v25 = vrot.slane %v6700_v15, %v7872_v63 }
 0x590   : > { %v3352_v43 = vpop.f32.mrf.mxu1  ;;  %3830 = vmatmul.mubr.bf16.gmra.mxu0 %v3447_v54  ;;  %v9534_v54 = vrot.slane %v6700_v15, %v7874_v2  ;;  %v11971_v15 = vmax.f32 %v8960_v0, 0.0  ;;  %v7384_v59 = vld [vmem:[#allocation7 + $0x310] ss:$8 sps:$4 sm:$0xff]  }
 0x591   : > { %v3353_v51 = vadd.f32 %v3352_v43, %v9458_v8  ;;  %v3417_v33 = vmax.f32 %v3351_v27, 0.0  ;;  %4714 = vmatpush1.bf16.msra.mxu0 %v7369_v10  ;;  %v7375_v8 = vld [vmem:[#allocation7 + $0x340] ss:$8 sps:$4 sm:$0xff]   ;;  %v7380_v43 = vld [vmem:[#allocation7 + $0x334] ss:$8 sps:$4 sm:$0xff]  }
 0x592   : > { %4715 = vmatprep.subr.bf16.mxu0 %v7374_v38 }
 0x593   : > { %v3418_v61 = vmax.f32 %v3353_v51, 0.0  ;;  %v3449_v44 = vpack.c.bf16 %v3417_v33, %v3415_v24 }
 0x595   : > { %v3450_v14 = vpack.c.bf16 %v3418_v61, %v3416_v19  ;;  %4716 = vmatpush1.bf16.msra.mxu0 %v7372_v3  ;;  %v7383_v19 = vld [vmem:[#allocation7 + $0x324] ss:$8 sps:$4 sm:$0xff]   ;;  %v11970_v3 = vmax.f32 %v8956_v26, 0.0 }
 0x596   : > { %4717 = vmatprep.subr.bf16.mxu0 %v7377_v52  ;;  %v7386_v52 = vld [vmem:[#allocation7 + $0x314] ss:$8 sps:$4 sm:$0xff]   ;;  %v7389_v26 = vld [vmem:[#allocation7 + $0x304] ss:$8 sps:$4 sm:$0xff]  }
 0x597   : > { %3839 = vmatprep.mubr.bf16.mxu0 %v3450_v14  ;;  %v7381_v14 = vld [vmem:[#allocation7 + $0x320] ss:$8 sps:$4 sm:$0xff]  }
 0x598   : > { %3840 = vmatmul.mubr.bf16.gmra.mxu0 %v3449_v44  ;;  %v11968_v44 = vmax.f32 %v8947_v9, 0.0 }
 0x599   : > { %4718 = vmatpush1.bf16.msra.mxu0 %v7375_v8 }
 0x59a   : > { %4719 = vmatprep.subr.bf16.mxu0 %v7380_v43 }
 0x59d   : > { %4720 = vmatpush1.bf16.msra.mxu0 %v7378_v36 }
 0x59e   : > { %4721 = vmatprep.subr.bf16.mxu0 %v7383_v19 }
 0x5a1   : > { %4722 = vmatpush1.bf16.msra.mxu0 %v7381_v14 }
 0x5a2   : > { %4723 = vmatprep.subr.bf16.mxu0 %v7386_v52 }
 0x5a5   : > { %4724 = vmatpush1.bf16.msra.mxu0 %v7384_v59  ;;  %v11975_v59 = vmax.f32 %v8992_v40, 0.0 }
 0x5a6   : > { %4725 = vmatprep.subr.bf16.mxu0 %v7389_v26 }
 0x5e0   : > { %v3691_v21 = vpop.f32.mrf.mxu0 }
 0x5e1   : > { %v3692_v51 = vadd.f32 %v3691_v21, %v9534_v54 }
 0x5e2   : > { %v3693_v5 = vpop.f32.mrf.mxu0 }
 0x5e3   : > { %v3694_v27 = vadd.f32 %v3693_v5, %v9531_v25  ;;  %v9550_v38 = vadd.f32 %v3692_v51, %v11970_v3  ;;  %v11973_v3 = vmax.f32 %v8983_v60, 0.0 }
 0x5e4   : > { %v3695_v33 = vpop.f32.mrf.mxu0 }
 0x5e5   : > { %v3696_v61 = vadd.f32 %v3695_v33, %v9534_v54  ;;  %v9541_v32 = vadd.f32 %v3694_v27, %v11968_v44  ;;  %v11531_v51 = vmax.f32 %v9550_v38, 0.0  ;;  %v7387_v44 = vld [vmem:[#allocation7 + $0x300] ss:$8 sps:$4 sm:$0xff]  }
 0x5e6   : > { %v3697_v24 = vpop.f32.mrf.mxu0  ;;  %4726 = vmatpush1.bf16.msra.mxu0 %v7387_v44 }
 0x5e7   : > { %v9545_v10 = vadd.f32 %v3696_v61, %v11969_v56  ;;  %v3698_v42 = vadd.f32 %v3697_v24, %v9531_v25  ;;  %v11565_v27 = vmax.f32 %v9541_v32, 0.0  ;;  %v11972_v56 = vmax.f32 %v8979_v20, 0.0 }
 0x5e8   : > { %v3701_v8 = vpop.f32.mrf.mxu0 }
 0x5e9   : > { %v9554_v21 = vadd.f32 %v3698_v42, %v11971_v15  ;;  %v11562_v9 = vmax.f32 %v9545_v10, 0.0  ;;  %v3702_v33 = vadd.f32 %v3701_v8, %v9534_v54  ;;  %v7392_v15 = vld [vmem:[#allocation7 + $0x3f4] ss:$8 sps:$4 sm:$0xff]  }
 0x5ea   : > { %v3703_v5 = vpop.f32.mrf.mxu0  ;;  %4727 = vmatprep.subr.bf16.mxu0 %v7392_v15  ;;  %v7393_v15 = vld [vmem:[#allocation7 + $0x3e0] ss:$8 sps:$4 sm:$0xff]  }
 0x5eb   : > { %v11528_v36 = vmax.f32 %v9554_v21, 0.0  ;;  %v3704_v43 = vadd.f32 %v3703_v5, %v9531_v25  ;;  %v3978_v24 = vpack.c.bf16 %v11562_v9, %v11531_v51  ;;  %v11974_v5 = vmax.f32 %v8988_v39, 0.0  ;;  %v7395_v39 = vld [vmem:[#allocation7 + $0x3e4] ss:$8 sps:$4 sm:$0xff]  }
 0x5ec   : > { %v3705_v0 = vpop.f32.mrf.mxu0 }
 0x5ed   : > { %v3706_v19 = vadd.f32 %v3705_v0, %v9534_v54  ;;  %v3979_v61 = vpack.c.bf16 %v11528_v36, %v11565_v27  ;;  %v9573_v42 = vadd.f32 %v3704_v43, %v11972_v56  ;;  %v9582_v0 = vadd.f32 %v3702_v33, %v11974_v5  ;;  %v7413_v27 = vld [vmem:[#allocation7 + $0x384] ss:$8 sps:$4 sm:$0xff]  }
 0x5ee   : > { %v3707_v14 = vpop.f32.mrf.mxu0  ;;  %v11976_v5 = vmax.f32 %v9011_v55, 0.0 }
 0x5ef   : > { %v9577_v8 = vadd.f32 %v3706_v19, %v11973_v3  ;;  %v3708_v52 = vadd.f32 %v3707_v14, %v9531_v25  ;;  %4248 = vmatprep.mubr.bf16.mxu1 %v3979_v61  ;;  %v7390_v19 = vld [vmem:[#allocation7 + $0x3f0] ss:$8 sps:$4 sm:$0xff]   ;;  %v11530_v14 = vmax.f32 %v9573_v42, 0.0  ;;  %v11532_v33 = vmax.f32 %v9582_v0, 0.0 }
 0x5f0   : > { %v3711_v36 = vpop.f32.mrf.mxu0  ;;  %4249 = vmatmul.mubr.bf16.vlgmr.msra.gmra.mxu1 %v3978_v24  ;;  %4728 = vmatpush2.bf16.msra.mxu0 %v7390_v19  ;;  %v11979_v19 = vmax.f32 %v9024_v12, 0.0 }
 0x5f1   : > { %v9586_v20 = vadd.f32 %v3708_v52, %v11975_v59  ;;  %v11535_v43 = vmax.f32 %v9577_v8, 0.0  ;;  %v3712_v24 = vadd.f32 %v3711_v36, %v9534_v54  ;;  %v11977_v36 = vmax.f32 %v9015_v37, 0.0  ;;  %4729 = vmatprep.subr.bf16.mxu0 %v7395_v39 }
 0x5f2   : > { %v3713_v60 = vpop.f32.mrf.mxu0 }
 0x5f3   : > { %v11529_v26 = vmax.f32 %v9586_v20, 0.0  ;;  %v3714_v61 = vadd.f32 %v3713_v60, %v9531_v25  ;;  %v3980_v3 = vpack.c.bf16 %v11535_v43, %v11532_v33 }
 0x5f4   : > { %v3715_v40 = vpop.f32.mrf.mxu0  ;;  %4730 = vmatpush2.bf16.msra.mxu0 %v7393_v15 }
 0x5f5   : > { %v3716_v56 = vadd.f32 %v3715_v40, %v9534_v54  ;;  %v3981_v44 = vpack.c.bf16 %v11529_v26, %v11530_v14  ;;  %v9605_v59 = vadd.f32 %v3714_v61, %v11976_v5  ;;  %v7398_v26 = vld [vmem:[#allocation7 + $0x3d4] ss:$8 sps:$4 sm:$0xff]   ;;  %v11978_v14 = vmax.f32 %v9020_v50, 0.0  ;;  %v7401_v50 = vld [vmem:[#allocation7 + $0x3c4] ss:$8 sps:$4 sm:$0xff]  }
 0x5f6   : > { %v3717_v52 = vpop.f32.mrf.mxu0  ;;  %4731 = vmatprep.subr.bf16.mxu0 %v7398_v26  ;;  %v7399_v26 = vld [vmem:[#allocation7 + $0x3c0] ss:$8 sps:$4 sm:$0xff]  }
 0x5f7   : > { %v9609_v60 = vadd.f32 %v3716_v56, %v11977_v36  ;;  %v3718_v40 = vadd.f32 %v3717_v52, %v9531_v25  ;;  %4258 = vmatprep.mubr.bf16.mxu1 %v3981_v44  ;;  %v9614_v51 = vadd.f32 %v3712_v24, %v11978_v14  ;;  %v7396_v56 = vld [vmem:[#allocation7 + $0x3d0] ss:$8 sps:$4 sm:$0xff]   ;;  %v11534_v52 = vmax.f32 %v9605_v59, 0.0 }
 0x5f8   : > { %v3721_v33 = vpop.f32.mrf.mxu0  ;;  %4259 = vmatmul.mubr.bf16.gmra.mxu1 %v3980_v3  ;;  %4732 = vmatpush2.bf16.msra.mxu0 %v7396_v56  ;;  %v11983_v56 = vmax.f32 %v9056_v18, 0.0 }
 0x5f9   : > { %v9618_v55 = vadd.f32 %v3718_v40, %v11979_v19  ;;  %v11539_v61 = vmax.f32 %v9609_v60, 0.0  ;;  %v11536_v14 = vmax.f32 %v9614_v51, 0.0  ;;  %v3722_v24 = vadd.f32 %v3721_v33, %v9534_v54  ;;  %4733 = vmatprep.subr.bf16.mxu0 %v7401_v50 }
 0x5fa   : > { %v3723_v37 = vpop.f32.mrf.mxu0  ;;  %v11980_v40 = vmax.f32 %v9043_v11, 0.0  ;;  %v11981_v33 = vmax.f32 %v9047_v31, 0.0 }
 0x5fb   : > { %v11533_v39 = vmax.f32 %v9618_v55, 0.0  ;;  %v3724_v44 = vadd.f32 %v3723_v37, %v9531_v25  ;;  %v3982_v5 = vpack.c.bf16 %v11539_v61, %v11536_v14 }
 0x5fc   : > { %v3725_v12 = vpop.f32.mrf.mxu0  ;;  %4734 = vmatpush2.bf16.msra.mxu0 %v7399_v26 }
 0x5fd   : > { %v3726_v3 = vadd.f32 %v3725_v12, %v9534_v54  ;;  %v3983_v15 = vpack.c.bf16 %v11533_v39, %v11534_v52  ;;  %v9637_v19 = vadd.f32 %v3724_v44, %v11980_v40  ;;  %v7404_v39 = vld [vmem:[#allocation7 + $0x3b4] ss:$8 sps:$4 sm:$0xff]   ;;  %v11982_v52 = vmax.f32 %v9052_v29, 0.0  ;;  %v7407_v29 = vld [vmem:[#allocation7 + $0x3a4] ss:$8 sps:$4 sm:$0xff]  }
 0x5fe   : > { %v3727_v36 = vpop.f32.mrf.mxu0  ;;  %4735 = vmatprep.subr.bf16.mxu0 %v7404_v39  ;;  %v7405_v39 = vld [vmem:[#allocation7 + $0x3a0] ss:$8 sps:$4 sm:$0xff]  }
 0x5ff   : > { %v9641_v37 = vadd.f32 %v3726_v3, %v11981_v33  ;;  %v3728_v12 = vadd.f32 %v3727_v36, %v9531_v25  ;;  %4268 = vmatprep.mubr.bf16.mxu1 %v3983_v15  ;;  %v9646_v43 = vadd.f32 %v3722_v24, %v11982_v52  ;;  %v7402_v3 = vld [vmem:[#allocation7 + $0x3b0] ss:$8 sps:$4 sm:$0xff]   ;;  %v11538_v36 = vmax.f32 %v9637_v19, 0.0 }
 0x600   : > { %v3731_v14 = vpop.f32.mrf.mxu0  ;;  %4269 = vmatmul.mubr.bf16.gmra.mxu1 %v3982_v5  ;;  %4736 = vmatpush2.bf16.msra.mxu0 %v7402_v3  ;;  %v11987_v3 = vmax.f32 %v9088_v62, 0.0 }
 0x601   : > { %v9650_v11 = vadd.f32 %v3728_v12, %v11983_v56  ;;  %v11561_v44 = vmax.f32 %v9641_v37, 0.0  ;;  %v11540_v52 = vmax.f32 %v9646_v43, 0.0  ;;  %v3732_v24 = vadd.f32 %v3731_v14, %v9534_v54  ;;  %4737 = vmatprep.subr.bf16.mxu0 %v7407_v29 }
 0x602   : > { %v3733_v31 = vpop.f32.mrf.mxu0  ;;  %v11984_v12 = vmax.f32 %v9075_v16, 0.0  ;;  %v11985_v14 = vmax.f32 %v9079_v49, 0.0 }
 0x603   : > { %v11537_v50 = vmax.f32 %v9650_v11, 0.0  ;;  %v3734_v15 = vadd.f32 %v3733_v31, %v9531_v25  ;;  %v3984_v40 = vpack.c.bf16 %v11561_v44, %v11540_v52  ;;  %v12016_v44 = vld [vmem:[#allocation15_spill] sm:$0xff] }
 0x604   : > { %v3735_v18 = vpop.f32.mrf.mxu0  ;;  %4738 = vmatpush2.bf16.msra.mxu0 %v7405_v39  ;;  %v12017_v9 = vmax.f32 %v12016_v44, 0.0 }
 0x605   : > { %v3736_v5 = vadd.f32 %v3735_v18, %v9534_v54  ;;  %v3985_v26 = vpack.c.bf16 %v11537_v50, %v11538_v36  ;;  %v9669_v56 = vadd.f32 %v3734_v15, %v11984_v12  ;;  %v7410_v50 = vld [vmem:[#allocation7 + $0x394] ss:$8 sps:$4 sm:$0xff]   ;;  %v11986_v36 = vmax.f32 %v9084_v7, 0.0 }
 0x606   : > { %v3737_v33 = vpop.f32.mrf.mxu0  ;;  %4739 = vmatprep.subr.bf16.mxu0 %v7410_v50  ;;  %v11988_v50 = vmax.f32 %v9107_v28, 0.0 }
 0x607   : > { %v9673_v31 = vadd.f32 %v3736_v5, %v11985_v14  ;;  %v3738_v18 = vadd.f32 %v3737_v33, %v9531_v25  ;;  %4278 = vmatprep.mubr.bf16.mxu1 %v3985_v26  ;;  %v9678_v61 = vadd.f32 %v3732_v24, %v11986_v36  ;;  %v7408_v5 = vld [vmem:[#allocation7 + $0x390] ss:$8 sps:$4 sm:$0xff]   ;;  %v11560_v33 = vmax.f32 %v9669_v56, 0.0 }
 0x608   : > { %v3741_v52 = vpop.f32.mrf.mxu0  ;;  %4279 = vmatmul.mubr.bf16.gmra.mxu1 %v3984_v40  ;;  %4740 = vmatpush2.bf16.msra.mxu0 %v7408_v5 }
 0x609   : > { %v9682_v16 = vadd.f32 %v3738_v18, %v11987_v3  ;;  %v11557_v15 = vmax.f32 %v9673_v31, 0.0  ;;  %v11542_v7 = vmax.f32 %v9678_v61, 0.0  ;;  %v3742_v36 = vadd.f32 %v3741_v52, %v9534_v54  ;;  %4741 = vmatprep.subr.bf16.mxu0 %v7413_v27 }
 0x60a   : > { %v3743_v49 = vpop.f32.mrf.mxu0  ;;  %v11989_v52 = vmax.f32 %v9111_v4, 0.0 }
 0x60b   : > { %v11541_v29 = vmax.f32 %v9682_v16, 0.0  ;;  %v3744_v26 = vadd.f32 %v3743_v49, %v9531_v25  ;;  %v3986_v39 = vpack.c.bf16 %v11557_v15, %v11542_v7  ;;  %v11990_v49 = vmax.f32 %v9116_v1, 0.0  ;;  %v12007_v15 = vld [vmem:[#allocation12_spill] sm:$0xff] }
 0x60c   : > { %v3745_v24 = vpop.f32.mrf.mxu0  ;;  %v11991_v7 = vmax.f32 %v9120_v47, 0.0 }
 0x60d   : > { %v3746_v62 = vadd.f32 %v3745_v24, %v9534_v54  ;;  %v3987_v40 = vpack.c.bf16 %v11541_v29, %v11560_v33  ;;  %v9701_v14 = vadd.f32 %v3744_v26, %v11988_v50  ;;  %v9710_v24 = vadd.f32 %v3742_v36, %v11990_v49 }
 0x60e   : > { %v3747_v12 = vpop.f32.mrf.mxu0 }
 0x60f   : > { %v9705_v18 = vadd.f32 %v3746_v62, %v11989_v52  ;;  %v3748_v3 = vadd.f32 %v3747_v12, %v9531_v25  ;;  %4288 = vmatprep.mubr.bf16.mxu1 %v3987_v40  ;;  %v11544_v4 = vmax.f32 %v9701_v14, 0.0  ;;  %v11545_v40 = vmax.f32 %v9710_v24, 0.0 }
 0x610   : > { %v3751_v29 = vpop.f32.mrf.mxu0  ;;  %4289 = vmatmul.mubr.bf16.gmra.mxu1 %v3986_v39  ;;  %v11992_v52 = vmax.f32 %v9139_v46, 0.0 }
 0x611   : > { %v9714_v5 = vadd.f32 %v3748_v3, %v11991_v7  ;;  %v11546_v28 = vmax.f32 %v9705_v18, 0.0  ;;  %v3752_v1 = vadd.f32 %v3751_v29, %v9534_v54  ;;  %v11993_v29 = vmax.f32 %v9143_v6, 0.0 }
 0x612   : > { %v3753_v26 = vpop.f32.mrf.mxu0 }
 0x613   : > { %v11543_v62 = vmax.f32 %v9714_v5, 0.0  ;;  %v3754_v12 = vadd.f32 %v3753_v26, %v9531_v25  ;;  %v3988_v7 = vpack.c.bf16 %v11546_v28, %v11545_v40  ;;  %v11995_v40 = vmax.f32 %v9152_v57, 0.0 }
 0x614   : > { %v3755_v36 = vpop.f32.mrf.mxu0 }
 0x615   : > { %v3756_v39 = vadd.f32 %v3755_v36, %v9534_v54  ;;  %v3989_v47 = vpack.c.bf16 %v11543_v62, %v11544_v4  ;;  %v9733_v3 = vadd.f32 %v3754_v12, %v11992_v52  ;;  %v11994_v36 = vmax.f32 %v9148_v35, 0.0 }
 0x616   : > { %v3757_v50 = vpop.f32.mrf.mxu0 }
 0x617   : > { %v9737_v49 = vadd.f32 %v3756_v39, %v11993_v29  ;;  %v3758_v26 = vadd.f32 %v3757_v50, %v9531_v25  ;;  %4298 = vmatprep.mubr.bf16.mxu1 %v3989_v47  ;;  %v9742_v62 = vadd.f32 %v3752_v1, %v11994_v36  ;;  %v11548_v6 = vmax.f32 %v9733_v3, 0.0 }
 0x618   : > { %v3761_v4 = vpop.f32.mrf.mxu0  ;;  %4299 = vmatmul.mubr.bf16.gmra.mxu1 %v3988_v7  ;;  %v11996_v29 = vmax.f32 %v9171_v22, 0.0 }
 0x619   : > { %v9746_v28 = vadd.f32 %v3758_v26, %v11995_v40  ;;  %v11550_v46 = vmax.f32 %v9737_v49, 0.0  ;;  %v11549_v47 = vmax.f32 %v9742_v62, 0.0  ;;  %v3762_v35 = vadd.f32 %v3761_v4, %v9534_v54 }
 0x61a   : > { %v3763_v12 = vpop.f32.mrf.mxu0  ;;  %v11997_v4 = vmax.f32 %v9175_v41, 0.0 }
 0x61b   : > { %v11547_v39 = vmax.f32 %v9746_v28, 0.0  ;;  %v3764_v50 = vadd.f32 %v3763_v12, %v9531_v25  ;;  %v3990_v40 = vpack.c.bf16 %v11550_v46, %v11549_v47  ;;  %v11999_v47 = vmax.f32 %v9184_v23, 0.0 }
 0x61c   : > { %v3765_v1 = vpop.f32.mrf.mxu0 }
 0x61d   : > { %v3766_v7 = vadd.f32 %v3765_v1, %v9534_v54  ;;  %v3991_v57 = vpack.c.bf16 %v11547_v39, %v11548_v6  ;;  %v9765_v26 = vadd.f32 %v3764_v50, %v11996_v29  ;;  %v11998_v1 = vmax.f32 %v9180_v17, 0.0 }
 0x61e   : > { %v3767_v52 = vpop.f32.mrf.mxu0 }
 0x61f   : > { %v9769_v36 = vadd.f32 %v3766_v7, %v11997_v4  ;;  %v3768_v12 = vadd.f32 %v3767_v52, %v9531_v25  ;;  %4308 = vmatprep.mubr.bf16.mxu1 %v3991_v57  ;;  %v9774_v39 = vadd.f32 %v3762_v35, %v11998_v1  ;;  %v11552_v41 = vmax.f32 %v9765_v26, 0.0 }
 0x620   : > { %v3771_v6 = vpop.f32.mrf.mxu0  ;;  %4309 = vmatmul.mubr.bf16.gmra.mxu1 %v3990_v40  ;;  %v12000_v4 = vmax.f32 %v9203_v48, 0.0 }
 0x621   : > { %v9778_v46 = vadd.f32 %v3768_v12, %v11999_v47  ;;  %v11554_v22 = vmax.f32 %v9769_v36, 0.0  ;;  %v11553_v57 = vmax.f32 %v9774_v39, 0.0  ;;  %v3772_v17 = vadd.f32 %v3771_v6, %v9534_v54 }
 0x622   : > { %v3773_v50 = vpop.f32.mrf.mxu0  ;;  %v12001_v6 = vmax.f32 %v9207_v53, 0.0 }
 0x623   : > { %v11551_v7 = vmax.f32 %v9778_v46, 0.0  ;;  %v3774_v52 = vadd.f32 %v3773_v50, %v9531_v25  ;;  %v3992_v47 = vpack.c.bf16 %v11554_v22, %v11553_v57  ;;  %v12003_v57 = vmax.f32 %v9216_v13, 0.0 }
 0x624   : > { %v3775_v35 = vpop.f32.mrf.mxu0 }
 0x625   : > { %v3776_v40 = vadd.f32 %v3775_v35, %v9534_v54  ;;  %v3993_v23 = vpack.c.bf16 %v11551_v7, %v11552_v41  ;;  %v9797_v12 = vadd.f32 %v3774_v52, %v12000_v4  ;;  %v12002_v35 = vmax.f32 %v9212_v58, 0.0 }
 0x626   : > { %v3777_v29 = vpop.f32.mrf.mxu0 }
 0x627   : > { %v9801_v1 = vadd.f32 %v3776_v40, %v12001_v6  ;;  %v3778_v50 = vadd.f32 %v3777_v29, %v9531_v25  ;;  %4318 = vmatprep.mubr.bf16.mxu1 %v3993_v23  ;;  %v9806_v7 = vadd.f32 %v3772_v17, %v12002_v35  ;;  %v11556_v53 = vmax.f32 %v9797_v12, 0.0 }
 0x628   : > { %v3781_v41 = vpop.f32.mrf.mxu0  ;;  %4319 = vmatmul.mubr.bf16.gmra.mxu1 %v3992_v47  ;;  %v12004_v6 = vmax.f32 %v9235_v34, 0.0 }
 0x629   : > { %v9810_v22 = vadd.f32 %v3778_v50, %v12003_v57  ;;  %v11559_v48 = vmax.f32 %v9801_v1, 0.0  ;;  %v11558_v23 = vmax.f32 %v9806_v7, 0.0  ;;  %v3782_v58 = vadd.f32 %v3781_v41, %v9534_v54 }
 0x62a   : > { %v3783_v52 = vpop.f32.mrf.mxu0  ;;  %v12005_v41 = vmax.f32 %v9239_v45, 0.0 }
 0x62b   : > { %v11555_v40 = vmax.f32 %v9810_v22, 0.0  ;;  %v3784_v29 = vadd.f32 %v3783_v52, %v9531_v25  ;;  %v3994_v57 = vpack.c.bf16 %v11559_v48, %v11558_v23  ;;  %v12008_v23 = vmax.f32 %v12007_v15, 0.0 }
 0x62c   : > { %v3785_v17 = vpop.f32.mrf.mxu0 }
 0x62d   : > { %v3786_v47 = vadd.f32 %v3785_v17, %v9534_v54  ;;  %v3995_v13 = vpack.c.bf16 %v11555_v40, %v11556_v53  ;;  %v9829_v50 = vadd.f32 %v3784_v29, %v12004_v6  ;;  %v12006_v17 = vmax.f32 %v9244_v30, 0.0 }
 0x62e   : > { %v3787_v4 = vpop.f32.mrf.mxu0 }
 0x62f   : > { %v9833_v35 = vadd.f32 %v3786_v47, %v12005_v41  ;;  %v3788_v52 = vadd.f32 %v3787_v4, %v9531_v25  ;;  %4328 = vmatprep.mubr.bf16.mxu1 %v3995_v13  ;;  %v9838_v40 = vadd.f32 %v3782_v58, %v12006_v17  ;;  %v11564_v45 = vmax.f32 %v9829_v50, 0.0  ;;  %v12010_v41 = vld [vmem:[#allocation13_spill] sm:$0xff] }
 0x630   : > { %v3791_v53 = vpop.f32.mrf.mxu0  ;;  %4329 = vmatmul.mubr.bf16.gmra.mxu1 %v3994_v57 }
 0x631   : > { %v9842_v48 = vadd.f32 %v3788_v52, %v12008_v23  ;;  %v11567_v34 = vmax.f32 %v9833_v35, 0.0  ;;  %v11566_v13 = vmax.f32 %v9838_v40, 0.0  ;;  %v3792_v30 = vadd.f32 %v3791_v53, %v9534_v54 }
 0x632   : > { %v3793_v29 = vpop.f32.mrf.mxu0  ;;  %v12011_v52 = vmax.f32 %v12010_v41, 0.0 }
 0x633   : > { %12009 = vst [vmem:[#allocation12_spill] sm:$0xff] %v9842_v48  ;;  %v11563_v47 = vmax.f32 %v9842_v48, 0.0  ;;  %v3794_v4 = vadd.f32 %v3793_v29, %v9531_v25  ;;  %v3996_v23 = vpack.c.bf16 %v11567_v34, %v11566_v13  ;;  %v12013_v29 = vld [vmem:[#allocation14_spill] sm:$0xff]  ;;  %v12019_v13 = vld [vmem:[#allocation16_spill] sm:$0xff] }
 0x634   : > { %v3795_v58 = vpop.f32.mrf.mxu0  ;;  %v12014_v53 = vmax.f32 %v12013_v29, 0.0  ;;  %v12020_v34 = vmax.f32 %v12019_v13, 0.0  ;;  %v12022_v29 = vld [vmem:[#allocation17_spill] sm:$0xff] }
 0x635   : > { %v3796_v57 = vadd.f32 %v3795_v58, %v9534_v54  ;;  %v3997_v15 = vpack.c.bf16 %v11563_v47, %v11564_v45  ;;  %v9861_v17 = vadd.f32 %v3794_v4, %v12011_v52  ;;  %v9870_v47 = vadd.f32 %v3792_v30, %v12017_v9  ;;  %v7411_v4 = vld [vmem:[#allocation7 + $0x380] ss:$8 sps:$4 sm:$0xff]  }
 0x636   : > { %v3797_v6 = vpop.f32.mrf.mxu0  ;;  %4742 = vmatpush2.bf16.msra.mxu0 %v7411_v4  ;;  %v12025_v4 = vld [vmem:[#allocation18_spill] sm:$0xff] }
 0x637   : > { %12012 = vst [vmem:[#allocation13_spill] sm:$0xff] %v9861_v17  ;;  %v9865_v33 = vadd.f32 %v3796_v57, %v12014_v53  ;;  %v3798_v58 = vadd.f32 %v3797_v6, %v9531_v25  ;;  %4338 = vmatprep.mubr.bf16.mxu1 %v3997_v15  ;;  %12018 = vst [vmem:[#allocation15_spill] sm:$0xff] %v9870_v47  ;;  %v11572_v57 = vmax.f32 %v9861_v17, 0.0  ;;  %v11574_v9 = vmax.f32 %v9870_v47, 0.0  ;;  %v12028_v17 = vld [vmem:[#allocation19_spill] sm:$0xff]  ;;  %v12031_v47 = vld [vmem:[#allocation20_spill] sm:$0xff] }
 0x638   : > { %v3801_v45 = vpop.f32.mrf.mxu0  ;;  %4339 = vmatmul.mubr.bf16.gmra.mxu1 %v3996_v23  ;;  %v12023_v53 = vmax.f32 %v12022_v29, 0.0 }
 0x639   : > { %12015 = vst [vmem:[#allocation14_spill] sm:$0xff] %v9865_v33  ;;  %v9874_v48 = vadd.f32 %v3798_v58, %v12020_v34  ;;  %v11575_v41 = vmax.f32 %v9865_v33, 0.0  ;;  %v3802_v30 = vadd.f32 %v3801_v45, %v9534_v54  ;;  %v12026_v45 = vmax.f32 %v12025_v4, 0.0  ;;  %v12034_v4 = vld [vmem:[#allocation21_spill] sm:$0xff] }
 0x63a   : > { %v3803_v52 = vpop.f32.mrf.mxu0 }
 0x63b   : > { %12021 = vst [vmem:[#allocation16_spill] sm:$0xff] %v9874_v48  ;;  %v11571_v15 = vmax.f32 %v9874_v48, 0.0  ;;  %v3804_v44 = vadd.f32 %v3803_v52, %v9531_v25  ;;  %v3998_v27 = vpack.c.bf16 %v11575_v41, %v11574_v9  ;;  %v12029_v48 = vmax.f32 %v12028_v17, 0.0 }
 0x63c   : > { %v3805_v23 = vpop.f32.mrf.mxu0  ;;  %v12032_v9 = vmax.f32 %v12031_v47, 0.0 }
 0x63d   : > { %v3806_v34 = vadd.f32 %v3805_v23, %v9534_v54  ;;  %v3999_v13 = vpack.c.bf16 %v11571_v15, %v11572_v57  ;;  %v9893_v58 = vadd.f32 %v3804_v44, %v12023_v53  ;;  %v9902_v15 = vadd.f32 %v3802_v30, %v12029_v48 }
 0x63e   : > { %v3807_v6 = vpop.f32.mrf.mxu0 }
 0x63f   : > { %12024 = vst [vmem:[#allocation17_spill] sm:$0xff] %v9893_v58  ;;  %v9897_v52 = vadd.f32 %v3806_v34, %v12026_v45  ;;  %v3808_v23 = vadd.f32 %v3807_v6, %v9531_v25  ;;  %4348 = vmatprep.mubr.bf16.mxu1 %v3999_v13  ;;  %12030 = vst [vmem:[#allocation19_spill] sm:$0xff] %v9902_v15  ;;  %v11580_v53 = vmax.f32 %v9893_v58, 0.0  ;;  %v11582_v13 = vmax.f32 %v9902_v15, 0.0  ;;  %v12040_v58 = vld [vmem:[#allocation23_spill] sm:$0xff]  ;;  %v12043_v15 = vld [vmem:[#allocation24_spill] sm:$0xff] }
 0x640   : > { %v3811_v57 = vpop.f32.mrf.mxu0  ;;  %4349 = vmatmul.mubr.bf16.gmra.mxu1 %v3998_v27  ;;  %v12035_v45 = vmax.f32 %v12034_v4, 0.0 }
 0x641   : > { %12027 = vst [vmem:[#allocation18_spill] sm:$0xff] %v9897_v52  ;;  %v9906_v41 = vadd.f32 %v3808_v23, %v12032_v9  ;;  %v11583_v44 = vmax.f32 %v9897_v52, 0.0  ;;  %v3812_v48 = vadd.f32 %v3811_v57, %v9534_v54 }
 0x642   : > { %v3813_v29 = vpop.f32.mrf.mxu0 }
 0x643   : > { %12033 = vst [vmem:[#allocation20_spill] sm:$0xff] %v9906_v41  ;;  %v11579_v34 = vmax.f32 %v9906_v41, 0.0  ;;  %v3814_v6 = vadd.f32 %v3813_v29, %v9531_v25  ;;  %v4000_v9 = vpack.c.bf16 %v11583_v44, %v11582_v13  ;;  %v12037_v29 = vld [vmem:[#allocation22_spill] sm:$0xff]  ;;  %v12041_v41 = vmax.f32 %v12040_v58, 0.0 }
 0x644   : > { %v3815_v17 = vpop.f32.mrf.mxu0  ;;  %v12038_v57 = vmax.f32 %v12037_v29, 0.0  ;;  %v12044_v13 = vmax.f32 %v12043_v15, 0.0  ;;  %v12046_v29 = vld [vmem:[#allocation25_spill] sm:$0xff] }
 0x645   : > { %v3816_v30 = vadd.f32 %v3815_v17, %v9534_v54  ;;  %v4001_v47 = vpack.c.bf16 %v11579_v34, %v11580_v53  ;;  %v9925_v23 = vadd.f32 %v3814_v6, %v12035_v45  ;;  %v9934_v34 = vadd.f32 %v3812_v48, %v12041_v41 }
 0x646   : > { %v3817_v27 = vpop.f32.mrf.mxu0 }
 0x647   : > { %12036 = vst [vmem:[#allocation21_spill] sm:$0xff] %v9925_v23  ;;  %v9929_v33 = vadd.f32 %v3816_v30, %v12038_v57  ;;  %v3818_v17 = vadd.f32 %v3817_v27, %v9531_v25  ;;  %4358 = vmatprep.mubr.bf16.mxu1 %v4001_v47  ;;  %12042 = vst [vmem:[#allocation23_spill] sm:$0xff] %v9934_v34  ;;  %v11588_v45 = vmax.f32 %v9925_v23, 0.0  ;;  %v11590_v47 = vmax.f32 %v9934_v34, 0.0  ;;  %v12052_v23 = vld [vmem:[#allocation27_spill] sm:$0xff]  ;;  %v12055_v34 = vld [vmem:[#allocation28_spill] sm:$0xff] }
 0x648   : > { %v3821_v53 = vpop.f32.mrf.mxu0  ;;  %4359 = vmatmul.mubr.bf16.gmra.mxu1 %v4000_v9  ;;  %v12047_v57 = vmax.f32 %v12046_v29, 0.0 }
 0x649   : > { %12039 = vst [vmem:[#allocation22_spill] sm:$0xff] %v9929_v33  ;;  %v9938_v44 = vadd.f32 %v3818_v17, %v12044_v13  ;;  %v11591_v6 = vmax.f32 %v9929_v33, 0.0  ;;  %v3822_v41 = vadd.f32 %v3821_v53, %v9534_v54 }
 0x64a   : > { %v3823_v4 = vpop.f32.mrf.mxu0 }
 0x64b   : > { %12045 = vst [vmem:[#allocation24_spill] sm:$0xff] %v9938_v44  ;;  %v11587_v30 = vmax.f32 %v9938_v44, 0.0  ;;  %v3824_v27 = vadd.f32 %v3823_v4, %v9531_v25  ;;  %v4002_v13 = vpack.c.bf16 %v11591_v6, %v11590_v47  ;;  %v12049_v4 = vld [vmem:[#allocation26_spill] sm:$0xff]  ;;  %v12053_v44 = vmax.f32 %v12052_v23, 0.0 }
 0x64c   : > { %v3825_v58 = vpop.f32.mrf.mxu0  ;;  %v12050_v53 = vmax.f32 %v12049_v4, 0.0  ;;  %v12056_v47 = vmax.f32 %v12055_v34, 0.0  ;;  %v12058_v4 = vld [vmem:[#allocation29_spill] sm:$0xff] }
 0x64d   : > { %v3826_v48 = vadd.f32 %v3825_v58, %v9534_v54  ;;  %v4003_v15 = vpack.c.bf16 %v11587_v30, %v11588_v45  ;;  %v9957_v17 = vadd.f32 %v3824_v27, %v12047_v57  ;;  %v9966_v30 = vadd.f32 %v3822_v41, %v12053_v44 }
 0x64e   : > { %v3827_v9 = vpop.f32.mrf.mxu0 }
 0x64f   : > { %12048 = vst [vmem:[#allocation25_spill] sm:$0xff] %v9957_v17  ;;  %v9961_v52 = vadd.f32 %v3826_v48, %v12050_v53  ;;  %v3828_v58 = vadd.f32 %v3827_v9, %v9531_v25  ;;  %4368 = vmatprep.mubr.bf16.mxu1 %v4003_v15  ;;  %12054 = vst [vmem:[#allocation27_spill] sm:$0xff] %v9966_v30  ;;  %v11596_v57 = vmax.f32 %v9957_v17, 0.0  ;;  %v11598_v15 = vmax.f32 %v9966_v30, 0.0  ;;  %v12064_v17 = vld [vmem:[#allocation31_spill] sm:$0xff]  ;;  %v12067_v30 = vld [vmem:[#allocation32_spill] sm:$0xff] }
 0x650   : > { %v3831_v45 = vpop.f32.mrf.mxu0  ;;  %4369 = vmatmul.mubr.bf16.gmra.mxu1 %v4002_v13  ;;  %v12059_v53 = vmax.f32 %v12058_v4, 0.0 }
 0x651   : > { %12051 = vst [vmem:[#allocation26_spill] sm:$0xff] %v9961_v52  ;;  %v9970_v6 = vadd.f32 %v3828_v58, %v12056_v47  ;;  %v11599_v27 = vmax.f32 %v9961_v52, 0.0  ;;  %v3832_v44 = vadd.f32 %v3831_v45, %v9534_v54 }
 0x652   : > { %v3833_v29 = vpop.f32.mrf.mxu0 }
 0x653   : > { %12057 = vst [vmem:[#allocation28_spill] sm:$0xff] %v9970_v6  ;;  %v11595_v48 = vmax.f32 %v9970_v6, 0.0  ;;  %v3834_v9 = vadd.f32 %v3833_v29, %v9531_v25  ;;  %v4004_v47 = vpack.c.bf16 %v11599_v27, %v11598_v15  ;;  %v12061_v29 = vld [vmem:[#allocation30_spill] sm:$0xff]  ;;  %v12065_v6 = vmax.f32 %v12064_v17, 0.0 }
 0x654   : > { %v3835_v23 = vpop.f32.mrf.mxu0  ;;  %v12062_v45 = vmax.f32 %v12061_v29, 0.0  ;;  %v12068_v15 = vmax.f32 %v12067_v30, 0.0  ;;  %v12070_v29 = vld [vmem:[#allocation33_spill] sm:$0xff] }
 0x655   : > { %v3836_v41 = vadd.f32 %v3835_v23, %v9534_v54  ;;  %v4005_v34 = vpack.c.bf16 %v11595_v48, %v11596_v57  ;;  %v9989_v58 = vadd.f32 %v3834_v9, %v12059_v53  ;;  %v9998_v48 = vadd.f32 %v3832_v44, %v12065_v6 }
 0x656   : > { %v3837_v13 = vpop.f32.mrf.mxu0 }
 0x657   : > { %12060 = vst [vmem:[#allocation29_spill] sm:$0xff] %v9989_v58  ;;  %v9993_v33 = vadd.f32 %v3836_v41, %v12062_v45  ;;  %v3838_v23 = vadd.f32 %v3837_v13, %v9531_v25  ;;  %4378 = vmatprep.mubr.bf16.mxu1 %v4005_v34  ;;  %12066 = vst [vmem:[#allocation31_spill] sm:$0xff] %v9998_v48  ;;  %v11603_v53 = vmax.f32 %v9989_v58, 0.0  ;;  %v11605_v34 = vmax.f32 %v9998_v48, 0.0 }
 0x658   : > { %v3841_v57 = vpop.f32.mrf.mxu0  ;;  %4379 = vmatmul.mubr.bf16.gmra.mxu1 %v4004_v47  ;;  %v12071_v45 = vmax.f32 %v12070_v29, 0.0 }
 0x659   : > { %12063 = vst [vmem:[#allocation30_spill] sm:$0xff] %v9993_v33  ;;  %v10002_v27 = vadd.f32 %v3838_v23, %v12068_v15  ;;  %v11610_v9 = vmax.f32 %v9993_v33, 0.0  ;;  %v3842_v6 = vadd.f32 %v3841_v57, %v9534_v54 }
 0x65a   : > { %v3843_v4 = vpop.f32.mrf.mxu0 }
 0x65b   : > { %12069 = vst [vmem:[#allocation32_spill] sm:$0xff] %v10002_v27  ;;  %v11602_v41 = vmax.f32 %v10002_v27, 0.0  ;;  %v3844_v13 = vadd.f32 %v3843_v4, %v9531_v25  ;;  %v4006_v15 = vpack.c.bf16 %v11610_v9, %v11605_v34  ;;  %v12073_v4 = vld [vmem:[#allocation34_spill] sm:$0xff] }
 0x65c   : > { %v3845_v17 = vpop.f32.mrf.mxu0  ;;  %v12074_v57 = vmax.f32 %v12073_v4, 0.0  ;;  %v7423_v4 = vld [vmem:[#allocation5 + $0x440] ss:$8 sps:$4 sm:$0xff]  }
 0x65d   : > { %v3846_v44 = vadd.f32 %v3845_v17, %v9534_v54  ;;  %v4007_v30 = vpack.c.bf16 %v11602_v41, %v11603_v53  ;;  %v10021_v23 = vadd.f32 %v3844_v13, %v12071_v45  ;;  %v12076_v17 = vld [vmem:[#allocation35_spill] sm:$0xff]  ;;  %v12079_v53 = vld [vmem:[#allocation36_spill] sm:$0xff] }
 0x65e   : > { %v3847_v47 = vpop.f32.mrf.mxu0  ;;  %v12077_v27 = vmax.f32 %v12076_v17, 0.0  ;;  %v12080_v48 = vmax.f32 %v12079_v53, 0.0  ;;  %v7416_v53 = vld [vmem:[#allocation5 + $0x474] ss:$8 sps:$4 sm:$0xff]  }
 0x65f   : > { %12072 = vst [vmem:[#allocation33_spill] sm:$0xff] %v10021_v23  ;;  %v10025_v52 = vadd.f32 %v3846_v44, %v12074_v57  ;;  %v3848_v54 = vadd.f32 %v3847_v47, %v9531_v25  ;;  %4388 = vmatprep.mubr.bf16.mxu1 %v4007_v30  ;;  %v11609_v13 = vmax.f32 %v10021_v23, 0.0  ;;  %5270 = vmatprep.subr.bf16.mxu1 %v7416_v53  ;;  %v7419_v30 = vld [vmem:[#allocation5 + $0x464] ss:$8 sps:$4 sm:$0xff]   ;;  %v7422_v47 = vld [vmem:[#allocation5 + $0x454] ss:$8 sps:$4 sm:$0xff]  }
 0x660   : > { %v10030_v41 = vadd.f32 %v3842_v6, %v12077_v27  ;;  %4389 = vmatmul.mubr.bf16.gmra.mxu1 %v4006_v15  ;;  %v7417_v6 = vld [vmem:[#allocation5 + $0x460] ss:$8 sps:$4 sm:$0xff]   ;;  %v7420_v15 = vld [vmem:[#allocation5 + $0x450] ss:$8 sps:$4 sm:$0xff]   ;;  %v7425_v57 = vld [vmem:[#allocation5 + $0x444] ss:$8 sps:$4 sm:$0xff]  }
 0x661   : > { %12075 = vst [vmem:[#allocation34_spill] sm:$0xff] %v10025_v52  ;;  %v10034_v34 = vadd.f32 %v3848_v54, %v12080_v48  ;;  %v11608_v29 = vmax.f32 %v10025_v52, 0.0  ;;  %v7414_v48 = vld [vmem:[#allocation5 + $0x470] ss:$8 sps:$4 sm:$0xff]   ;;  %v6733_v54 = vld [vmem:[%s11253_s4 + $0x6] sm:$0x3] }
 0x662   : > { %12078 = vst [vmem:[#allocation35_spill] sm:$0xff] %v10030_v41  ;;  %v11607_v44 = vmax.f32 %v10030_v41, 0.0  ;;  %5271 = vmatpush1.bf16.msra.mxu1 %v7414_v48  ;;  %v7428_v48 = vld [vmem:[#allocation5 + $0x434] ss:$8 sps:$4 sm:$0xff]   ;;  %v10055_v53 = vrot.slane %v6733_v54, %v7874_v2 }
 0x663   : > { %12081 = vst [vmem:[#allocation36_spill] sm:$0xff] %v10034_v34  ;;  %v11606_v45 = vmax.f32 %v10034_v34, 0.0  ;;  %5272 = vmatprep.subr.bf16.mxu1 %v7419_v30  ;;  %v7432_v34 = vld [vmem:[#allocation5 + $0x410] ss:$8 sps:$4 sm:$0xff]  }
 0x664   : > { %v4008_v27 = vpack.c.bf16 %v11608_v29, %v11607_v44  ;;  %v7434_v29 = vld [vmem:[#allocation5 + $0x414] ss:$8 sps:$4 sm:$0xff]  }
 0x665   : > { %v4009_v25 = vpack.c.bf16 %v11606_v45, %v11609_v13 }
 0x666   : > { %5273 = vmatpush1.bf16.msra.mxu1 %v7417_v6 }
 0x667   : > { %4398 = vmatprep.mubr.bf16.mxu1 %v4009_v25  ;;  %5274 = vmatprep.subr.bf16.mxu1 %v7422_v47  ;;  %v10052_v25 = vrot.slane %v6733_v54, %v7872_v63 }
 0x668   : > { %4399 = vmatmul.mubr.bf16.gmra.mxu1 %v4008_v27  ;;  %v7426_v27 = vld [vmem:[#allocation5 + $0x430] ss:$8 sps:$4 sm:$0xff]  }
 0x66a   : > { %5275 = vmatpush1.bf16.msra.mxu1 %v7420_v15 }
 0x66b   : > { %5276 = vmatprep.subr.bf16.mxu1 %v7425_v57  ;;  %v7431_v57 = vld [vmem:[#allocation5 + $0x424] ss:$8 sps:$4 sm:$0xff]  }
 0x66e   : > { %5277 = vmatpush1.bf16.msra.mxu1 %v7423_v4  ;;  %v7429_v4 = vld [vmem:[#allocation5 + $0x420] ss:$8 sps:$4 sm:$0xff]  }
 0x66f   : > { %5278 = vmatprep.subr.bf16.mxu1 %v7428_v48 }
 0x672   : > { %5279 = vmatpush1.bf16.msra.mxu1 %v7426_v27  ;;  %v7437_v27 = vld [vmem:[#allocation5 + $0x404] ss:$8 sps:$4 sm:$0xff]  }
 0x673   : > { %5280 = vmatprep.subr.bf16.mxu1 %v7431_v57  ;;  %v7443_v57 = vld [vmem:[#allocation5 + $0x4e4] ss:$8 sps:$4 sm:$0xff]  }
 0x676   : > { %5281 = vmatpush1.bf16.msra.mxu1 %v7429_v4 }
 0x677   : > { %5282 = vmatprep.subr.bf16.mxu1 %v7434_v29 }
 0x67a   : > { %5283 = vmatpush1.bf16.msra.mxu1 %v7432_v34 }
 0x67b   : > { %5284 = vmatprep.subr.bf16.mxu1 %v7437_v27 }
 0x6b0   : > { %v4250_v17 = vpop.f32.mrf.mxu1 }
 0x6b1   : > { %v4251_v45 = vadd.f32 %v4250_v17, %v10055_v53  ;;  %v7435_v17 = vld [vmem:[#allocation5 + $0x400] ss:$8 sps:$4 sm:$0xff]  }
 0x6b2   : > { %v4252_v6 = vpop.f32.mrf.mxu1  ;;  %5285 = vmatpush1.bf16.msra.mxu1 %v7435_v17 }
 0x6b3   : > { %v4253_v15 = vadd.f32 %v4252_v6, %v10052_v25  ;;  %v4409_v6 = vmax.f32 %v4251_v45, 0.0 }
 0x6b4   : > { %v4254_v30 = vpop.f32.mrf.mxu1 }
 0x6b5   : > { %v4255_v47 = vadd.f32 %v4254_v30, %v10055_v53  ;;  %v4410_v48 = vmax.f32 %v4253_v15, 0.0 }
 0x6b6   : > { %v4256_v44 = vpop.f32.mrf.mxu1 }
 0x6b7   : > { %v4257_v13 = vadd.f32 %v4256_v44, %v10052_v25  ;;  %v4411_v9 = vmax.f32 %v4255_v47, 0.0  ;;  %v7440_v47 = vld [vmem:[#allocation5 + $0x4f4] ss:$8 sps:$4 sm:$0xff]  }
 0x6b8   : > { %v4260_v54 = vpop.f32.mrf.mxu1  ;;  %5286 = vmatprep.subr.bf16.mxu1 %v7440_v47 }
 0x6b9   : > { %v4412_v41 = vmax.f32 %v4257_v13, 0.0  ;;  %v4473_v23 = vpack.c.bf16 %v4411_v9, %v4409_v6  ;;  %v4261_v4 = vadd.f32 %v4260_v54, %v10055_v53  ;;  %v7438_v9 = vld [vmem:[#allocation5 + $0x4f0] ss:$8 sps:$4 sm:$0xff]  }
 0x6ba   : > { %v4262_v52 = vpop.f32.mrf.mxu1  ;;  %5287 = vmatpush2.bf16.msra.mxu1 %v7438_v9 }
 0x6bb   : > { %v4474_v30 = vpack.c.bf16 %v4412_v41, %v4410_v48  ;;  %v4263_v58 = vadd.f32 %v4262_v52, %v10052_v25  ;;  %v4413_v52 = vmax.f32 %v4261_v4, 0.0  ;;  %5288 = vmatprep.subr.bf16.mxu1 %v7443_v57 }
 0x6bc   : > { %v4264_v33 = vpop.f32.mrf.mxu1 }
 0x6bd   : > { %v4265_v44 = vadd.f32 %v4264_v33, %v10055_v53  ;;  %4743 = vmatprep.mubr.bf16.mxu0 %v4474_v30  ;;  %v4414_v41 = vmax.f32 %v4263_v58, 0.0  ;;  %v7441_v30 = vld [vmem:[#allocation5 + $0x4e0] ss:$8 sps:$4 sm:$0xff]  }
 0x6be   : > { %v4266_v15 = vpop.f32.mrf.mxu1  ;;  %4744 = vmatmul.mubr.bf16.vlgmr.msra.gmra.mxu0 %v4473_v23  ;;  %5289 = vmatpush2.bf16.msra.mxu1 %v7441_v30 }
 0x6bf   : > { %v4267_v29 = vadd.f32 %v4266_v15, %v10052_v25  ;;  %v4415_v13 = vmax.f32 %v4265_v44, 0.0  ;;  %v7446_v44 = vld [vmem:[#allocation5 + $0x4d4] ss:$8 sps:$4 sm:$0xff]  }
 0x6c0   : > { %v4270_v45 = vpop.f32.mrf.mxu1  ;;  %5290 = vmatprep.subr.bf16.mxu1 %v7446_v44 }
 0x6c1   : > { %v4416_v34 = vmax.f32 %v4267_v29, 0.0  ;;  %v4475_v6 = vpack.c.bf16 %v4415_v13, %v4413_v52  ;;  %v4271_v17 = vadd.f32 %v4270_v45, %v10055_v53  ;;  %v7444_v29 = vld [vmem:[#allocation5 + $0x4d0] ss:$8 sps:$4 sm:$0xff]  }
 0x6c2   : > { %v4272_v48 = vpop.f32.mrf.mxu1  ;;  %5291 = vmatpush2.bf16.msra.mxu1 %v7444_v29 }
 0x6c3   : > { %v4476_v33 = vpack.c.bf16 %v4416_v34, %v4414_v41  ;;  %v4273_v54 = vadd.f32 %v4272_v48, %v10052_v25  ;;  %v7449_v41 = vld [vmem:[#allocation5 + $0x4c4] ss:$8 sps:$4 sm:$0xff]   ;;  %v4417_v34 = vmax.f32 %v4271_v17, 0.0 }
 0x6c4   : > { %v4274_v27 = vpop.f32.mrf.mxu1  ;;  %5292 = vmatprep.subr.bf16.mxu1 %v7449_v41 }
 0x6c5   : > { %v4275_v23 = vadd.f32 %v4274_v27, %v10055_v53  ;;  %4753 = vmatprep.mubr.bf16.mxu0 %v4476_v33  ;;  %v4418_v13 = vmax.f32 %v4273_v54, 0.0  ;;  %v7447_v27 = vld [vmem:[#allocation5 + $0x4c0] ss:$8 sps:$4 sm:$0xff]  }
 0x6c6   : > { %v4276_v58 = vpop.f32.mrf.mxu1  ;;  %4754 = vmatmul.mubr.bf16.gmra.mxu0 %v4475_v6  ;;  %5293 = vmatpush2.bf16.msra.mxu1 %v7447_v27 }
 0x6c7   : > { %v4277_v47 = vadd.f32 %v4276_v58, %v10052_v25  ;;  %v4419_v4 = vmax.f32 %v4275_v23, 0.0  ;;  %v7452_v23 = vld [vmem:[#allocation5 + $0x4b4] ss:$8 sps:$4 sm:$0xff]  }
 0x6c8   : > { %v4280_v15 = vpop.f32.mrf.mxu1  ;;  %5294 = vmatprep.subr.bf16.mxu1 %v7452_v23 }
 0x6c9   : > { %v4420_v9 = vmax.f32 %v4277_v47, 0.0  ;;  %v4477_v33 = vpack.c.bf16 %v4419_v4, %v4417_v34  ;;  %v4281_v30 = vadd.f32 %v4280_v15, %v10055_v53  ;;  %v7450_v47 = vld [vmem:[#allocation5 + $0x4b0] ss:$8 sps:$4 sm:$0xff]  }
 0x6ca   : > { %v4282_v52 = vpop.f32.mrf.mxu1  ;;  %5295 = vmatpush2.bf16.msra.mxu1 %v7450_v47 }
 0x6cb   : > { %v4478_v48 = vpack.c.bf16 %v4420_v9, %v4418_v13  ;;  %v4283_v45 = vadd.f32 %v4282_v52, %v10052_v25  ;;  %v7455_v13 = vld [vmem:[#allocation5 + $0x4a4] ss:$8 sps:$4 sm:$0xff]   ;;  %v4421_v9 = vmax.f32 %v4281_v30, 0.0 }
 0x6cc   : > { %v4284_v57 = vpop.f32.mrf.mxu1  ;;  %5296 = vmatprep.subr.bf16.mxu1 %v7455_v13 }
 0x6cd   : > { %v4285_v6 = vadd.f32 %v4284_v57, %v10055_v53  ;;  %4763 = vmatprep.mubr.bf16.mxu0 %v4478_v48  ;;  %v4422_v4 = vmax.f32 %v4283_v45, 0.0  ;;  %v7453_v57 = vld [vmem:[#allocation5 + $0x4a0] ss:$8 sps:$4 sm:$0xff]  }
 0x6ce   : > { %v4286_v54 = vpop.f32.mrf.mxu1  ;;  %4764 = vmatmul.mubr.bf16.gmra.mxu0 %v4477_v33  ;;  %5297 = vmatpush2.bf16.msra.mxu1 %v7453_v57 }
 0x6cf   : > { %v4287_v44 = vadd.f32 %v4286_v54, %v10052_v25  ;;  %v4423_v17 = vmax.f32 %v4285_v6, 0.0  ;;  %v7458_v6 = vld [vmem:[#allocation5 + $0x494] ss:$8 sps:$4 sm:$0xff]  }
 0x6d0   : > { %v4290_v58 = vpop.f32.mrf.mxu1  ;;  %5298 = vmatprep.subr.bf16.mxu1 %v7458_v6 }
 0x6d1   : > { %v4424_v29 = vmax.f32 %v4287_v44, 0.0  ;;  %v4479_v48 = vpack.c.bf16 %v4423_v17, %v4421_v9  ;;  %v4291_v27 = vadd.f32 %v4290_v58, %v10055_v53  ;;  %v7456_v44 = vld [vmem:[#allocation5 + $0x490] ss:$8 sps:$4 sm:$0xff]  }
 0x6d2   : > { %v4292_v34 = vpop.f32.mrf.mxu1  ;;  %5299 = vmatpush2.bf16.msra.mxu1 %v7456_v44 }
 0x6d3   : > { %v4480_v52 = vpack.c.bf16 %v4424_v29, %v4422_v4  ;;  %v4293_v15 = vadd.f32 %v4292_v34, %v10052_v25  ;;  %v4425_v4 = vmax.f32 %v4291_v27, 0.0 }
 0x6d4   : > { %v4294_v41 = vpop.f32.mrf.mxu1 }
 0x6d5   : > { %v4295_v33 = vadd.f32 %v4294_v41, %v10055_v53  ;;  %4773 = vmatprep.mubr.bf16.mxu0 %v4480_v52  ;;  %v4426_v17 = vmax.f32 %v4293_v15, 0.0 }
 0x6d6   : > { %v4296_v45 = vpop.f32.mrf.mxu1  ;;  %4774 = vmatmul.mubr.bf16.gmra.mxu0 %v4479_v48 }
 0x6d7   : > { %v4297_v23 = vadd.f32 %v4296_v45, %v10052_v25  ;;  %v4427_v30 = vmax.f32 %v4295_v33, 0.0 }
 0x6d8   : > { %v4300_v54 = vpop.f32.mrf.mxu1 }
 0x6d9   : > { %v4428_v47 = vmax.f32 %v4297_v23, 0.0  ;;  %v4481_v34 = vpack.c.bf16 %v4427_v30, %v4425_v4  ;;  %v4301_v48 = vadd.f32 %v4300_v54, %v10055_v53 }
 0x6da   : > { %v4302_v29 = vpop.f32.mrf.mxu1 }
 0x6db   : > { %v4482_v9 = vpack.c.bf16 %v4428_v47, %v4426_v17  ;;  %v4303_v13 = vadd.f32 %v4302_v29, %v10052_v25  ;;  %v4429_v45 = vmax.f32 %v4301_v48, 0.0 }
 0x6dc   : > { %v4304_v52 = vpop.f32.mrf.mxu1 }
 0x6dd   : > { %v4305_v58 = vadd.f32 %v4304_v52, %v10055_v53  ;;  %4783 = vmatprep.mubr.bf16.mxu0 %v4482_v9  ;;  %v4430_v6 = vmax.f32 %v4303_v13, 0.0 }
 0x6de   : > { %v4306_v41 = vpop.f32.mrf.mxu1  ;;  %4784 = vmatmul.mubr.bf16.gmra.mxu0 %v4481_v34 }
 0x6df   : > { %v4307_v57 = vadd.f32 %v4306_v41, %v10052_v25  ;;  %v4431_v15 = vmax.f32 %v4305_v58, 0.0 }
 0x6e0   : > { %v4310_v33 = vpop.f32.mrf.mxu1 }
 0x6e1   : > { %v4432_v27 = vmax.f32 %v4307_v57, 0.0  ;;  %v4483_v17 = vpack.c.bf16 %v4431_v15, %v4429_v45  ;;  %v4311_v54 = vadd.f32 %v4310_v33, %v10055_v53 }
 0x6e2   : > { %v4312_v23 = vpop.f32.mrf.mxu1 }
 0x6e3   : > { %v4484_v30 = vpack.c.bf16 %v4432_v27, %v4430_v6  ;;  %v4313_v47 = vadd.f32 %v4312_v23, %v10052_v25  ;;  %v4433_v48 = vmax.f32 %v4311_v54, 0.0 }
 0x6e4   : > { %v4314_v44 = vpop.f32.mrf.mxu1 }
 0x6e5   : > { %v4315_v4 = vadd.f32 %v4314_v44, %v10055_v53  ;;  %4793 = vmatprep.mubr.bf16.mxu0 %v4484_v30  ;;  %v4434_v13 = vmax.f32 %v4313_v47, 0.0 }
 0x6e6   : > { %v4316_v29 = vpop.f32.mrf.mxu1  ;;  %4794 = vmatmul.mubr.bf16.gmra.mxu0 %v4483_v17 }
 0x6e7   : > { %v4317_v9 = vadd.f32 %v4316_v29, %v10052_v25  ;;  %v4435_v34 = vmax.f32 %v4315_v4, 0.0 }
 0x6e8   : > { %v4320_v52 = vpop.f32.mrf.mxu1 }
 0x6e9   : > { %v4436_v58 = vmax.f32 %v4317_v9, 0.0  ;;  %v4485_v15 = vpack.c.bf16 %v4435_v34, %v4433_v48  ;;  %v4321_v33 = vadd.f32 %v4320_v52, %v10055_v53 }
 0x6ea   : > { %v4322_v41 = vpop.f32.mrf.mxu1 }
 0x6eb   : > { %v4486_v57 = vpack.c.bf16 %v4436_v58, %v4434_v13  ;;  %v4323_v27 = vadd.f32 %v4322_v41, %v10052_v25  ;;  %v4437_v54 = vmax.f32 %v4321_v33, 0.0 }
 0x6ec   : > { %v4324_v6 = vpop.f32.mrf.mxu1 }
 0x6ed   : > { %v4325_v45 = vadd.f32 %v4324_v6, %v10055_v53  ;;  %4803 = vmatprep.mubr.bf16.mxu0 %v4486_v57  ;;  %v4438_v47 = vmax.f32 %v4323_v27, 0.0 }
 0x6ee   : > { %v4326_v23 = vpop.f32.mrf.mxu1  ;;  %4804 = vmatmul.mubr.bf16.gmra.mxu0 %v4485_v15 }
 0x6ef   : > { %v4327_v30 = vadd.f32 %v4326_v23, %v10052_v25  ;;  %v4439_v17 = vmax.f32 %v4325_v45, 0.0 }
 0x6f0   : > { %v4330_v44 = vpop.f32.mrf.mxu1 }
 0x6f1   : > { %v4440_v4 = vmax.f32 %v4327_v30, 0.0  ;;  %v4487_v34 = vpack.c.bf16 %v4439_v17, %v4437_v54  ;;  %v4331_v52 = vadd.f32 %v4330_v44, %v10055_v53 }
 0x6f2   : > { %v4332_v29 = vpop.f32.mrf.mxu1 }
 0x6f3   : > { %v4488_v9 = vpack.c.bf16 %v4440_v4, %v4438_v47  ;;  %v4333_v58 = vadd.f32 %v4332_v29, %v10052_v25  ;;  %v4441_v33 = vmax.f32 %v4331_v52, 0.0 }
 0x6f4   : > { %v4334_v13 = vpop.f32.mrf.mxu1 }
 0x6f5   : > { %v4335_v48 = vadd.f32 %v4334_v13, %v10055_v53  ;;  %4813 = vmatprep.mubr.bf16.mxu0 %v4488_v9  ;;  %v4442_v27 = vmax.f32 %v4333_v58, 0.0 }
 0x6f6   : > { %v4336_v41 = vpop.f32.mrf.mxu1  ;;  %4814 = vmatmul.mubr.bf16.gmra.mxu0 %v4487_v34 }
 0x6f7   : > { %v4337_v57 = vadd.f32 %v4336_v41, %v10052_v25  ;;  %v4443_v15 = vmax.f32 %v4335_v48, 0.0 }
 0x6f8   : > { %v4340_v6 = vpop.f32.mrf.mxu1 }
 0x6f9   : > { %v4444_v45 = vmax.f32 %v4337_v57, 0.0  ;;  %v4489_v17 = vpack.c.bf16 %v4443_v15, %v4441_v33  ;;  %v4341_v44 = vadd.f32 %v4340_v6, %v10055_v53 }
 0x6fa   : > { %v4342_v23 = vpop.f32.mrf.mxu1 }
 0x6fb   : > { %v4490_v30 = vpack.c.bf16 %v4444_v45, %v4442_v27  ;;  %v4343_v4 = vadd.f32 %v4342_v23, %v10052_v25  ;;  %v4445_v52 = vmax.f32 %v4341_v44, 0.0 }
 0x6fc   : > { %v4344_v47 = vpop.f32.mrf.mxu1 }
 0x6fd   : > { %v4345_v54 = vadd.f32 %v4344_v47, %v10055_v53  ;;  %4823 = vmatprep.mubr.bf16.mxu0 %v4490_v30  ;;  %v4446_v58 = vmax.f32 %v4343_v4, 0.0  ;;  %v7461_v4 = vld [vmem:[#allocation5 + $0x484] ss:$8 sps:$4 sm:$0xff]  }
 0x6fe   : > { %v4346_v29 = vpop.f32.mrf.mxu1  ;;  %4824 = vmatmul.mubr.bf16.gmra.mxu0 %v4489_v17  ;;  %5300 = vmatprep.subr.bf16.mxu1 %v7461_v4 }
 0x6ff   : > { %v4347_v9 = vadd.f32 %v4346_v29, %v10052_v25  ;;  %v4447_v34 = vmax.f32 %v4345_v54, 0.0  ;;  %v7459_v29 = vld [vmem:[#allocation5 + $0x480] ss:$8 sps:$4 sm:$0xff]  }
 0x700   : > { %v4350_v13 = vpop.f32.mrf.mxu1  ;;  %5301 = vmatpush2.bf16.msra.mxu1 %v7459_v29 }
 0x701   : > { %v4448_v48 = vmax.f32 %v4347_v9, 0.0  ;;  %v4491_v15 = vpack.c.bf16 %v4447_v34, %v4445_v52  ;;  %v4351_v6 = vadd.f32 %v4350_v13, %v10055_v53 }
 0x702   : > { %v4352_v41 = vpop.f32.mrf.mxu1 }
 0x703   : > { %v4492_v57 = vpack.c.bf16 %v4448_v48, %v4446_v58  ;;  %v4353_v45 = vadd.f32 %v4352_v41, %v10052_v25  ;;  %v4449_v9 = vmax.f32 %v4351_v6, 0.0 }
 0x704   : > { %v4354_v27 = vpop.f32.mrf.mxu1 }
 0x705   : > { %v4355_v33 = vadd.f32 %v4354_v27, %v10055_v53  ;;  %4833 = vmatprep.mubr.bf16.mxu0 %v4492_v57  ;;  %v4450_v54 = vmax.f32 %v4353_v45, 0.0 }
 0x706   : > { %v4356_v23 = vpop.f32.mrf.mxu1  ;;  %4834 = vmatmul.mubr.bf16.gmra.mxu0 %v4491_v15 }
 0x707   : > { %v4357_v30 = vadd.f32 %v4356_v23, %v10052_v25  ;;  %v4451_v17 = vmax.f32 %v4355_v33, 0.0 }
 0x708   : > { %v4360_v47 = vpop.f32.mrf.mxu1 }
 0x709   : > { %v4452_v44 = vmax.f32 %v4357_v30, 0.0  ;;  %v4493_v48 = vpack.c.bf16 %v4451_v17, %v4449_v9  ;;  %v4361_v57 = vadd.f32 %v4360_v47, %v10055_v53 }
 0x70a   : > { %v4362_v34 = vpop.f32.mrf.mxu1 }
 0x70b   : > { %v4494_v58 = vpack.c.bf16 %v4452_v44, %v4450_v54  ;;  %v4363_v41 = vadd.f32 %v4362_v34, %v10052_v25  ;;  %v4453_v30 = vmax.f32 %v4361_v57, 0.0 }
 0x70c   : > { %v4364_v52 = vpop.f32.mrf.mxu1 }
 0x70d   : > { %v4365_v13 = vadd.f32 %v4364_v52, %v10055_v53  ;;  %4843 = vmatprep.mubr.bf16.mxu0 %v4494_v58  ;;  %v4454_v6 = vmax.f32 %v4363_v41, 0.0 }
 0x70e   : > { %v4366_v15 = vpop.f32.mrf.mxu1  ;;  %4844 = vmatmul.mubr.bf16.gmra.mxu0 %v4493_v48 }
 0x70f   : > { %v4367_v27 = vadd.f32 %v4366_v15, %v10052_v25  ;;  %v4455_v45 = vmax.f32 %v4365_v13, 0.0 }
 0x710   : > { %v4370_v33 = vpop.f32.mrf.mxu1 }
 0x711   : > { %v4456_v23 = vmax.f32 %v4367_v27, 0.0  ;;  %v4495_v17 = vpack.c.bf16 %v4455_v45, %v4453_v30  ;;  %v4371_v47 = vadd.f32 %v4370_v33, %v10055_v53 }
 0x712   : > { %v4372_v4 = vpop.f32.mrf.mxu1 }
 0x713   : > { %v4496_v54 = vpack.c.bf16 %v4456_v23, %v4454_v6  ;;  %v4373_v29 = vadd.f32 %v4372_v4, %v10052_v25  ;;  %v4457_v57 = vmax.f32 %v4371_v47, 0.0 }
 0x714   : > { %v4374_v44 = vpop.f32.mrf.mxu1 }
 0x715   : > { %v4375_v9 = vadd.f32 %v4374_v44, %v10055_v53  ;;  %4853 = vmatprep.mubr.bf16.mxu0 %v4496_v54  ;;  %v4458_v41 = vmax.f32 %v4373_v29, 0.0 }
 0x716   : > { %v4376_v34 = vpop.f32.mrf.mxu1  ;;  %4854 = vmatmul.mubr.bf16.gmra.mxu0 %v4495_v17 }
 0x717   : > { %v4377_v58 = vadd.f32 %v4376_v34, %v10052_v25  ;;  %v4459_v48 = vmax.f32 %v4375_v9, 0.0 }
 0x718   : > { %v4380_v52 = vpop.f32.mrf.mxu1 }
 0x719   : > { %v4460_v13 = vmax.f32 %v4377_v58, 0.0  ;;  %v4497_v45 = vpack.c.bf16 %v4459_v48, %v4457_v57  ;;  %v4381_v33 = vadd.f32 %v4380_v52, %v10055_v53 }
 0x71a   : > { %v4382_v15 = vpop.f32.mrf.mxu1 }
 0x71b   : > { %v4498_v27 = vpack.c.bf16 %v4460_v13, %v4458_v41  ;;  %v4383_v23 = vadd.f32 %v4382_v15, %v10052_v25  ;;  %v4461_v47 = vmax.f32 %v4381_v33, 0.0 }
 0x71c   : > { %v4384_v6 = vpop.f32.mrf.mxu1 }
 0x71d   : > { %v4385_v30 = vadd.f32 %v4384_v6, %v10055_v53  ;;  %4863 = vmatprep.mubr.bf16.mxu0 %v4498_v27  ;;  %v4462_v29 = vmax.f32 %v4383_v23, 0.0 }
 0x71e   : > { %v4386_v4 = vpop.f32.mrf.mxu1  ;;  %4864 = vmatmul.mubr.bf16.gmra.mxu0 %v4497_v45 }
 0x71f   : > { %v4387_v54 = vadd.f32 %v4386_v4, %v10052_v25  ;;  %v4463_v17 = vmax.f32 %v4385_v30, 0.0 }
 0x720   : > { %v4390_v44 = vpop.f32.mrf.mxu1 }
 0x721   : > { %v4464_v9 = vmax.f32 %v4387_v54, 0.0  ;;  %v4499_v48 = vpack.c.bf16 %v4463_v17, %v4461_v47  ;;  %v4391_v52 = vadd.f32 %v4390_v44, %v10055_v53 }
 0x722   : > { %v4392_v34 = vpop.f32.mrf.mxu1 }
 0x723   : > { %v4500_v58 = vpack.c.bf16 %v4464_v9, %v4462_v29  ;;  %v4393_v13 = vadd.f32 %v4392_v34, %v10052_v25  ;;  %v4465_v33 = vmax.f32 %v4391_v52, 0.0 }
 0x724   : > { %v4394_v41 = vpop.f32.mrf.mxu1 }
 0x725   : > { %v4395_v57 = vadd.f32 %v4394_v41, %v10055_v53  ;;  %4873 = vmatprep.mubr.bf16.mxu0 %v4500_v58  ;;  %v4466_v23 = vmax.f32 %v4393_v13, 0.0 }
 0x726   : > { %v4396_v15 = vpop.f32.mrf.mxu1  ;;  %4874 = vmatmul.mubr.bf16.gmra.mxu0 %v4499_v48 }
 0x727   : > { %v4397_v27 = vadd.f32 %v4396_v15, %v10052_v25  ;;  %v4467_v45 = vmax.f32 %v4395_v57, 0.0 }
 0x728   : > { %v4400_v6 = vpop.f32.mrf.mxu1 }
 0x729   : > { %v4468_v30 = vmax.f32 %v4397_v27, 0.0  ;;  %v4501_v17 = vpack.c.bf16 %v4467_v45, %v4465_v33  ;;  %v4401_v44 = vadd.f32 %v4400_v6, %v10055_v53  ;;  %v7462_v27 = vld [vmem:[#allocation7 + $0x470] ss:$8 sps:$4 sm:$0xff]   ;;  %v7464_v45 = vld [vmem:[#allocation7 + $0x474] ss:$8 sps:$4 sm:$0xff]  }
 0x72a   : > { %v4402_v4 = vpop.f32.mrf.mxu1  ;;  %5765 = vmatprep.subr.bf16.mxu0 %v7464_v45  ;;  %v7470_v6 = vld [vmem:[#allocation7 + $0x454] ss:$8 sps:$4 sm:$0xff]   ;;  %v7473_v33 = vld [vmem:[#allocation7 + $0x444] ss:$8 sps:$4 sm:$0xff]   ;;  %v12083_v45 = vmax.f32 %v9545_v10, 0.0 }
 0x72b   : > { %v4502_v54 = vpack.c.bf16 %v4468_v30, %v4466_v23  ;;  %v4403_v9 = vadd.f32 %v4402_v4, %v10052_v25  ;;  %v4469_v57 = vmax.f32 %v4401_v44, 0.0  ;;  %5766 = vmatpush1.bf16.msra.mxu0 %v7462_v27  ;;  %v7465_v23 = vld [vmem:[#allocation7 + $0x460] ss:$8 sps:$4 sm:$0xff]   ;;  %v7467_v30 = vld [vmem:[#allocation7 + $0x464] ss:$8 sps:$4 sm:$0xff]  }
 0x72c   : > { %v4404_v29 = vpop.f32.mrf.mxu1  ;;  %5767 = vmatprep.subr.bf16.mxu0 %v7467_v30  ;;  %v6766_v4 = vld [vmem:[%s11255_s6 + $0x6] sm:$0x3]  ;;  %v7474_v44 = vld [vmem:[#allocation7 + $0x430] ss:$8 sps:$4 sm:$0xff]  }
 0x72d   : > { %v4405_v47 = vadd.f32 %v4404_v29, %v10055_v53  ;;  %4883 = vmatprep.mubr.bf16.mxu0 %v4502_v54  ;;  %v4470_v41 = vmax.f32 %v4403_v9, 0.0  ;;  %v7468_v53 = vld [vmem:[#allocation7 + $0x450] ss:$8 sps:$4 sm:$0xff]   ;;  %v10125_v54 = vrot.slane %v6766_v4, %v7872_v63 }
 0x72e   : > { %v4406_v34 = vpop.f32.mrf.mxu1  ;;  %4884 = vmatmul.mubr.bf16.gmra.mxu0 %v4501_v17  ;;  %v10128_v17 = vrot.slane %v6766_v4, %v7874_v2  ;;  %v12085_v4 = vmax.f32 %v9554_v21, 0.0  ;;  %v7480_v10 = vld [vmem:[#allocation7 + $0x410] ss:$8 sps:$4 sm:$0xff]  }
 0x72f   : > { %v4407_v58 = vadd.f32 %v4406_v34, %v10052_v25  ;;  %v4471_v48 = vmax.f32 %v4405_v47, 0.0  ;;  %5768 = vmatpush1.bf16.msra.mxu0 %v7465_v23  ;;  %v7471_v25 = vld [vmem:[#allocation7 + $0x440] ss:$8 sps:$4 sm:$0xff]   ;;  %v7476_v34 = vld [vmem:[#allocation7 + $0x434] ss:$8 sps:$4 sm:$0xff]  }
 0x730   : > { %5769 = vmatprep.subr.bf16.mxu0 %v7470_v6 }
 0x731   : > { %v4472_v13 = vmax.f32 %v4407_v58, 0.0  ;;  %v4503_v15 = vpack.c.bf16 %v4471_v48, %v4469_v57 }
 0x733   : > { %v4504_v52 = vpack.c.bf16 %v4472_v13, %v4470_v41  ;;  %5770 = vmatpush1.bf16.msra.mxu0 %v7468_v53  ;;  %v7479_v41 = vld [vmem:[#allocation7 + $0x424] ss:$8 sps:$4 sm:$0xff]   ;;  %v12084_v53 = vmax.f32 %v9550_v38, 0.0 }
 0x734   : > { %5771 = vmatprep.subr.bf16.mxu0 %v7473_v33  ;;  %v7482_v33 = vld [vmem:[#allocation7 + $0x414] ss:$8 sps:$4 sm:$0xff]   ;;  %v7485_v38 = vld [vmem:[#allocation7 + $0x404] ss:$8 sps:$4 sm:$0xff]  }
 0x735   : > { %4893 = vmatprep.mubr.bf16.mxu0 %v4504_v52  ;;  %v7477_v52 = vld [vmem:[#allocation7 + $0x420] ss:$8 sps:$4 sm:$0xff]  }
 0x736   : > { %4894 = vmatmul.mubr.bf16.gmra.mxu0 %v4503_v15  ;;  %v12082_v15 = vmax.f32 %v9541_v32, 0.0 }
 0x737   : > { %5772 = vmatpush1.bf16.msra.mxu0 %v7471_v25 }
 0x738   : > { %5773 = vmatprep.subr.bf16.mxu0 %v7476_v34 }
 0x73b   : > { %5774 = vmatpush1.bf16.msra.mxu0 %v7474_v44 }
 0x73c   : > { %5775 = vmatprep.subr.bf16.mxu0 %v7479_v41 }
 0x73f   : > { %5776 = vmatpush1.bf16.msra.mxu0 %v7477_v52 }
 0x740   : > { %5777 = vmatprep.subr.bf16.mxu0 %v7482_v33 }
 0x743   : > { %5778 = vmatpush1.bf16.msra.mxu0 %v7480_v10  ;;  %v12089_v10 = vmax.f32 %v9586_v20, 0.0 }
 0x744   : > { %5779 = vmatprep.subr.bf16.mxu0 %v7485_v38 }
 0x77e   : > { %v4745_v29 = vpop.f32.mrf.mxu0 }
 0x77f   : > { %v4746_v58 = vadd.f32 %v4745_v29, %v10128_v17 }
 0x780   : > { %v4747_v9 = vpop.f32.mrf.mxu0 }
 0x781   : > { %v4748_v47 = vadd.f32 %v4747_v9, %v10125_v54  ;;  %v10144_v6 = vadd.f32 %v4746_v58, %v12084_v53  ;;  %v12087_v53 = vmax.f32 %v9577_v8, 0.0 }
 0x782   : > { %v4749_v48 = vpop.f32.mrf.mxu0 }
 0x783   : > { %v4750_v13 = vadd.f32 %v4749_v48, %v10128_v17  ;;  %v10135_v27 = vadd.f32 %v4748_v47, %v12082_v15  ;;  %v11654_v58 = vmax.f32 %v10144_v6, 0.0  ;;  %v7483_v15 = vld [vmem:[#allocation7 + $0x400] ss:$8 sps:$4 sm:$0xff]  }
 0x784   : > { %v4751_v57 = vpop.f32.mrf.mxu0  ;;  %5780 = vmatpush1.bf16.msra.mxu0 %v7483_v15 }
 0x785   : > { %v10139_v23 = vadd.f32 %v4750_v13, %v12083_v45  ;;  %v4752_v30 = vadd.f32 %v4751_v57, %v10125_v54  ;;  %v11651_v47 = vmax.f32 %v10135_v27, 0.0  ;;  %v12086_v45 = vmax.f32 %v9573_v42, 0.0 }
 0x786   : > { %v4755_v25 = vpop.f32.mrf.mxu0 }
 0x787   : > { %v10148_v29 = vadd.f32 %v4752_v30, %v12085_v4  ;;  %v11620_v32 = vmax.f32 %v10139_v23, 0.0  ;;  %v4756_v48 = vadd.f32 %v4755_v25, %v10128_v17  ;;  %v7488_v4 = vld [vmem:[#allocation7 + $0x4f4] ss:$8 sps:$4 sm:$0xff]  }
 0x788   : > { %v4757_v9 = vpop.f32.mrf.mxu0  ;;  %5781 = vmatprep.subr.bf16.mxu0 %v7488_v4  ;;  %v7489_v4 = vld [vmem:[#allocation7 + $0x4e0] ss:$8 sps:$4 sm:$0xff]  }
 0x789   : > { %v11617_v44 = vmax.f32 %v10148_v29, 0.0  ;;  %v4758_v34 = vadd.f32 %v4757_v9, %v10125_v54  ;;  %v5032_v57 = vpack.c.bf16 %v11620_v32, %v11654_v58  ;;  %v12088_v9 = vmax.f32 %v9582_v0, 0.0  ;;  %v7491_v0 = vld [vmem:[#allocation7 + $0x4e4] ss:$8 sps:$4 sm:$0xff]  }
 0x78a   : > { %v4759_v21 = vpop.f32.mrf.mxu0  ;;  %v7509_v58 = vld [vmem:[#allocation7 + $0x484] ss:$8 sps:$4 sm:$0xff]  }
 0x78b   : > { %v4760_v41 = vadd.f32 %v4759_v21, %v10128_v17  ;;  %v5033_v13 = vpack.c.bf16 %v11617_v44, %v11651_v47  ;;  %v10167_v30 = vadd.f32 %v4758_v34, %v12086_v45  ;;  %v10176_v21 = vadd.f32 %v4756_v48, %v12088_v9 }
 0x78c   : > { %v4761_v52 = vpop.f32.mrf.mxu0  ;;  %v12090_v9 = vmax.f32 %v9605_v59, 0.0 }
 0x78d   : > { %v10171_v25 = vadd.f32 %v4760_v41, %v12087_v53  ;;  %v4762_v33 = vadd.f32 %v4761_v52, %v10125_v54  ;;  %5302 = vmatprep.mubr.bf16.mxu1 %v5033_v13  ;;  %v7486_v41 = vld [vmem:[#allocation7 + $0x4f0] ss:$8 sps:$4 sm:$0xff]   ;;  %v11619_v52 = vmax.f32 %v10167_v30, 0.0  ;;  %v11624_v48 = vmax.f32 %v10176_v21, 0.0 }
 0x78e   : > { %v4765_v44 = vpop.f32.mrf.mxu0  ;;  %5303 = vmatmul.mubr.bf16.vlgmr.msra.gmra.mxu1 %v5032_v57  ;;  %5782 = vmatpush2.bf16.msra.mxu0 %v7486_v41  ;;  %v12093_v41 = vmax.f32 %v9618_v55, 0.0 }
 0x78f   : > { %v10180_v42 = vadd.f32 %v4762_v33, %v12089_v10  ;;  %v11621_v34 = vmax.f32 %v10171_v25, 0.0  ;;  %v4766_v57 = vadd.f32 %v4765_v44, %v10128_v17  ;;  %v12091_v44 = vmax.f32 %v9609_v60, 0.0  ;;  %5783 = vmatprep.subr.bf16.mxu0 %v7491_v0 }
 0x790   : > { %v4767_v8 = vpop.f32.mrf.mxu0 }
 0x791   : > { %v11618_v38 = vmax.f32 %v10180_v42, 0.0  ;;  %v4768_v13 = vadd.f32 %v4767_v8, %v10125_v54  ;;  %v5034_v53 = vpack.c.bf16 %v11621_v34, %v11624_v48 }
 0x792   : > { %v4769_v20 = vpop.f32.mrf.mxu0  ;;  %5784 = vmatpush2.bf16.msra.mxu0 %v7489_v4 }
 0x793   : > { %v4770_v45 = vadd.f32 %v4769_v20, %v10128_v17  ;;  %v5035_v15 = vpack.c.bf16 %v11618_v38, %v11619_v52  ;;  %v10199_v10 = vadd.f32 %v4768_v13, %v12090_v9  ;;  %v7494_v38 = vld [vmem:[#allocation7 + $0x4d4] ss:$8 sps:$4 sm:$0xff]   ;;  %v12092_v52 = vmax.f32 %v9614_v51, 0.0  ;;  %v7497_v51 = vld [vmem:[#allocation7 + $0x4c4] ss:$8 sps:$4 sm:$0xff]  }
 0x794   : > { %v4771_v33 = vpop.f32.mrf.mxu0  ;;  %5785 = vmatprep.subr.bf16.mxu0 %v7494_v38  ;;  %v7495_v38 = vld [vmem:[#allocation7 + $0x4c0] ss:$8 sps:$4 sm:$0xff]  }
 0x795   : > { %v10203_v8 = vadd.f32 %v4770_v45, %v12091_v44  ;;  %v4772_v20 = vadd.f32 %v4771_v33, %v10125_v54  ;;  %5312 = vmatprep.mubr.bf16.mxu1 %v5035_v15  ;;  %v10208_v32 = vadd.f32 %v4766_v57, %v12092_v52  ;;  %v7492_v45 = vld [vmem:[#allocation7 + $0x4d0] ss:$8 sps:$4 sm:$0xff]   ;;  %v11623_v33 = vmax.f32 %v10199_v10, 0.0 }
 0x796   : > { %v4775_v34 = vpop.f32.mrf.mxu0  ;;  %5313 = vmatmul.mubr.bf16.gmra.mxu1 %v5034_v53  ;;  %5786 = vmatpush2.bf16.msra.mxu0 %v7492_v45  ;;  %v12097_v45 = vmax.f32 %v9650_v11, 0.0 }
 0x797   : > { %v10212_v59 = vadd.f32 %v4772_v20, %v12093_v41  ;;  %v11625_v13 = vmax.f32 %v10203_v8, 0.0  ;;  %v11628_v52 = vmax.f32 %v10208_v32, 0.0  ;;  %v4776_v57 = vadd.f32 %v4775_v34, %v10128_v17  ;;  %5787 = vmatprep.subr.bf16.mxu0 %v7497_v51 }
 0x798   : > { %v4777_v60 = vpop.f32.mrf.mxu0  ;;  %v12094_v20 = vmax.f32 %v9637_v19, 0.0  ;;  %v12095_v34 = vmax.f32 %v9641_v37, 0.0 }
 0x799   : > { %v11622_v0 = vmax.f32 %v10212_v59, 0.0  ;;  %v4778_v15 = vadd.f32 %v4777_v60, %v10125_v54  ;;  %v5036_v9 = vpack.c.bf16 %v11625_v13, %v11628_v52 }
 0x79a   : > { %v4779_v55 = vpop.f32.mrf.mxu0  ;;  %5788 = vmatpush2.bf16.msra.mxu0 %v7495_v38 }
 0x79b   : > { %v4780_v53 = vadd.f32 %v4779_v55, %v10128_v17  ;;  %v5037_v4 = vpack.c.bf16 %v11622_v0, %v11623_v33  ;;  %v10231_v41 = vadd.f32 %v4778_v15, %v12094_v20  ;;  %v7500_v0 = vld [vmem:[#allocation7 + $0x4b4] ss:$8 sps:$4 sm:$0xff]   ;;  %v12096_v33 = vmax.f32 %v9646_v43, 0.0  ;;  %v7503_v43 = vld [vmem:[#allocation7 + $0x4a4] ss:$8 sps:$4 sm:$0xff]  }
 0x79c   : > { %v4781_v44 = vpop.f32.mrf.mxu0  ;;  %5789 = vmatprep.subr.bf16.mxu0 %v7500_v0  ;;  %v7501_v0 = vld [vmem:[#allocation7 + $0x4a0] ss:$8 sps:$4 sm:$0xff]  }
 0x79d   : > { %v10235_v60 = vadd.f32 %v4780_v53, %v12095_v34  ;;  %v4782_v55 = vadd.f32 %v4781_v44, %v10125_v54  ;;  %5322 = vmatprep.mubr.bf16.mxu1 %v5037_v4  ;;  %v10240_v48 = vadd.f32 %v4776_v57, %v12096_v33  ;;  %v7498_v53 = vld [vmem:[#allocation7 + $0x4b0] ss:$8 sps:$4 sm:$0xff]   ;;  %v11627_v44 = vmax.f32 %v10231_v41, 0.0 }
 0x79e   : > { %v4785_v13 = vpop.f32.mrf.mxu0  ;;  %5323 = vmatmul.mubr.bf16.gmra.mxu1 %v5036_v9  ;;  %5790 = vmatpush2.bf16.msra.mxu0 %v7498_v53  ;;  %v12101_v53 = vmax.f32 %v9682_v16, 0.0 }
 0x79f   : > { %v10244_v19 = vadd.f32 %v4782_v55, %v12097_v45  ;;  %v11629_v15 = vmax.f32 %v10235_v60, 0.0  ;;  %v11650_v33 = vmax.f32 %v10240_v48, 0.0  ;;  %v4786_v57 = vadd.f32 %v4785_v13, %v10128_v17  ;;  %5791 = vmatprep.subr.bf16.mxu0 %v7503_v43 }
 0x7a0   : > { %v4787_v37 = vpop.f32.mrf.mxu0  ;;  %v12098_v55 = vmax.f32 %v9669_v56, 0.0  ;;  %v12099_v13 = vmax.f32 %v9673_v31, 0.0 }
 0x7a1   : > { %v11626_v51 = vmax.f32 %v10244_v19, 0.0  ;;  %v4788_v4 = vadd.f32 %v4787_v37, %v10125_v54  ;;  %v5038_v20 = vpack.c.bf16 %v11629_v15, %v11650_v33  ;;  %v12131_v33 = vld [vmem:[#allocation15_spill] sm:$0xff] }
 0x7a2   : > { %v4789_v11 = vpop.f32.mrf.mxu0  ;;  %5792 = vmatpush2.bf16.msra.mxu0 %v7501_v0  ;;  %v12132_v47 = vmax.f32 %v12131_v33, 0.0 }
 0x7a3   : > { %v4790_v9 = vadd.f32 %v4789_v11, %v10128_v17  ;;  %v5039_v38 = vpack.c.bf16 %v11626_v51, %v11627_v44  ;;  %v10263_v45 = vadd.f32 %v4788_v4, %v12098_v55  ;;  %v7506_v51 = vld [vmem:[#allocation7 + $0x494] ss:$8 sps:$4 sm:$0xff]   ;;  %v12100_v44 = vmax.f32 %v9678_v61, 0.0 }
 0x7a4   : > { %v4791_v34 = vpop.f32.mrf.mxu0  ;;  %5793 = vmatprep.subr.bf16.mxu0 %v7506_v51  ;;  %v12102_v51 = vmax.f32 %v9701_v14, 0.0 }
 0x7a5   : > { %v10267_v37 = vadd.f32 %v4790_v9, %v12099_v13  ;;  %v4792_v11 = vadd.f32 %v4791_v34, %v10125_v54  ;;  %5332 = vmatprep.mubr.bf16.mxu1 %v5039_v38  ;;  %v10272_v52 = vadd.f32 %v4786_v57, %v12100_v44  ;;  %v7504_v9 = vld [vmem:[#allocation7 + $0x490] ss:$8 sps:$4 sm:$0xff]   ;;  %v11646_v34 = vmax.f32 %v10263_v45, 0.0 }
 0x7a6   : > { %v4795_v15 = vpop.f32.mrf.mxu0  ;;  %5333 = vmatmul.mubr.bf16.gmra.mxu1 %v5038_v20  ;;  %5794 = vmatpush2.bf16.msra.mxu0 %v7504_v9 }
 0x7a7   : > { %v10276_v56 = vadd.f32 %v4792_v11, %v12101_v53  ;;  %v11631_v4 = vmax.f32 %v10267_v37, 0.0  ;;  %v11649_v61 = vmax.f32 %v10272_v52, 0.0  ;;  %v4796_v44 = vadd.f32 %v4795_v15, %v10128_v17  ;;  %5795 = vmatprep.subr.bf16.mxu0 %v7509_v58 }
 0x7a8   : > { %v4797_v31 = vpop.f32.mrf.mxu0  ;;  %v12103_v15 = vmax.f32 %v9705_v18, 0.0 }
 0x7a9   : > { %v11630_v43 = vmax.f32 %v10276_v56, 0.0  ;;  %v4798_v38 = vadd.f32 %v4797_v31, %v10125_v54  ;;  %v5040_v0 = vpack.c.bf16 %v11631_v4, %v11649_v61  ;;  %v12104_v31 = vmax.f32 %v9710_v24, 0.0 }
 0x7aa   : > { %v4799_v57 = vpop.f32.mrf.mxu0  ;;  %v12105_v4 = vmax.f32 %v9714_v5, 0.0 }
 0x7ab   : > { %v4800_v16 = vadd.f32 %v4799_v57, %v10128_v17  ;;  %v5041_v20 = vpack.c.bf16 %v11630_v43, %v11646_v34  ;;  %v10295_v13 = vadd.f32 %v4798_v38, %v12102_v51  ;;  %v10304_v57 = vadd.f32 %v4796_v44, %v12104_v31  ;;  %v12122_v34 = vld [vmem:[#allocation12_spill] sm:$0xff] }
 0x7ac   : > { %v4801_v55 = vpop.f32.mrf.mxu0 }
 0x7ad   : > { %v10299_v11 = vadd.f32 %v4800_v16, %v12103_v15  ;;  %v4802_v53 = vadd.f32 %v4801_v55, %v10125_v54  ;;  %5342 = vmatprep.mubr.bf16.mxu1 %v5041_v20  ;;  %v11633_v18 = vmax.f32 %v10295_v13, 0.0  ;;  %v11635_v20 = vmax.f32 %v10304_v57, 0.0 }
 0x7ae   : > { %v4805_v43 = vpop.f32.mrf.mxu0  ;;  %5343 = vmatmul.mubr.bf16.gmra.mxu1 %v5040_v0  ;;  %v12106_v15 = vmax.f32 %v9733_v3, 0.0 }
 0x7af   : > { %v10308_v9 = vadd.f32 %v4802_v53, %v12105_v4  ;;  %v11634_v14 = vmax.f32 %v10299_v11, 0.0  ;;  %v4806_v24 = vadd.f32 %v4805_v43, %v10128_v17  ;;  %v12107_v43 = vmax.f32 %v9737_v49, 0.0 }
 0x7b0   : > { %v4807_v38 = vpop.f32.mrf.mxu0 }
 0x7b1   : > { %v11632_v16 = vmax.f32 %v10308_v9, 0.0  ;;  %v4808_v55 = vadd.f32 %v4807_v38, %v10125_v54  ;;  %v5042_v4 = vpack.c.bf16 %v11634_v14, %v11635_v20  ;;  %v12109_v14 = vmax.f32 %v9746_v28, 0.0 }
 0x7b2   : > { %v4809_v44 = vpop.f32.mrf.mxu0 }
 0x7b3   : > { %v4810_v0 = vadd.f32 %v4809_v44, %v10128_v17  ;;  %v5043_v5 = vpack.c.bf16 %v11632_v16, %v11633_v18  ;;  %v10327_v53 = vadd.f32 %v4808_v55, %v12106_v15  ;;  %v12108_v44 = vmax.f32 %v9742_v62, 0.0 }
 0x7b4   : > { %v4811_v51 = vpop.f32.mrf.mxu0 }
 0x7b5   : > { %v10331_v31 = vadd.f32 %v4810_v0, %v12107_v43  ;;  %v4812_v38 = vadd.f32 %v4811_v51, %v10125_v54  ;;  %5352 = vmatprep.mubr.bf16.mxu1 %v5043_v5  ;;  %v10336_v16 = vadd.f32 %v4806_v24, %v12108_v44  ;;  %v11637_v49 = vmax.f32 %v10327_v53, 0.0 }
 0x7b6   : > { %v4815_v18 = vpop.f32.mrf.mxu0  ;;  %5353 = vmatmul.mubr.bf16.gmra.mxu1 %v5042_v4  ;;  %v12110_v43 = vmax.f32 %v9765_v26, 0.0 }
 0x7b7   : > { %v10340_v20 = vadd.f32 %v4812_v38, %v12109_v14  ;;  %v11638_v3 = vmax.f32 %v10331_v31, 0.0  ;;  %v11639_v5 = vmax.f32 %v10336_v16, 0.0  ;;  %v4816_v62 = vadd.f32 %v4815_v18, %v10128_v17 }
 0x7b8   : > { %v4817_v55 = vpop.f32.mrf.mxu0  ;;  %v12111_v18 = vmax.f32 %v9769_v36, 0.0 }
 0x7b9   : > { %v11636_v0 = vmax.f32 %v10340_v20, 0.0  ;;  %v4818_v51 = vadd.f32 %v4817_v55, %v10125_v54  ;;  %v5044_v14 = vpack.c.bf16 %v11638_v3, %v11639_v5  ;;  %v12113_v3 = vmax.f32 %v9778_v46, 0.0 }
 0x7ba   : > { %v4819_v24 = vpop.f32.mrf.mxu0 }
 0x7bb   : > { %v4820_v4 = vadd.f32 %v4819_v24, %v10128_v17  ;;  %v5045_v28 = vpack.c.bf16 %v11636_v0, %v11637_v49  ;;  %v10359_v38 = vadd.f32 %v4818_v51, %v12110_v43  ;;  %v12112_v24 = vmax.f32 %v9774_v39, 0.0 }
 0x7bc   : > { %v4821_v15 = vpop.f32.mrf.mxu0 }
 0x7bd   : > { %v10363_v44 = vadd.f32 %v4820_v4, %v12111_v18  ;;  %v4822_v55 = vadd.f32 %v4821_v15, %v10125_v54  ;;  %5362 = vmatprep.mubr.bf16.mxu1 %v5045_v28  ;;  %v10368_v0 = vadd.f32 %v4816_v62, %v12112_v24  ;;  %v11641_v36 = vmax.f32 %v10359_v38, 0.0 }
 0x7be   : > { %v4825_v49 = vpop.f32.mrf.mxu0  ;;  %5363 = vmatmul.mubr.bf16.gmra.mxu1 %v5044_v14  ;;  %v12114_v18 = vmax.f32 %v9797_v12, 0.0 }
 0x7bf   : > { %v10372_v5 = vadd.f32 %v4822_v55, %v12113_v3  ;;  %v11642_v26 = vmax.f32 %v10363_v44, 0.0  ;;  %v11643_v28 = vmax.f32 %v10368_v0, 0.0  ;;  %v4826_v39 = vadd.f32 %v4825_v49, %v10128_v17 }
 0x7c0   : > { %v4827_v51 = vpop.f32.mrf.mxu0  ;;  %v12115_v49 = vmax.f32 %v9801_v1, 0.0 }
 0x7c1   : > { %v11640_v4 = vmax.f32 %v10372_v5, 0.0  ;;  %v4828_v15 = vadd.f32 %v4827_v51, %v10125_v54  ;;  %v5046_v3 = vpack.c.bf16 %v11642_v26, %v11643_v28  ;;  %v12117_v26 = vmax.f32 %v9810_v22, 0.0 }
 0x7c2   : > { %v4829_v62 = vpop.f32.mrf.mxu0 }
 0x7c3   : > { %v4830_v14 = vadd.f32 %v4829_v62, %v10128_v17  ;;  %v5047_v46 = vpack.c.bf16 %v11640_v4, %v11641_v36  ;;  %v10391_v55 = vadd.f32 %v4828_v15, %v12114_v18  ;;  %v12116_v62 = vmax.f32 %v9806_v7, 0.0 }
 0x7c4   : > { %v4831_v43 = vpop.f32.mrf.mxu0 }
 0x7c5   : > { %v10395_v24 = vadd.f32 %v4830_v14, %v12115_v49  ;;  %v4832_v51 = vadd.f32 %v4831_v43, %v10125_v54  ;;  %5372 = vmatprep.mubr.bf16.mxu1 %v5047_v46  ;;  %v10400_v4 = vadd.f32 %v4826_v39, %v12116_v62  ;;  %v11645_v1 = vmax.f32 %v10391_v55, 0.0 }
 0x7c6   : > { %v4835_v36 = vpop.f32.mrf.mxu0  ;;  %5373 = vmatmul.mubr.bf16.gmra.mxu1 %v5046_v3  ;;  %v12118_v49 = vmax.f32 %v9829_v50, 0.0 }
 0x7c7   : > { %v10404_v28 = vadd.f32 %v4832_v51, %v12117_v26  ;;  %v11647_v12 = vmax.f32 %v10395_v24, 0.0  ;;  %v11648_v46 = vmax.f32 %v10400_v4, 0.0  ;;  %v4836_v7 = vadd.f32 %v4835_v36, %v10128_v17 }
 0x7c8   : > { %v4837_v15 = vpop.f32.mrf.mxu0  ;;  %v12119_v36 = vmax.f32 %v9833_v35, 0.0 }
 0x7c9   : > { %v11644_v14 = vmax.f32 %v10404_v28, 0.0  ;;  %v4838_v43 = vadd.f32 %v4837_v15, %v10125_v54  ;;  %v5048_v26 = vpack.c.bf16 %v11647_v12, %v11648_v46  ;;  %v12123_v12 = vmax.f32 %v12122_v34, 0.0 }
 0x7ca   : > { %v4839_v39 = vpop.f32.mrf.mxu0 }
 0x7cb   : > { %v4840_v3 = vadd.f32 %v4839_v39, %v10128_v17  ;;  %v5049_v22 = vpack.c.bf16 %v11644_v14, %v11645_v1  ;;  %v10423_v51 = vadd.f32 %v4838_v43, %v12118_v49  ;;  %v12121_v39 = vmax.f32 %v9838_v40, 0.0 }
 0x7cc   : > { %v4841_v18 = vpop.f32.mrf.mxu0 }
 0x7cd   : > { %v10427_v62 = vadd.f32 %v4840_v3, %v12119_v36  ;;  %v4842_v15 = vadd.f32 %v4841_v18, %v10125_v54  ;;  %5382 = vmatprep.mubr.bf16.mxu1 %v5049_v22  ;;  %v10432_v14 = vadd.f32 %v4836_v7, %v12121_v39  ;;  %v11653_v35 = vmax.f32 %v10423_v51, 0.0  ;;  %v12125_v36 = vld [vmem:[#allocation13_spill] sm:$0xff] }
 0x7ce   : > { %v4845_v1 = vpop.f32.mrf.mxu0  ;;  %5383 = vmatmul.mubr.bf16.gmra.mxu1 %v5048_v26 }
 0x7cf   : > { %12120 = vst [vmem:[#allocation37_spill] sm:$0xff] %v10427_v62  ;;  %v10436_v46 = vadd.f32 %v4842_v15, %v12123_v12  ;;  %v11655_v50 = vmax.f32 %v10427_v62, 0.0  ;;  %v11656_v22 = vmax.f32 %v10432_v14, 0.0  ;;  %v4846_v40 = vadd.f32 %v4845_v1, %v10128_v17 }
 0x7d0   : > { %v4847_v43 = vpop.f32.mrf.mxu0  ;;  %v12126_v15 = vmax.f32 %v12125_v36, 0.0 }
 0x7d1   : > { %12124 = vst [vmem:[#allocation12_spill] sm:$0xff] %v10436_v46  ;;  %v11652_v3 = vmax.f32 %v10436_v46, 0.0  ;;  %v4848_v18 = vadd.f32 %v4847_v43, %v10125_v54  ;;  %v5050_v12 = vpack.c.bf16 %v11655_v50, %v11656_v22  ;;  %v12128_v43 = vld [vmem:[#allocation14_spill] sm:$0xff]  ;;  %v12134_v50 = vld [vmem:[#allocation16_spill] sm:$0xff] }
 0x7d2   : > { %v4849_v7 = vpop.f32.mrf.mxu0  ;;  %v12129_v1 = vmax.f32 %v12128_v43, 0.0  ;;  %v12135_v22 = vmax.f32 %v12134_v50, 0.0  ;;  %v12137_v43 = vld [vmem:[#allocation17_spill] sm:$0xff] }
 0x7d3   : > { %v4850_v26 = vadd.f32 %v4849_v7, %v10128_v17  ;;  %v5051_v34 = vpack.c.bf16 %v11652_v3, %v11653_v35  ;;  %v10455_v39 = vadd.f32 %v4848_v18, %v12126_v15  ;;  %v10464_v3 = vadd.f32 %v4846_v40, %v12132_v47  ;;  %v7507_v18 = vld [vmem:[#allocation7 + $0x480] ss:$8 sps:$4 sm:$0xff]  }
 0x7d4   : > { %v4851_v49 = vpop.f32.mrf.mxu0  ;;  %5796 = vmatpush2.bf16.msra.mxu0 %v7507_v18  ;;  %v12140_v18 = vld [vmem:[#allocation18_spill] sm:$0xff] }
 0x7d5   : > { %12127 = vst [vmem:[#allocation13_spill] sm:$0xff] %v10455_v39  ;;  %v10459_v61 = vadd.f32 %v4850_v26, %v12129_v1  ;;  %v4852_v7 = vadd.f32 %v4851_v49, %v10125_v54  ;;  %5392 = vmatprep.mubr.bf16.mxu1 %v5051_v34  ;;  %12133 = vst [vmem:[#allocation15_spill] sm:$0xff] %v10464_v3  ;;  %v11661_v26 = vmax.f32 %v10455_v39, 0.0  ;;  %v11664_v47 = vmax.f32 %v10464_v3, 0.0  ;;  %v12143_v39 = vld [vmem:[#allocation19_spill] sm:$0xff] }
 0x7d6   : > { %v4855_v35 = vpop.f32.mrf.mxu0  ;;  %5393 = vmatmul.mubr.bf16.gmra.mxu1 %v5050_v12  ;;  %v12138_v1 = vmax.f32 %v12137_v43, 0.0 }
 0x7d7   : > { %12130 = vst [vmem:[#allocation14_spill] sm:$0xff] %v10459_v61  ;;  %v10468_v46 = vadd.f32 %v4852_v7, %v12135_v22  ;;  %v11663_v36 = vmax.f32 %v10459_v61, 0.0  ;;  %v4856_v40 = vadd.f32 %v4855_v35, %v10128_v17  ;;  %v12141_v35 = vmax.f32 %v12140_v18, 0.0  ;;  %v12146_v61 = vld [vmem:[#allocation20_spill] sm:$0xff]  ;;  %v12149_v18 = vld [vmem:[#allocation21_spill] sm:$0xff] }
 0x7d8   : > { %v4857_v15 = vpop.f32.mrf.mxu0 }
 0x7d9   : > { %12136 = vst [vmem:[#allocation16_spill] sm:$0xff] %v10468_v46  ;;  %v11660_v34 = vmax.f32 %v10468_v46, 0.0  ;;  %v4858_v33 = vadd.f32 %v4857_v15, %v10125_v54  ;;  %v5052_v58 = vpack.c.bf16 %v11663_v36, %v11664_v47  ;;  %v12144_v46 = vmax.f32 %v12143_v39, 0.0 }
 0x7da   : > { %v4859_v12 = vpop.f32.mrf.mxu0  ;;  %v12147_v36 = vmax.f32 %v12146_v61, 0.0 }
 0x7db   : > { %v4860_v50 = vadd.f32 %v4859_v12, %v10128_v17  ;;  %v5053_v22 = vpack.c.bf16 %v11660_v34, %v11661_v26  ;;  %v10487_v7 = vadd.f32 %v4858_v33, %v12138_v1  ;;  %v10496_v34 = vadd.f32 %v4856_v40, %v12144_v46 }
 0x7dc   : > { %v4861_v49 = vpop.f32.mrf.mxu0 }
 0x7dd   : > { %12139 = vst [vmem:[#allocation17_spill] sm:$0xff] %v10487_v7  ;;  %v10491_v15 = vadd.f32 %v4860_v50, %v12141_v35  ;;  %v4862_v12 = vadd.f32 %v4861_v49, %v10125_v54  ;;  %5402 = vmatprep.mubr.bf16.mxu1 %v5053_v22  ;;  %12145 = vst [vmem:[#allocation19_spill] sm:$0xff] %v10496_v34  ;;  %v11669_v1 = vmax.f32 %v10487_v7, 0.0  ;;  %v11672_v22 = vmax.f32 %v10496_v34, 0.0  ;;  %v12155_v7 = vld [vmem:[#allocation23_spill] sm:$0xff] }
 0x7de   : > { %v4865_v26 = vpop.f32.mrf.mxu0  ;;  %5403 = vmatmul.mubr.bf16.gmra.mxu1 %v5052_v58  ;;  %v12150_v35 = vmax.f32 %v12149_v18, 0.0 }
 0x7df   : > { %12142 = vst [vmem:[#allocation18_spill] sm:$0xff] %v10491_v15  ;;  %v10500_v47 = vadd.f32 %v4862_v12, %v12147_v36  ;;  %v11671_v33 = vmax.f32 %v10491_v15, 0.0  ;;  %v4866_v46 = vadd.f32 %v4865_v26, %v10128_v17  ;;  %v12158_v15 = vld [vmem:[#allocation24_spill] sm:$0xff] }
 0x7e0   : > { %v4867_v43 = vpop.f32.mrf.mxu0 }
 0x7e1   : > { %12148 = vst [vmem:[#allocation20_spill] sm:$0xff] %v10500_v47  ;;  %v11668_v50 = vmax.f32 %v10500_v47, 0.0  ;;  %v4868_v49 = vadd.f32 %v4867_v43, %v10125_v54  ;;  %v5054_v36 = vpack.c.bf16 %v11671_v33, %v11672_v22  ;;  %v12152_v43 = vld [vmem:[#allocation22_spill] sm:$0xff]  ;;  %v12156_v47 = vmax.f32 %v12155_v7, 0.0 }
 0x7e2   : > { %v4869_v39 = vpop.f32.mrf.mxu0  ;;  %v12153_v26 = vmax.f32 %v12152_v43, 0.0  ;;  %v12159_v33 = vmax.f32 %v12158_v15, 0.0  ;;  %v12161_v43 = vld [vmem:[#allocation25_spill] sm:$0xff] }
 0x7e3   : > { %v4870_v40 = vadd.f32 %v4869_v39, %v10128_v17  ;;  %v5055_v61 = vpack.c.bf16 %v11668_v50, %v11669_v1  ;;  %v10519_v12 = vadd.f32 %v4868_v49, %v12150_v35  ;;  %v10528_v50 = vadd.f32 %v4866_v46, %v12156_v47 }
 0x7e4   : > { %v4871_v58 = vpop.f32.mrf.mxu0 }
 0x7e5   : > { %12151 = vst [vmem:[#allocation21_spill] sm:$0xff] %v10519_v12  ;;  %v10523_v3 = vadd.f32 %v4870_v40, %v12153_v26  ;;  %v4872_v39 = vadd.f32 %v4871_v58, %v10125_v54  ;;  %5412 = vmatprep.mubr.bf16.mxu1 %v5055_v61  ;;  %12157 = vst [vmem:[#allocation23_spill] sm:$0xff] %v10528_v50  ;;  %v11677_v35 = vmax.f32 %v10519_v12, 0.0  ;;  %v11680_v61 = vmax.f32 %v10528_v50, 0.0  ;;  %v12167_v12 = vld [vmem:[#allocation27_spill] sm:$0xff] }
 0x7e6   : > { %v4875_v1 = vpop.f32.mrf.mxu0  ;;  %5413 = vmatmul.mubr.bf16.gmra.mxu1 %v5054_v36  ;;  %v12162_v26 = vmax.f32 %v12161_v43, 0.0 }
 0x7e7   : > { %12154 = vst [vmem:[#allocation22_spill] sm:$0xff] %v10523_v3  ;;  %v10532_v22 = vadd.f32 %v4872_v39, %v12159_v33  ;;  %v11679_v49 = vmax.f32 %v10523_v3, 0.0  ;;  %v4876_v47 = vadd.f32 %v4875_v1, %v10128_v17  ;;  %v12170_v3 = vld [vmem:[#allocation28_spill] sm:$0xff] }
 0x7e8   : > { %v4877_v18 = vpop.f32.mrf.mxu0 }
 0x7e9   : > { %12160 = vst [vmem:[#allocation24_spill] sm:$0xff] %v10532_v22  ;;  %v11676_v40 = vmax.f32 %v10532_v22, 0.0  ;;  %v4878_v58 = vadd.f32 %v4877_v18, %v10125_v54  ;;  %v5056_v33 = vpack.c.bf16 %v11679_v49, %v11680_v61  ;;  %v12164_v18 = vld [vmem:[#allocation26_spill] sm:$0xff]  ;;  %v12168_v22 = vmax.f32 %v12167_v12, 0.0 }
 0x7ea   : > { %v4879_v7 = vpop.f32.mrf.mxu0  ;;  %v12165_v1 = vmax.f32 %v12164_v18, 0.0  ;;  %v12171_v49 = vmax.f32 %v12170_v3, 0.0  ;;  %v12173_v18 = vld [vmem:[#allocation29_spill] sm:$0xff] }
 0x7eb   : > { %v4880_v46 = vadd.f32 %v4879_v7, %v10128_v17  ;;  %v5057_v15 = vpack.c.bf16 %v11676_v40, %v11677_v35  ;;  %v10551_v39 = vadd.f32 %v4878_v58, %v12162_v26  ;;  %v10560_v40 = vadd.f32 %v4876_v47, %v12168_v22 }
 0x7ec   : > { %v4881_v36 = vpop.f32.mrf.mxu0 }
 0x7ed   : > { %12163 = vst [vmem:[#allocation25_spill] sm:$0xff] %v10551_v39  ;;  %v10555_v34 = vadd.f32 %v4880_v46, %v12165_v1  ;;  %v4882_v7 = vadd.f32 %v4881_v36, %v10125_v54  ;;  %5422 = vmatprep.mubr.bf16.mxu1 %v5057_v15  ;;  %12169 = vst [vmem:[#allocation27_spill] sm:$0xff] %v10560_v40  ;;  %v11685_v26 = vmax.f32 %v10551_v39, 0.0  ;;  %v11688_v15 = vmax.f32 %v10560_v40, 0.0  ;;  %v12179_v39 = vld [vmem:[#allocation31_spill] sm:$0xff] }
 0x7ee   : > { %v4885_v35 = vpop.f32.mrf.mxu0  ;;  %5423 = vmatmul.mubr.bf16.gmra.mxu1 %v5056_v33  ;;  %v12174_v1 = vmax.f32 %v12173_v18, 0.0 }
 0x7ef   : > { %12166 = vst [vmem:[#allocation26_spill] sm:$0xff] %v10555_v34  ;;  %v10564_v61 = vadd.f32 %v4882_v7, %v12171_v49  ;;  %v11687_v58 = vmax.f32 %v10555_v34, 0.0  ;;  %v4886_v22 = vadd.f32 %v4885_v35, %v10128_v17  ;;  %v12182_v34 = vld [vmem:[#allocation32_spill] sm:$0xff] }
 0x7f0   : > { %v4887_v43 = vpop.f32.mrf.mxu0 }
 0x7f1   : > { %12172 = vst [vmem:[#allocation28_spill] sm:$0xff] %v10564_v61  ;;  %v11684_v46 = vmax.f32 %v10564_v61, 0.0  ;;  %v4888_v36 = vadd.f32 %v4887_v43, %v10125_v54  ;;  %v5058_v49 = vpack.c.bf16 %v11687_v58, %v11688_v15  ;;  %v12176_v43 = vld [vmem:[#allocation30_spill] sm:$0xff]  ;;  %v12180_v61 = vmax.f32 %v12179_v39, 0.0 }
 0x7f2   : > { %v4889_v12 = vpop.f32.mrf.mxu0  ;;  %v12177_v35 = vmax.f32 %v12176_v43, 0.0  ;;  %v12183_v58 = vmax.f32 %v12182_v34, 0.0  ;;  %v12185_v43 = vld [vmem:[#allocation33_spill] sm:$0xff] }
 0x7f3   : > { %v4890_v47 = vadd.f32 %v4889_v12, %v10128_v17  ;;  %v5059_v3 = vpack.c.bf16 %v11684_v46, %v11685_v26  ;;  %v10583_v7 = vadd.f32 %v4888_v36, %v12174_v1  ;;  %v10592_v46 = vadd.f32 %v4886_v22, %v12180_v61 }
 0x7f4   : > { %v4891_v33 = vpop.f32.mrf.mxu0 }
 0x7f5   : > { %12175 = vst [vmem:[#allocation29_spill] sm:$0xff] %v10583_v7  ;;  %v10587_v50 = vadd.f32 %v4890_v47, %v12177_v35  ;;  %v4892_v12 = vadd.f32 %v4891_v33, %v10125_v54  ;;  %5432 = vmatprep.mubr.bf16.mxu1 %v5059_v3  ;;  %12181 = vst [vmem:[#allocation31_spill] sm:$0xff] %v10592_v46  ;;  %v11692_v1 = vmax.f32 %v10583_v7, 0.0  ;;  %v11699_v3 = vmax.f32 %v10592_v46, 0.0 }
 0x7f6   : > { %v4895_v26 = vpop.f32.mrf.mxu0  ;;  %5433 = vmatmul.mubr.bf16.gmra.mxu1 %v5058_v49  ;;  %v12186_v35 = vmax.f32 %v12185_v43, 0.0 }
 0x7f7   : > { %12178 = vst [vmem:[#allocation30_spill] sm:$0xff] %v10587_v50  ;;  %v10596_v15 = vadd.f32 %v4892_v12, %v12183_v58  ;;  %v11694_v36 = vmax.f32 %v10587_v50, 0.0  ;;  %v4896_v61 = vadd.f32 %v4895_v26, %v10128_v17 }
 0x7f8   : > { %v4897_v18 = vpop.f32.mrf.mxu0 }
 0x7f9   : > { %12184 = vst [vmem:[#allocation32_spill] sm:$0xff] %v10596_v15  ;;  %v11691_v47 = vmax.f32 %v10596_v15, 0.0  ;;  %v4898_v33 = vadd.f32 %v4897_v18, %v10125_v54  ;;  %v5060_v58 = vpack.c.bf16 %v11694_v36, %v11699_v3  ;;  %v12188_v18 = vld [vmem:[#allocation34_spill] sm:$0xff] }
 0x7fa   : > { %v4899_v39 = vpop.f32.mrf.mxu0  ;;  %v12189_v26 = vmax.f32 %v12188_v18, 0.0  ;;  %v6099_v18 = vld [vmem:[%s11256_s7 + $0x68] sm:$0xff] }
 0x7fb   : > { %v4900_v22 = vadd.f32 %v4899_v39, %v10128_v17  ;;  %v5061_v34 = vpack.c.bf16 %v11691_v47, %v11692_v1  ;;  %v10615_v12 = vadd.f32 %v4898_v33, %v12186_v35  ;;  %v12191_v39 = vld [vmem:[#allocation35_spill] sm:$0xff]  ;;  %v12194_v1 = vld [vmem:[#allocation36_spill] sm:$0xff] }
 0x7fc   : > { %v4901_v49 = vpop.f32.mrf.mxu0  ;;  %v12192_v15 = vmax.f32 %v12191_v39, 0.0  ;;  %v12195_v50 = vmax.f32 %v12194_v1, 0.0  ;;  %v6101_v1 = vld [vmem:[%s11256_s7 + $0x78] sm:$0xff]  ;;  %v10668_v39 = vld [vmem:[%s11256_s7 + $0x60] sm:$0xff] }
 0x7fd   : > { %12187 = vst [vmem:[#allocation33_spill] sm:$0xff] %v10615_v12  ;;  %v10619_v40 = vadd.f32 %v4900_v22, %v12189_v26  ;;  %v4902_v17 = vadd.f32 %v4901_v49, %v10125_v54  ;;  %5442 = vmatprep.mubr.bf16.mxu1 %v5061_v34  ;;  %v11697_v33 = vmax.f32 %v10615_v12, 0.0  ;;  %v6799_v34 = vld [vmem:[%s11253_s4 + $0x8] sm:$0x3] }
 0x7fe   : > { %v10624_v47 = vadd.f32 %v4896_v61, %v12192_v15  ;;  %5443 = vmatmul.mubr.bf16.gmra.mxu1 %v5060_v58  ;;  %v6100_v61 = vld [vmem:[%s11256_s7 + $0x70] sm:$0xff]  ;;  %v10656_v49 = vrot.slane %v6799_v34, %v7872_v63  ;;  %v10662_v26 = vrot.slane %v6799_v34, %v7874_v2  ;;  %v10677_v34 = vld [vmem:[%s11256_s7 + $0x58] sm:$0xff] }
 0x7ff   : > { %12190 = vst [vmem:[#allocation34_spill] sm:$0xff] %v10619_v40  ;;  %v10628_v36 = vadd.f32 %v4902_v17, %v12195_v50  ;;  %v11696_v43 = vmax.f32 %v10619_v40, 0.0  ;;  %v7664_v50 = vmov 0.0  }
 0x800   : > { %12193 = vst [vmem:[#allocation35_spill] sm:$0xff] %v10624_v47  ;;  %v11698_v22 = vmax.f32 %v10624_v47, 0.0  ;;  %6872 = vmatprep.subr.mxu1 %v7664_v50  ;;  %6125 = vmatprep.subr.mxu0 %v7664_v50 }
 0x801   : > { %12196 = vst [vmem:[#allocation36_spill] sm:$0xff] %v10628_v36  ;;  %v11695_v35 = vmax.f32 %v10628_v36, 0.0  ;;  %6904 = vmatpush1.msra.mxu1 %v6101_v1 }
 0x802   : > { %v5062_v15 = vpack.c.bf16 %v11696_v43, %v11698_v22  ;;  %6873 = vmatprep.subr.mxu1 %v7664_v50 }
 0x803   : > { %v5063_v54 = vpack.c.bf16 %v11695_v35, %v11697_v33  ;;  %6905 = vmatpush1.msra.mxu1 %v6100_v61 }
 0x804   : > { %6874 = vmatprep.subr.mxu1 %v7664_v50 }
 0x805   : > { %5452 = vmatprep.mubr.bf16.mxu1 %v5063_v54  ;;  %6906 = vmatpush1.msra.mxu1 %v6099_v18 }
 0x806   : > { %5453 = vmatmul.mubr.bf16.gmra.mxu1 %v5062_v15  ;;  %6875 = vmatprep.subr.mxu1 %v7664_v50 }
 0x807   : > { %6907 = vmatpush1.msra.mxu1 %v10668_v39 }
 0x808   : > { %6876 = vmatprep.subr.mxu1 %v7664_v50 }
 0x809   : > { %6908 = vmatpush1.msra.mxu1 %v10677_v34 }
 0x80a   : > { %6877 = vmatprep.subr.mxu1 %v7664_v50 }
 0x84e   : > { %v5304_v58 = vpop.f32.mrf.mxu1 }
 0x84f   : > { %v5305_v43 = vadd.f32 %v5304_v58, %v10662_v26  ;;  %v10693_v58 = vld [vmem:[%s11256_s7 + $0x48] sm:$0xff] }
 0x850   : > { %v5306_v17 = vpop.f32.mrf.mxu1 }
 0x851   : > { %v5307_v15 = vadd.f32 %v5306_v17, %v10656_v49  ;;  %v10686_v17 = vld [vmem:[%s11256_s7 + $0x50] sm:$0xff] }
 0x852   : > { %v5308_v54 = vpop.f32.mrf.mxu1  ;;  %6909 = vmatpush1.msra.mxu1 %v10686_v17 }
 0x853   : > { %v5309_v35 = vadd.f32 %v5308_v54, %v10662_v26  ;;  %v5464_v36 = vmax.f32 %v5307_v15, 0.0  ;;  %6878 = vmatprep.subr.mxu1 %v7664_v50 }
 0x854   : > { %v5310_v33 = vpop.f32.mrf.mxu1  ;;  %6910 = vmatpush1.msra.mxu1 %v10693_v58 }
 0x855   : > { %v5311_v22 = vadd.f32 %v5310_v33, %v10656_v49  ;;  %v5465_v54 = vmax.f32 %v5309_v35, 0.0  ;;  %v5463_v33 = vmax.f32 %v5305_v43, 0.0  ;;  %6879 = vmatprep.subr.mxu1 %v7664_v50  ;;  %v10700_v35 = vld [vmem:[%s11256_s7 + $0x40] sm:$0xff] }
 0x856   : > { %v5314_v3 = vpop.f32.mrf.mxu1  ;;  %6911 = vmatpush1.msra.mxu1 %v10700_v35 }
 0x857   : > { %v5466_v40 = vmax.f32 %v5311_v22, 0.0  ;;  %v5527_v22 = vpack.c.bf16 %v5465_v54, %v5463_v33  ;;  %6880 = vmatprep.subr.mxu1 %v7664_v50 }
 0x858   : > { %v5316_v12 = vpop.f32.mrf.mxu1 }
 0x859   : > { %v5528_v47 = vpack.c.bf16 %v5466_v40, %v5464_v36  ;;  %v5317_v7 = vadd.f32 %v5316_v12, %v10656_v49  ;;  %v10709_v40 = vld [vmem:[%s11256_s7 + $0x38] sm:$0xff]  ;;  %v5315_v36 = vadd.f32 %v5314_v3, %v10662_v26 }
 0x85a   : > { %v5318_v15 = vpop.f32.mrf.mxu1  ;;  %6912 = vmatpush1.msra.mxu1 %v10709_v40 }
 0x85b   : > { %v5319_v46 = vadd.f32 %v5318_v15, %v10662_v26  ;;  %5797 = vmatprep.mubr.bf16.mxu0 %v5528_v47  ;;  %6881 = vmatprep.subr.mxu1 %v7664_v50  ;;  %v10718_v47 = vld [vmem:[%s11256_s7 + $0x30] sm:$0xff]  ;;  %v5468_v3 = vmax.f32 %v5317_v7, 0.0  ;;  %v10726_v15 = vld [vmem:[%s11256_s7 + $0x28] sm:$0xff]  ;;  %v10734_v7 = vld [vmem:[%s11256_s7 + $0x20] sm:$0xff] }
 0x85c   : > { %v5320_v43 = vpop.f32.mrf.mxu1  ;;  %5798 = vmatmul.mubr.bf16.vlgmr.msra.gmra.mxu0 %v5527_v22  ;;  %6913 = vmatpush1.msra.mxu1 %v10718_v47 }
 0x85d   : > { %v5321_v54 = vadd.f32 %v5320_v43, %v10656_v49  ;;  %6126 = vmatpush1.msra.mxu0 %v6101_v1  ;;  %v5469_v12 = vmax.f32 %v5319_v46, 0.0  ;;  %6882 = vmatprep.subr.mxu1 %v7664_v50  ;;  %v5467_v43 = vmax.f32 %v5315_v36, 0.0 }
 0x85e   : > { %v5324_v33 = vpop.f32.mrf.mxu1  ;;  %6127 = vmatprep.subr.mxu0 %v7664_v50  ;;  %6914 = vmatpush1.msra.mxu1 %v10726_v15 }
 0x85f   : > { %v5470_v22 = vmax.f32 %v5321_v54, 0.0  ;;  %6128 = vmatpush1.msra.mxu0 %v6100_v61  ;;  %6883 = vmatprep.subr.mxu1 %v7664_v50  ;;  %v5529_v1 = vpack.c.bf16 %v5469_v12, %v5467_v43 }
 0x860   : > { %v5326_v62 = vpop.f32.mrf.mxu1  ;;  %6129 = vmatprep.subr.mxu0 %v7664_v50  ;;  %6915 = vmatpush1.msra.mxu1 %v10734_v7 }
 0x861   : > { %v5530_v46 = vpack.c.bf16 %v5470_v22, %v5468_v3  ;;  %6130 = vmatpush1.msra.mxu0 %v6099_v18  ;;  %v5327_v36 = vadd.f32 %v5326_v62, %v10656_v49  ;;  %v5325_v18 = vadd.f32 %v5324_v33, %v10662_v26  ;;  %6884 = vmatprep.subr.mxu1 %v7664_v50  ;;  %v10749_v62 = vld [vmem:[%s11256_s7 + $0x18] sm:$0xff] }
 0x862   : > { %v5328_v61 = vpop.f32.mrf.mxu1  ;;  %6131 = vmatprep.subr.mxu0 %v7664_v50  ;;  %6916 = vmatpush1.msra.mxu1 %v10749_v62 }
 0x863   : > { %v5329_v54 = vadd.f32 %v5328_v61, %v10662_v26  ;;  %5807 = vmatprep.mubr.bf16.mxu0 %v5530_v46  ;;  %6132 = vmatpush1.msra.mxu0 %v10668_v39  ;;  %v5472_v39 = vmax.f32 %v5327_v36, 0.0  ;;  %v5471_v46 = vmax.f32 %v5325_v18, 0.0 }
 0x864   : > { %v5330_v3 = vpop.f32.mrf.mxu1  ;;  %5808 = vmatmul.mubr.bf16.gmra.mxu0 %v5529_v1  ;;  %6133 = vmatprep.subr.mxu0 %v7664_v50 }
 0x865   : > { %v5331_v12 = vadd.f32 %v5330_v3, %v10656_v49  ;;  %6134 = vmatpush1.msra.mxu0 %v10677_v34  ;;  %v5473_v22 = vmax.f32 %v5329_v54, 0.0  ;;  %6885 = vmatprep.subr.mxu1 %v7664_v50  ;;  %v10758_v34 = vld [vmem:[%s11256_s7 + $0x10] sm:$0xff] }
 0x866   : > { %v5334_v43 = vpop.f32.mrf.mxu1  ;;  %6135 = vmatprep.subr.mxu0 %v7664_v50  ;;  %6917 = vmatpush1.msra.mxu1 %v10758_v34 }
 0x867   : > { %v5474_v33 = vmax.f32 %v5331_v12, 0.0  ;;  %6136 = vmatpush1.msra.mxu0 %v10686_v17  ;;  %6886 = vmatprep.subr.mxu1 %v7664_v50  ;;  %v10767_v17 = vld [vmem:[%s11256_s7 + $0x8] sm:$0xff]  ;;  %v5531_v36 = vpack.c.bf16 %v5473_v22, %v5471_v46 }
 0x868   : > { %v5336_v1 = vpop.f32.mrf.mxu1  ;;  %6137 = vmatprep.subr.mxu0 %v7664_v50  ;;  %6918 = vmatpush1.msra.mxu1 %v10767_v17 }
 0x869   : > { %v5532_v61 = vpack.c.bf16 %v5474_v33, %v5472_v39  ;;  %6138 = vmatpush1.msra.mxu0 %v10693_v58  ;;  %v5337_v18 = vadd.f32 %v5336_v1, %v10656_v49  ;;  %v5335_v58 = vadd.f32 %v5334_v43, %v10662_v26  ;;  %6887 = vmatprep.subr.mxu1 %v7664_v50  ;;  %v6086_v39 = vld [vmem:[%s11256_s7] sm:$0xff] }
 0x86a   : > { %v5338_v54 = vpop.f32.mrf.mxu1  ;;  %6139 = vmatprep.subr.mxu0 %v7664_v50  ;;  %6919 = vmatpush1.msra.mxu1 %v6086_v39 }
 0x86b   : > { %v5339_v3 = vadd.f32 %v5338_v54, %v10662_v26  ;;  %5817 = vmatprep.mubr.bf16.mxu0 %v5532_v61  ;;  %6140 = vmatpush1.msra.mxu0 %v10700_v35  ;;  %v5476_v35 = vmax.f32 %v5337_v18, 0.0  ;;  %v5475_v1 = vmax.f32 %v5335_v58, 0.0 }
 0x86c   : > { %v5340_v12 = vpop.f32.mrf.mxu1  ;;  %5818 = vmatmul.mubr.bf16.gmra.mxu0 %v5531_v36  ;;  %6141 = vmatprep.subr.mxu0 %v7664_v50 }
 0x86d   : > { %v5341_v22 = vadd.f32 %v5340_v12, %v10656_v49  ;;  %6142 = vmatpush1.msra.mxu0 %v10709_v40  ;;  %v5477_v33 = vmax.f32 %v5339_v3, 0.0  ;;  %6888 = vmatprep.subr.mxu1 %v7664_v50  ;;  %v6117_v40 = vld [vmem:[%s11256_s7 + $0xf8] sm:$0xff] }
 0x86e   : > { %v5344_v46 = vpop.f32.mrf.mxu1  ;;  %6143 = vmatprep.subr.mxu0 %v7664_v50  ;;  %6920 = vmatpush2.msra.mxu1 %v6117_v40 }
 0x86f   : > { %v5478_v43 = vmax.f32 %v5341_v22, 0.0  ;;  %6144 = vmatpush1.msra.mxu0 %v10718_v47  ;;  %6889 = vmatprep.subr.mxu1 %v7664_v50  ;;  %v6116_v47 = vld [vmem:[%s11256_s7 + $0xf0] sm:$0xff]  ;;  %v5533_v54 = vpack.c.bf16 %v5477_v33, %v5475_v1  ;;  %v6115_v33 = vld [vmem:[%s11256_s7 + $0xe8] sm:$0xff] }
 0x870   : > { %v5346_v61 = vpop.f32.mrf.mxu1  ;;  %6145 = vmatprep.subr.mxu0 %v7664_v50  ;;  %6921 = vmatpush2.msra.mxu1 %v6116_v47 }
 0x871   : > { %v5534_v36 = vpack.c.bf16 %v5478_v43, %v5476_v35  ;;  %6146 = vmatpush1.msra.mxu0 %v10726_v15  ;;  %v5347_v3 = vadd.f32 %v5346_v61, %v10656_v49  ;;  %v5345_v15 = vadd.f32 %v5344_v46, %v10662_v26  ;;  %6890 = vmatprep.subr.mxu1 %v7664_v50 }
 0x872   : > { %v5348_v18 = vpop.f32.mrf.mxu1  ;;  %6147 = vmatprep.subr.mxu0 %v7664_v50  ;;  %6922 = vmatpush2.msra.mxu1 %v6115_v33 }
 0x873   : > { %v5349_v58 = vadd.f32 %v5348_v18, %v10662_v26  ;;  %5827 = vmatprep.mubr.bf16.mxu0 %v5534_v36  ;;  %6148 = vmatpush1.msra.mxu0 %v10734_v7  ;;  %v5480_v7 = vmax.f32 %v5347_v3, 0.0  ;;  %v5479_v1 = vmax.f32 %v5345_v15, 0.0 }
 0x874   : > { %v5350_v12 = vpop.f32.mrf.mxu1  ;;  %5828 = vmatmul.mubr.bf16.gmra.mxu0 %v5533_v54  ;;  %6149 = vmatprep.subr.mxu0 %v7664_v50  ;;  %v6113_v54 = vld [vmem:[%s11256_s7 + $0xd8] sm:$0xff] }
 0x875   : > { %v5351_v22 = vadd.f32 %v5350_v12, %v10656_v49  ;;  %6150 = vmatpush1.msra.mxu0 %v10749_v62  ;;  %v5481_v35 = vmax.f32 %v5349_v58, 0.0  ;;  %6891 = vmatprep.subr.mxu1 %v7664_v50  ;;  %v6114_v62 = vld [vmem:[%s11256_s7 + $0xe0] sm:$0xff] }
 0x876   : > { %v5354_v43 = vpop.f32.mrf.mxu1  ;;  %6151 = vmatprep.subr.mxu0 %v7664_v50  ;;  %6923 = vmatpush2.msra.mxu1 %v6114_v62 }
 0x877   : > { %v5482_v46 = vmax.f32 %v5351_v22, 0.0  ;;  %6152 = vmatpush1.msra.mxu0 %v10758_v34  ;;  %6892 = vmatprep.subr.mxu1 %v7664_v50  ;;  %v5535_v34 = vpack.c.bf16 %v5481_v35, %v5479_v1  ;;  %v5355_v15 = vadd.f32 %v5354_v43, %v10662_v26  ;;  %v6112_v22 = vld [vmem:[%s11256_s7 + $0xd0] sm:$0xff] }
 0x878   : > { %v5356_v61 = vpop.f32.mrf.mxu1  ;;  %6153 = vmatprep.subr.mxu0 %v7664_v50  ;;  %6924 = vmatpush2.msra.mxu1 %v6113_v54 }
 0x879   : > { %v5536_v36 = vpack.c.bf16 %v5482_v46, %v5480_v7  ;;  %6154 = vmatpush1.msra.mxu0 %v10767_v17  ;;  %v5357_v3 = vadd.f32 %v5356_v61, %v10656_v49  ;;  %6893 = vmatprep.subr.mxu1 %v7664_v50  ;;  %v6111_v46 = vld [vmem:[%s11256_s7 + $0xc8] sm:$0xff] }
 0x87a   : > { %v5358_v18 = vpop.f32.mrf.mxu1  ;;  %6155 = vmatprep.subr.mxu0 %v7664_v50  ;;  %6925 = vmatpush2.msra.mxu1 %v6112_v22 }
 0x87b   : > { %v5359_v58 = vadd.f32 %v5358_v18, %v10662_v26  ;;  %5837 = vmatprep.mubr.bf16.mxu0 %v5536_v36  ;;  %6156 = vmatpush1.msra.mxu0 %v6086_v39  ;;  %v5484_v39 = vmax.f32 %v5357_v3, 0.0  ;;  %v6110_v36 = vld [vmem:[%s11256_s7 + $0xc0] sm:$0xff] }
 0x87c   : > { %v5360_v17 = vpop.f32.mrf.mxu1  ;;  %5838 = vmatmul.mubr.bf16.gmra.mxu0 %v5535_v34  ;;  %6157 = vmatprep.subr.mxu0 %v7664_v50 }
 0x87d   : > { %v5361_v12 = vadd.f32 %v5360_v17, %v10656_v49  ;;  %6158 = vmatpush2.msra.mxu0 %v6117_v40  ;;  %v5485_v35 = vmax.f32 %v5359_v58, 0.0  ;;  %6894 = vmatprep.subr.mxu1 %v7664_v50  ;;  %v5483_v40 = vmax.f32 %v5355_v15, 0.0  ;;  %v6109_v17 = vld [vmem:[%s11256_s7 + $0xb8] sm:$0xff] }
 0x87e   : > { %v5364_v7 = vpop.f32.mrf.mxu1  ;;  %6159 = vmatprep.subr.mxu0 %v7664_v50  ;;  %6926 = vmatpush2.msra.mxu1 %v6111_v46 }
 0x87f   : > { %v5486_v43 = vmax.f32 %v5361_v12, 0.0  ;;  %6160 = vmatpush2.msra.mxu0 %v6116_v47  ;;  %6895 = vmatprep.subr.mxu1 %v7664_v50  ;;  %v5537_v47 = vpack.c.bf16 %v5485_v35, %v5483_v40  ;;  %v5365_v58 = vadd.f32 %v5364_v7, %v10662_v26 }
 0x880   : > { %v5366_v1 = vpop.f32.mrf.mxu1  ;;  %6161 = vmatprep.subr.mxu0 %v7664_v50  ;;  %6927 = vmatpush2.msra.mxu1 %v6110_v36 }
 0x881   : > { %v5538_v61 = vpack.c.bf16 %v5486_v43, %v5484_v39  ;;  %6162 = vmatpush2.msra.mxu0 %v6115_v33  ;;  %v5367_v18 = vadd.f32 %v5366_v1, %v10656_v49  ;;  %6896 = vmatprep.subr.mxu1 %v7664_v50  ;;  %v6108_v39 = vld [vmem:[%s11256_s7 + $0xb0] sm:$0xff]  ;;  %v6107_v1 = vld [vmem:[%s11256_s7 + $0xa8] sm:$0xff] }
 0x882   : > { %v5368_v34 = vpop.f32.mrf.mxu1  ;;  %6163 = vmatprep.subr.mxu0 %v7664_v50  ;;  %6928 = vmatpush2.msra.mxu1 %v6109_v17 }
 0x883   : > { %v5369_v3 = vadd.f32 %v5368_v34, %v10662_v26  ;;  %5847 = vmatprep.mubr.bf16.mxu0 %v5538_v61  ;;  %6164 = vmatpush2.msra.mxu0 %v6114_v62  ;;  %v5488_v62 = vmax.f32 %v5367_v18, 0.0 }
 0x884   : > { %v5370_v33 = vpop.f32.mrf.mxu1  ;;  %5848 = vmatmul.mubr.bf16.gmra.mxu0 %v5537_v47  ;;  %6165 = vmatprep.subr.mxu0 %v7664_v50 }
 0x885   : > { %v5371_v15 = vadd.f32 %v5370_v33, %v10656_v49  ;;  %6166 = vmatpush2.msra.mxu0 %v6113_v54  ;;  %v5489_v12 = vmax.f32 %v5369_v3, 0.0  ;;  %6897 = vmatprep.subr.mxu1 %v7664_v50  ;;  %v5487_v54 = vmax.f32 %v5365_v58, 0.0 }
 0x886   : > { %v5374_v35 = vpop.f32.mrf.mxu1  ;;  %6167 = vmatprep.subr.mxu0 %v7664_v50  ;;  %6929 = vmatpush2.msra.mxu1 %v6108_v39 }
 0x887   : > { %v5490_v7 = vmax.f32 %v5371_v15, 0.0  ;;  %6168 = vmatpush2.msra.mxu0 %v6112_v22  ;;  %6898 = vmatprep.subr.mxu1 %v7664_v50  ;;  %v5539_v22 = vpack.c.bf16 %v5489_v12, %v5487_v54  ;;  %v5375_v18 = vadd.f32 %v5374_v35, %v10662_v26 }
 0x888   : > { %v5376_v43 = vpop.f32.mrf.mxu1  ;;  %6169 = vmatprep.subr.mxu0 %v7664_v50  ;;  %6930 = vmatpush2.msra.mxu1 %v6107_v1 }
 0x889   : > { %v5540_v40 = vpack.c.bf16 %v5490_v7, %v5488_v62  ;;  %6170 = vmatpush2.msra.mxu0 %v6111_v46  ;;  %v5377_v47 = vadd.f32 %v5376_v43, %v10656_v49  ;;  %6899 = vmatprep.subr.mxu1 %v7664_v50  ;;  %v5491_v62 = vmax.f32 %v5375_v18, 0.0 }
 0x88a   : > { %v5378_v61 = vpop.f32.mrf.mxu1  ;;  %6171 = vmatprep.subr.mxu0 %v7664_v50 }
 0x88b   : > { %v5379_v34 = vadd.f32 %v5378_v61, %v10662_v26  ;;  %5857 = vmatprep.mubr.bf16.mxu0 %v5540_v40  ;;  %6172 = vmatpush2.msra.mxu0 %v6110_v36  ;;  %v5492_v15 = vmax.f32 %v5377_v47, 0.0 }
 0x88c   : > { %v5380_v46 = vpop.f32.mrf.mxu1  ;;  %5858 = vmatmul.mubr.bf16.gmra.mxu0 %v5539_v22  ;;  %6173 = vmatprep.subr.mxu0 %v7664_v50 }
 0x88d   : > { %v5381_v3 = vadd.f32 %v5380_v46, %v10656_v49  ;;  %6174 = vmatpush2.msra.mxu0 %v6109_v17  ;;  %v5493_v58 = vmax.f32 %v5379_v34, 0.0 }
 0x88e   : > { %v5384_v33 = vpop.f32.mrf.mxu1  ;;  %6175 = vmatprep.subr.mxu0 %v7664_v50 }
 0x88f   : > { %v5494_v12 = vmax.f32 %v5381_v3, 0.0  ;;  %6176 = vmatpush2.msra.mxu0 %v6108_v39  ;;  %v5541_v7 = vpack.c.bf16 %v5493_v58, %v5491_v62  ;;  %v5385_v40 = vadd.f32 %v5384_v33, %v10662_v26 }
 0x890   : > { %v5386_v36 = vpop.f32.mrf.mxu1  ;;  %6177 = vmatprep.subr.mxu0 %v7664_v50 }
 0x891   : > { %v5542_v35 = vpack.c.bf16 %v5494_v12, %v5492_v15  ;;  %6178 = vmatpush2.msra.mxu0 %v6107_v1  ;;  %v5387_v17 = vadd.f32 %v5386_v36, %v10656_v49  ;;  %v5495_v1 = vmax.f32 %v5385_v40, 0.0 }
 0x892   : > { %v5388_v54 = vpop.f32.mrf.mxu1  ;;  %6179 = vmatprep.subr.mxu0 %v7664_v50 }
 0x893   : > { %v5389_v43 = vadd.f32 %v5388_v54, %v10662_v26  ;;  %5867 = vmatprep.mubr.bf16.mxu0 %v5542_v35  ;;  %v5496_v34 = vmax.f32 %v5387_v17, 0.0  ;;  %v6106_v35 = vld [vmem:[%s11256_s7 + $0xa0] sm:$0xff] }
 0x894   : > { %v5390_v22 = vpop.f32.mrf.mxu1  ;;  %5868 = vmatmul.mubr.bf16.gmra.mxu0 %v5541_v7  ;;  %6931 = vmatpush2.msra.mxu1 %v6106_v35 }
 0x895   : > { %v5391_v39 = vadd.f32 %v5390_v22, %v10656_v49  ;;  %v5497_v61 = vmax.f32 %v5389_v43, 0.0  ;;  %6180 = vmatpush2.msra.mxu0 %v6106_v35  ;;  %v6105_v43 = vld [vmem:[%s11256_s7 + $0x98] sm:$0xff]  ;;  %6900 = vmatprep.subr.mxu1 %v7664_v50 }
 0x896   : > { %v5394_v47 = vpop.f32.mrf.mxu1  ;;  %6181 = vmatprep.subr.mxu0 %v7664_v50  ;;  %6932 = vmatpush2.msra.mxu1 %v6105_v43 }
 0x897   : > { %v5498_v18 = vmax.f32 %v5391_v39, 0.0  ;;  %v5543_v58 = vpack.c.bf16 %v5497_v61, %v5495_v1  ;;  %v5395_v33 = vadd.f32 %v5394_v47, %v10662_v26  ;;  %6182 = vmatpush2.msra.mxu0 %v6105_v43  ;;  %v6104_v47 = vld [vmem:[%s11256_s7 + $0x90] sm:$0xff]  ;;  %6901 = vmatprep.subr.mxu1 %v7664_v50 }
 0x898   : > { %v5396_v46 = vpop.f32.mrf.mxu1  ;;  %6183 = vmatprep.subr.mxu0 %v7664_v50  ;;  %6933 = vmatpush2.msra.mxu1 %v6104_v47 }
 0x899   : > { %v5544_v3 = vpack.c.bf16 %v5498_v18, %v5496_v34  ;;  %v5397_v12 = vadd.f32 %v5396_v46, %v10656_v49  ;;  %v5499_v39 = vmax.f32 %v5395_v33, 0.0  ;;  %6184 = vmatpush2.msra.mxu0 %v6104_v47  ;;  %v6103_v46 = vld [vmem:[%s11256_s7 + $0x88] sm:$0xff]  ;;  %6902 = vmatprep.subr.mxu1 %v7664_v50 }
 0x89a   : > { %v5398_v15 = vpop.f32.mrf.mxu1  ;;  %6185 = vmatprep.subr.mxu0 %v7664_v50  ;;  %6934 = vmatpush2.msra.mxu1 %v6103_v46 }
 0x89b   : > { %v5399_v62 = vadd.f32 %v5398_v15, %v10662_v26  ;;  %5877 = vmatprep.mubr.bf16.mxu0 %v5544_v3  ;;  %v5500_v40 = vmax.f32 %v5397_v12, 0.0  ;;  %6186 = vmatpush2.msra.mxu0 %v6103_v46 }
 0x89c   : > { %v5400_v36 = vpop.f32.mrf.mxu1  ;;  %5878 = vmatmul.mubr.bf16.gmra.mxu0 %v5543_v58  ;;  %6187 = vmatprep.subr.mxu0 %v7664_v50 }
 0x89d   : > { %v5401_v7 = vadd.f32 %v5400_v36, %v10656_v49  ;;  %v5501_v54 = vmax.f32 %v5399_v62, 0.0  ;;  %v6102_v62 = vld [vmem:[%s11256_s7 + $0x80] sm:$0xff]  ;;  %6903 = vmatprep.subr.mxu1 %v7664_v50 }
 0x89e   : > { %v5404_v17 = vpop.f32.mrf.mxu1  ;;  %6188 = vmatpush2.msra.mxu0 %v6102_v62  ;;  %6935 = vmatpush2.msra.mxu1 %v6102_v62 }
 0x89f   : > { %v5502_v22 = vmax.f32 %v5401_v7, 0.0  ;;  %v5545_v18 = vpack.c.bf16 %v5501_v54, %v5499_v39  ;;  %v5405_v15 = vadd.f32 %v5404_v17, %v10662_v26 }
 0x8a0   : > { %v5406_v61 = vpop.f32.mrf.mxu1 }
 0x8a1   : > { %v5546_v34 = vpack.c.bf16 %v5502_v22, %v5500_v40  ;;  %v5407_v3 = vadd.f32 %v5406_v61, %v10656_v49  ;;  %v5503_v17 = vmax.f32 %v5405_v15, 0.0 }
 0x8a2   : > { %v5408_v1 = vpop.f32.mrf.mxu1 }
 0x8a3   : > { %v5409_v58 = vadd.f32 %v5408_v1, %v10662_v26  ;;  %5887 = vmatprep.mubr.bf16.mxu0 %v5546_v34  ;;  %v5504_v7 = vmax.f32 %v5407_v3, 0.0 }
 0x8a4   : > { %v5410_v12 = vpop.f32.mrf.mxu1  ;;  %5888 = vmatmul.mubr.bf16.gmra.mxu0 %v5545_v18 }
 0x8a5   : > { %v5411_v33 = vadd.f32 %v5410_v12, %v10656_v49  ;;  %v5505_v36 = vmax.f32 %v5409_v58, 0.0 }
 0x8a6   : > { %v5414_v35 = vpop.f32.mrf.mxu1 }
 0x8a7   : > { %v5506_v54 = vmax.f32 %v5411_v33, 0.0  ;;  %v5547_v22 = vpack.c.bf16 %v5505_v36, %v5503_v17  ;;  %v5415_v34 = vadd.f32 %v5414_v35, %v10662_v26 }
 0x8a8   : > { %v5416_v43 = vpop.f32.mrf.mxu1 }
 0x8a9   : > { %v5548_v40 = vpack.c.bf16 %v5506_v54, %v5504_v7  ;;  %v5417_v61 = vadd.f32 %v5416_v43, %v10656_v49  ;;  %v5507_v15 = vmax.f32 %v5415_v34, 0.0 }
 0x8aa   : > { %v5418_v39 = vpop.f32.mrf.mxu1 }
 0x8ab   : > { %v5419_v47 = vadd.f32 %v5418_v39, %v10662_v26  ;;  %5897 = vmatprep.mubr.bf16.mxu0 %v5548_v40  ;;  %v5508_v3 = vmax.f32 %v5417_v61, 0.0 }
 0x8ac   : > { %v5420_v18 = vpop.f32.mrf.mxu1  ;;  %5898 = vmatmul.mubr.bf16.gmra.mxu0 %v5547_v22 }
 0x8ad   : > { %v5421_v1 = vadd.f32 %v5420_v18, %v10656_v49  ;;  %v5509_v50 = vmax.f32 %v5419_v47, 0.0 }
 0x8ae   : > { %v5424_v46 = vpop.f32.mrf.mxu1 }
 0x8af   : > { %v5510_v58 = vmax.f32 %v5421_v1, 0.0  ;;  %v5549_v33 = vpack.c.bf16 %v5509_v50, %v5507_v15  ;;  %v5425_v35 = vadd.f32 %v5424_v46, %v10662_v26 }
 0x8b0   : > { %v5426_v12 = vpop.f32.mrf.mxu1 }
 0x8b1   : > { %v5550_v62 = vpack.c.bf16 %v5510_v58, %v5508_v3  ;;  %v5427_v7 = vadd.f32 %v5426_v12, %v10656_v49  ;;  %v5511_v47 = vmax.f32 %v5425_v35, 0.0 }
 0x8b2   : > { %v5428_v36 = vpop.f32.mrf.mxu1 }
 0x8b3   : > { %v5429_v54 = vadd.f32 %v5428_v36, %v10662_v26  ;;  %5907 = vmatprep.mubr.bf16.mxu0 %v5550_v62  ;;  %v5512_v39 = vmax.f32 %v5427_v7, 0.0 }
 0x8b4   : > { %v5430_v17 = vpop.f32.mrf.mxu1  ;;  %5908 = vmatmul.mubr.bf16.gmra.mxu0 %v5549_v33 }
 0x8b5   : > { %v5431_v43 = vadd.f32 %v5430_v17, %v10656_v49  ;;  %v5513_v40 = vmax.f32 %v5429_v54, 0.0 }
 0x8b6   : > { %v5434_v22 = vpop.f32.mrf.mxu1 }
 0x8b7   : > { %v5514_v61 = vmax.f32 %v5431_v43, 0.0  ;;  %v5551_v1 = vpack.c.bf16 %v5513_v40, %v5511_v47  ;;  %v5435_v46 = vadd.f32 %v5434_v22, %v10662_v26 }
 0x8b8   : > { %v5436_v34 = vpop.f32.mrf.mxu1 }
 0x8b9   : > { %v5552_v18 = vpack.c.bf16 %v5514_v61, %v5512_v39  ;;  %v5437_v3 = vadd.f32 %v5436_v34, %v10656_v49  ;;  %v5515_v54 = vmax.f32 %v5435_v46, 0.0 }
 0x8ba   : > { %v5438_v50 = vpop.f32.mrf.mxu1 }
 0x8bb   : > { %v5439_v58 = vadd.f32 %v5438_v50, %v10662_v26  ;;  %5917 = vmatprep.mubr.bf16.mxu0 %v5552_v18  ;;  %v5516_v36 = vmax.f32 %v5437_v3, 0.0 }
 0x8bc   : > { %v5440_v15 = vpop.f32.mrf.mxu1  ;;  %5918 = vmatmul.mubr.bf16.gmra.mxu0 %v5551_v1 }
 0x8bd   : > { %v5441_v12 = vadd.f32 %v5440_v15, %v10656_v49  ;;  %v5517_v62 = vmax.f32 %v5439_v58, 0.0 }
 0x8be   : > { %v5444_v33 = vpop.f32.mrf.mxu1 }
 0x8bf   : > { %v5518_v7 = vmax.f32 %v5441_v12, 0.0  ;;  %v5553_v43 = vpack.c.bf16 %v5517_v62, %v5515_v54  ;;  %v5445_v22 = vadd.f32 %v5444_v33, %v10662_v26 }
 0x8c0   : > { %v5446_v35 = vpop.f32.mrf.mxu1 }
 0x8c1   : > { %v5554_v17 = vpack.c.bf16 %v5518_v7, %v5516_v36  ;;  %v5447_v39 = vadd.f32 %v5446_v35, %v10656_v49  ;;  %v5519_v58 = vmax.f32 %v5445_v22, 0.0 }
 0x8c2   : > { %v5448_v40 = vpop.f32.mrf.mxu1 }
 0x8c3   : > { %v5449_v61 = vadd.f32 %v5448_v40, %v10662_v26  ;;  %5927 = vmatprep.mubr.bf16.mxu0 %v5554_v17  ;;  %v5520_v50 = vmax.f32 %v5447_v39, 0.0 }
 0x8c4   : > { %v5450_v47 = vpop.f32.mrf.mxu1  ;;  %5928 = vmatmul.mubr.bf16.gmra.mxu0 %v5553_v43 }
 0x8c5   : > { %v5451_v34 = vadd.f32 %v5450_v47, %v10656_v49  ;;  %v5521_v18 = vmax.f32 %v5449_v61, 0.0  ;;  %v6832_v47 = vld [vmem:[%s11255_s6 + $0x8] sm:$0x3] }
 0x8c6   : > { %v5454_v1 = vpop.f32.mrf.mxu1 }
 0x8c7   : > { %v5522_v3 = vmax.f32 %v5451_v34, 0.0  ;;  %v5555_v12 = vpack.c.bf16 %v5521_v18, %v5519_v58  ;;  %v5455_v33 = vadd.f32 %v5454_v1, %v10662_v26  ;;  %v10927_v34 = vrot.slane %v6832_v47, %v7874_v2 }
 0x8c8   : > { %v5456_v46 = vpop.f32.mrf.mxu1 }
 0x8c9   : > { %v5556_v15 = vpack.c.bf16 %v5522_v3, %v5520_v50  ;;  %v5457_v36 = vadd.f32 %v5456_v46, %v10656_v49  ;;  %v5523_v39 = vmax.f32 %v5455_v33, 0.0  ;;  %v12197_v3 = vmax.f32 %v10144_v6, 0.0 }
 0x8ca   : > { %v5458_v62 = vpop.f32.mrf.mxu1  ;;  %v12199_v33 = vmax.f32 %v10139_v23, 0.0  ;;  %v12202_v23 = vmax.f32 %v10167_v30, 0.0 }
 0x8cb   : > { %v5459_v7 = vadd.f32 %v5458_v62, %v10662_v26  ;;  %5937 = vmatprep.mubr.bf16.mxu0 %v5556_v15  ;;  %v5524_v43 = vmax.f32 %v5457_v36, 0.0  ;;  %v10930_v26 = vrot.slane %v6832_v47, %v7872_v63  ;;  %v12198_v15 = vmax.f32 %v10135_v27, 0.0 }
 0x8cc   : > { %v5460_v54 = vpop.f32.mrf.mxu1  ;;  %5938 = vmatmul.mubr.bf16.gmra.mxu0 %v5555_v12 }
 0x8cd   : > { %v5461_v35 = vadd.f32 %v5460_v54, %v10656_v49  ;;  %v5525_v17 = vmax.f32 %v5459_v7, 0.0 }
 0x8cf   : > { %v5526_v40 = vmax.f32 %v5461_v35, 0.0  ;;  %v5557_v22 = vpack.c.bf16 %v5525_v17, %v5523_v39  ;;  %v12200_v17 = vmax.f32 %v10148_v29, 0.0 }
 0x8d1   : > { %v5558_v61 = vpack.c.bf16 %v5526_v40, %v5524_v43 }
 0x8d3   : > { %5947 = vmatprep.mubr.bf16.mxu0 %v5558_v61 }
 0x8d4   : > { %5948 = vmatmul.mubr.bf16.gmra.mxu0 %v5557_v22  ;;  %v12201_v22 = vmax.f32 %v10176_v21, 0.0  ;;  %v12204_v21 = vmax.f32 %v10180_v42, 0.0 }
 0x91c   : > { %v5799_v18 = vpop.f32.mrf.mxu0 }
 0x91d   : > { %v5800_v49 = vadd.f32 %v5799_v18, %v10927_v34 }
 0x91e   : > { %v5801_v1 = vpop.f32.mrf.mxu0 }
 0x91f   : > { %v5802_v50 = vadd.f32 %v5801_v1, %v10930_v26  ;;  %v5958_v58 = vadd.f32 %v5800_v49, %v12197_v3 }
 0x920   : > { %v5803_v46 = vpop.f32.mrf.mxu0 }
 0x921   : > { %v5959_v12 = vadd.f32 %v5802_v50, %v12198_v15  ;;  %v5804_v62 = vadd.f32 %v5803_v46, %v10927_v34  ;;  %v6022_v7 = vmax.f32 %v5958_v58, 0.0  ;;  %v12203_v46 = vmax.f32 %v10171_v25, 0.0 }
 0x922   : > { %v5805_v2 = vpop.f32.mrf.mxu0  ;;  %v12206_v25 = vmax.f32 %v10199_v10, 0.0 }
 0x923   : > { %v6023_v36 = vmax.f32 %v5959_v12, 0.0  ;;  %v5806_v63 = vadd.f32 %v5805_v2, %v10930_v26  ;;  %v5960_v54 = vadd.f32 %v5804_v62, %v12199_v33  ;;  %v12205_v33 = vmax.f32 %v10208_v32, 0.0 }
 0x924   : > { %v5809_v35 = vpop.f32.mrf.mxu0  ;;  %v12208_v32 = vmax.f32 %v10212_v59, 0.0 }
 0x925   : > { %v5961_v43 = vadd.f32 %v5806_v63, %v12200_v17  ;;  %v5810_v6 = vadd.f32 %v5809_v35, %v10927_v34  ;;  %6189 = vmatprep.mubr.f32.mxu0 %v6023_v36  ;;  %v6024_v61 = vmax.f32 %v5960_v54, 0.0 }
 0x926   : > { %v5811_v40 = vpop.f32.mrf.mxu0  ;;  %6190 = vmatmul.mubr.f32.vlgmr.msra.gmra.mxu0 %v6022_v7 }
 0x927   : > { %v6025_v27 = vmax.f32 %v5961_v43, 0.0  ;;  %v5812_v39 = vadd.f32 %v5811_v40, %v10930_v26  ;;  %v5962_v47 = vadd.f32 %v5810_v6, %v12201_v22 }
 0x928   : > { %v5813_v18 = vpop.f32.mrf.mxu0 }
 0x929   : > { %v5963_v49 = vadd.f32 %v5812_v39, %v12202_v23  ;;  %v5814_v1 = vadd.f32 %v5813_v18, %v10927_v34  ;;  %6194 = vmatprep.mubr.f32.mxu0 %v6025_v27  ;;  %v6026_v58 = vmax.f32 %v5962_v47, 0.0  ;;  %v12207_v39 = vmax.f32 %v10203_v8, 0.0 }
 0x92a   : > { %v5815_v29 = vpop.f32.mrf.mxu0  ;;  %6195 = vmatmul.mubr.f32.gmra.mxu0 %v6024_v61  ;;  %v12210_v8 = vmax.f32 %v10231_v41, 0.0 }
 0x92b   : > { %v6027_v50 = vmax.f32 %v5963_v49, 0.0  ;;  %v5816_v3 = vadd.f32 %v5815_v29, %v10930_v26  ;;  %v5964_v15 = vadd.f32 %v5814_v1, %v12203_v46  ;;  %v12209_v29 = vmax.f32 %v10240_v48, 0.0 }
 0x92c   : > { %v5819_v12 = vpop.f32.mrf.mxu0  ;;  %v12212_v48 = vmax.f32 %v10244_v19, 0.0 }
 0x92d   : > { %v5965_v62 = vadd.f32 %v5816_v3, %v12204_v21  ;;  %v5820_v2 = vadd.f32 %v5819_v12, %v10927_v34  ;;  %6199 = vmatprep.mubr.f32.mxu0 %v6027_v50  ;;  %v6028_v7 = vmax.f32 %v5964_v15, 0.0 }
 0x92e   : > { %v5821_v30 = vpop.f32.mrf.mxu0  ;;  %6200 = vmatmul.mubr.f32.gmra.mxu0 %v6026_v58 }
 0x92f   : > { %v6029_v36 = vmax.f32 %v5965_v62, 0.0  ;;  %v5822_v63 = vadd.f32 %v5821_v30, %v10930_v26  ;;  %v5966_v54 = vadd.f32 %v5820_v2, %v12205_v33  ;;  %v12211_v62 = vmax.f32 %v10235_v60, 0.0 }
 0x930   : > { %v5823_v35 = vpop.f32.mrf.mxu0  ;;  %v12214_v60 = vmax.f32 %v10263_v45, 0.0 }
 0x931   : > { %v5967_v17 = vadd.f32 %v5822_v63, %v12206_v25  ;;  %v5824_v43 = vadd.f32 %v5823_v35, %v10927_v34  ;;  %6204 = vmatprep.mubr.f32.mxu0 %v6029_v36  ;;  %v6030_v27 = vmax.f32 %v5966_v54, 0.0  ;;  %v12213_v35 = vmax.f32 %v10272_v52, 0.0 }
 0x932   : > { %v5825_v42 = vpop.f32.mrf.mxu0  ;;  %6205 = vmatmul.mubr.f32.gmra.mxu0 %v6028_v7  ;;  %v12216_v52 = vmax.f32 %v10276_v56, 0.0 }
 0x933   : > { %v6031_v6 = vmax.f32 %v5967_v17, 0.0  ;;  %v5826_v40 = vadd.f32 %v5825_v42, %v10930_v26  ;;  %v5968_v61 = vadd.f32 %v5824_v43, %v12207_v39  ;;  %v12215_v39 = vmax.f32 %v10267_v37, 0.0 }
 0x934   : > { %v5829_v22 = vpop.f32.mrf.mxu0  ;;  %v12218_v37 = vmax.f32 %v10295_v13, 0.0 }
 0x935   : > { %v5969_v47 = vadd.f32 %v5826_v40, %v12208_v32  ;;  %v5830_v18 = vadd.f32 %v5829_v22, %v10927_v34  ;;  %6209 = vmatprep.mubr.f32.mxu0 %v6031_v6  ;;  %v6032_v1 = vmax.f32 %v5968_v61, 0.0 }
 0x936   : > { %v5831_v10 = vpop.f32.mrf.mxu0  ;;  %6210 = vmatmul.mubr.f32.gmra.mxu0 %v6030_v27 }
 0x937   : > { %v6033_v23 = vmax.f32 %v5969_v47, 0.0  ;;  %v5832_v49 = vadd.f32 %v5831_v10, %v10930_v26  ;;  %v5970_v50 = vadd.f32 %v5830_v18, %v12209_v29 }
 0x938   : > { %v5833_v3 = vpop.f32.mrf.mxu0 }
 0x939   : > { %v5971_v58 = vadd.f32 %v5832_v49, %v12210_v8  ;;  %v5834_v46 = vadd.f32 %v5833_v3, %v10927_v34  ;;  %6214 = vmatprep.mubr.f32.mxu0 %v6033_v23  ;;  %v6034_v21 = vmax.f32 %v5970_v50, 0.0  ;;  %v12217_v49 = vmax.f32 %v10304_v57, 0.0 }
 0x93a   : > { %v5835_v59 = vpop.f32.mrf.mxu0  ;;  %6215 = vmatmul.mubr.f32.gmra.mxu0 %v6032_v1  ;;  %v12220_v57 = vmax.f32 %v10308_v9, 0.0 }
 0x93b   : > { %v6035_v15 = vmax.f32 %v5971_v58, 0.0  ;;  %v5836_v12 = vadd.f32 %v5835_v59, %v10930_v26  ;;  %v5972_v2 = vadd.f32 %v5834_v46, %v12211_v62  ;;  %v12219_v59 = vmax.f32 %v10299_v11, 0.0 }
 0x93c   : > { %v5839_v30 = vpop.f32.mrf.mxu0  ;;  %v12222_v11 = vmax.f32 %v10327_v53, 0.0 }
 0x93d   : > { %v5973_v36 = vadd.f32 %v5836_v12, %v12212_v48  ;;  %v5840_v63 = vadd.f32 %v5839_v30, %v10927_v34  ;;  %6219 = vmatprep.mubr.f32.mxu0 %v6035_v15  ;;  %v6036_v54 = vmax.f32 %v5972_v2, 0.0 }
 0x93e   : > { %v5841_v41 = vpop.f32.mrf.mxu0  ;;  %6220 = vmatmul.mubr.f32.gmra.mxu0 %v6034_v21 }
 0x93f   : > { %v6037_v7 = vmax.f32 %v5973_v36, 0.0  ;;  %v5842_v33 = vadd.f32 %v5841_v41, %v10930_v26  ;;  %v5974_v25 = vadd.f32 %v5840_v63, %v12213_v35  ;;  %v12221_v36 = vmax.f32 %v10336_v16, 0.0 }
 0x940   : > { %v5843_v17 = vpop.f32.mrf.mxu0  ;;  %v12224_v16 = vmax.f32 %v10340_v20, 0.0 }
 0x941   : > { %v5975_v43 = vadd.f32 %v5842_v33, %v12214_v60  ;;  %v5844_v42 = vadd.f32 %v5843_v17, %v10927_v34  ;;  %6224 = vmatprep.mubr.f32.mxu1 %v6037_v7  ;;  %v6038_v27 = vmax.f32 %v5974_v25, 0.0  ;;  %v12223_v17 = vmax.f32 %v10331_v31, 0.0 }
 0x942   : > { %v5845_v19 = vpop.f32.mrf.mxu0  ;;  %6225 = vmatmul.mubr.f32.vlgmr.msra.gmra.mxu1 %v6036_v54  ;;  %v12226_v31 = vmax.f32 %v10359_v38, 0.0 }
 0x943   : > { %v6039_v6 = vmax.f32 %v5975_v43, 0.0  ;;  %v5846_v40 = vadd.f32 %v5845_v19, %v10930_v26  ;;  %v5976_v61 = vadd.f32 %v5844_v42, %v12215_v39  ;;  %v12225_v39 = vmax.f32 %v10368_v0, 0.0 }
 0x944   : > { %v5849_v22 = vpop.f32.mrf.mxu0  ;;  %v12228_v0 = vmax.f32 %v10372_v5, 0.0 }
 0x945   : > { %v5977_v32 = vadd.f32 %v5846_v40, %v12216_v52  ;;  %v5850_v47 = vadd.f32 %v5849_v22, %v10927_v34  ;;  %6229 = vmatprep.mubr.f32.mxu1 %v6039_v6  ;;  %v6040_v23 = vmax.f32 %v5976_v61, 0.0 }
 0x946   : > { %v5851_v45 = vpop.f32.mrf.mxu0  ;;  %6230 = vmatmul.mubr.f32.gmra.mxu1 %v6038_v27 }
 0x947   : > { %v6041_v18 = vmax.f32 %v5977_v32, 0.0  ;;  %v5852_v10 = vadd.f32 %v5851_v45, %v10930_v26  ;;  %v5978_v1 = vadd.f32 %v5850_v47, %v12217_v49 }
 0x948   : > { %v5853_v29 = vpop.f32.mrf.mxu0 }
 0x949   : > { %v5979_v50 = vadd.f32 %v5852_v10, %v12218_v37  ;;  %v5854_v3 = vadd.f32 %v5853_v29, %v10927_v34  ;;  %6234 = vmatprep.mubr.f32.mxu1 %v6041_v18  ;;  %v6042_v46 = vmax.f32 %v5978_v1, 0.0  ;;  %v12227_v10 = vmax.f32 %v10363_v44, 0.0 }
 0x94a   : > { %v5855_v56 = vpop.f32.mrf.mxu0  ;;  %6235 = vmatmul.mubr.f32.gmra.mxu1 %v6040_v23  ;;  %v12230_v44 = vmax.f32 %v10391_v55, 0.0 }
 0x94b   : > { %v6043_v8 = vmax.f32 %v5979_v50, 0.0  ;;  %v5856_v58 = vadd.f32 %v5855_v56, %v10930_v26  ;;  %v5980_v15 = vadd.f32 %v5854_v3, %v12219_v59  ;;  %v12229_v56 = vmax.f32 %v10400_v4, 0.0 }
 0x94c   : > { %v5859_v12 = vpop.f32.mrf.mxu0  ;;  %v12232_v4 = vmax.f32 %v10404_v28, 0.0 }
 0x94d   : > { %v5981_v21 = vadd.f32 %v5856_v58, %v12220_v57  ;;  %v5860_v62 = vadd.f32 %v5859_v12, %v10927_v34  ;;  %6239 = vmatprep.mubr.f32.mxu1 %v6043_v8  ;;  %v6044_v48 = vmax.f32 %v5980_v15, 0.0 }
 0x94e   : > { %v5861_v13 = vpop.f32.mrf.mxu0  ;;  %6240 = vmatmul.mubr.f32.gmra.mxu1 %v6042_v46 }
 0x94f   : > { %v6045_v2 = vmax.f32 %v5981_v21, 0.0  ;;  %v5862_v30 = vadd.f32 %v5861_v13, %v10930_v26  ;;  %v5982_v63 = vadd.f32 %v5860_v62, %v12221_v36  ;;  %v12231_v21 = vmax.f32 %v10395_v24, 0.0 }
 0x950   : > { %v5863_v41 = vpop.f32.mrf.mxu0  ;;  %v12234_v24 = vmax.f32 %v10423_v51, 0.0 }
 0x951   : > { %v5983_v7 = vadd.f32 %v5862_v30, %v12222_v11  ;;  %v5864_v33 = vadd.f32 %v5863_v41, %v10927_v34  ;;  %6244 = vmatprep.mubr.f32.mxu1 %v6045_v2  ;;  %v6046_v25 = vmax.f32 %v5982_v63, 0.0  ;;  %v12233_v41 = vmax.f32 %v10432_v14, 0.0 }
 0x952   : > { %v5865_v9 = vpop.f32.mrf.mxu0  ;;  %6245 = vmatmul.mubr.f32.gmra.mxu1 %v6044_v48 }
 0x953   : > { %v6047_v54 = vmax.f32 %v5983_v7, 0.0  ;;  %v5866_v35 = vadd.f32 %v5865_v9, %v10930_v26  ;;  %v5984_v60 = vadd.f32 %v5864_v33, %v12223_v17  ;;  %v12235_v17 = vld [vmem:[#allocation37_spill] sm:$0xff] }
 0x954   : > { %v5869_v43 = vpop.f32.mrf.mxu0 }
 0x955   : > { %v5985_v42 = vadd.f32 %v5866_v35, %v12224_v16  ;;  %v5870_v19 = vadd.f32 %v5869_v43, %v10927_v34  ;;  %6249 = vmatprep.mubr.f32.mxu1 %v6047_v54  ;;  %v6048_v27 = vmax.f32 %v5984_v60, 0.0  ;;  %v12236_v60 = vmax.f32 %v12235_v17, 0.0 }
 0x956   : > { %v5871_v53 = vpop.f32.mrf.mxu0  ;;  %6250 = vmatmul.mubr.f32.gmra.mxu1 %v6046_v25 }
 0x957   : > { %v6049_v6 = vmax.f32 %v5985_v42, 0.0  ;;  %v5872_v40 = vadd.f32 %v5871_v53, %v10930_v26  ;;  %v5986_v61 = vadd.f32 %v5870_v19, %v12225_v39  ;;  %v12237_v42 = vld [vmem:[#allocation12_spill] sm:$0xff]  ;;  %v12239_v39 = vld [vmem:[#allocation15_spill] sm:$0xff] }
 0x958   : > { %v5873_v22 = vpop.f32.mrf.mxu0  ;;  %v12238_v14 = vmax.f32 %v12237_v42, 0.0 }
 0x959   : > { %v5987_v52 = vadd.f32 %v5872_v40, %v12226_v31  ;;  %v5874_v32 = vadd.f32 %v5873_v22, %v10927_v34  ;;  %6254 = vmatprep.mubr.f32.mxu1 %v6049_v6  ;;  %v6050_v18 = vmax.f32 %v5986_v61, 0.0  ;;  %v12240_v61 = vmax.f32 %v12239_v39, 0.0 }
 0x95a   : > { %v5875_v20 = vpop.f32.mrf.mxu0  ;;  %6255 = vmatmul.mubr.f32.gmra.mxu1 %v6048_v27 }
 0x95b   : > { %v6051_v47 = vmax.f32 %v5987_v52, 0.0  ;;  %v5876_v45 = vadd.f32 %v5875_v20, %v10930_v26  ;;  %v5988_v23 = vadd.f32 %v5874_v32, %v12227_v10  ;;  %v12241_v52 = vld [vmem:[#allocation13_spill] sm:$0xff] }
 0x95c   : > { %v5879_v49 = vpop.f32.mrf.mxu0  ;;  %v12242_v32 = vmax.f32 %v12241_v52, 0.0 }
 0x95d   : > { %v5989_v1 = vadd.f32 %v5876_v45, %v12228_v0  ;;  %v5880_v29 = vadd.f32 %v5879_v49, %v10927_v34  ;;  %6259 = vmatprep.mubr.f32.mxu1 %v6051_v47  ;;  %v6052_v3 = vmax.f32 %v5988_v23, 0.0  ;;  %v12243_v49 = vld [vmem:[#allocation14_spill] sm:$0xff] }
 0x95e   : > { %v5881_v38 = vpop.f32.mrf.mxu0  ;;  %6260 = vmatmul.mubr.f32.gmra.mxu1 %v6050_v18  ;;  %v12244_v0 = vmax.f32 %v12243_v49, 0.0 }
 0x95f   : > { %v6053_v37 = vmax.f32 %v5989_v1, 0.0  ;;  %v5882_v50 = vadd.f32 %v5881_v38, %v10930_v26  ;;  %v5990_v8 = vadd.f32 %v5880_v29, %v12229_v56  ;;  %v12245_v38 = vld [vmem:[#allocation16_spill] sm:$0xff] }
 0x960   : > { %v5883_v58 = vpop.f32.mrf.mxu0 }
 0x961   : > { %v5991_v46 = vadd.f32 %v5882_v50, %v12230_v44  ;;  %v5884_v59 = vadd.f32 %v5883_v58, %v10927_v34  ;;  %6264 = vmatprep.mubr.f32.mxu1 %v6053_v37  ;;  %v6054_v57 = vmax.f32 %v5990_v8, 0.0  ;;  %v12246_v37 = vmax.f32 %v12245_v38, 0.0 }
 0x962   : > { %v5885_v5 = vpop.f32.mrf.mxu0  ;;  %6265 = vmatmul.mubr.f32.gmra.mxu1 %v6052_v3 }
 0x963   : > { %v6055_v15 = vmax.f32 %v5991_v46, 0.0  ;;  %v5886_v12 = vadd.f32 %v5885_v5, %v10930_v26  ;;  %v5992_v62 = vadd.f32 %v5884_v59, %v12231_v21  ;;  %v12247_v46 = vld [vmem:[#allocation19_spill] sm:$0xff] }
 0x964   : > { %v5889_v13 = vpop.f32.mrf.mxu0  ;;  %v12248_v59 = vmax.f32 %v12247_v46, 0.0 }
 0x965   : > { %v5993_v2 = vadd.f32 %v5886_v12, %v12232_v4  ;;  %v5890_v30 = vadd.f32 %v5889_v13, %v10927_v34  ;;  %6269 = vmatprep.mubr.f32.mxu1 %v6055_v15  ;;  %v6056_v63 = vmax.f32 %v5992_v62, 0.0  ;;  %v12249_v12 = vld [vmem:[#allocation17_spill] sm:$0xff] }
 0x966   : > { %v5891_v55 = vpop.f32.mrf.mxu0  ;;  %6270 = vmatmul.mubr.f32.gmra.mxu1 %v6054_v57  ;;  %v12250_v57 = vmax.f32 %v12249_v12, 0.0 }
 0x967   : > { %v6057_v48 = vmax.f32 %v5993_v2, 0.0  ;;  %v5892_v36 = vadd.f32 %v5891_v55, %v10930_v26  ;;  %v5994_v11 = vadd.f32 %v5890_v30, %v12233_v41  ;;  %v12251_v55 = vld [vmem:[#allocation18_spill] sm:$0xff]  ;;  %v12253_v41 = vld [vmem:[#allocation20_spill] sm:$0xff] }
 0x968   : > { %v5893_v7 = vpop.f32.mrf.mxu0 }
 0x969   : > { %v5995_v33 = vadd.f32 %v5892_v36, %v12234_v24  ;;  %v5894_v9 = vadd.f32 %v5893_v7, %v10927_v34  ;;  %6274 = vmatprep.mubr.f32.mxu1 %v6057_v48  ;;  %v6058_v25 = vmax.f32 %v5994_v11, 0.0  ;;  %v12252_v48 = vmax.f32 %v12251_v55, 0.0 }
 0x96a   : > { %v5895_v28 = vpop.f32.mrf.mxu0  ;;  %6275 = vmatmul.mubr.f32.gmra.mxu1 %v6056_v63  ;;  %v12254_v11 = vmax.f32 %v12253_v41, 0.0 }
 0x96b   : > { %v6059_v54 = vmax.f32 %v5995_v33, 0.0  ;;  %v5896_v35 = vadd.f32 %v5895_v28, %v10930_v26  ;;  %v5996_v43 = vadd.f32 %v5894_v9, %v12236_v60 }
 0x96c   : > { %v5899_v16 = vpop.f32.mrf.mxu0 }
 0x96d   : > { %v5997_v19 = vadd.f32 %v5896_v35, %v12238_v14  ;;  %v5900_v53 = vadd.f32 %v5899_v16, %v10927_v34  ;;  %6279 = vmatprep.mubr.f32.mxu1 %v6059_v54  ;;  %v6060_v27 = vmax.f32 %v5996_v43, 0.0  ;;  %v12255_v35 = vld [vmem:[#allocation23_spill] sm:$0xff]  ;;  %v12257_v43 = vld [vmem:[#allocation21_spill] sm:$0xff] }
 0x96e   : > { %v5901_v51 = vpop.f32.mrf.mxu0  ;;  %6280 = vmatmul.mubr.f32.gmra.mxu1 %v6058_v25  ;;  %v12256_v25 = vmax.f32 %v12255_v35, 0.0  ;;  %v12258_v16 = vmax.f32 %v12257_v43, 0.0 }
 0x96f   : > { %v6061_v6 = vmax.f32 %v5997_v19, 0.0  ;;  %v5902_v40 = vadd.f32 %v5901_v51, %v10930_v26  ;;  %v5998_v22 = vadd.f32 %v5900_v53, %v12240_v61 }
 0x970   : > { %v5903_v31 = vpop.f32.mrf.mxu0 }
 0x971   : > { %v5999_v20 = vadd.f32 %v5902_v40, %v12242_v32  ;;  %v5904_v47 = vadd.f32 %v5903_v31, %v10927_v34  ;;  %6284 = vmatprep.mubr.f32.mxu1 %v6061_v6  ;;  %v6062_v23 = vmax.f32 %v5998_v22, 0.0  ;;  %v12259_v40 = vld [vmem:[#allocation22_spill] sm:$0xff]  ;;  %v12261_v22 = vld [vmem:[#allocation24_spill] sm:$0xff] }
 0x972   : > { %v5905_v45 = vpop.f32.mrf.mxu0  ;;  %6285 = vmatmul.mubr.f32.gmra.mxu1 %v6060_v27  ;;  %v12260_v27 = vmax.f32 %v12259_v40, 0.0  ;;  %v12262_v31 = vmax.f32 %v12261_v22, 0.0 }
 0x973   : > { %v6063_v18 = vmax.f32 %v5999_v20, 0.0  ;;  %v5906_v10 = vadd.f32 %v5905_v45, %v10930_v26  ;;  %v6000_v1 = vadd.f32 %v5904_v47, %v12244_v0 }
 0x974   : > { %v5909_v29 = vpop.f32.mrf.mxu0 }
 0x975   : > { %v6001_v50 = vadd.f32 %v5906_v10, %v12246_v37  ;;  %v5910_v3 = vadd.f32 %v5909_v29, %v10927_v34  ;;  %6289 = vmatprep.mubr.f32.mxu1 %v6063_v18  ;;  %v6064_v44 = vmax.f32 %v6000_v1, 0.0  ;;  %v12263_v10 = vld [vmem:[#allocation27_spill] sm:$0xff]  ;;  %v12265_v1 = vld [vmem:[#allocation25_spill] sm:$0xff] }
 0x976   : > { %v5911_v56 = vpop.f32.mrf.mxu0  ;;  %6290 = vmatmul.mubr.f32.gmra.mxu1 %v6062_v23  ;;  %v12264_v23 = vmax.f32 %v12263_v10, 0.0  ;;  %v12266_v29 = vmax.f32 %v12265_v1, 0.0 }
 0x977   : > { %v6065_v8 = vmax.f32 %v6001_v50, 0.0  ;;  %v5912_v58 = vadd.f32 %v5911_v56, %v10930_v26  ;;  %v6002_v5 = vadd.f32 %v5910_v3, %v12248_v59 }
 0x978   : > { %v5913_v15 = vpop.f32.mrf.mxu0 }
 0x979   : > { %v6003_v21 = vadd.f32 %v5912_v58, %v12250_v57  ;;  %v5914_v62 = vadd.f32 %v5913_v15, %v10927_v34  ;;  %6294 = vmatprep.mubr.f32.mxu1 %v6065_v8  ;;  %v6066_v30 = vmax.f32 %v6002_v5, 0.0  ;;  %v12267_v58 = vld [vmem:[#allocation26_spill] sm:$0xff]  ;;  %v12269_v5 = vld [vmem:[#allocation28_spill] sm:$0xff] }
 0x97a   : > { %v5915_v13 = vpop.f32.mrf.mxu0  ;;  %6295 = vmatmul.mubr.f32.gmra.mxu1 %v6064_v44  ;;  %v12268_v44 = vmax.f32 %v12267_v58, 0.0  ;;  %v12270_v15 = vmax.f32 %v12269_v5, 0.0 }
 0x97b   : > { %v6067_v4 = vmax.f32 %v6003_v21, 0.0  ;;  %v5916_v2 = vadd.f32 %v5915_v13, %v10930_v26  ;;  %v6004_v36 = vadd.f32 %v5914_v62, %v12252_v48 }
 0x97c   : > { %v5919_v63 = vpop.f32.mrf.mxu0 }
 0x97d   : > { %v6005_v7 = vadd.f32 %v5916_v2, %v12254_v11  ;;  %v5920_v24 = vadd.f32 %v5919_v63, %v10927_v34  ;;  %6299 = vmatprep.mubr.f32.mxu1 %v6067_v4  ;;  %v6068_v54 = vmax.f32 %v6004_v36, 0.0  ;;  %v12271_v2 = vld [vmem:[#allocation31_spill] sm:$0xff]  ;;  %v12273_v36 = vld [vmem:[#allocation29_spill] sm:$0xff] }
 0x97e   : > { %v5921_v33 = vpop.f32.mrf.mxu0  ;;  %6300 = vmatmul.mubr.f32.gmra.mxu1 %v6066_v30  ;;  %v12272_v30 = vmax.f32 %v12271_v2, 0.0  ;;  %v12274_v63 = vmax.f32 %v12273_v36, 0.0 }
 0x97f   : > { %v6069_v9 = vmax.f32 %v6005_v7, 0.0  ;;  %v5922_v28 = vadd.f32 %v5921_v33, %v10930_v26  ;;  %v6006_v17 = vadd.f32 %v5920_v24, %v12256_v25 }
 0x980   : > { %v5923_v60 = vpop.f32.mrf.mxu0 }
 0x981   : > { %v6007_v42 = vadd.f32 %v5922_v28, %v12258_v16  ;;  %v5924_v14 = vadd.f32 %v5923_v60, %v10927_v34  ;;  %6304 = vmatprep.mubr.f32.mxu1 %v6069_v9  ;;  %v6070_v6 = vmax.f32 %v6006_v17, 0.0  ;;  %v12275_v28 = vld [vmem:[#allocation30_spill] sm:$0xff]  ;;  %v12277_v17 = vld [vmem:[#allocation32_spill] sm:$0xff] }
 0x982   : > { %v5925_v19 = vpop.f32.mrf.mxu0  ;;  %6305 = vmatmul.mubr.f32.gmra.mxu1 %v6068_v54  ;;  %v12276_v54 = vmax.f32 %v12275_v28, 0.0  ;;  %v12278_v60 = vmax.f32 %v12277_v17, 0.0 }
 0x983   : > { %v6071_v53 = vmax.f32 %v6007_v42, 0.0  ;;  %v5926_v51 = vadd.f32 %v5925_v19, %v10930_v26  ;;  %v6008_v39 = vadd.f32 %v5924_v14, %v12260_v27 }
 0x984   : > { %v5929_v61 = vpop.f32.mrf.mxu0 }
 0x985   : > { %v6009_v52 = vadd.f32 %v5926_v51, %v12262_v31  ;;  %v5930_v32 = vadd.f32 %v5929_v61, %v10927_v34  ;;  %6309 = vmatprep.mubr.f32.mxu1 %v6071_v53  ;;  %v6072_v18 = vmax.f32 %v6008_v39, 0.0  ;;  %v12279_v51 = vld [vmem:[#allocation35_spill] sm:$0xff]  ;;  %v12281_v39 = vld [vmem:[#allocation33_spill] sm:$0xff] }
 0x986   : > { %v5931_v20 = vpop.f32.mrf.mxu0  ;;  %6310 = vmatmul.mubr.f32.gmra.mxu1 %v6070_v6  ;;  %v12280_v6 = vmax.f32 %v12279_v51, 0.0  ;;  %v12282_v61 = vmax.f32 %v12281_v39, 0.0 }
 0x987   : > { %v6073_v47 = vmax.f32 %v6009_v52, 0.0  ;;  %v5932_v45 = vadd.f32 %v5931_v20, %v10930_v26  ;;  %v6010_v49 = vadd.f32 %v5930_v32, %v12264_v23  ;;  %v12285_v23 = vld [vmem:[#allocation36_spill] sm:$0xff] }
 0x988   : > { %v5933_v0 = vpop.f32.mrf.mxu0 }
 0x989   : > { %v6011_v38 = vadd.f32 %v5932_v45, %v12266_v29  ;;  %v5934_v37 = vadd.f32 %v5933_v0, %v10927_v34  ;;  %6314 = vmatprep.mubr.f32.mxu1 %v6073_v47  ;;  %v6074_v8 = vmax.f32 %v6010_v49, 0.0  ;;  %v12283_v45 = vld [vmem:[#allocation34_spill] sm:$0xff]  ;;  %v12286_v49 = vmax.f32 %v12285_v23, 0.0 }
 0x98a   : > { %v5935_v50 = vpop.f32.mrf.mxu0  ;;  %6315 = vmatmul.mubr.f32.gmra.mxu1 %v6072_v18  ;;  %v12284_v18 = vmax.f32 %v12283_v45, 0.0 }
 0x98b   : > { %v6075_v3 = vmax.f32 %v6011_v38, 0.0  ;;  %v5936_v56 = vadd.f32 %v5935_v50, %v10930_v26  ;;  %v6012_v46 = vadd.f32 %v5934_v37, %v12268_v44 }
 0x98c   : > { %v5939_v59 = vpop.f32.mrf.mxu0 }
 0x98d   : > { %v6013_v12 = vadd.f32 %v5936_v56, %v12270_v15  ;;  %v5940_v57 = vadd.f32 %v5939_v59, %v10927_v34  ;;  %6319 = vmatprep.mubr.f32.mxu1 %v6075_v3  ;;  %v6076_v4 = vmax.f32 %v6012_v46, 0.0 }
 0x98e   : > { %v5941_v21 = vpop.f32.mrf.mxu0  ;;  %6320 = vmatmul.mubr.f32.gmra.mxu1 %v6074_v8 }
 0x98f   : > { %v6077_v62 = vmax.f32 %v6013_v12, 0.0  ;;  %v5942_v13 = vadd.f32 %v5941_v21, %v10930_v26  ;;  %v6014_v55 = vadd.f32 %v5940_v57, %v12272_v30 }
 0x990   : > { %v5943_v48 = vpop.f32.mrf.mxu0 }
 0x991   : > { %v6015_v41 = vadd.f32 %v5942_v13, %v12274_v63  ;;  %v5944_v11 = vadd.f32 %v5943_v48, %v10927_v34  ;;  %6324 = vmatprep.mubr.f32.mxu1 %v6077_v62  ;;  %v6078_v9 = vmax.f32 %v6014_v55, 0.0 }
 0x992   : > { %v5945_v7 = vpop.f32.mrf.mxu0  ;;  %6325 = vmatmul.mubr.f32.gmra.mxu1 %v6076_v4 }
 0x993   : > { %v6079_v24 = vmax.f32 %v6015_v41, 0.0  ;;  %v5946_v33 = vadd.f32 %v5945_v7, %v10930_v26  ;;  %v6016_v35 = vadd.f32 %v5944_v11, %v12276_v54 }
 0x994   : > { %v5949_v25 = vpop.f32.mrf.mxu0 }
 0x995   : > { %v6017_v43 = vadd.f32 %v5946_v33, %v12278_v60  ;;  %v5950_v16 = vadd.f32 %v5949_v25, %v10927_v34  ;;  %6329 = vmatprep.mubr.f32.mxu1 %v6079_v24  ;;  %v6080_v53 = vmax.f32 %v6016_v35, 0.0 }
 0x996   : > { %v5951_v42 = vpop.f32.mrf.mxu0  ;;  %6330 = vmatmul.mubr.f32.gmra.mxu1 %v6078_v9 }
 0x997   : > { %v6081_v14 = vmax.f32 %v6017_v43, 0.0  ;;  %v5952_v19 = vadd.f32 %v5951_v42, %v10930_v26  ;;  %v6018_v40 = vadd.f32 %v5950_v16, %v12280_v6 }
 0x998   : > { %v5953_v27 = vpop.f32.mrf.mxu0 }
 0x999   : > { %v6019_v22 = vadd.f32 %v5952_v19, %v12282_v61  ;;  %v5954_v31 = vadd.f32 %v5953_v27, %v10927_v34  ;;  %6334 = vmatprep.mubr.f32.mxu1 %v6081_v14  ;;  %v6082_v47 = vmax.f32 %v6018_v40, 0.0  ;;  %v11130_v34 = vld [vmem:[%s11257_s8] ss:$0 sm:$0xff] }
 0x99a   : > { %v5955_v52 = vpop.f32.mrf.mxu0  ;;  %6335 = vmatmul.mubr.f32.gmra.mxu1 %v6080_v53 }
 0x99b   : > { %v6083_v32 = vmax.f32 %v6019_v22, 0.0  ;;  %v5956_v20 = vadd.f32 %v5955_v52, %v10930_v26  ;;  %v6020_v10 = vadd.f32 %v5954_v31, %v12284_v18 }
 0x99d   : > { %v6021_v0 = vadd.f32 %v5956_v20, %v12286_v49  ;;  %6339 = vmatprep.mubr.f32.mxu1 %v6083_v32  ;;  %v6084_v29 = vmax.f32 %v6020_v10, 0.0 }
 0x99e   : > { %6340 = vmatmul.mubr.f32.gmra.mxu1 %v6082_v47 }
 0x99f   : > { %v6085_v1 = vmax.f32 %v6021_v0, 0.0 }
 0x9a1   : > { %6344 = vmatprep.mubr.f32.mxu1 %v6085_v1 }
 0x9a2   : > { %6345 = vmatmul.mubr.f32.gmra.mxu1 %v6084_v29 }
 0x9e6   : > { %v6191_v26 = vpop.f32.mrf.mxu0 }
 0x9e7   : > { %v6192_v38 = vadd.f32 %v11130_v34, %v6191_v26 }
 0x9e8   : > { %v6193_v37 = vpop.f32.mrf.mxu0 }
 0x9e9   : > { %6350 = vst [vmem:[%s11133_s22] sm:$0xff] %v6192_v38 }
 0x9ea   : > { %v6196_v50 = vpop.f32.mrf.mxu0 }
 0x9eb   : > { %v6197_v3 = vadd.f32 %v11130_v34, %v6196_v50 }
 0x9ec   : > { %v6198_v56 = vpop.f32.mrf.mxu0 }
 0x9ed   : > { %6351 = vst [vmem:[%s11133_s22 + $0x8] sm:$0xff] %v6197_v3 }
 0x9ee   : > { %v6201_v8 = vpop.f32.mrf.mxu0 }
 0x9ef   : > { %v6202_v58 = vadd.f32 %v11130_v34, %v6201_v8 }
 0x9f0   : > { %v6203_v44 = vpop.f32.mrf.mxu0 }
 0x9f1   : > { %6352 = vst [vmem:[%s11133_s22 + $0x10] sm:$0xff] %v6202_v58 }
 0x9f2   : > { %v6206_v46 = vpop.f32.mrf.mxu0 }
 0x9f3   : > { %v6207_v59 = vadd.f32 %v11130_v34, %v6206_v46 }
 0x9f4   : > { %v6208_v5 = vpop.f32.mrf.mxu0 }
 0x9f5   : > { %6353 = vst [vmem:[%s11133_s22 + $0x18] sm:$0xff] %v6207_v59 }
 0x9f6   : > { %v6211_v15 = vpop.f32.mrf.mxu0 }
 0x9f7   : > { %v6212_v12 = vadd.f32 %v11130_v34, %v6211_v15 }
 0x9f8   : > { %v6213_v57 = vpop.f32.mrf.mxu0 }
 0x9f9   : > { %6354 = vst [vmem:[%s11133_s22 + $0x20] sm:$0xff] %v6212_v12 }
 0x9fa   : > { %v6216_v21 = vpop.f32.mrf.mxu0 }
 0x9fb   : > { %v6217_v62 = vadd.f32 %v11130_v34, %v6216_v21 }
 0x9fc   : > { %v6218_v13 = vpop.f32.mrf.mxu0 }
 0x9fd   : > { %6355 = vst [vmem:[%s11133_s22 + $0x28] sm:$0xff] %v6217_v62 }
 0x9fe   : > { %v6221_v4 = vpop.f32.mrf.mxu0 }
 0x9ff   : > { %v6222_v2 = vadd.f32 %v11130_v34, %v6221_v4 }
 0xa00   : > { %v6223_v30 = vpop.f32.mrf.mxu0 }
 0xa01   : > { %6356 = vst [vmem:[%s11133_s22 + $0x30] sm:$0xff] %v6222_v2 }
 0xa02   : > { %v6226_v55 = vpop.f32.mrf.mxu1 }
 0xa03   : > { %v6227_v48 = vadd.f32 %v11130_v34, %v6226_v55 }
 0xa04   : > { %v6228_v36 = vpop.f32.mrf.mxu1 }
 0xa05   : > { %6357 = vst [vmem:[%s11133_s22 + $0x38] sm:$0xff] %v6227_v48 }
 0xa06   : > { %v6231_v63 = vpop.f32.mrf.mxu1 }
 0xa07   : > { %v6232_v41 = vadd.f32 %v11130_v34, %v6231_v63 }
 0xa08   : > { %v6233_v11 = vpop.f32.mrf.mxu1 }
 0xa09   : > { %6358 = vst [vmem:[%s11133_s22 + $0x40] sm:$0xff] %v6232_v41 }
 0xa0a   : > { %v6236_v7 = vpop.f32.mrf.mxu1 }
 0xa0b   : > { %v6237_v24 = vadd.f32 %v11130_v34, %v6236_v7 }
 0xa0c   : > { %v6238_v33 = vpop.f32.mrf.mxu1 }
 0xa0d   : > { %6359 = vst [vmem:[%s11133_s22 + $0x48] sm:$0xff] %v6237_v24 }
 0xa0e   : > { %v6241_v9 = vpop.f32.mrf.mxu1 }
 0xa0f   : > { %v6242_v28 = vadd.f32 %v11130_v34, %v6241_v9 }
 0xa10   : > { %v6243_v54 = vpop.f32.mrf.mxu1 }
 0xa11   : > { %6360 = vst [vmem:[%s11133_s22 + $0x50] sm:$0xff] %v6242_v28 }
 0xa12   : > { %v6246_v35 = vpop.f32.mrf.mxu1 }
 0xa13   : > { %v6247_v25 = vadd.f32 %v11130_v34, %v6246_v35 }
 0xa14   : > { %v6248_v17 = vpop.f32.mrf.mxu1 }
 0xa15   : > { %6361 = vst [vmem:[%s11133_s22 + $0x58] sm:$0xff] %v6247_v25 }
 0xa16   : > { %v6251_v60 = vpop.f32.mrf.mxu1 }
 0xa17   : > { %v6252_v43 = vadd.f32 %v11130_v34, %v6251_v60 }
 0xa18   : > { %v6253_v16 = vpop.f32.mrf.mxu1 }
 0xa19   : > { %6362 = vst [vmem:[%s11133_s22 + $0x60] sm:$0xff] %v6252_v43 }
 0xa1a   : > { %v6256_v42 = vpop.f32.mrf.mxu1 }
 0xa1b   : > { %v6257_v14 = vadd.f32 %v11130_v34, %v6256_v42 }
 0xa1c   : > { %v6258_v19 = vpop.f32.mrf.mxu1 }
 0xa1d   : > { %6363 = vst [vmem:[%s11133_s22 + $0x68] sm:$0xff] %v6257_v14 }
 0xa1e   : > { %v6261_v53 = vpop.f32.mrf.mxu1 }
 0xa1f   : > { %v6262_v51 = vadd.f32 %v11130_v34, %v6261_v53 }
 0xa20   : > { %v6263_v6 = vpop.f32.mrf.mxu1 }
 0xa21   : > { %6364 = vst [vmem:[%s11133_s22 + $0x70] sm:$0xff] %v6262_v51 }
 0xa22   : > { %v6266_v40 = vpop.f32.mrf.mxu1 }
 0xa23   : > { %v6267_v27 = vadd.f32 %v11130_v34, %v6266_v40 }
 0xa24   : > { %v6268_v39 = vpop.f32.mrf.mxu1 }
 0xa25   : > { %6365 = vst [vmem:[%s11133_s22 + $0x78] sm:$0xff] %v6267_v27 }
 0xa26   : > { %v6271_v61 = vpop.f32.mrf.mxu1 }
 0xa27   : > { %v6272_v22 = vadd.f32 %v11130_v34, %v6271_v61 }
 0xa28   : > { %v6273_v31 = vpop.f32.mrf.mxu1 }
 0xa29   : > { %6366 = vst [vmem:[%s11133_s22 + $0x80] sm:$0xff] %v6272_v22 }
 0xa2a   : > { %v6276_v52 = vpop.f32.mrf.mxu1 }
 0xa2b   : > { %v6277_v32 = vadd.f32 %v11130_v34, %v6276_v52 }
 0xa2c   : > { %v6278_v20 = vpop.f32.mrf.mxu1 }
 0xa2d   : > { %6367 = vst [vmem:[%s11133_s22 + $0x88] sm:$0xff] %v6277_v32 }
 0xa2e   : > { %v6281_v47 = vpop.f32.mrf.mxu1 }
 0xa2f   : > { %v6282_v45 = vadd.f32 %v11130_v34, %v6281_v47 }
 0xa30   : > { %v6283_v18 = vpop.f32.mrf.mxu1 }
 0xa31   : > { %6368 = vst [vmem:[%s11133_s22 + $0x90] sm:$0xff] %v6282_v45 }
 0xa32   : > { %v6286_v10 = vpop.f32.mrf.mxu1 }
 0xa33   : > { %v6287_v23 = vadd.f32 %v11130_v34, %v6286_v10 }
 0xa34   : > { %v6288_v49 = vpop.f32.mrf.mxu1 }
 0xa35   : > { %6369 = vst [vmem:[%s11133_s22 + $0x98] sm:$0xff] %v6287_v23 }
 0xa36   : > { %v6291_v0 = vpop.f32.mrf.mxu1 }
 0xa37   : > { %v6292_v1 = vadd.f32 %v11130_v34, %v6291_v0 }
 0xa38   : > { %v6293_v29 = vpop.f32.mrf.mxu1 }
 0xa39   : > { %6370 = vst [vmem:[%s11133_s22 + $0xa0] sm:$0xff] %v6292_v1 }
 0xa3a   : > { %v6296_v26 = vpop.f32.mrf.mxu1 }
 0xa3b   : > { %v6297_v38 = vadd.f32 %v11130_v34, %v6296_v26 }
 0xa3c   : > { %v6298_v37 = vpop.f32.mrf.mxu1 }
 0xa3d   : > { %6371 = vst [vmem:[%s11133_s22 + $0xa8] sm:$0xff] %v6297_v38 }
 0xa3e   : > { %v6301_v50 = vpop.f32.mrf.mxu1 }
 0xa3f   : > { %v6302_v3 = vadd.f32 %v11130_v34, %v6301_v50 }
 0xa40   : > { %v6303_v56 = vpop.f32.mrf.mxu1 }
 0xa41   : > { %6372 = vst [vmem:[%s11133_s22 + $0xb0] sm:$0xff] %v6302_v3 }
 0xa42   : > { %v6306_v8 = vpop.f32.mrf.mxu1 }
 0xa43   : > { %v6307_v58 = vadd.f32 %v11130_v34, %v6306_v8 }
 0xa44   : > { %v6308_v44 = vpop.f32.mrf.mxu1 }
 0xa45   : > { %6373 = vst [vmem:[%s11133_s22 + $0xb8] sm:$0xff] %v6307_v58 }
 0xa46   : > { %v6311_v46 = vpop.f32.mrf.mxu1 }
 0xa47   : > { %v6312_v59 = vadd.f32 %v11130_v34, %v6311_v46 }
 0xa48   : > { %v6313_v5 = vpop.f32.mrf.mxu1 }
 0xa49   : > { %6374 = vst [vmem:[%s11133_s22 + $0xc0] sm:$0xff] %v6312_v59 }
 0xa4a   : > { %v6316_v15 = vpop.f32.mrf.mxu1 }
 0xa4b   : > { %v6317_v12 = vadd.f32 %v11130_v34, %v6316_v15 }
 0xa4c   : > { %v6318_v57 = vpop.f32.mrf.mxu1 }
 0xa4d   : > { %6375 = vst [vmem:[%s11133_s22 + $0xc8] sm:$0xff] %v6317_v12 }
 0xa4e   : > { %v6321_v21 = vpop.f32.mrf.mxu1 }
 0xa4f   : > { %v6322_v62 = vadd.f32 %v11130_v34, %v6321_v21 }
 0xa50   : > { %v6323_v13 = vpop.f32.mrf.mxu1 }
 0xa51   : > { %6376 = vst [vmem:[%s11133_s22 + $0xd0] sm:$0xff] %v6322_v62 }
 0xa52   : > { %v6326_v4 = vpop.f32.mrf.mxu1 }
 0xa53   : > { %v6327_v2 = vadd.f32 %v11130_v34, %v6326_v4 }
 0xa54   : > { %v6328_v30 = vpop.f32.mrf.mxu1 }
 0xa55   : > { %6377 = vst [vmem:[%s11133_s22 + $0xd8] sm:$0xff] %v6327_v2 }
 0xa56   : > { %v6331_v55 = vpop.f32.mrf.mxu1 }
 0xa57   : > { %v6332_v48 = vadd.f32 %v11130_v34, %v6331_v55 }
 0xa58   : > { %v6333_v36 = vpop.f32.mrf.mxu1 }
 0xa59   : > { %6378 = vst [vmem:[%s11133_s22 + $0xe0] sm:$0xff] %v6332_v48 }
 0xa5a   : > { %v6336_v63 = vpop.f32.mrf.mxu1 }
 0xa5b   : > { %v6337_v41 = vadd.f32 %v11130_v34, %v6336_v63 }
 0xa5c   : > { %v6338_v11 = vpop.f32.mrf.mxu1 }
 0xa5d   : > { %6379 = vst [vmem:[%s11133_s22 + $0xe8] sm:$0xff] %v6337_v41 }
 0xa5e   : > { %v6341_v7 = vpop.f32.mrf.mxu1 }
 0xa5f   : > { %v6342_v24 = vadd.f32 %v11130_v34, %v6341_v7 }
 0xa60   : > { %v6343_v33 = vpop.f32.mrf.mxu1 }
 0xa61   : > { %6380 = vst [vmem:[%s11133_s22 + $0xf0] sm:$0xff] %v6342_v24 }
 0xa62   : > { %v6346_v9 = vpop.f32.mrf.mxu1 }
 0xa63   : > { %v6347_v28 = vadd.f32 %v11130_v34, %v6346_v9 }
 0xa64   : > { %v6348_v54 = vpop.f32.mrf.mxu1 }
 0xa65   : > { %6381 = vst [vmem:[%s11133_s22 + $0xf8] sm:$0xff] %v6347_v28 }
 0xa66   : > { %7601 = shalt.err (!%p7598_p0)
}
 0xa67   : > { %s7602_s27 = scalar_lea.hbm %s11201_s14, 4096  ;;  %s7606_s24 = scalar_lea.hbm %s11258_s9, 8192 }
 0xa68   : > { %p7603_p6 = scmp.ne.s32.totalorder %s11201_s14, %s7602_s27  ;;  %p7607_p1 = scmp.lt.s32.totalorder %s11201_s14, %s11258_s9 }
 0xa69   : > { %p7608_p5 = scmp.lt.s32.totalorder %s7606_s24, %s7602_s27 }
 0xa6a   : > { %p7604_p9 = pnand %p7603_p6, %p12287_p3 }
 0xa6b   : > { %p7609_p12 = por %p7608_p5, %p7607_p1 }
 0xa6c   : > { %p7605_p13 = pneg %p7604_p9 }
 0xa6e   : > { %p7610_p10 = pnand %p7609_p12, %p7605_p13 }
 0xa70   : > { %7613 = shalt.err (!%p7610_p10)
}
 0xa71   : > { %s7666_s16 = smov 128   ;;  %s7667_s25 = smov 8  }
 0xa72   : > { %6948 = dma.vmem_to_hbm [thread:$0]  (%p12287_p3), %s11203_s21, 4096, %s11201_s14, %s11209_s13, %s7666_s16, %s7666_s16, %s7667_s25  }
 0xa73 PF: > { %p6970_p2 = scmp.ge.s32.totalorder %s7656_s12, 2  ;;  %s6411_s29 = sand.u32 1, %s7644_s30  }
 0xa74   : > { %p12288_p4 = scmp.ne.s32.totalorder %s11708_s20, 0  ;;  %s6412_s23 = scalar_lea.sflag [#allocation4], %s6411_s29 }
 0xa76   : > { %p6961_p7 = pnand %p6970_p2, %p12288_p4 }
 0xa78   : > { %p6962_p8 = pneg %p6961_p7 }
 0xa7a   : > { %7639 = dma.done.wait (%p6962_p8), %s6412_s23, 4096  }
 0xa7b   : > { %7641 = vsyncadd (%p6962_p8), %s6412_s23, 4294963200  ;;  %p21_p11 = scmp.ge.s32.totalorder %s7743_s15, 4   ;;  %s12289_s30 = smov %s7648_s10 }
 0xa7c   : > { %s12290_s10 = smov %s7652_s11  ;;  %s12291_s11 = smov %s7754_s18 }
 0xa7d   : > { %s12292_s12 = smov %s7743_s15  ;;  %23 = sbr.rel (!%p21_p11) target bundleno = 5 (0x5), region = 120 }
 0xa82   :  { %6417 = vsyncpa [#allocation3], 1 }
 0xa83   :  { %6419 = vsyncpa [#allocation3 + $0x1], 1 }
 0xa84   :  { %6420 = vsyncpa [#allocation6], 1 }
 0xa85   :  { %6421 = vsyncpa [#allocation4], 1 }
 0xa86   :  { %6423 = vsyncpa [#allocation4 + $0x1], 1 }

</bundles_post_ra>
